<compile_context>
chip_gen: v5e
topology: v5e:2x2
jax: 0.10.0
libtpu: 0.0.40
codegen_flags: <defaults>
</compile_context>

<pallas_src>
import functools

import numpy as np
import jax
import jax.numpy as jnp
from jax.experimental import pallas as pl
from jax.experimental.pallas import tpu as pltpu


# ----------------------------------------------------------------------------
# In-kernel math helpers (elementwise only -> always lower on Mosaic)
# ----------------------------------------------------------------------------
_SQRT_HALF = 0.7071067811865476


def _erf(x):
    # Abramowitz & Stegun 7.1.26 polynomial, |abs err| < 1.5e-7 (fp32-accurate).
    a1, a2, a3, a4, a5 = (0.254829592, -0.284496736, 1.421413741,
                          -1.453152027, 1.061405429)
    p = 0.3275911
    sign = jnp.where(x >= 0.0, 1.0, -1.0)
    ax = jnp.abs(x)
    t = 1.0 / (1.0 + p * ax)
    poly = ((((a5 * t + a4) * t + a3) * t + a2) * t + a1) * t
    return sign * (1.0 - poly * jnp.exp(-ax * ax))


def _gelu(x):
    # torch.nn.functional.gelu default = exact erf form.
    return 0.5 * x * (1.0 + _erf(x * _SQRT_HALF))


# ----------------------------------------------------------------------------
# Constant matrices (built once in numpy, transposed for the (L, C) layout)
# ----------------------------------------------------------------------------
def make_rdft_t(lin, m, lin_keep):
    """FT (2m, lin_keep): FT @ x^T == [Re; Im] of rfft(x, norm='forward')[:, :m]^T.

    Built for a length-`lin` signal whose trailing (lin - lin_keep) samples are
    zero, so those columns are simply dropped (folds the zero-pad of x_fc0).
    """
    n = np.arange(lin, dtype=np.float64)[None, :]
    k = np.arange(m, dtype=np.float64)[:, None]
    ang = 2.0 * np.pi * k * n / lin
    frt = np.cos(ang) / lin
    fit = -np.sin(ang) / lin
    return jnp.asarray(np.concatenate([frt, fit], axis=0)[:, :lin_keep],
                       jnp.float32)


def make_irdft_t(m, lout):
    """GT (lout, 2m): GT @ [Yr; Yi] == irfft(Y zero-padded, n=lout, norm='forward')^T.

    DC / Nyquist imaginary parts drop out automatically (their sin columns are
    zero), matching pocketfft's c2r convention used by torch.fft.irfft.
    """
    assert m <= lout // 2 + 1
    kk = np.arange(m)
    c = np.where((kk == 0) | (2 * kk == lout), 1.0, 2.0)[None, :]
    k = kk[None, :].astype(np.float64)
    n = np.arange(lout, dtype=np.float64)[:, None]
    ang = 2.0 * np.pi * k * n / lout
    grt = c * np.cos(ang)
    git = -c * np.sin(ang)
    return jnp.asarray(np.concatenate([grt, git], axis=1), jnp.float32)


def make_interp_t(lin, lout, lin_keep):
    """PT (lout, lin_keep): PT @ x^T == F.interpolate(x, lout, 'linear', align_corners=True)^T."""
    p = np.zeros((lin, lout), np.float64)
    if lout == 1:
        p[0, 0] = 1.0
    else:
        src = np.arange(lout) * (lin - 1) / (lout - 1)
        lo = np.clip(np.floor(src).astype(np.int64), 0, max(lin - 2, 0))
        frac = src - lo
        for j in range(lout):
            p[lo[j], j] += 1.0 - frac[j]
            p[min(lo[j] + 1, lin - 1), j] += frac[j]
    return jnp.asarray(p.T[:, :lin_keep], jnp.float32)


# ----------------------------------------------------------------------------
# Fused Pallas kernel: entire UNO1d forward, one batch element per grid step
# ----------------------------------------------------------------------------
def _uno1d_kernel(*refs, n_tokens, block_meta):
    dot = functools.partial(jnp.dot, preferred_element_type=jnp.float32)
    it = iter(refs)

    x_ref, g_ref = next(it), next(it)
    wn1x, wn1g, bn1 = next(it), next(it), next(it)
    w0, b0 = next(it), next(it)

    def take_block(normalize):
        ft = next(it); gt = next(it); pt = next(it)
        wr = next(it); wi = next(it); wct = next(it); bc = next(it)
        gamma = beta = None
        if normalize:
            gamma = next(it); beta = next(it)
        return (ft, gt, pt, wr, wi, wct, bc, gamma, beta)

    blocks = [take_block(norm) for (_, norm) in block_meta]
    wf1, bf1 = next(it), next(it)
    wf2, bf2 = next(it), next(it)
    out_ref = next(it)

    # ---- lifting layers fc_n1 / fc0 (tokens on sublanes, channels on lanes)
    x = x_ref[0]                                     # (N, C_x)
    g = g_ref[0]                                     # (N, 1)
    # cat((x, grid), -1) @ W  ==  x @ W[:C_x]  +  grid * W[C_x]   (no concat)
    h = _gelu(dot(x, wn1x[...]) + g * wn1g[...] + bn1[...])       # (N, width//2)
    h0 = _gelu(dot(h, w0[...]) + b0[...])                         # (N, width) == x_fc0^T[:N]

    # ---- one OperatorBlock_1D: SpectralConv1d + pointwise conv + interp
    #      [+ InstanceNorm] + GELU, all in (L, C) layout.
    def op_block(a, ft, gt, pt, wr, wi, wct, bc, gamma, beta, m, normalize):
        # a: (Lin, cin);  ft: (2m, Lin);  gt: (Lout, 2m);  pt: (Lout, Lin)
        # wr/wi: (m, cin, cout);  wct: (cin, cout);  bc/gamma/beta: (1, cout)
        z = dot(ft[...], a)                          # (2m, cin): rows [Xr^T; Xi^T]
        rows = []
        for k in range(m):                           # real parts of mode mixing (MXU)
            xr_k = z[k:k + 1, :]
            xi_k = z[m + k:m + k + 1, :]
            rows.append(dot(xr_k, wr[k]) - dot(xi_k, wi[k]))
        for k in range(m):                           # imaginary parts
            xr_k = z[k:k + 1, :]
            xi_k = z[m + k:m + k + 1, :]
            rows.append(dot(xr_k, wi[k]) + dot(xi_k, wr[k]))
        yt = jnp.concatenate(rows, axis=0)           # (2m, cout) = [Yr^T; Yi^T]
        y = dot(gt[...], yt)                         # (Lout, cout)   spectral path
        # pointwise 1x1 conv + linear interp (align_corners=True); per-channel
        # bias commutes with the interpolation (rows of PT sum to 1).
        y = y + dot(pt[...], dot(a, wct[...])) + bc[...]
        if normalize:                                # InstanceNorm1d(affine=True), eps=1e-5
            mean = jnp.mean(y, axis=0, keepdims=True)
            var = jnp.mean((y - mean) ** 2, axis=0, keepdims=True)
            y = (y - mean) * jax.lax.rsqrt(var + 1e-5)
            y = y * gamma[...] + beta[...]
        return _gelu(y)                              # Non_Lin=True for every block

    b0_, b1_, b2_, b4_, b5_ = blocks
    c0 = op_block(h0, *b0_, m=block_meta[0][0], normalize=block_meta[0][1])  # (D1/2, 2w)
    c1 = op_block(c0, *b1_, m=block_meta[1][0], normalize=block_meta[1][1])  # (D1/4, 4w)
    c2 = op_block(c1, *b2_, m=block_meta[2][0], normalize=block_meta[2][1])  # (D1/4, 4w)
    c4 = op_block(c2, *b4_, m=block_meta[3][0], normalize=block_meta[3][1])  # (D1/2, 2w)
    c4 = jnp.concatenate([c4, c0], axis=1)                                   # (D1/2, 4w)
    c5 = op_block(c4, *b5_, m=block_meta[4][0], normalize=block_meta[4][1])  # (D1,   w)

    # cat([x_c5, x_fc0], channels) -> strip padding -> fc1 -> gelu -> fc2
    tok = jnp.concatenate([c5[:n_tokens, :], h0], axis=1)                    # (N, 2w)
    h1 = _gelu(dot(tok, wf1[...]) + bf1[...])                                # (N, w)
    out_ref[0] = dot(h1, wf2[...]) + bf2[...]                                # (N, C_out)


# ----------------------------------------------------------------------------
# UNO1d forward: one pallas_call over the batch
# ----------------------------------------------------------------------------
def uno1d_forward(params, x, grid_feat, *, width, pad):
    """x: (B, N, num_channels*initial_step), grid_feat: (B, N, 1)."""
    del width  # implied by parameter shapes
    b, n, cx = x.shape
    d1 = n + pad

    def _const_map(nd):
        return lambda i: (0,) * nd

    ops = [jnp.asarray(x, jnp.float32), jnp.asarray(grid_feat, jnp.float32)]
    specs = [pl.BlockSpec((1, n, cx), lambda i: (i, 0, 0)),
             pl.BlockSpec((1, n, 1), lambda i: (i, 0, 0))]

    def add(arr):
        arr = jnp.asarray(arr, jnp.float32)
        ops.append(arr)
        specs.append(pl.BlockSpec(tuple(arr.shape), _const_map(arr.ndim)))

    wn1 = params["fc_n1"]["w"]                           # (cx + 1, width // 2)
    add(wn1[:cx, :]); add(wn1[cx:cx + 1, :]); add(params["fc_n1"]["b"].reshape(1, -1))
    add(params["fc0"]["w"]); add(params["fc0"]["b"].reshape(1, -1))

    # (name, Lin, Lout, Lin_keep, Normalize); Lin_keep < Lin only for conv0,
    # where the trailing zero-pad of x_fc0 is folded into FT / PT.
    layout = [("conv0", d1, d1 // 2, n, False),
              ("conv1", d1 // 2, d1 // 4, d1 // 2, True),
              ("conv2", d1 // 4, d1 // 4, d1 // 4, False),
              ("conv4", d1 // 4, d1 // 2, d1 // 4, True),
              ("conv5", d1 // 2, d1, d1 // 2, False)]

    block_meta = []
    for name, lin, lout, lin_keep, normalize in layout:
        p = params[name]
        m = int(p["wr"].shape[0])
        block_meta.append((m, normalize))
        add(make_rdft_t(lin, m, lin_keep))               # FT (2m, Lin_keep)
        add(make_irdft_t(m, lout))                       # GT (Lout, 2m)
        add(make_interp_t(lin, lout, lin_keep))          # PT (Lout, Lin_keep)
        add(p["wr"]); add(p["wi"])                       # (m, cin, cout): cout on lanes
        add(p["wct"])                                    # (cin, cout)
        add(p["bc"].reshape(1, -1))
        if normalize:
            add(p["gamma"].reshape(1, -1)); add(p["beta"].reshape(1, -1))

    add(params["fc1"]["w"]); add(params["fc1"]["b"].reshape(1, -1))
    add(params["fc2"]["w"]); add(params["fc2"]["b"].reshape(1, -1))

    c_out = params["fc2"]["w"].shape[1]
    out = pl.pallas_call(
        functools.partial(_uno1d_kernel, n_tokens=n, block_meta=tuple(block_meta)),
        out_shape=jax.ShapeDtypeStruct((b, n, c_out), jnp.float32),
        grid=(b,),
        in_specs=specs,
        out_specs=pl.BlockSpec((1, n, c_out), lambda i: (i, 0, 0)),
        compiler_params=pltpu.CompilerParams(
            dimension_semantics=("parallel",),           # feeds both TCs on v7x
            vmem_limit_bytes=16 * 1024 * 1024),          # actual footprint ~5 MiB
    )(*ops)
    return out[:, :, None, :]                            # unsqueeze(-2)


# ----------------------------------------------------------------------------
# Deterministic parameter init (shapes follow UNO1d.__init__, stored in the
# kernel-friendly layouts: spectral weights (modes, cin, cout), conv1x1 as W^T)
# ----------------------------------------------------------------------------
def init_params(key, num_channels, width, initial_step, factor=1):
    in_width = num_channels * initial_step + 1
    keys = list(jax.random.split(key, 32))
    kit = iter(keys)

    def lin_p(cin, cout):
        kw, kb = next(kit), next(kit)
        s = 1.0 / float(np.sqrt(cin))
        return {"w": s * jax.random.normal(kw, (cin, cout), jnp.float32),
                "b": s * jax.random.normal(kb, (cout,), jnp.float32)}

    def block_p(cin, cout, modes):
        kw, kc, kb = next(kit), next(kit), next(kit)
        scale = (1.0 / (2.0 * cin)) ** 0.5                  # SpectralConv1d init
        w = scale * jax.random.normal(kw, (cin, cout, modes, 2), jnp.float32)
        return {"wr": jnp.transpose(w[..., 0], (2, 0, 1)),  # (modes, cin, cout)
                "wi": jnp.transpose(w[..., 1], (2, 0, 1)),
                "wct": 0.1 * jax.random.normal(kc, (cin, cout), jnp.float32),
                "bc": 0.1 * jax.random.normal(kb, (cout,), jnp.float32),
                "gamma": jnp.ones((cout,), jnp.float32),    # InstanceNorm affine
                "beta": jnp.zeros((cout,), jnp.float32)}

    f = factor
    return {
        "fc_n1": lin_p(in_width, width // 2),
        "fc0": lin_p(width // 2, width),
        "conv0": block_p(width, 2 * f * width, 11),
        "conv1": block_p(2 * f * width, 4 * f * width, 5),
        "conv2": block_p(4 * f * width, 4 * f * width, 5),
        "conv4": block_p(4 * f * width, 2 * f * width, 5),
        "conv5": block_p(4 * f * width, width, 11),
        "fc1": lin_p(2 * width, width),
        "fc2": lin_p(width, num_channels),
    }


if __name__ == "__main__":
    num_channels, width, pad, initial_step = 2, 16, 9, 10
    B, N = 2, 31            # N chosen so D1 = N + pad = 40 supports all mode counts

    key = jax.random.PRNGKey(0)
    kp, kx = jax.random.split(key, 2)
    params = init_params(kp, num_channels, width, initial_step)

    x = jax.random.normal(kx, (B, N, num_channels * initial_step), jnp.float32)
    grid_feat = jnp.broadcast_to(
        jnp.linspace(0.0, 1.0, N, dtype=jnp.float32)[None, :, None], (B, N, 1))

    out = uno1d_forward(params, x, grid_feat, width=width, pad=pad)
    out = jax.block_until_ready(out)
    assert out.shape == (B, N, 1, num_channels), out.shape
    assert bool(jnp.all(jnp.isfinite(out)))
    print("KERNEL_OK")
</pallas_src>

<mosaic_0001>
module attributes {stable_mosaic.version = 11 : i64} {
  func.func @_uno1d_kernel(%arg0: i32, %arg1: memref<1x31x20xf32, #tpu.memory_space<vmem>>, %arg2: memref<1x31x1xf32, #tpu.memory_space<vmem>>, %arg3: memref<20x8xf32, #tpu.memory_space<vmem>>, %arg4: memref<1x8xf32, #tpu.memory_space<vmem>>, %arg5: memref<1x8xf32, #tpu.memory_space<vmem>>, %arg6: memref<8x16xf32, #tpu.memory_space<vmem>>, %arg7: memref<1x16xf32, #tpu.memory_space<vmem>>, %arg8: memref<22x31xf32, #tpu.memory_space<vmem>>, %arg9: memref<20x22xf32, #tpu.memory_space<vmem>>, %arg10: memref<20x31xf32, #tpu.memory_space<vmem>>, %arg11: memref<11x16x32xf32, #tpu.memory_space<vmem>>, %arg12: memref<11x16x32xf32, #tpu.memory_space<vmem>>, %arg13: memref<16x32xf32, #tpu.memory_space<vmem>>, %arg14: memref<1x32xf32, #tpu.memory_space<vmem>>, %arg15: memref<10x20xf32, #tpu.memory_space<vmem>>, %arg16: memref<10x10xf32, #tpu.memory_space<vmem>>, %arg17: memref<10x20xf32, #tpu.memory_space<vmem>>, %arg18: memref<5x32x64xf32, #tpu.memory_space<vmem>>, %arg19: memref<5x32x64xf32, #tpu.memory_space<vmem>>, %arg20: memref<32x64xf32, #tpu.memory_space<vmem>>, %arg21: memref<1x64xf32, #tpu.memory_space<vmem>>, %arg22: memref<1x64xf32, #tpu.memory_space<vmem>>, %arg23: memref<1x64xf32, #tpu.memory_space<vmem>>, %arg24: memref<10x10xf32, #tpu.memory_space<vmem>>, %arg25: memref<10x10xf32, #tpu.memory_space<vmem>>, %arg26: memref<10x10xf32, #tpu.memory_space<vmem>>, %arg27: memref<5x64x64xf32, #tpu.memory_space<vmem>>, %arg28: memref<5x64x64xf32, #tpu.memory_space<vmem>>, %arg29: memref<64x64xf32, #tpu.memory_space<vmem>>, %arg30: memref<1x64xf32, #tpu.memory_space<vmem>>, %arg31: memref<10x10xf32, #tpu.memory_space<vmem>>, %arg32: memref<20x10xf32, #tpu.memory_space<vmem>>, %arg33: memref<20x10xf32, #tpu.memory_space<vmem>>, %arg34: memref<5x64x32xf32, #tpu.memory_space<vmem>>, %arg35: memref<5x64x32xf32, #tpu.memory_space<vmem>>, %arg36: memref<64x32xf32, #tpu.memory_space<vmem>>, %arg37: memref<1x32xf32, #tpu.memory_space<vmem>>, %arg38: memref<1x32xf32, #tpu.memory_space<vmem>>, %arg39: memref<1x32xf32, #tpu.memory_space<vmem>>, %arg40: memref<22x20xf32, #tpu.memory_space<vmem>>, %arg41: memref<40x22xf32, #tpu.memory_space<vmem>>, %arg42: memref<40x20xf32, #tpu.memory_space<vmem>>, %arg43: memref<11x64x16xf32, #tpu.memory_space<vmem>>, %arg44: memref<11x64x16xf32, #tpu.memory_space<vmem>>, %arg45: memref<64x16xf32, #tpu.memory_space<vmem>>, %arg46: memref<1x16xf32, #tpu.memory_space<vmem>>, %arg47: memref<32x16xf32, #tpu.memory_space<vmem>>, %arg48: memref<1x16xf32, #tpu.memory_space<vmem>>, %arg49: memref<16x2xf32, #tpu.memory_space<vmem>>, %arg50: memref<1x2xf32, #tpu.memory_space<vmem>>, %arg51: memref<1x31x2xf32, #tpu.memory_space<vmem>>) attributes {dimension_semantics = [#tpu.dimension_semantics<parallel>], iteration_bounds = array<i64: 2>, scalar_prefetch = 0 : i64, scratch_operands = 0 : i64, tpu.core_type = #tpu.core_type<tc>, window_params = [{transform_indices = @transform_0, window_bounds = array<i64: 1, 31, 20>}, {transform_indices = @transform_1, window_bounds = array<i64: 1, 31, 1>}, {pipeline_mode = #tpu.pipeline_mode<synchronous>, transform_indices = @transform_2, window_bounds = array<i64: 20, 8>}, {pipeline_mode = #tpu.pipeline_mode<synchronous>, transform_indices = @transform_3, window_bounds = array<i64: 1, 8>}, {pipeline_mode = #tpu.pipeline_mode<synchronous>, transform_indices = @transform_4, window_bounds = array<i64: 1, 8>}, {pipeline_mode = #tpu.pipeline_mode<synchronous>, transform_indices = @transform_5, window_bounds = array<i64: 8, 16>}, {pipeline_mode = #tpu.pipeline_mode<synchronous>, transform_indices = @transform_6, window_bounds = array<i64: 1, 16>}, {pipeline_mode = #tpu.pipeline_mode<synchronous>, transform_indices = @transform_7, window_bounds = array<i64: 22, 31>}, {pipeline_mode = #tpu.pipeline_mode<synchronous>, transform_indices = @transform_8, window_bounds = array<i64: 20, 22>}, {pipeline_mode = #tpu.pipeline_mode<synchronous>, transform_indices = @transform_9, window_bounds = array<i64: 20, 31>}, {pipeline_mode = #tpu.pipeline_mode<synchronous>, transform_indices = @transform_10, window_bounds = array<i64: 11, 16, 32>}, {pipeline_mode = #tpu.pipeline_mode<synchronous>, transform_indices = @transform_11, window_bounds = array<i64: 11, 16, 32>}, {pipeline_mode = #tpu.pipeline_mode<synchronous>, transform_indices = @transform_12, window_bounds = array<i64: 16, 32>}, {pipeline_mode = #tpu.pipeline_mode<synchronous>, transform_indices = @transform_13, window_bounds = array<i64: 1, 32>}, {pipeline_mode = #tpu.pipeline_mode<synchronous>, transform_indices = @transform_14, window_bounds = array<i64: 10, 20>}, {pipeline_mode = #tpu.pipeline_mode<synchronous>, transform_indices = @transform_15, window_bounds = array<i64: 10, 10>}, {pipeline_mode = #tpu.pipeline_mode<synchronous>, transform_indices = @transform_16, window_bounds = array<i64: 10, 20>}, {pipeline_mode = #tpu.pipeline_mode<synchronous>, transform_indices = @transform_17, window_bounds = array<i64: 5, 32, 64>}, {pipeline_mode = #tpu.pipeline_mode<synchronous>, transform_indices = @transform_18, window_bounds = array<i64: 5, 32, 64>}, {pipeline_mode = #tpu.pipeline_mode<synchronous>, transform_indices = @transform_19, window_bounds = array<i64: 32, 64>}, {pipeline_mode = #tpu.pipeline_mode<synchronous>, transform_indices = @transform_20, window_bounds = array<i64: 1, 64>}, {pipeline_mode = #tpu.pipeline_mode<synchronous>, transform_indices = @transform_21, window_bounds = array<i64: 1, 64>}, {pipeline_mode = #tpu.pipeline_mode<synchronous>, transform_indices = @transform_22, window_bounds = array<i64: 1, 64>}, {pipeline_mode = #tpu.pipeline_mode<synchronous>, transform_indices = @transform_23, window_bounds = array<i64: 10, 10>}, {pipeline_mode = #tpu.pipeline_mode<synchronous>, transform_indices = @transform_24, window_bounds = array<i64: 10, 10>}, {pipeline_mode = #tpu.pipeline_mode<synchronous>, transform_indices = @transform_25, window_bounds = array<i64: 10, 10>}, {pipeline_mode = #tpu.pipeline_mode<synchronous>, transform_indices = @transform_26, window_bounds = array<i64: 5, 64, 64>}, {pipeline_mode = #tpu.pipeline_mode<synchronous>, transform_indices = @transform_27, window_bounds = array<i64: 5, 64, 64>}, {pipeline_mode = #tpu.pipeline_mode<synchronous>, transform_indices = @transform_28, window_bounds = array<i64: 64, 64>}, {pipeline_mode = #tpu.pipeline_mode<synchronous>, transform_indices = @transform_29, window_bounds = array<i64: 1, 64>}, {pipeline_mode = #tpu.pipeline_mode<synchronous>, transform_indices = @transform_30, window_bounds = array<i64: 10, 10>}, {pipeline_mode = #tpu.pipeline_mode<synchronous>, transform_indices = @transform_31, window_bounds = array<i64: 20, 10>}, {pipeline_mode = #tpu.pipeline_mode<synchronous>, transform_indices = @transform_32, window_bounds = array<i64: 20, 10>}, {pipeline_mode = #tpu.pipeline_mode<synchronous>, transform_indices = @transform_33, window_bounds = array<i64: 5, 64, 32>}, {pipeline_mode = #tpu.pipeline_mode<synchronous>, transform_indices = @transform_34, window_bounds = array<i64: 5, 64, 32>}, {pipeline_mode = #tpu.pipeline_mode<synchronous>, transform_indices = @transform_35, window_bounds = array<i64: 64, 32>}, {pipeline_mode = #tpu.pipeline_mode<synchronous>, transform_indices = @transform_36, window_bounds = array<i64: 1, 32>}, {pipeline_mode = #tpu.pipeline_mode<synchronous>, transform_indices = @transform_37, window_bounds = array<i64: 1, 32>}, {pipeline_mode = #tpu.pipeline_mode<synchronous>, transform_indices = @transform_38, window_bounds = array<i64: 1, 32>}, {pipeline_mode = #tpu.pipeline_mode<synchronous>, transform_indices = @transform_39, window_bounds = array<i64: 22, 20>}, {pipeline_mode = #tpu.pipeline_mode<synchronous>, transform_indices = @transform_40, window_bounds = array<i64: 40, 22>}, {pipeline_mode = #tpu.pipeline_mode<synchronous>, transform_indices = @transform_41, window_bounds = array<i64: 40, 20>}, {pipeline_mode = #tpu.pipeline_mode<synchronous>, transform_indices = @transform_42, window_bounds = array<i64: 11, 64, 16>}, {pipeline_mode = #tpu.pipeline_mode<synchronous>, transform_indices = @transform_43, window_bounds = array<i64: 11, 64, 16>}, {pipeline_mode = #tpu.pipeline_mode<synchronous>, transform_indices = @transform_44, window_bounds = array<i64: 64, 16>}, {pipeline_mode = #tpu.pipeline_mode<synchronous>, transform_indices = @transform_45, window_bounds = array<i64: 1, 16>}, {pipeline_mode = #tpu.pipeline_mode<synchronous>, transform_indices = @transform_46, window_bounds = array<i64: 32, 16>}, {pipeline_mode = #tpu.pipeline_mode<synchronous>, transform_indices = @transform_47, window_bounds = array<i64: 1, 16>}, {pipeline_mode = #tpu.pipeline_mode<synchronous>, transform_indices = @transform_48, window_bounds = array<i64: 16, 2>}, {pipeline_mode = #tpu.pipeline_mode<synchronous>, transform_indices = @transform_49, window_bounds = array<i64: 1, 2>}, {transform_indices = @transform_50, window_bounds = array<i64: 1, 31, 2>}]} {
    %c0 = arith.constant 0 : index
    %c0_0 = arith.constant 0 : index
    %c0_1 = arith.constant 0 : index
    %0 = vector.load %arg1[%c0, %c0_0, %c0_1] : memref<1x31x20xf32, #tpu.memory_space<vmem>>, vector<1x31x20xf32>
    %1 = vector.shape_cast %0 : vector<1x31x20xf32> to vector<31x20xf32>
    %c0_2 = arith.constant 0 : index
    %c0_3 = arith.constant 0 : index
    %c0_4 = arith.constant 0 : index
    %2 = vector.load %arg2[%c0_2, %c0_3, %c0_4] : memref<1x31x1xf32, #tpu.memory_space<vmem>>, vector<1x31x1xf32>
    %3 = vector.shape_cast %2 : vector<1x31x1xf32> to vector<31x1xf32>
    %c0_5 = arith.constant 0 : index
    %c0_6 = arith.constant 0 : index
    %4 = vector.load %arg3[%c0_5, %c0_6] : memref<20x8xf32, #tpu.memory_space<vmem>>, vector<20x8xf32>
    %cst = arith.constant dense<0.000000e+00> : vector<31x8xf32>
    %5 = tpu.matmul %1, %4, %cst {dimension_numbers = #tpu.dot_dimension_numbers<[1], [0], [0], [1], [0, 0, 1, 1], [], []>} : vector<31x20xf32>, vector<20x8xf32>, vector<31x8xf32> -> vector<31x8xf32>
    %c0_7 = arith.constant 0 : index
    %c0_8 = arith.constant 0 : index
    %6 = vector.load %arg4[%c0_7, %c0_8] : memref<1x8xf32, #tpu.memory_space<vmem>>, vector<1x8xf32>
    %7 = vector.broadcast %3 : vector<31x1xf32> to vector<31x8xf32>
    %8 = vector.broadcast %6 : vector<1x8xf32> to vector<31x8xf32>
    %9 = arith.mulf %7, %8 : vector<31x8xf32>
    %10 = arith.addf %5, %9 : vector<31x8xf32>
    %c0_9 = arith.constant 0 : index
    %c0_10 = arith.constant 0 : index
    %11 = vector.load %arg5[%c0_9, %c0_10] : memref<1x8xf32, #tpu.memory_space<vmem>>, vector<1x8xf32>
    %12 = vector.broadcast %11 : vector<1x8xf32> to vector<31x8xf32>
    %13 = arith.addf %10, %12 : vector<31x8xf32>
    %cst_11 = arith.constant 5.000000e-01 : f32
    %14 = vector.broadcast %cst_11 : f32 to vector<31x8xf32>
    %15 = arith.mulf %14, %13 : vector<31x8xf32>
    %cst_12 = arith.constant 0.707106769 : f32
    %16 = vector.broadcast %cst_12 : f32 to vector<31x8xf32>
    %17 = arith.mulf %13, %16 : vector<31x8xf32>
    %cst_13 = arith.constant 0.000000e+00 : f32
    %18 = vector.broadcast %cst_13 : f32 to vector<31x8xf32>
    %19 = arith.cmpf oge, %17, %18 : vector<31x8xf32>
    %cst_14 = arith.constant 1.000000e+00 : f32
    %cst_15 = arith.constant -1.000000e+00 : f32
    %20 = vector.broadcast %cst_14 : f32 to vector<31x8xf32>
    %21 = vector.broadcast %cst_15 : f32 to vector<31x8xf32>
    %22 = arith.select %19, %20, %21 : vector<31x8xi1>, vector<31x8xf32>
    %23 = math.absf %17 : vector<31x8xf32>
    %cst_16 = arith.constant 0.327591091 : f32
    %24 = vector.broadcast %cst_16 : f32 to vector<31x8xf32>
    %25 = arith.mulf %24, %23 : vector<31x8xf32>
    %cst_17 = arith.constant 1.000000e+00 : f32
    %26 = vector.broadcast %cst_17 : f32 to vector<31x8xf32>
    %27 = arith.addf %26, %25 : vector<31x8xf32>
    %cst_18 = arith.constant 1.000000e+00 : f32
    %28 = vector.broadcast %cst_18 : f32 to vector<31x8xf32>
    %29 = arith.divf %28, %27 : vector<31x8xf32>
    %cst_19 = arith.constant 1.06140542 : f32
    %30 = vector.broadcast %cst_19 : f32 to vector<31x8xf32>
    %31 = arith.mulf %30, %29 : vector<31x8xf32>
    %cst_20 = arith.constant -1.45315206 : f32
    %32 = vector.broadcast %cst_20 : f32 to vector<31x8xf32>
    %33 = arith.addf %31, %32 : vector<31x8xf32>
    %34 = arith.mulf %33, %29 : vector<31x8xf32>
    %cst_21 = arith.constant 1.42141378 : f32
    %35 = vector.broadcast %cst_21 : f32 to vector<31x8xf32>
    %36 = arith.addf %34, %35 : vector<31x8xf32>
    %37 = arith.mulf %36, %29 : vector<31x8xf32>
    %cst_22 = arith.constant -0.284496725 : f32
    %38 = vector.broadcast %cst_22 : f32 to vector<31x8xf32>
    %39 = arith.addf %37, %38 : vector<31x8xf32>
    %40 = arith.mulf %39, %29 : vector<31x8xf32>
    %cst_23 = arith.constant 0.254829586 : f32
    %41 = vector.broadcast %cst_23 : f32 to vector<31x8xf32>
    %42 = arith.addf %40, %41 : vector<31x8xf32>
    %43 = arith.mulf %42, %29 : vector<31x8xf32>
    %cst_24 = arith.constant 0.000000e+00 : f32
    %44 = vector.broadcast %cst_24 : f32 to vector<31x8xf32>
    %45 = arith.subf %44, %23 : vector<31x8xf32>
    %46 = arith.mulf %45, %23 : vector<31x8xf32>
    %47 = math.exp %46 : vector<31x8xf32>
    %48 = arith.mulf %43, %47 : vector<31x8xf32>
    %cst_25 = arith.constant 1.000000e+00 : f32
    %49 = vector.broadcast %cst_25 : f32 to vector<31x8xf32>
    %50 = arith.subf %49, %48 : vector<31x8xf32>
    %51 = arith.mulf %22, %50 : vector<31x8xf32>
    %cst_26 = arith.constant 1.000000e+00 : f32
    %52 = vector.broadcast %cst_26 : f32 to vector<31x8xf32>
    %53 = arith.addf %52, %51 : vector<31x8xf32>
    %54 = arith.mulf %15, %53 : vector<31x8xf32>
    %c0_27 = arith.constant 0 : index
    %c0_28 = arith.constant 0 : index
    %55 = vector.load %arg6[%c0_27, %c0_28] : memref<8x16xf32, #tpu.memory_space<vmem>>, vector<8x16xf32>
    %cst_29 = arith.constant dense<0.000000e+00> : vector<31x16xf32>
    %56 = tpu.matmul %54, %55, %cst_29 {dimension_numbers = #tpu.dot_dimension_numbers<[1], [0], [0], [1], [0, 0, 1, 1], [], []>} : vector<31x8xf32>, vector<8x16xf32>, vector<31x16xf32> -> vector<31x16xf32>
    %c0_30 = arith.constant 0 : index
    %c0_31 = arith.constant 0 : index
    %57 = vector.load %arg7[%c0_30, %c0_31] : memref<1x16xf32, #tpu.memory_space<vmem>>, vector<1x16xf32>
    %58 = vector.broadcast %57 : vector<1x16xf32> to vector<31x16xf32>
    %59 = arith.addf %56, %58 : vector<31x16xf32>
    %cst_32 = arith.constant 5.000000e-01 : f32
    %60 = vector.broadcast %cst_32 : f32 to vector<31x16xf32>
    %61 = arith.mulf %60, %59 : vector<31x16xf32>
    %cst_33 = arith.constant 0.707106769 : f32
    %62 = vector.broadcast %cst_33 : f32 to vector<31x16xf32>
    %63 = arith.mulf %59, %62 : vector<31x16xf32>
    %cst_34 = arith.constant 0.000000e+00 : f32
    %64 = vector.broadcast %cst_34 : f32 to vector<31x16xf32>
    %65 = arith.cmpf oge, %63, %64 : vector<31x16xf32>
    %cst_35 = arith.constant 1.000000e+00 : f32
    %cst_36 = arith.constant -1.000000e+00 : f32
    %66 = vector.broadcast %cst_35 : f32 to vector<31x16xf32>
    %67 = vector.broadcast %cst_36 : f32 to vector<31x16xf32>
    %68 = arith.select %65, %66, %67 : vector<31x16xi1>, vector<31x16xf32>
    %69 = math.absf %63 : vector<31x16xf32>
    %cst_37 = arith.constant 0.327591091 : f32
    %70 = vector.broadcast %cst_37 : f32 to vector<31x16xf32>
    %71 = arith.mulf %70, %69 : vector<31x16xf32>
    %cst_38 = arith.constant 1.000000e+00 : f32
    %72 = vector.broadcast %cst_38 : f32 to vector<31x16xf32>
    %73 = arith.addf %72, %71 : vector<31x16xf32>
    %cst_39 = arith.constant 1.000000e+00 : f32
    %74 = vector.broadcast %cst_39 : f32 to vector<31x16xf32>
    %75 = arith.divf %74, %73 : vector<31x16xf32>
    %cst_40 = arith.constant 1.06140542 : f32
    %76 = vector.broadcast %cst_40 : f32 to vector<31x16xf32>
    %77 = arith.mulf %76, %75 : vector<31x16xf32>
    %cst_41 = arith.constant -1.45315206 : f32
    %78 = vector.broadcast %cst_41 : f32 to vector<31x16xf32>
    %79 = arith.addf %77, %78 : vector<31x16xf32>
    %80 = arith.mulf %79, %75 : vector<31x16xf32>
    %cst_42 = arith.constant 1.42141378 : f32
    %81 = vector.broadcast %cst_42 : f32 to vector<31x16xf32>
    %82 = arith.addf %80, %81 : vector<31x16xf32>
    %83 = arith.mulf %82, %75 : vector<31x16xf32>
    %cst_43 = arith.constant -0.284496725 : f32
    %84 = vector.broadcast %cst_43 : f32 to vector<31x16xf32>
    %85 = arith.addf %83, %84 : vector<31x16xf32>
    %86 = arith.mulf %85, %75 : vector<31x16xf32>
    %cst_44 = arith.constant 0.254829586 : f32
    %87 = vector.broadcast %cst_44 : f32 to vector<31x16xf32>
    %88 = arith.addf %86, %87 : vector<31x16xf32>
    %89 = arith.mulf %88, %75 : vector<31x16xf32>
    %cst_45 = arith.constant 0.000000e+00 : f32
    %90 = vector.broadcast %cst_45 : f32 to vector<31x16xf32>
    %91 = arith.subf %90, %69 : vector<31x16xf32>
    %92 = arith.mulf %91, %69 : vector<31x16xf32>
    %93 = math.exp %92 : vector<31x16xf32>
    %94 = arith.mulf %89, %93 : vector<31x16xf32>
    %cst_46 = arith.constant 1.000000e+00 : f32
    %95 = vector.broadcast %cst_46 : f32 to vector<31x16xf32>
    %96 = arith.subf %95, %94 : vector<31x16xf32>
    %97 = arith.mulf %68, %96 : vector<31x16xf32>
    %cst_47 = arith.constant 1.000000e+00 : f32
    %98 = vector.broadcast %cst_47 : f32 to vector<31x16xf32>
    %99 = arith.addf %98, %97 : vector<31x16xf32>
    %100 = arith.mulf %61, %99 : vector<31x16xf32>
    %c0_48 = arith.constant 0 : index
    %c0_49 = arith.constant 0 : index
    %101 = vector.load %arg8[%c0_48, %c0_49] : memref<22x31xf32, #tpu.memory_space<vmem>>, vector<22x31xf32>
    %cst_50 = arith.constant dense<0.000000e+00> : vector<22x16xf32>
    %102 = tpu.matmul %101, %100, %cst_50 {dimension_numbers = #tpu.dot_dimension_numbers<[1], [0], [0], [1], [0, 0, 1, 1], [], []>} : vector<22x31xf32>, vector<31x16xf32>, vector<22x16xf32> -> vector<22x16xf32>
    %103 = vector.extract_strided_slice %102 {offsets = [0, 0], sizes = [1, 16], strides = [1, 1]} : vector<22x16xf32> to vector<1x16xf32>
    %104 = vector.extract_strided_slice %102 {offsets = [11, 0], sizes = [1, 16], strides = [1, 1]} : vector<22x16xf32> to vector<1x16xf32>
    %c0_51 = arith.constant 0 : index
    %c0_52 = arith.constant 0 : index
    %c0_53 = arith.constant 0 : index
    %105 = vector.load %arg11[%c0_51, %c0_52, %c0_53] : memref<11x16x32xf32, #tpu.memory_space<vmem>>, vector<1x16x32xf32>
    %106 = vector.shape_cast %105 : vector<1x16x32xf32> to vector<16x32xf32>
    %cst_54 = arith.constant dense<0.000000e+00> : vector<1x32xf32>
    %107 = tpu.matmul %103, %106, %cst_54 {dimension_numbers = #tpu.dot_dimension_numbers<[1], [0], [0], [1], [0, 0, 1, 1], [], []>} : vector<1x16xf32>, vector<16x32xf32>, vector<1x32xf32> -> vector<1x32xf32>
    %c0_55 = arith.constant 0 : index
    %c0_56 = arith.constant 0 : index
    %c0_57 = arith.constant 0 : index
    %108 = vector.load %arg12[%c0_55, %c0_56, %c0_57] : memref<11x16x32xf32, #tpu.memory_space<vmem>>, vector<1x16x32xf32>
    %109 = vector.shape_cast %108 : vector<1x16x32xf32> to vector<16x32xf32>
    %cst_58 = arith.constant dense<0.000000e+00> : vector<1x32xf32>
    %110 = tpu.matmul %104, %109, %cst_58 {dimension_numbers = #tpu.dot_dimension_numbers<[1], [0], [0], [1], [0, 0, 1, 1], [], []>} : vector<1x16xf32>, vector<16x32xf32>, vector<1x32xf32> -> vector<1x32xf32>
    %111 = arith.subf %107, %110 : vector<1x32xf32>
    %112 = vector.extract_strided_slice %102 {offsets = [1, 0], sizes = [1, 16], strides = [1, 1]} : vector<22x16xf32> to vector<1x16xf32>
    %113 = vector.extract_strided_slice %102 {offsets = [12, 0], sizes = [1, 16], strides = [1, 1]} : vector<22x16xf32> to vector<1x16xf32>
    %c1 = arith.constant 1 : index
    %c0_59 = arith.constant 0 : index
    %c0_60 = arith.constant 0 : index
    %114 = vector.load %arg11[%c1, %c0_59, %c0_60] : memref<11x16x32xf32, #tpu.memory_space<vmem>>, vector<1x16x32xf32>
    %115 = vector.shape_cast %114 : vector<1x16x32xf32> to vector<16x32xf32>
    %cst_61 = arith.constant dense<0.000000e+00> : vector<1x32xf32>
    %116 = tpu.matmul %112, %115, %cst_61 {dimension_numbers = #tpu.dot_dimension_numbers<[1], [0], [0], [1], [0, 0, 1, 1], [], []>} : vector<1x16xf32>, vector<16x32xf32>, vector<1x32xf32> -> vector<1x32xf32>
    %c1_62 = arith.constant 1 : index
    %c0_63 = arith.constant 0 : index
    %c0_64 = arith.constant 0 : index
    %117 = vector.load %arg12[%c1_62, %c0_63, %c0_64] : memref<11x16x32xf32, #tpu.memory_space<vmem>>, vector<1x16x32xf32>
    %118 = vector.shape_cast %117 : vector<1x16x32xf32> to vector<16x32xf32>
    %cst_65 = arith.constant dense<0.000000e+00> : vector<1x32xf32>
    %119 = tpu.matmul %113, %118, %cst_65 {dimension_numbers = #tpu.dot_dimension_numbers<[1], [0], [0], [1], [0, 0, 1, 1], [], []>} : vector<1x16xf32>, vector<16x32xf32>, vector<1x32xf32> -> vector<1x32xf32>
    %120 = arith.subf %116, %119 : vector<1x32xf32>
    %121 = vector.extract_strided_slice %102 {offsets = [2, 0], sizes = [1, 16], strides = [1, 1]} : vector<22x16xf32> to vector<1x16xf32>
    %122 = vector.extract_strided_slice %102 {offsets = [13, 0], sizes = [1, 16], strides = [1, 1]} : vector<22x16xf32> to vector<1x16xf32>
    %c2 = arith.constant 2 : index
    %c0_66 = arith.constant 0 : index
    %c0_67 = arith.constant 0 : index
    %123 = vector.load %arg11[%c2, %c0_66, %c0_67] : memref<11x16x32xf32, #tpu.memory_space<vmem>>, vector<1x16x32xf32>
    %124 = vector.shape_cast %123 : vector<1x16x32xf32> to vector<16x32xf32>
    %cst_68 = arith.constant dense<0.000000e+00> : vector<1x32xf32>
    %125 = tpu.matmul %121, %124, %cst_68 {dimension_numbers = #tpu.dot_dimension_numbers<[1], [0], [0], [1], [0, 0, 1, 1], [], []>} : vector<1x16xf32>, vector<16x32xf32>, vector<1x32xf32> -> vector<1x32xf32>
    %c2_69 = arith.constant 2 : index
    %c0_70 = arith.constant 0 : index
    %c0_71 = arith.constant 0 : index
    %126 = vector.load %arg12[%c2_69, %c0_70, %c0_71] : memref<11x16x32xf32, #tpu.memory_space<vmem>>, vector<1x16x32xf32>
    %127 = vector.shape_cast %126 : vector<1x16x32xf32> to vector<16x32xf32>
    %cst_72 = arith.constant dense<0.000000e+00> : vector<1x32xf32>
    %128 = tpu.matmul %122, %127, %cst_72 {dimension_numbers = #tpu.dot_dimension_numbers<[1], [0], [0], [1], [0, 0, 1, 1], [], []>} : vector<1x16xf32>, vector<16x32xf32>, vector<1x32xf32> -> vector<1x32xf32>
    %129 = arith.subf %125, %128 : vector<1x32xf32>
    %130 = vector.extract_strided_slice %102 {offsets = [3, 0], sizes = [1, 16], strides = [1, 1]} : vector<22x16xf32> to vector<1x16xf32>
    %131 = vector.extract_strided_slice %102 {offsets = [14, 0], sizes = [1, 16], strides = [1, 1]} : vector<22x16xf32> to vector<1x16xf32>
    %c3 = arith.constant 3 : index
    %c0_73 = arith.constant 0 : index
    %c0_74 = arith.constant 0 : index
    %132 = vector.load %arg11[%c3, %c0_73, %c0_74] : memref<11x16x32xf32, #tpu.memory_space<vmem>>, vector<1x16x32xf32>
    %133 = vector.shape_cast %132 : vector<1x16x32xf32> to vector<16x32xf32>
    %cst_75 = arith.constant dense<0.000000e+00> : vector<1x32xf32>
    %134 = tpu.matmul %130, %133, %cst_75 {dimension_numbers = #tpu.dot_dimension_numbers<[1], [0], [0], [1], [0, 0, 1, 1], [], []>} : vector<1x16xf32>, vector<16x32xf32>, vector<1x32xf32> -> vector<1x32xf32>
    %c3_76 = arith.constant 3 : index
    %c0_77 = arith.constant 0 : index
    %c0_78 = arith.constant 0 : index
    %135 = vector.load %arg12[%c3_76, %c0_77, %c0_78] : memref<11x16x32xf32, #tpu.memory_space<vmem>>, vector<1x16x32xf32>
    %136 = vector.shape_cast %135 : vector<1x16x32xf32> to vector<16x32xf32>
    %cst_79 = arith.constant dense<0.000000e+00> : vector<1x32xf32>
    %137 = tpu.matmul %131, %136, %cst_79 {dimension_numbers = #tpu.dot_dimension_numbers<[1], [0], [0], [1], [0, 0, 1, 1], [], []>} : vector<1x16xf32>, vector<16x32xf32>, vector<1x32xf32> -> vector<1x32xf32>
    %138 = arith.subf %134, %137 : vector<1x32xf32>
    %139 = vector.extract_strided_slice %102 {offsets = [4, 0], sizes = [1, 16], strides = [1, 1]} : vector<22x16xf32> to vector<1x16xf32>
    %140 = vector.extract_strided_slice %102 {offsets = [15, 0], sizes = [1, 16], strides = [1, 1]} : vector<22x16xf32> to vector<1x16xf32>
    %c4 = arith.constant 4 : index
    %c0_80 = arith.constant 0 : index
    %c0_81 = arith.constant 0 : index
    %141 = vector.load %arg11[%c4, %c0_80, %c0_81] : memref<11x16x32xf32, #tpu.memory_space<vmem>>, vector<1x16x32xf32>
    %142 = vector.shape_cast %141 : vector<1x16x32xf32> to vector<16x32xf32>
    %cst_82 = arith.constant dense<0.000000e+00> : vector<1x32xf32>
    %143 = tpu.matmul %139, %142, %cst_82 {dimension_numbers = #tpu.dot_dimension_numbers<[1], [0], [0], [1], [0, 0, 1, 1], [], []>} : vector<1x16xf32>, vector<16x32xf32>, vector<1x32xf32> -> vector<1x32xf32>
    %c4_83 = arith.constant 4 : index
    %c0_84 = arith.constant 0 : index
    %c0_85 = arith.constant 0 : index
    %144 = vector.load %arg12[%c4_83, %c0_84, %c0_85] : memref<11x16x32xf32, #tpu.memory_space<vmem>>, vector<1x16x32xf32>
    %145 = vector.shape_cast %144 : vector<1x16x32xf32> to vector<16x32xf32>
    %cst_86 = arith.constant dense<0.000000e+00> : vector<1x32xf32>
    %146 = tpu.matmul %140, %145, %cst_86 {dimension_numbers = #tpu.dot_dimension_numbers<[1], [0], [0], [1], [0, 0, 1, 1], [], []>} : vector<1x16xf32>, vector<16x32xf32>, vector<1x32xf32> -> vector<1x32xf32>
    %147 = arith.subf %143, %146 : vector<1x32xf32>
    %148 = vector.extract_strided_slice %102 {offsets = [5, 0], sizes = [1, 16], strides = [1, 1]} : vector<22x16xf32> to vector<1x16xf32>
    %149 = vector.extract_strided_slice %102 {offsets = [16, 0], sizes = [1, 16], strides = [1, 1]} : vector<22x16xf32> to vector<1x16xf32>
    %c5 = arith.constant 5 : index
    %c0_87 = arith.constant 0 : index
    %c0_88 = arith.constant 0 : index
    %150 = vector.load %arg11[%c5, %c0_87, %c0_88] : memref<11x16x32xf32, #tpu.memory_space<vmem>>, vector<1x16x32xf32>
    %151 = vector.shape_cast %150 : vector<1x16x32xf32> to vector<16x32xf32>
    %cst_89 = arith.constant dense<0.000000e+00> : vector<1x32xf32>
    %152 = tpu.matmul %148, %151, %cst_89 {dimension_numbers = #tpu.dot_dimension_numbers<[1], [0], [0], [1], [0, 0, 1, 1], [], []>} : vector<1x16xf32>, vector<16x32xf32>, vector<1x32xf32> -> vector<1x32xf32>
    %c5_90 = arith.constant 5 : index
    %c0_91 = arith.constant 0 : index
    %c0_92 = arith.constant 0 : index
    %153 = vector.load %arg12[%c5_90, %c0_91, %c0_92] : memref<11x16x32xf32, #tpu.memory_space<vmem>>, vector<1x16x32xf32>
    %154 = vector.shape_cast %153 : vector<1x16x32xf32> to vector<16x32xf32>
    %cst_93 = arith.constant dense<0.000000e+00> : vector<1x32xf32>
    %155 = tpu.matmul %149, %154, %cst_93 {dimension_numbers = #tpu.dot_dimension_numbers<[1], [0], [0], [1], [0, 0, 1, 1], [], []>} : vector<1x16xf32>, vector<16x32xf32>, vector<1x32xf32> -> vector<1x32xf32>
    %156 = arith.subf %152, %155 : vector<1x32xf32>
    %157 = vector.extract_strided_slice %102 {offsets = [6, 0], sizes = [1, 16], strides = [1, 1]} : vector<22x16xf32> to vector<1x16xf32>
    %158 = vector.extract_strided_slice %102 {offsets = [17, 0], sizes = [1, 16], strides = [1, 1]} : vector<22x16xf32> to vector<1x16xf32>
    %c6 = arith.constant 6 : index
    %c0_94 = arith.constant 0 : index
    %c0_95 = arith.constant 0 : index
    %159 = vector.load %arg11[%c6, %c0_94, %c0_95] : memref<11x16x32xf32, #tpu.memory_space<vmem>>, vector<1x16x32xf32>
    %160 = vector.shape_cast %159 : vector<1x16x32xf32> to vector<16x32xf32>
    %cst_96 = arith.constant dense<0.000000e+00> : vector<1x32xf32>
    %161 = tpu.matmul %157, %160, %cst_96 {dimension_numbers = #tpu.dot_dimension_numbers<[1], [0], [0], [1], [0, 0, 1, 1], [], []>} : vector<1x16xf32>, vector<16x32xf32>, vector<1x32xf32> -> vector<1x32xf32>
    %c6_97 = arith.constant 6 : index
    %c0_98 = arith.constant 0 : index
    %c0_99 = arith.constant 0 : index
    %162 = vector.load %arg12[%c6_97, %c0_98, %c0_99] : memref<11x16x32xf32, #tpu.memory_space<vmem>>, vector<1x16x32xf32>
    %163 = vector.shape_cast %162 : vector<1x16x32xf32> to vector<16x32xf32>
    %cst_100 = arith.constant dense<0.000000e+00> : vector<1x32xf32>
    %164 = tpu.matmul %158, %163, %cst_100 {dimension_numbers = #tpu.dot_dimension_numbers<[1], [0], [0], [1], [0, 0, 1, 1], [], []>} : vector<1x16xf32>, vector<16x32xf32>, vector<1x32xf32> -> vector<1x32xf32>
    %165 = arith.subf %161, %164 : vector<1x32xf32>
    %166 = vector.extract_strided_slice %102 {offsets = [7, 0], sizes = [1, 16], strides = [1, 1]} : vector<22x16xf32> to vector<1x16xf32>
    %167 = vector.extract_strided_slice %102 {offsets = [18, 0], sizes = [1, 16], strides = [1, 1]} : vector<22x16xf32> to vector<1x16xf32>
    %c7 = arith.constant 7 : index
    %c0_101 = arith.constant 0 : index
    %c0_102 = arith.constant 0 : index
    %168 = vector.load %arg11[%c7, %c0_101, %c0_102] : memref<11x16x32xf32, #tpu.memory_space<vmem>>, vector<1x16x32xf32>
    %169 = vector.shape_cast %168 : vector<1x16x32xf32> to vector<16x32xf32>
    %cst_103 = arith.constant dense<0.000000e+00> : vector<1x32xf32>
    %170 = tpu.matmul %166, %169, %cst_103 {dimension_numbers = #tpu.dot_dimension_numbers<[1], [0], [0], [1], [0, 0, 1, 1], [], []>} : vector<1x16xf32>, vector<16x32xf32>, vector<1x32xf32> -> vector<1x32xf32>
    %c7_104 = arith.constant 7 : index
    %c0_105 = arith.constant 0 : index
    %c0_106 = arith.constant 0 : index
    %171 = vector.load %arg12[%c7_104, %c0_105, %c0_106] : memref<11x16x32xf32, #tpu.memory_space<vmem>>, vector<1x16x32xf32>
    %172 = vector.shape_cast %171 : vector<1x16x32xf32> to vector<16x32xf32>
    %cst_107 = arith.constant dense<0.000000e+00> : vector<1x32xf32>
    %173 = tpu.matmul %167, %172, %cst_107 {dimension_numbers = #tpu.dot_dimension_numbers<[1], [0], [0], [1], [0, 0, 1, 1], [], []>} : vector<1x16xf32>, vector<16x32xf32>, vector<1x32xf32> -> vector<1x32xf32>
    %174 = arith.subf %170, %173 : vector<1x32xf32>
    %175 = vector.extract_strided_slice %102 {offsets = [8, 0], sizes = [1, 16], strides = [1, 1]} : vector<22x16xf32> to vector<1x16xf32>
    %176 = vector.extract_strided_slice %102 {offsets = [19, 0], sizes = [1, 16], strides = [1, 1]} : vector<22x16xf32> to vector<1x16xf32>
    %c8 = arith.constant 8 : index
    %c0_108 = arith.constant 0 : index
    %c0_109 = arith.constant 0 : index
    %177 = vector.load %arg11[%c8, %c0_108, %c0_109] : memref<11x16x32xf32, #tpu.memory_space<vmem>>, vector<1x16x32xf32>
    %178 = vector.shape_cast %177 : vector<1x16x32xf32> to vector<16x32xf32>
    %cst_110 = arith.constant dense<0.000000e+00> : vector<1x32xf32>
    %179 = tpu.matmul %175, %178, %cst_110 {dimension_numbers = #tpu.dot_dimension_numbers<[1], [0], [0], [1], [0, 0, 1, 1], [], []>} : vector<1x16xf32>, vector<16x32xf32>, vector<1x32xf32> -> vector<1x32xf32>
    %c8_111 = arith.constant 8 : index
    %c0_112 = arith.constant 0 : index
    %c0_113 = arith.constant 0 : index
    %180 = vector.load %arg12[%c8_111, %c0_112, %c0_113] : memref<11x16x32xf32, #tpu.memory_space<vmem>>, vector<1x16x32xf32>
    %181 = vector.shape_cast %180 : vector<1x16x32xf32> to vector<16x32xf32>
    %cst_114 = arith.constant dense<0.000000e+00> : vector<1x32xf32>
    %182 = tpu.matmul %176, %181, %cst_114 {dimension_numbers = #tpu.dot_dimension_numbers<[1], [0], [0], [1], [0, 0, 1, 1], [], []>} : vector<1x16xf32>, vector<16x32xf32>, vector<1x32xf32> -> vector<1x32xf32>
    %183 = arith.subf %179, %182 : vector<1x32xf32>
    %184 = vector.extract_strided_slice %102 {offsets = [9, 0], sizes = [1, 16], strides = [1, 1]} : vector<22x16xf32> to vector<1x16xf32>
    %185 = vector.extract_strided_slice %102 {offsets = [20, 0], sizes = [1, 16], strides = [1, 1]} : vector<22x16xf32> to vector<1x16xf32>
    %c9 = arith.constant 9 : index
    %c0_115 = arith.constant 0 : index
    %c0_116 = arith.constant 0 : index
    %186 = vector.load %arg11[%c9, %c0_115, %c0_116] : memref<11x16x32xf32, #tpu.memory_space<vmem>>, vector<1x16x32xf32>
    %187 = vector.shape_cast %186 : vector<1x16x32xf32> to vector<16x32xf32>
    %cst_117 = arith.constant dense<0.000000e+00> : vector<1x32xf32>
    %188 = tpu.matmul %184, %187, %cst_117 {dimension_numbers = #tpu.dot_dimension_numbers<[1], [0], [0], [1], [0, 0, 1, 1], [], []>} : vector<1x16xf32>, vector<16x32xf32>, vector<1x32xf32> -> vector<1x32xf32>
    %c9_118 = arith.constant 9 : index
    %c0_119 = arith.constant 0 : index
    %c0_120 = arith.constant 0 : index
    %189 = vector.load %arg12[%c9_118, %c0_119, %c0_120] : memref<11x16x32xf32, #tpu.memory_space<vmem>>, vector<1x16x32xf32>
    %190 = vector.shape_cast %189 : vector<1x16x32xf32> to vector<16x32xf32>
    %cst_121 = arith.constant dense<0.000000e+00> : vector<1x32xf32>
    %191 = tpu.matmul %185, %190, %cst_121 {dimension_numbers = #tpu.dot_dimension_numbers<[1], [0], [0], [1], [0, 0, 1, 1], [], []>} : vector<1x16xf32>, vector<16x32xf32>, vector<1x32xf32> -> vector<1x32xf32>
    %192 = arith.subf %188, %191 : vector<1x32xf32>
    %193 = vector.extract_strided_slice %102 {offsets = [10, 0], sizes = [1, 16], strides = [1, 1]} : vector<22x16xf32> to vector<1x16xf32>
    %194 = vector.extract_strided_slice %102 {offsets = [21, 0], sizes = [1, 16], strides = [1, 1]} : vector<22x16xf32> to vector<1x16xf32>
    %c10 = arith.constant 10 : index
    %c0_122 = arith.constant 0 : index
    %c0_123 = arith.constant 0 : index
    %195 = vector.load %arg11[%c10, %c0_122, %c0_123] : memref<11x16x32xf32, #tpu.memory_space<vmem>>, vector<1x16x32xf32>
    %196 = vector.shape_cast %195 : vector<1x16x32xf32> to vector<16x32xf32>
    %cst_124 = arith.constant dense<0.000000e+00> : vector<1x32xf32>
    %197 = tpu.matmul %193, %196, %cst_124 {dimension_numbers = #tpu.dot_dimension_numbers<[1], [0], [0], [1], [0, 0, 1, 1], [], []>} : vector<1x16xf32>, vector<16x32xf32>, vector<1x32xf32> -> vector<1x32xf32>
    %c10_125 = arith.constant 10 : index
    %c0_126 = arith.constant 0 : index
    %c0_127 = arith.constant 0 : index
    %198 = vector.load %arg12[%c10_125, %c0_126, %c0_127] : memref<11x16x32xf32, #tpu.memory_space<vmem>>, vector<1x16x32xf32>
    %199 = vector.shape_cast %198 : vector<1x16x32xf32> to vector<16x32xf32>
    %cst_128 = arith.constant dense<0.000000e+00> : vector<1x32xf32>
    %200 = tpu.matmul %194, %199, %cst_128 {dimension_numbers = #tpu.dot_dimension_numbers<[1], [0], [0], [1], [0, 0, 1, 1], [], []>} : vector<1x16xf32>, vector<16x32xf32>, vector<1x32xf32> -> vector<1x32xf32>
    %201 = arith.subf %197, %200 : vector<1x32xf32>
    %202 = vector.extract_strided_slice %102 {offsets = [0, 0], sizes = [1, 16], strides = [1, 1]} : vector<22x16xf32> to vector<1x16xf32>
    %203 = vector.extract_strided_slice %102 {offsets = [11, 0], sizes = [1, 16], strides = [1, 1]} : vector<22x16xf32> to vector<1x16xf32>
    %c0_129 = arith.constant 0 : index
    %c0_130 = arith.constant 0 : index
    %c0_131 = arith.constant 0 : index
    %204 = vector.load %arg12[%c0_129, %c0_130, %c0_131] : memref<11x16x32xf32, #tpu.memory_space<vmem>>, vector<1x16x32xf32>
    %205 = vector.shape_cast %204 : vector<1x16x32xf32> to vector<16x32xf32>
    %cst_132 = arith.constant dense<0.000000e+00> : vector<1x32xf32>
    %206 = tpu.matmul %202, %205, %cst_132 {dimension_numbers = #tpu.dot_dimension_numbers<[1], [0], [0], [1], [0, 0, 1, 1], [], []>} : vector<1x16xf32>, vector<16x32xf32>, vector<1x32xf32> -> vector<1x32xf32>
    %c0_133 = arith.constant 0 : index
    %c0_134 = arith.constant 0 : index
    %c0_135 = arith.constant 0 : index
    %207 = vector.load %arg11[%c0_133, %c0_134, %c0_135] : memref<11x16x32xf32, #tpu.memory_space<vmem>>, vector<1x16x32xf32>
    %208 = vector.shape_cast %207 : vector<1x16x32xf32> to vector<16x32xf32>
    %cst_136 = arith.constant dense<0.000000e+00> : vector<1x32xf32>
    %209 = tpu.matmul %203, %208, %cst_136 {dimension_numbers = #tpu.dot_dimension_numbers<[1], [0], [0], [1], [0, 0, 1, 1], [], []>} : vector<1x16xf32>, vector<16x32xf32>, vector<1x32xf32> -> vector<1x32xf32>
    %210 = arith.addf %206, %209 : vector<1x32xf32>
    %211 = vector.extract_strided_slice %102 {offsets = [1, 0], sizes = [1, 16], strides = [1, 1]} : vector<22x16xf32> to vector<1x16xf32>
    %212 = vector.extract_strided_slice %102 {offsets = [12, 0], sizes = [1, 16], strides = [1, 1]} : vector<22x16xf32> to vector<1x16xf32>
    %c1_137 = arith.constant 1 : index
    %c0_138 = arith.constant 0 : index
    %c0_139 = arith.constant 0 : index
    %213 = vector.load %arg12[%c1_137, %c0_138, %c0_139] : memref<11x16x32xf32, #tpu.memory_space<vmem>>, vector<1x16x32xf32>
    %214 = vector.shape_cast %213 : vector<1x16x32xf32> to vector<16x32xf32>
    %cst_140 = arith.constant dense<0.000000e+00> : vector<1x32xf32>
    %215 = tpu.matmul %211, %214, %cst_140 {dimension_numbers = #tpu.dot_dimension_numbers<[1], [0], [0], [1], [0, 0, 1, 1], [], []>} : vector<1x16xf32>, vector<16x32xf32>, vector<1x32xf32> -> vector<1x32xf32>
    %c1_141 = arith.constant 1 : index
    %c0_142 = arith.constant 0 : index
    %c0_143 = arith.constant 0 : index
    %216 = vector.load %arg11[%c1_141, %c0_142, %c0_143] : memref<11x16x32xf32, #tpu.memory_space<vmem>>, vector<1x16x32xf32>
    %217 = vector.shape_cast %216 : vector<1x16x32xf32> to vector<16x32xf32>
    %cst_144 = arith.constant dense<0.000000e+00> : vector<1x32xf32>
    %218 = tpu.matmul %212, %217, %cst_144 {dimension_numbers = #tpu.dot_dimension_numbers<[1], [0], [0], [1], [0, 0, 1, 1], [], []>} : vector<1x16xf32>, vector<16x32xf32>, vector<1x32xf32> -> vector<1x32xf32>
    %219 = arith.addf %215, %218 : vector<1x32xf32>
    %220 = vector.extract_strided_slice %102 {offsets = [2, 0], sizes = [1, 16], strides = [1, 1]} : vector<22x16xf32> to vector<1x16xf32>
    %221 = vector.extract_strided_slice %102 {offsets = [13, 0], sizes = [1, 16], strides = [1, 1]} : vector<22x16xf32> to vector<1x16xf32>
    %c2_145 = arith.constant 2 : index
    %c0_146 = arith.constant 0 : index
    %c0_147 = arith.constant 0 : index
    %222 = vector.load %arg12[%c2_145, %c0_146, %c0_147] : memref<11x16x32xf32, #tpu.memory_space<vmem>>, vector<1x16x32xf32>
    %223 = vector.shape_cast %222 : vector<1x16x32xf32> to vector<16x32xf32>
    %cst_148 = arith.constant dense<0.000000e+00> : vector<1x32xf32>
    %224 = tpu.matmul %220, %223, %cst_148 {dimension_numbers = #tpu.dot_dimension_numbers<[1], [0], [0], [1], [0, 0, 1, 1], [], []>} : vector<1x16xf32>, vector<16x32xf32>, vector<1x32xf32> -> vector<1x32xf32>
    %c2_149 = arith.constant 2 : index
    %c0_150 = arith.constant 0 : index
    %c0_151 = arith.constant 0 : index
    %225 = vector.load %arg11[%c2_149, %c0_150, %c0_151] : memref<11x16x32xf32, #tpu.memory_space<vmem>>, vector<1x16x32xf32>
    %226 = vector.shape_cast %225 : vector<1x16x32xf32> to vector<16x32xf32>
    %cst_152 = arith.constant dense<0.000000e+00> : vector<1x32xf32>
    %227 = tpu.matmul %221, %226, %cst_152 {dimension_numbers = #tpu.dot_dimension_numbers<[1], [0], [0], [1], [0, 0, 1, 1], [], []>} : vector<1x16xf32>, vector<16x32xf32>, vector<1x32xf32> -> vector<1x32xf32>
    %228 = arith.addf %224, %227 : vector<1x32xf32>
    %229 = vector.extract_strided_slice %102 {offsets = [3, 0], sizes = [1, 16], strides = [1, 1]} : vector<22x16xf32> to vector<1x16xf32>
    %230 = vector.extract_strided_slice %102 {offsets = [14, 0], sizes = [1, 16], strides = [1, 1]} : vector<22x16xf32> to vector<1x16xf32>
    %c3_153 = arith.constant 3 : index
    %c0_154 = arith.constant 0 : index
    %c0_155 = arith.constant 0 : index
    %231 = vector.load %arg12[%c3_153, %c0_154, %c0_155] : memref<11x16x32xf32, #tpu.memory_space<vmem>>, vector<1x16x32xf32>
    %232 = vector.shape_cast %231 : vector<1x16x32xf32> to vector<16x32xf32>
    %cst_156 = arith.constant dense<0.000000e+00> : vector<1x32xf32>
    %233 = tpu.matmul %229, %232, %cst_156 {dimension_numbers = #tpu.dot_dimension_numbers<[1], [0], [0], [1], [0, 0, 1, 1], [], []>} : vector<1x16xf32>, vector<16x32xf32>, vector<1x32xf32> -> vector<1x32xf32>
    %c3_157 = arith.constant 3 : index
    %c0_158 = arith.constant 0 : index
    %c0_159 = arith.constant 0 : index
    %234 = vector.load %arg11[%c3_157, %c0_158, %c0_159] : memref<11x16x32xf32, #tpu.memory_space<vmem>>, vector<1x16x32xf32>
    %235 = vector.shape_cast %234 : vector<1x16x32xf32> to vector<16x32xf32>
    %cst_160 = arith.constant dense<0.000000e+00> : vector<1x32xf32>
    %236 = tpu.matmul %230, %235, %cst_160 {dimension_numbers = #tpu.dot_dimension_numbers<[1], [0], [0], [1], [0, 0, 1, 1], [], []>} : vector<1x16xf32>, vector<16x32xf32>, vector<1x32xf32> -> vector<1x32xf32>
    %237 = arith.addf %233, %236 : vector<1x32xf32>
    %238 = vector.extract_strided_slice %102 {offsets = [4, 0], sizes = [1, 16], strides = [1, 1]} : vector<22x16xf32> to vector<1x16xf32>
    %239 = vector.extract_strided_slice %102 {offsets = [15, 0], sizes = [1, 16], strides = [1, 1]} : vector<22x16xf32> to vector<1x16xf32>
    %c4_161 = arith.constant 4 : index
    %c0_162 = arith.constant 0 : index
    %c0_163 = arith.constant 0 : index
    %240 = vector.load %arg12[%c4_161, %c0_162, %c0_163] : memref<11x16x32xf32, #tpu.memory_space<vmem>>, vector<1x16x32xf32>
    %241 = vector.shape_cast %240 : vector<1x16x32xf32> to vector<16x32xf32>
    %cst_164 = arith.constant dense<0.000000e+00> : vector<1x32xf32>
    %242 = tpu.matmul %238, %241, %cst_164 {dimension_numbers = #tpu.dot_dimension_numbers<[1], [0], [0], [1], [0, 0, 1, 1], [], []>} : vector<1x16xf32>, vector<16x32xf32>, vector<1x32xf32> -> vector<1x32xf32>
    %c4_165 = arith.constant 4 : index
    %c0_166 = arith.constant 0 : index
    %c0_167 = arith.constant 0 : index
    %243 = vector.load %arg11[%c4_165, %c0_166, %c0_167] : memref<11x16x32xf32, #tpu.memory_space<vmem>>, vector<1x16x32xf32>
    %244 = vector.shape_cast %243 : vector<1x16x32xf32> to vector<16x32xf32>
    %cst_168 = arith.constant dense<0.000000e+00> : vector<1x32xf32>
    %245 = tpu.matmul %239, %244, %cst_168 {dimension_numbers = #tpu.dot_dimension_numbers<[1], [0], [0], [1], [0, 0, 1, 1], [], []>} : vector<1x16xf32>, vector<16x32xf32>, vector<1x32xf32> -> vector<1x32xf32>
    %246 = arith.addf %242, %245 : vector<1x32xf32>
    %247 = vector.extract_strided_slice %102 {offsets = [5, 0], sizes = [1, 16], strides = [1, 1]} : vector<22x16xf32> to vector<1x16xf32>
    %248 = vector.extract_strided_slice %102 {offsets = [16, 0], sizes = [1, 16], strides = [1, 1]} : vector<22x16xf32> to vector<1x16xf32>
    %c5_169 = arith.constant 5 : index
    %c0_170 = arith.constant 0 : index
    %c0_171 = arith.constant 0 : index
    %249 = vector.load %arg12[%c5_169, %c0_170, %c0_171] : memref<11x16x32xf32, #tpu.memory_space<vmem>>, vector<1x16x32xf32>
    %250 = vector.shape_cast %249 : vector<1x16x32xf32> to vector<16x32xf32>
    %cst_172 = arith.constant dense<0.000000e+00> : vector<1x32xf32>
    %251 = tpu.matmul %247, %250, %cst_172 {dimension_numbers = #tpu.dot_dimension_numbers<[1], [0], [0], [1], [0, 0, 1, 1], [], []>} : vector<1x16xf32>, vector<16x32xf32>, vector<1x32xf32> -> vector<1x32xf32>
    %c5_173 = arith.constant 5 : index
    %c0_174 = arith.constant 0 : index
    %c0_175 = arith.constant 0 : index
    %252 = vector.load %arg11[%c5_173, %c0_174, %c0_175] : memref<11x16x32xf32, #tpu.memory_space<vmem>>, vector<1x16x32xf32>
    %253 = vector.shape_cast %252 : vector<1x16x32xf32> to vector<16x32xf32>
    %cst_176 = arith.constant dense<0.000000e+00> : vector<1x32xf32>
    %254 = tpu.matmul %248, %253, %cst_176 {dimension_numbers = #tpu.dot_dimension_numbers<[1], [0], [0], [1], [0, 0, 1, 1], [], []>} : vector<1x16xf32>, vector<16x32xf32>, vector<1x32xf32> -> vector<1x32xf32>
    %255 = arith.addf %251, %254 : vector<1x32xf32>
    %256 = vector.extract_strided_slice %102 {offsets = [6, 0], sizes = [1, 16], strides = [1, 1]} : vector<22x16xf32> to vector<1x16xf32>
    %257 = vector.extract_strided_slice %102 {offsets = [17, 0], sizes = [1, 16], strides = [1, 1]} : vector<22x16xf32> to vector<1x16xf32>
    %c6_177 = arith.constant 6 : index
    %c0_178 = arith.constant 0 : index
    %c0_179 = arith.constant 0 : index
    %258 = vector.load %arg12[%c6_177, %c0_178, %c0_179] : memref<11x16x32xf32, #tpu.memory_space<vmem>>, vector<1x16x32xf32>
    %259 = vector.shape_cast %258 : vector<1x16x32xf32> to vector<16x32xf32>
    %cst_180 = arith.constant dense<0.000000e+00> : vector<1x32xf32>
    %260 = tpu.matmul %256, %259, %cst_180 {dimension_numbers = #tpu.dot_dimension_numbers<[1], [0], [0], [1], [0, 0, 1, 1], [], []>} : vector<1x16xf32>, vector<16x32xf32>, vector<1x32xf32> -> vector<1x32xf32>
    %c6_181 = arith.constant 6 : index
    %c0_182 = arith.constant 0 : index
    %c0_183 = arith.constant 0 : index
    %261 = vector.load %arg11[%c6_181, %c0_182, %c0_183] : memref<11x16x32xf32, #tpu.memory_space<vmem>>, vector<1x16x32xf32>
    %262 = vector.shape_cast %261 : vector<1x16x32xf32> to vector<16x32xf32>
    %cst_184 = arith.constant dense<0.000000e+00> : vector<1x32xf32>
    %263 = tpu.matmul %257, %262, %cst_184 {dimension_numbers = #tpu.dot_dimension_numbers<[1], [0], [0], [1], [0, 0, 1, 1], [], []>} : vector<1x16xf32>, vector<16x32xf32>, vector<1x32xf32> -> vector<1x32xf32>
    %264 = arith.addf %260, %263 : vector<1x32xf32>
    %265 = vector.extract_strided_slice %102 {offsets = [7, 0], sizes = [1, 16], strides = [1, 1]} : vector<22x16xf32> to vector<1x16xf32>
    %266 = vector.extract_strided_slice %102 {offsets = [18, 0], sizes = [1, 16], strides = [1, 1]} : vector<22x16xf32> to vector<1x16xf32>
    %c7_185 = arith.constant 7 : index
    %c0_186 = arith.constant 0 : index
    %c0_187 = arith.constant 0 : index
    %267 = vector.load %arg12[%c7_185, %c0_186, %c0_187] : memref<11x16x32xf32, #tpu.memory_space<vmem>>, vector<1x16x32xf32>
    %268 = vector.shape_cast %267 : vector<1x16x32xf32> to vector<16x32xf32>
    %cst_188 = arith.constant dense<0.000000e+00> : vector<1x32xf32>
    %269 = tpu.matmul %265, %268, %cst_188 {dimension_numbers = #tpu.dot_dimension_numbers<[1], [0], [0], [1], [0, 0, 1, 1], [], []>} : vector<1x16xf32>, vector<16x32xf32>, vector<1x32xf32> -> vector<1x32xf32>
    %c7_189 = arith.constant 7 : index
    %c0_190 = arith.constant 0 : index
    %c0_191 = arith.constant 0 : index
    %270 = vector.load %arg11[%c7_189, %c0_190, %c0_191] : memref<11x16x32xf32, #tpu.memory_space<vmem>>, vector<1x16x32xf32>
    %271 = vector.shape_cast %270 : vector<1x16x32xf32> to vector<16x32xf32>
    %cst_192 = arith.constant dense<0.000000e+00> : vector<1x32xf32>
    %272 = tpu.matmul %266, %271, %cst_192 {dimension_numbers = #tpu.dot_dimension_numbers<[1], [0], [0], [1], [0, 0, 1, 1], [], []>} : vector<1x16xf32>, vector<16x32xf32>, vector<1x32xf32> -> vector<1x32xf32>
    %273 = arith.addf %269, %272 : vector<1x32xf32>
    %274 = vector.extract_strided_slice %102 {offsets = [8, 0], sizes = [1, 16], strides = [1, 1]} : vector<22x16xf32> to vector<1x16xf32>
    %275 = vector.extract_strided_slice %102 {offsets = [19, 0], sizes = [1, 16], strides = [1, 1]} : vector<22x16xf32> to vector<1x16xf32>
    %c8_193 = arith.constant 8 : index
    %c0_194 = arith.constant 0 : index
    %c0_195 = arith.constant 0 : index
    %276 = vector.load %arg12[%c8_193, %c0_194, %c0_195] : memref<11x16x32xf32, #tpu.memory_space<vmem>>, vector<1x16x32xf32>
    %277 = vector.shape_cast %276 : vector<1x16x32xf32> to vector<16x32xf32>
    %cst_196 = arith.constant dense<0.000000e+00> : vector<1x32xf32>
    %278 = tpu.matmul %274, %277, %cst_196 {dimension_numbers = #tpu.dot_dimension_numbers<[1], [0], [0], [1], [0, 0, 1, 1], [], []>} : vector<1x16xf32>, vector<16x32xf32>, vector<1x32xf32> -> vector<1x32xf32>
    %c8_197 = arith.constant 8 : index
    %c0_198 = arith.constant 0 : index
    %c0_199 = arith.constant 0 : index
    %279 = vector.load %arg11[%c8_197, %c0_198, %c0_199] : memref<11x16x32xf32, #tpu.memory_space<vmem>>, vector<1x16x32xf32>
    %280 = vector.shape_cast %279 : vector<1x16x32xf32> to vector<16x32xf32>
    %cst_200 = arith.constant dense<0.000000e+00> : vector<1x32xf32>
    %281 = tpu.matmul %275, %280, %cst_200 {dimension_numbers = #tpu.dot_dimension_numbers<[1], [0], [0], [1], [0, 0, 1, 1], [], []>} : vector<1x16xf32>, vector<16x32xf32>, vector<1x32xf32> -> vector<1x32xf32>
    %282 = arith.addf %278, %281 : vector<1x32xf32>
    %283 = vector.extract_strided_slice %102 {offsets = [9, 0], sizes = [1, 16], strides = [1, 1]} : vector<22x16xf32> to vector<1x16xf32>
    %284 = vector.extract_strided_slice %102 {offsets = [20, 0], sizes = [1, 16], strides = [1, 1]} : vector<22x16xf32> to vector<1x16xf32>
    %c9_201 = arith.constant 9 : index
    %c0_202 = arith.constant 0 : index
    %c0_203 = arith.constant 0 : index
    %285 = vector.load %arg12[%c9_201, %c0_202, %c0_203] : memref<11x16x32xf32, #tpu.memory_space<vmem>>, vector<1x16x32xf32>
    %286 = vector.shape_cast %285 : vector<1x16x32xf32> to vector<16x32xf32>
    %cst_204 = arith.constant dense<0.000000e+00> : vector<1x32xf32>
    %287 = tpu.matmul %283, %286, %cst_204 {dimension_numbers = #tpu.dot_dimension_numbers<[1], [0], [0], [1], [0, 0, 1, 1], [], []>} : vector<1x16xf32>, vector<16x32xf32>, vector<1x32xf32> -> vector<1x32xf32>
    %c9_205 = arith.constant 9 : index
    %c0_206 = arith.constant 0 : index
    %c0_207 = arith.constant 0 : index
    %288 = vector.load %arg11[%c9_205, %c0_206, %c0_207] : memref<11x16x32xf32, #tpu.memory_space<vmem>>, vector<1x16x32xf32>
    %289 = vector.shape_cast %288 : vector<1x16x32xf32> to vector<16x32xf32>
    %cst_208 = arith.constant dense<0.000000e+00> : vector<1x32xf32>
    %290 = tpu.matmul %284, %289, %cst_208 {dimension_numbers = #tpu.dot_dimension_numbers<[1], [0], [0], [1], [0, 0, 1, 1], [], []>} : vector<1x16xf32>, vector<16x32xf32>, vector<1x32xf32> -> vector<1x32xf32>
    %291 = arith.addf %287, %290 : vector<1x32xf32>
    %292 = vector.extract_strided_slice %102 {offsets = [10, 0], sizes = [1, 16], strides = [1, 1]} : vector<22x16xf32> to vector<1x16xf32>
    %293 = vector.extract_strided_slice %102 {offsets = [21, 0], sizes = [1, 16], strides = [1, 1]} : vector<22x16xf32> to vector<1x16xf32>
    %c10_209 = arith.constant 10 : index
    %c0_210 = arith.constant 0 : index
    %c0_211 = arith.constant 0 : index
    %294 = vector.load %arg12[%c10_209, %c0_210, %c0_211] : memref<11x16x32xf32, #tpu.memory_space<vmem>>, vector<1x16x32xf32>
    %295 = vector.shape_cast %294 : vector<1x16x32xf32> to vector<16x32xf32>
    %cst_212 = arith.constant dense<0.000000e+00> : vector<1x32xf32>
    %296 = tpu.matmul %292, %295, %cst_212 {dimension_numbers = #tpu.dot_dimension_numbers<[1], [0], [0], [1], [0, 0, 1, 1], [], []>} : vector<1x16xf32>, vector<16x32xf32>, vector<1x32xf32> -> vector<1x32xf32>
    %c10_213 = arith.constant 10 : index
    %c0_214 = arith.constant 0 : index
    %c0_215 = arith.constant 0 : index
    %297 = vector.load %arg11[%c10_213, %c0_214, %c0_215] : memref<11x16x32xf32, #tpu.memory_space<vmem>>, vector<1x16x32xf32>
    %298 = vector.shape_cast %297 : vector<1x16x32xf32> to vector<16x32xf32>
    %cst_216 = arith.constant dense<0.000000e+00> : vector<1x32xf32>
    %299 = tpu.matmul %293, %298, %cst_216 {dimension_numbers = #tpu.dot_dimension_numbers<[1], [0], [0], [1], [0, 0, 1, 1], [], []>} : vector<1x16xf32>, vector<16x32xf32>, vector<1x32xf32> -> vector<1x32xf32>
    %300 = arith.addf %296, %299 : vector<1x32xf32>
    %301 = tpu.concatenate %111, %120, %129, %138, %147, %156, %165, %174, %183, %192, %201, %210, %219, %228, %237, %246 in 0 : vector<1x32xf32>, vector<1x32xf32>, vector<1x32xf32>, vector<1x32xf32>, vector<1x32xf32>, vector<1x32xf32>, vector<1x32xf32>, vector<1x32xf32>, vector<1x32xf32>, vector<1x32xf32>, vector<1x32xf32>, vector<1x32xf32>, vector<1x32xf32>, vector<1x32xf32>, vector<1x32xf32>, vector<1x32xf32> -> vector<16x32xf32>
    %302 = tpu.concatenate %255, %264, %273, %282, %291, %300 in 0 : vector<1x32xf32>, vector<1x32xf32>, vector<1x32xf32>, vector<1x32xf32>, vector<1x32xf32>, vector<1x32xf32> -> vector<6x32xf32>
    %303 = tpu.concatenate %301, %302 in 0 : vector<16x32xf32>, vector<6x32xf32> -> vector<22x32xf32>
    %c0_217 = arith.constant 0 : index
    %c0_218 = arith.constant 0 : index
    %304 = vector.load %arg9[%c0_217, %c0_218] : memref<20x22xf32, #tpu.memory_space<vmem>>, vector<20x22xf32>
    %cst_219 = arith.constant dense<0.000000e+00> : vector<20x32xf32>
    %305 = tpu.matmul %304, %303, %cst_219 {dimension_numbers = #tpu.dot_dimension_numbers<[1], [0], [0], [1], [0, 0, 1, 1], [], []>} : vector<20x22xf32>, vector<22x32xf32>, vector<20x32xf32> -> vector<20x32xf32>
    %c0_220 = arith.constant 0 : index
    %c0_221 = arith.constant 0 : index
    %306 = vector.load %arg10[%c0_220, %c0_221] : memref<20x31xf32, #tpu.memory_space<vmem>>, vector<20x31xf32>
    %c0_222 = arith.constant 0 : index
    %c0_223 = arith.constant 0 : index
    %307 = vector.load %arg13[%c0_222, %c0_223] : memref<16x32xf32, #tpu.memory_space<vmem>>, vector<16x32xf32>
    %cst_224 = arith.constant dense<0.000000e+00> : vector<31x32xf32>
    %308 = tpu.matmul %100, %307, %cst_224 {dimension_numbers = #tpu.dot_dimension_numbers<[1], [0], [0], [1], [0, 0, 1, 1], [], []>} : vector<31x16xf32>, vector<16x32xf32>, vector<31x32xf32> -> vector<31x32xf32>
    %cst_225 = arith.constant dense<0.000000e+00> : vector<20x32xf32>
    %309 = tpu.matmul %306, %308, %cst_225 {dimension_numbers = #tpu.dot_dimension_numbers<[1], [0], [0], [1], [0, 0, 1, 1], [], []>} : vector<20x31xf32>, vector<31x32xf32>, vector<20x32xf32> -> vector<20x32xf32>
    %310 = arith.addf %305, %309 : vector<20x32xf32>
    %c0_226 = arith.constant 0 : index
    %c0_227 = arith.constant 0 : index
    %311 = vector.load %arg14[%c0_226, %c0_227] : memref<1x32xf32, #tpu.memory_space<vmem>>, vector<1x32xf32>
    %312 = vector.broadcast %311 : vector<1x32xf32> to vector<20x32xf32>
    %313 = arith.addf %310, %312 : vector<20x32xf32>
    %cst_228 = arith.constant 5.000000e-01 : f32
    %314 = vector.broadcast %cst_228 : f32 to vector<20x32xf32>
    %315 = arith.mulf %314, %313 : vector<20x32xf32>
    %cst_229 = arith.constant 0.707106769 : f32
    %316 = vector.broadcast %cst_229 : f32 to vector<20x32xf32>
    %317 = arith.mulf %313, %316 : vector<20x32xf32>
    %cst_230 = arith.constant 0.000000e+00 : f32
    %318 = vector.broadcast %cst_230 : f32 to vector<20x32xf32>
    %319 = arith.cmpf oge, %317, %318 : vector<20x32xf32>
    %cst_231 = arith.constant 1.000000e+00 : f32
    %cst_232 = arith.constant -1.000000e+00 : f32
    %320 = vector.broadcast %cst_231 : f32 to vector<20x32xf32>
    %321 = vector.broadcast %cst_232 : f32 to vector<20x32xf32>
    %322 = arith.select %319, %320, %321 : vector<20x32xi1>, vector<20x32xf32>
    %323 = math.absf %317 : vector<20x32xf32>
    %cst_233 = arith.constant 0.327591091 : f32
    %324 = vector.broadcast %cst_233 : f32 to vector<20x32xf32>
    %325 = arith.mulf %324, %323 : vector<20x32xf32>
    %cst_234 = arith.constant 1.000000e+00 : f32
    %326 = vector.broadcast %cst_234 : f32 to vector<20x32xf32>
    %327 = arith.addf %326, %325 : vector<20x32xf32>
    %cst_235 = arith.constant 1.000000e+00 : f32
    %328 = vector.broadcast %cst_235 : f32 to vector<20x32xf32>
    %329 = arith.divf %328, %327 : vector<20x32xf32>
    %cst_236 = arith.constant 1.06140542 : f32
    %330 = vector.broadcast %cst_236 : f32 to vector<20x32xf32>
    %331 = arith.mulf %330, %329 : vector<20x32xf32>
    %cst_237 = arith.constant -1.45315206 : f32
    %332 = vector.broadcast %cst_237 : f32 to vector<20x32xf32>
    %333 = arith.addf %331, %332 : vector<20x32xf32>
    %334 = arith.mulf %333, %329 : vector<20x32xf32>
    %cst_238 = arith.constant 1.42141378 : f32
    %335 = vector.broadcast %cst_238 : f32 to vector<20x32xf32>
    %336 = arith.addf %334, %335 : vector<20x32xf32>
    %337 = arith.mulf %336, %329 : vector<20x32xf32>
    %cst_239 = arith.constant -0.284496725 : f32
    %338 = vector.broadcast %cst_239 : f32 to vector<20x32xf32>
    %339 = arith.addf %337, %338 : vector<20x32xf32>
    %340 = arith.mulf %339, %329 : vector<20x32xf32>
    %cst_240 = arith.constant 0.254829586 : f32
    %341 = vector.broadcast %cst_240 : f32 to vector<20x32xf32>
    %342 = arith.addf %340, %341 : vector<20x32xf32>
    %343 = arith.mulf %342, %329 : vector<20x32xf32>
    %cst_241 = arith.constant 0.000000e+00 : f32
    %344 = vector.broadcast %cst_241 : f32 to vector<20x32xf32>
    %345 = arith.subf %344, %323 : vector<20x32xf32>
    %346 = arith.mulf %345, %323 : vector<20x32xf32>
    %347 = math.exp %346 : vector<20x32xf32>
    %348 = arith.mulf %343, %347 : vector<20x32xf32>
    %cst_242 = arith.constant 1.000000e+00 : f32
    %349 = vector.broadcast %cst_242 : f32 to vector<20x32xf32>
    %350 = arith.subf %349, %348 : vector<20x32xf32>
    %351 = arith.mulf %322, %350 : vector<20x32xf32>
    %cst_243 = arith.constant 1.000000e+00 : f32
    %352 = vector.broadcast %cst_243 : f32 to vector<20x32xf32>
    %353 = arith.addf %352, %351 : vector<20x32xf32>
    %354 = arith.mulf %315, %353 : vector<20x32xf32>
    %c0_244 = arith.constant 0 : index
    %c0_245 = arith.constant 0 : index
    %355 = vector.load %arg15[%c0_244, %c0_245] : memref<10x20xf32, #tpu.memory_space<vmem>>, vector<10x20xf32>
    %cst_246 = arith.constant dense<0.000000e+00> : vector<10x32xf32>
    %356 = tpu.matmul %355, %354, %cst_246 {dimension_numbers = #tpu.dot_dimension_numbers<[1], [0], [0], [1], [0, 0, 1, 1], [], []>} : vector<10x20xf32>, vector<20x32xf32>, vector<10x32xf32> -> vector<10x32xf32>
    %357 = vector.extract_strided_slice %356 {offsets = [0, 0], sizes = [1, 32], strides = [1, 1]} : vector<10x32xf32> to vector<1x32xf32>
    %358 = vector.extract_strided_slice %356 {offsets = [5, 0], sizes = [1, 32], strides = [1, 1]} : vector<10x32xf32> to vector<1x32xf32>
    %c0_247 = arith.constant 0 : index
    %c0_248 = arith.constant 0 : index
    %c0_249 = arith.constant 0 : index
    %359 = vector.load %arg18[%c0_247, %c0_248, %c0_249] : memref<5x32x64xf32, #tpu.memory_space<vmem>>, vector<1x32x64xf32>
    %360 = vector.shape_cast %359 : vector<1x32x64xf32> to vector<32x64xf32>
    %cst_250 = arith.constant dense<0.000000e+00> : vector<1x64xf32>
    %361 = tpu.matmul %357, %360, %cst_250 {dimension_numbers = #tpu.dot_dimension_numbers<[1], [0], [0], [1], [0, 0, 1, 1], [], []>} : vector<1x32xf32>, vector<32x64xf32>, vector<1x64xf32> -> vector<1x64xf32>
    %c0_251 = arith.constant 0 : index
    %c0_252 = arith.constant 0 : index
    %c0_253 = arith.constant 0 : index
    %362 = vector.load %arg19[%c0_251, %c0_252, %c0_253] : memref<5x32x64xf32, #tpu.memory_space<vmem>>, vector<1x32x64xf32>
    %363 = vector.shape_cast %362 : vector<1x32x64xf32> to vector<32x64xf32>
    %cst_254 = arith.constant dense<0.000000e+00> : vector<1x64xf32>
    %364 = tpu.matmul %358, %363, %cst_254 {dimension_numbers = #tpu.dot_dimension_numbers<[1], [0], [0], [1], [0, 0, 1, 1], [], []>} : vector<1x32xf32>, vector<32x64xf32>, vector<1x64xf32> -> vector<1x64xf32>
    %365 = arith.subf %361, %364 : vector<1x64xf32>
    %366 = vector.extract_strided_slice %356 {offsets = [1, 0], sizes = [1, 32], strides = [1, 1]} : vector<10x32xf32> to vector<1x32xf32>
    %367 = vector.extract_strided_slice %356 {offsets = [6, 0], sizes = [1, 32], strides = [1, 1]} : vector<10x32xf32> to vector<1x32xf32>
    %c1_255 = arith.constant 1 : index
    %c0_256 = arith.constant 0 : index
    %c0_257 = arith.constant 0 : index
    %368 = vector.load %arg18[%c1_255, %c0_256, %c0_257] : memref<5x32x64xf32, #tpu.memory_space<vmem>>, vector<1x32x64xf32>
    %369 = vector.shape_cast %368 : vector<1x32x64xf32> to vector<32x64xf32>
    %cst_258 = arith.constant dense<0.000000e+00> : vector<1x64xf32>
    %370 = tpu.matmul %366, %369, %cst_258 {dimension_numbers = #tpu.dot_dimension_numbers<[1], [0], [0], [1], [0, 0, 1, 1], [], []>} : vector<1x32xf32>, vector<32x64xf32>, vector<1x64xf32> -> vector<1x64xf32>
    %c1_259 = arith.constant 1 : index
    %c0_260 = arith.constant 0 : index
    %c0_261 = arith.constant 0 : index
    %371 = vector.load %arg19[%c1_259, %c0_260, %c0_261] : memref<5x32x64xf32, #tpu.memory_space<vmem>>, vector<1x32x64xf32>
    %372 = vector.shape_cast %371 : vector<1x32x64xf32> to vector<32x64xf32>
    %cst_262 = arith.constant dense<0.000000e+00> : vector<1x64xf32>
    %373 = tpu.matmul %367, %372, %cst_262 {dimension_numbers = #tpu.dot_dimension_numbers<[1], [0], [0], [1], [0, 0, 1, 1], [], []>} : vector<1x32xf32>, vector<32x64xf32>, vector<1x64xf32> -> vector<1x64xf32>
    %374 = arith.subf %370, %373 : vector<1x64xf32>
    %375 = vector.extract_strided_slice %356 {offsets = [2, 0], sizes = [1, 32], strides = [1, 1]} : vector<10x32xf32> to vector<1x32xf32>
    %376 = vector.extract_strided_slice %356 {offsets = [7, 0], sizes = [1, 32], strides = [1, 1]} : vector<10x32xf32> to vector<1x32xf32>
    %c2_263 = arith.constant 2 : index
    %c0_264 = arith.constant 0 : index
    %c0_265 = arith.constant 0 : index
    %377 = vector.load %arg18[%c2_263, %c0_264, %c0_265] : memref<5x32x64xf32, #tpu.memory_space<vmem>>, vector<1x32x64xf32>
    %378 = vector.shape_cast %377 : vector<1x32x64xf32> to vector<32x64xf32>
    %cst_266 = arith.constant dense<0.000000e+00> : vector<1x64xf32>
    %379 = tpu.matmul %375, %378, %cst_266 {dimension_numbers = #tpu.dot_dimension_numbers<[1], [0], [0], [1], [0, 0, 1, 1], [], []>} : vector<1x32xf32>, vector<32x64xf32>, vector<1x64xf32> -> vector<1x64xf32>
    %c2_267 = arith.constant 2 : index
    %c0_268 = arith.constant 0 : index
    %c0_269 = arith.constant 0 : index
    %380 = vector.load %arg19[%c2_267, %c0_268, %c0_269] : memref<5x32x64xf32, #tpu.memory_space<vmem>>, vector<1x32x64xf32>
    %381 = vector.shape_cast %380 : vector<1x32x64xf32> to vector<32x64xf32>
    %cst_270 = arith.constant dense<0.000000e+00> : vector<1x64xf32>
    %382 = tpu.matmul %376, %381, %cst_270 {dimension_numbers = #tpu.dot_dimension_numbers<[1], [0], [0], [1], [0, 0, 1, 1], [], []>} : vector<1x32xf32>, vector<32x64xf32>, vector<1x64xf32> -> vector<1x64xf32>
    %383 = arith.subf %379, %382 : vector<1x64xf32>
    %384 = vector.extract_strided_slice %356 {offsets = [3, 0], sizes = [1, 32], strides = [1, 1]} : vector<10x32xf32> to vector<1x32xf32>
    %385 = vector.extract_strided_slice %356 {offsets = [8, 0], sizes = [1, 32], strides = [1, 1]} : vector<10x32xf32> to vector<1x32xf32>
    %c3_271 = arith.constant 3 : index
    %c0_272 = arith.constant 0 : index
    %c0_273 = arith.constant 0 : index
    %386 = vector.load %arg18[%c3_271, %c0_272, %c0_273] : memref<5x32x64xf32, #tpu.memory_space<vmem>>, vector<1x32x64xf32>
    %387 = vector.shape_cast %386 : vector<1x32x64xf32> to vector<32x64xf32>
    %cst_274 = arith.constant dense<0.000000e+00> : vector<1x64xf32>
    %388 = tpu.matmul %384, %387, %cst_274 {dimension_numbers = #tpu.dot_dimension_numbers<[1], [0], [0], [1], [0, 0, 1, 1], [], []>} : vector<1x32xf32>, vector<32x64xf32>, vector<1x64xf32> -> vector<1x64xf32>
    %c3_275 = arith.constant 3 : index
    %c0_276 = arith.constant 0 : index
    %c0_277 = arith.constant 0 : index
    %389 = vector.load %arg19[%c3_275, %c0_276, %c0_277] : memref<5x32x64xf32, #tpu.memory_space<vmem>>, vector<1x32x64xf32>
    %390 = vector.shape_cast %389 : vector<1x32x64xf32> to vector<32x64xf32>
    %cst_278 = arith.constant dense<0.000000e+00> : vector<1x64xf32>
    %391 = tpu.matmul %385, %390, %cst_278 {dimension_numbers = #tpu.dot_dimension_numbers<[1], [0], [0], [1], [0, 0, 1, 1], [], []>} : vector<1x32xf32>, vector<32x64xf32>, vector<1x64xf32> -> vector<1x64xf32>
    %392 = arith.subf %388, %391 : vector<1x64xf32>
    %393 = vector.extract_strided_slice %356 {offsets = [4, 0], sizes = [1, 32], strides = [1, 1]} : vector<10x32xf32> to vector<1x32xf32>
    %394 = vector.extract_strided_slice %356 {offsets = [9, 0], sizes = [1, 32], strides = [1, 1]} : vector<10x32xf32> to vector<1x32xf32>
    %c4_279 = arith.constant 4 : index
    %c0_280 = arith.constant 0 : index
    %c0_281 = arith.constant 0 : index
    %395 = vector.load %arg18[%c4_279, %c0_280, %c0_281] : memref<5x32x64xf32, #tpu.memory_space<vmem>>, vector<1x32x64xf32>
    %396 = vector.shape_cast %395 : vector<1x32x64xf32> to vector<32x64xf32>
    %cst_282 = arith.constant dense<0.000000e+00> : vector<1x64xf32>
    %397 = tpu.matmul %393, %396, %cst_282 {dimension_numbers = #tpu.dot_dimension_numbers<[1], [0], [0], [1], [0, 0, 1, 1], [], []>} : vector<1x32xf32>, vector<32x64xf32>, vector<1x64xf32> -> vector<1x64xf32>
    %c4_283 = arith.constant 4 : index
    %c0_284 = arith.constant 0 : index
    %c0_285 = arith.constant 0 : index
    %398 = vector.load %arg19[%c4_283, %c0_284, %c0_285] : memref<5x32x64xf32, #tpu.memory_space<vmem>>, vector<1x32x64xf32>
    %399 = vector.shape_cast %398 : vector<1x32x64xf32> to vector<32x64xf32>
    %cst_286 = arith.constant dense<0.000000e+00> : vector<1x64xf32>
    %400 = tpu.matmul %394, %399, %cst_286 {dimension_numbers = #tpu.dot_dimension_numbers<[1], [0], [0], [1], [0, 0, 1, 1], [], []>} : vector<1x32xf32>, vector<32x64xf32>, vector<1x64xf32> -> vector<1x64xf32>
    %401 = arith.subf %397, %400 : vector<1x64xf32>
    %402 = vector.extract_strided_slice %356 {offsets = [0, 0], sizes = [1, 32], strides = [1, 1]} : vector<10x32xf32> to vector<1x32xf32>
    %403 = vector.extract_strided_slice %356 {offsets = [5, 0], sizes = [1, 32], strides = [1, 1]} : vector<10x32xf32> to vector<1x32xf32>
    %c0_287 = arith.constant 0 : index
    %c0_288 = arith.constant 0 : index
    %c0_289 = arith.constant 0 : index
    %404 = vector.load %arg19[%c0_287, %c0_288, %c0_289] : memref<5x32x64xf32, #tpu.memory_space<vmem>>, vector<1x32x64xf32>
    %405 = vector.shape_cast %404 : vector<1x32x64xf32> to vector<32x64xf32>
    %cst_290 = arith.constant dense<0.000000e+00> : vector<1x64xf32>
    %406 = tpu.matmul %402, %405, %cst_290 {dimension_numbers = #tpu.dot_dimension_numbers<[1], [0], [0], [1], [0, 0, 1, 1], [], []>} : vector<1x32xf32>, vector<32x64xf32>, vector<1x64xf32> -> vector<1x64xf32>
    %c0_291 = arith.constant 0 : index
    %c0_292 = arith.constant 0 : index
    %c0_293 = arith.constant 0 : index
    %407 = vector.load %arg18[%c0_291, %c0_292, %c0_293] : memref<5x32x64xf32, #tpu.memory_space<vmem>>, vector<1x32x64xf32>
    %408 = vector.shape_cast %407 : vector<1x32x64xf32> to vector<32x64xf32>
    %cst_294 = arith.constant dense<0.000000e+00> : vector<1x64xf32>
    %409 = tpu.matmul %403, %408, %cst_294 {dimension_numbers = #tpu.dot_dimension_numbers<[1], [0], [0], [1], [0, 0, 1, 1], [], []>} : vector<1x32xf32>, vector<32x64xf32>, vector<1x64xf32> -> vector<1x64xf32>
    %410 = arith.addf %406, %409 : vector<1x64xf32>
    %411 = vector.extract_strided_slice %356 {offsets = [1, 0], sizes = [1, 32], strides = [1, 1]} : vector<10x32xf32> to vector<1x32xf32>
    %412 = vector.extract_strided_slice %356 {offsets = [6, 0], sizes = [1, 32], strides = [1, 1]} : vector<10x32xf32> to vector<1x32xf32>
    %c1_295 = arith.constant 1 : index
    %c0_296 = arith.constant 0 : index
    %c0_297 = arith.constant 0 : index
    %413 = vector.load %arg19[%c1_295, %c0_296, %c0_297] : memref<5x32x64xf32, #tpu.memory_space<vmem>>, vector<1x32x64xf32>
    %414 = vector.shape_cast %413 : vector<1x32x64xf32> to vector<32x64xf32>
    %cst_298 = arith.constant dense<0.000000e+00> : vector<1x64xf32>
    %415 = tpu.matmul %411, %414, %cst_298 {dimension_numbers = #tpu.dot_dimension_numbers<[1], [0], [0], [1], [0, 0, 1, 1], [], []>} : vector<1x32xf32>, vector<32x64xf32>, vector<1x64xf32> -> vector<1x64xf32>
    %c1_299 = arith.constant 1 : index
    %c0_300 = arith.constant 0 : index
    %c0_301 = arith.constant 0 : index
    %416 = vector.load %arg18[%c1_299, %c0_300, %c0_301] : memref<5x32x64xf32, #tpu.memory_space<vmem>>, vector<1x32x64xf32>
    %417 = vector.shape_cast %416 : vector<1x32x64xf32> to vector<32x64xf32>
    %cst_302 = arith.constant dense<0.000000e+00> : vector<1x64xf32>
    %418 = tpu.matmul %412, %417, %cst_302 {dimension_numbers = #tpu.dot_dimension_numbers<[1], [0], [0], [1], [0, 0, 1, 1], [], []>} : vector<1x32xf32>, vector<32x64xf32>, vector<1x64xf32> -> vector<1x64xf32>
    %419 = arith.addf %415, %418 : vector<1x64xf32>
    %420 = vector.extract_strided_slice %356 {offsets = [2, 0], sizes = [1, 32], strides = [1, 1]} : vector<10x32xf32> to vector<1x32xf32>
    %421 = vector.extract_strided_slice %356 {offsets = [7, 0], sizes = [1, 32], strides = [1, 1]} : vector<10x32xf32> to vector<1x32xf32>
    %c2_303 = arith.constant 2 : index
    %c0_304 = arith.constant 0 : index
    %c0_305 = arith.constant 0 : index
    %422 = vector.load %arg19[%c2_303, %c0_304, %c0_305] : memref<5x32x64xf32, #tpu.memory_space<vmem>>, vector<1x32x64xf32>
    %423 = vector.shape_cast %422 : vector<1x32x64xf32> to vector<32x64xf32>
    %cst_306 = arith.constant dense<0.000000e+00> : vector<1x64xf32>
    %424 = tpu.matmul %420, %423, %cst_306 {dimension_numbers = #tpu.dot_dimension_numbers<[1], [0], [0], [1], [0, 0, 1, 1], [], []>} : vector<1x32xf32>, vector<32x64xf32>, vector<1x64xf32> -> vector<1x64xf32>
    %c2_307 = arith.constant 2 : index
    %c0_308 = arith.constant 0 : index
    %c0_309 = arith.constant 0 : index
    %425 = vector.load %arg18[%c2_307, %c0_308, %c0_309] : memref<5x32x64xf32, #tpu.memory_space<vmem>>, vector<1x32x64xf32>
    %426 = vector.shape_cast %425 : vector<1x32x64xf32> to vector<32x64xf32>
    %cst_310 = arith.constant dense<0.000000e+00> : vector<1x64xf32>
    %427 = tpu.matmul %421, %426, %cst_310 {dimension_numbers = #tpu.dot_dimension_numbers<[1], [0], [0], [1], [0, 0, 1, 1], [], []>} : vector<1x32xf32>, vector<32x64xf32>, vector<1x64xf32> -> vector<1x64xf32>
    %428 = arith.addf %424, %427 : vector<1x64xf32>
    %429 = vector.extract_strided_slice %356 {offsets = [3, 0], sizes = [1, 32], strides = [1, 1]} : vector<10x32xf32> to vector<1x32xf32>
    %430 = vector.extract_strided_slice %356 {offsets = [8, 0], sizes = [1, 32], strides = [1, 1]} : vector<10x32xf32> to vector<1x32xf32>
    %c3_311 = arith.constant 3 : index
    %c0_312 = arith.constant 0 : index
    %c0_313 = arith.constant 0 : index
    %431 = vector.load %arg19[%c3_311, %c0_312, %c0_313] : memref<5x32x64xf32, #tpu.memory_space<vmem>>, vector<1x32x64xf32>
    %432 = vector.shape_cast %431 : vector<1x32x64xf32> to vector<32x64xf32>
    %cst_314 = arith.constant dense<0.000000e+00> : vector<1x64xf32>
    %433 = tpu.matmul %429, %432, %cst_314 {dimension_numbers = #tpu.dot_dimension_numbers<[1], [0], [0], [1], [0, 0, 1, 1], [], []>} : vector<1x32xf32>, vector<32x64xf32>, vector<1x64xf32> -> vector<1x64xf32>
    %c3_315 = arith.constant 3 : index
    %c0_316 = arith.constant 0 : index
    %c0_317 = arith.constant 0 : index
    %434 = vector.load %arg18[%c3_315, %c0_316, %c0_317] : memref<5x32x64xf32, #tpu.memory_space<vmem>>, vector<1x32x64xf32>
    %435 = vector.shape_cast %434 : vector<1x32x64xf32> to vector<32x64xf32>
    %cst_318 = arith.constant dense<0.000000e+00> : vector<1x64xf32>
    %436 = tpu.matmul %430, %435, %cst_318 {dimension_numbers = #tpu.dot_dimension_numbers<[1], [0], [0], [1], [0, 0, 1, 1], [], []>} : vector<1x32xf32>, vector<32x64xf32>, vector<1x64xf32> -> vector<1x64xf32>
    %437 = arith.addf %433, %436 : vector<1x64xf32>
    %438 = vector.extract_strided_slice %356 {offsets = [4, 0], sizes = [1, 32], strides = [1, 1]} : vector<10x32xf32> to vector<1x32xf32>
    %439 = vector.extract_strided_slice %356 {offsets = [9, 0], sizes = [1, 32], strides = [1, 1]} : vector<10x32xf32> to vector<1x32xf32>
    %c4_319 = arith.constant 4 : index
    %c0_320 = arith.constant 0 : index
    %c0_321 = arith.constant 0 : index
    %440 = vector.load %arg19[%c4_319, %c0_320, %c0_321] : memref<5x32x64xf32, #tpu.memory_space<vmem>>, vector<1x32x64xf32>
    %441 = vector.shape_cast %440 : vector<1x32x64xf32> to vector<32x64xf32>
    %cst_322 = arith.constant dense<0.000000e+00> : vector<1x64xf32>
    %442 = tpu.matmul %438, %441, %cst_322 {dimension_numbers = #tpu.dot_dimension_numbers<[1], [0], [0], [1], [0, 0, 1, 1], [], []>} : vector<1x32xf32>, vector<32x64xf32>, vector<1x64xf32> -> vector<1x64xf32>
    %c4_323 = arith.constant 4 : index
    %c0_324 = arith.constant 0 : index
    %c0_325 = arith.constant 0 : index
    %443 = vector.load %arg18[%c4_323, %c0_324, %c0_325] : memref<5x32x64xf32, #tpu.memory_space<vmem>>, vector<1x32x64xf32>
    %444 = vector.shape_cast %443 : vector<1x32x64xf32> to vector<32x64xf32>
    %cst_326 = arith.constant dense<0.000000e+00> : vector<1x64xf32>
    %445 = tpu.matmul %439, %444, %cst_326 {dimension_numbers = #tpu.dot_dimension_numbers<[1], [0], [0], [1], [0, 0, 1, 1], [], []>} : vector<1x32xf32>, vector<32x64xf32>, vector<1x64xf32> -> vector<1x64xf32>
    %446 = arith.addf %442, %445 : vector<1x64xf32>
    %447 = tpu.concatenate %365, %374, %383, %392, %401, %410, %419, %428, %437, %446 in 0 : vector<1x64xf32>, vector<1x64xf32>, vector<1x64xf32>, vector<1x64xf32>, vector<1x64xf32>, vector<1x64xf32>, vector<1x64xf32>, vector<1x64xf32>, vector<1x64xf32>, vector<1x64xf32> -> vector<10x64xf32>
    %c0_327 = arith.constant 0 : index
    %c0_328 = arith.constant 0 : index
    %448 = vector.load %arg16[%c0_327, %c0_328] : memref<10x10xf32, #tpu.memory_space<vmem>>, vector<10x10xf32>
    %cst_329 = arith.constant dense<0.000000e+00> : vector<10x64xf32>
    %449 = tpu.matmul %448, %447, %cst_329 {dimension_numbers = #tpu.dot_dimension_numbers<[1], [0], [0], [1], [0, 0, 1, 1], [], []>} : vector<10x10xf32>, vector<10x64xf32>, vector<10x64xf32> -> vector<10x64xf32>
    %c0_330 = arith.constant 0 : index
    %c0_331 = arith.constant 0 : index
    %450 = vector.load %arg17[%c0_330, %c0_331] : memref<10x20xf32, #tpu.memory_space<vmem>>, vector<10x20xf32>
    %c0_332 = arith.constant 0 : index
    %c0_333 = arith.constant 0 : index
    %451 = vector.load %arg20[%c0_332, %c0_333] : memref<32x64xf32, #tpu.memory_space<vmem>>, vector<32x64xf32>
    %cst_334 = arith.constant dense<0.000000e+00> : vector<20x64xf32>
    %452 = tpu.matmul %354, %451, %cst_334 {dimension_numbers = #tpu.dot_dimension_numbers<[1], [0], [0], [1], [0, 0, 1, 1], [], []>} : vector<20x32xf32>, vector<32x64xf32>, vector<20x64xf32> -> vector<20x64xf32>
    %cst_335 = arith.constant dense<0.000000e+00> : vector<10x64xf32>
    %453 = tpu.matmul %450, %452, %cst_335 {dimension_numbers = #tpu.dot_dimension_numbers<[1], [0], [0], [1], [0, 0, 1, 1], [], []>} : vector<10x20xf32>, vector<20x64xf32>, vector<10x64xf32> -> vector<10x64xf32>
    %454 = arith.addf %449, %453 : vector<10x64xf32>
    %c0_336 = arith.constant 0 : index
    %c0_337 = arith.constant 0 : index
    %455 = vector.load %arg21[%c0_336, %c0_337] : memref<1x64xf32, #tpu.memory_space<vmem>>, vector<1x64xf32>
    %456 = vector.broadcast %455 : vector<1x64xf32> to vector<10x64xf32>
    %457 = arith.addf %454, %456 : vector<10x64xf32>
    %cst_338 = arith.constant dense<0.000000e+00> : vector<64xf32>
    %458 = vector.multi_reduction <add>, %457, %cst_338 [0] : vector<10x64xf32> to vector<64xf32>
    %459 = vector.shape_cast %458 : vector<64xf32> to vector<1x64xf32>
    %cst_339 = arith.constant 1.000000e+01 : f32
    %460 = vector.broadcast %cst_339 : f32 to vector<1x64xf32>
    %461 = arith.divf %459, %460 : vector<1x64xf32>
    %462 = vector.broadcast %461 : vector<1x64xf32> to vector<10x64xf32>
    %463 = arith.subf %457, %462 : vector<10x64xf32>
    %464 = arith.mulf %463, %463 : vector<10x64xf32>
    %cst_340 = arith.constant dense<0.000000e+00> : vector<64xf32>
    %465 = vector.multi_reduction <add>, %464, %cst_340 [0] : vector<10x64xf32> to vector<64xf32>
    %466 = vector.shape_cast %465 : vector<64xf32> to vector<1x64xf32>
    %cst_341 = arith.constant 1.000000e+01 : f32
    %467 = vector.broadcast %cst_341 : f32 to vector<1x64xf32>
    %468 = arith.divf %466, %467 : vector<1x64xf32>
    %469 = vector.broadcast %461 : vector<1x64xf32> to vector<10x64xf32>
    %470 = arith.subf %457, %469 : vector<10x64xf32>
    %cst_342 = arith.constant 9.99999974E-6 : f32
    %471 = vector.broadcast %cst_342 : f32 to vector<1x64xf32>
    %472 = arith.addf %468, %471 : vector<1x64xf32>
    %473 = math.rsqrt %472 : vector<1x64xf32>
    %474 = vector.broadcast %473 : vector<1x64xf32> to vector<10x64xf32>
    %475 = arith.mulf %470, %474 : vector<10x64xf32>
    %c0_343 = arith.constant 0 : index
    %c0_344 = arith.constant 0 : index
    %476 = vector.load %arg22[%c0_343, %c0_344] : memref<1x64xf32, #tpu.memory_space<vmem>>, vector<1x64xf32>
    %477 = vector.broadcast %476 : vector<1x64xf32> to vector<10x64xf32>
    %478 = arith.mulf %475, %477 : vector<10x64xf32>
    %c0_345 = arith.constant 0 : index
    %c0_346 = arith.constant 0 : index
    %479 = vector.load %arg23[%c0_345, %c0_346] : memref<1x64xf32, #tpu.memory_space<vmem>>, vector<1x64xf32>
    %480 = vector.broadcast %479 : vector<1x64xf32> to vector<10x64xf32>
    %481 = arith.addf %478, %480 : vector<10x64xf32>
    %cst_347 = arith.constant 5.000000e-01 : f32
    %482 = vector.broadcast %cst_347 : f32 to vector<10x64xf32>
    %483 = arith.mulf %482, %481 : vector<10x64xf32>
    %cst_348 = arith.constant 0.707106769 : f32
    %484 = vector.broadcast %cst_348 : f32 to vector<10x64xf32>
    %485 = arith.mulf %481, %484 : vector<10x64xf32>
    %cst_349 = arith.constant 0.000000e+00 : f32
    %486 = vector.broadcast %cst_349 : f32 to vector<10x64xf32>
    %487 = arith.cmpf oge, %485, %486 : vector<10x64xf32>
    %cst_350 = arith.constant 1.000000e+00 : f32
    %cst_351 = arith.constant -1.000000e+00 : f32
    %488 = vector.broadcast %cst_350 : f32 to vector<10x64xf32>
    %489 = vector.broadcast %cst_351 : f32 to vector<10x64xf32>
    %490 = arith.select %487, %488, %489 : vector<10x64xi1>, vector<10x64xf32>
    %491 = math.absf %485 : vector<10x64xf32>
    %cst_352 = arith.constant 0.327591091 : f32
    %492 = vector.broadcast %cst_352 : f32 to vector<10x64xf32>
    %493 = arith.mulf %492, %491 : vector<10x64xf32>
    %cst_353 = arith.constant 1.000000e+00 : f32
    %494 = vector.broadcast %cst_353 : f32 to vector<10x64xf32>
    %495 = arith.addf %494, %493 : vector<10x64xf32>
    %cst_354 = arith.constant 1.000000e+00 : f32
    %496 = vector.broadcast %cst_354 : f32 to vector<10x64xf32>
    %497 = arith.divf %496, %495 : vector<10x64xf32>
    %cst_355 = arith.constant 1.06140542 : f32
    %498 = vector.broadcast %cst_355 : f32 to vector<10x64xf32>
    %499 = arith.mulf %498, %497 : vector<10x64xf32>
    %cst_356 = arith.constant -1.45315206 : f32
    %500 = vector.broadcast %cst_356 : f32 to vector<10x64xf32>
    %501 = arith.addf %499, %500 : vector<10x64xf32>
    %502 = arith.mulf %501, %497 : vector<10x64xf32>
    %cst_357 = arith.constant 1.42141378 : f32
    %503 = vector.broadcast %cst_357 : f32 to vector<10x64xf32>
    %504 = arith.addf %502, %503 : vector<10x64xf32>
    %505 = arith.mulf %504, %497 : vector<10x64xf32>
    %cst_358 = arith.constant -0.284496725 : f32
    %506 = vector.broadcast %cst_358 : f32 to vector<10x64xf32>
    %507 = arith.addf %505, %506 : vector<10x64xf32>
    %508 = arith.mulf %507, %497 : vector<10x64xf32>
    %cst_359 = arith.constant 0.254829586 : f32
    %509 = vector.broadcast %cst_359 : f32 to vector<10x64xf32>
    %510 = arith.addf %508, %509 : vector<10x64xf32>
    %511 = arith.mulf %510, %497 : vector<10x64xf32>
    %cst_360 = arith.constant 0.000000e+00 : f32
    %512 = vector.broadcast %cst_360 : f32 to vector<10x64xf32>
    %513 = arith.subf %512, %491 : vector<10x64xf32>
    %514 = arith.mulf %513, %491 : vector<10x64xf32>
    %515 = math.exp %514 : vector<10x64xf32>
    %516 = arith.mulf %511, %515 : vector<10x64xf32>
    %cst_361 = arith.constant 1.000000e+00 : f32
    %517 = vector.broadcast %cst_361 : f32 to vector<10x64xf32>
    %518 = arith.subf %517, %516 : vector<10x64xf32>
    %519 = arith.mulf %490, %518 : vector<10x64xf32>
    %cst_362 = arith.constant 1.000000e+00 : f32
    %520 = vector.broadcast %cst_362 : f32 to vector<10x64xf32>
    %521 = arith.addf %520, %519 : vector<10x64xf32>
    %522 = arith.mulf %483, %521 : vector<10x64xf32>
    %c0_363 = arith.constant 0 : index
    %c0_364 = arith.constant 0 : index
    %523 = vector.load %arg24[%c0_363, %c0_364] : memref<10x10xf32, #tpu.memory_space<vmem>>, vector<10x10xf32>
    %cst_365 = arith.constant dense<0.000000e+00> : vector<10x64xf32>
    %524 = tpu.matmul %523, %522, %cst_365 {dimension_numbers = #tpu.dot_dimension_numbers<[1], [0], [0], [1], [0, 0, 1, 1], [], []>} : vector<10x10xf32>, vector<10x64xf32>, vector<10x64xf32> -> vector<10x64xf32>
    %525 = vector.extract_strided_slice %524 {offsets = [0, 0], sizes = [1, 64], strides = [1, 1]} : vector<10x64xf32> to vector<1x64xf32>
    %526 = vector.extract_strided_slice %524 {offsets = [5, 0], sizes = [1, 64], strides = [1, 1]} : vector<10x64xf32> to vector<1x64xf32>
    %c0_366 = arith.constant 0 : index
    %c0_367 = arith.constant 0 : index
    %c0_368 = arith.constant 0 : index
    %527 = vector.load %arg27[%c0_366, %c0_367, %c0_368] : memref<5x64x64xf32, #tpu.memory_space<vmem>>, vector<1x64x64xf32>
    %528 = vector.shape_cast %527 : vector<1x64x64xf32> to vector<64x64xf32>
    %cst_369 = arith.constant dense<0.000000e+00> : vector<1x64xf32>
    %529 = tpu.matmul %525, %528, %cst_369 {dimension_numbers = #tpu.dot_dimension_numbers<[1], [0], [0], [1], [0, 0, 1, 1], [], []>} : vector<1x64xf32>, vector<64x64xf32>, vector<1x64xf32> -> vector<1x64xf32>
    %c0_370 = arith.constant 0 : index
    %c0_371 = arith.constant 0 : index
    %c0_372 = arith.constant 0 : index
    %530 = vector.load %arg28[%c0_370, %c0_371, %c0_372] : memref<5x64x64xf32, #tpu.memory_space<vmem>>, vector<1x64x64xf32>
    %531 = vector.shape_cast %530 : vector<1x64x64xf32> to vector<64x64xf32>
    %cst_373 = arith.constant dense<0.000000e+00> : vector<1x64xf32>
    %532 = tpu.matmul %526, %531, %cst_373 {dimension_numbers = #tpu.dot_dimension_numbers<[1], [0], [0], [1], [0, 0, 1, 1], [], []>} : vector<1x64xf32>, vector<64x64xf32>, vector<1x64xf32> -> vector<1x64xf32>
    %533 = arith.subf %529, %532 : vector<1x64xf32>
    %534 = vector.extract_strided_slice %524 {offsets = [1, 0], sizes = [1, 64], strides = [1, 1]} : vector<10x64xf32> to vector<1x64xf32>
    %535 = vector.extract_strided_slice %524 {offsets = [6, 0], sizes = [1, 64], strides = [1, 1]} : vector<10x64xf32> to vector<1x64xf32>
    %c1_374 = arith.constant 1 : index
    %c0_375 = arith.constant 0 : index
    %c0_376 = arith.constant 0 : index
    %536 = vector.load %arg27[%c1_374, %c0_375, %c0_376] : memref<5x64x64xf32, #tpu.memory_space<vmem>>, vector<1x64x64xf32>
    %537 = vector.shape_cast %536 : vector<1x64x64xf32> to vector<64x64xf32>
    %cst_377 = arith.constant dense<0.000000e+00> : vector<1x64xf32>
    %538 = tpu.matmul %534, %537, %cst_377 {dimension_numbers = #tpu.dot_dimension_numbers<[1], [0], [0], [1], [0, 0, 1, 1], [], []>} : vector<1x64xf32>, vector<64x64xf32>, vector<1x64xf32> -> vector<1x64xf32>
    %c1_378 = arith.constant 1 : index
    %c0_379 = arith.constant 0 : index
    %c0_380 = arith.constant 0 : index
    %539 = vector.load %arg28[%c1_378, %c0_379, %c0_380] : memref<5x64x64xf32, #tpu.memory_space<vmem>>, vector<1x64x64xf32>
    %540 = vector.shape_cast %539 : vector<1x64x64xf32> to vector<64x64xf32>
    %cst_381 = arith.constant dense<0.000000e+00> : vector<1x64xf32>
    %541 = tpu.matmul %535, %540, %cst_381 {dimension_numbers = #tpu.dot_dimension_numbers<[1], [0], [0], [1], [0, 0, 1, 1], [], []>} : vector<1x64xf32>, vector<64x64xf32>, vector<1x64xf32> -> vector<1x64xf32>
    %542 = arith.subf %538, %541 : vector<1x64xf32>
    %543 = vector.extract_strided_slice %524 {offsets = [2, 0], sizes = [1, 64], strides = [1, 1]} : vector<10x64xf32> to vector<1x64xf32>
    %544 = vector.extract_strided_slice %524 {offsets = [7, 0], sizes = [1, 64], strides = [1, 1]} : vector<10x64xf32> to vector<1x64xf32>
    %c2_382 = arith.constant 2 : index
    %c0_383 = arith.constant 0 : index
    %c0_384 = arith.constant 0 : index
    %545 = vector.load %arg27[%c2_382, %c0_383, %c0_384] : memref<5x64x64xf32, #tpu.memory_space<vmem>>, vector<1x64x64xf32>
    %546 = vector.shape_cast %545 : vector<1x64x64xf32> to vector<64x64xf32>
    %cst_385 = arith.constant dense<0.000000e+00> : vector<1x64xf32>
    %547 = tpu.matmul %543, %546, %cst_385 {dimension_numbers = #tpu.dot_dimension_numbers<[1], [0], [0], [1], [0, 0, 1, 1], [], []>} : vector<1x64xf32>, vector<64x64xf32>, vector<1x64xf32> -> vector<1x64xf32>
    %c2_386 = arith.constant 2 : index
    %c0_387 = arith.constant 0 : index
    %c0_388 = arith.constant 0 : index
    %548 = vector.load %arg28[%c2_386, %c0_387, %c0_388] : memref<5x64x64xf32, #tpu.memory_space<vmem>>, vector<1x64x64xf32>
    %549 = vector.shape_cast %548 : vector<1x64x64xf32> to vector<64x64xf32>
    %cst_389 = arith.constant dense<0.000000e+00> : vector<1x64xf32>
    %550 = tpu.matmul %544, %549, %cst_389 {dimension_numbers = #tpu.dot_dimension_numbers<[1], [0], [0], [1], [0, 0, 1, 1], [], []>} : vector<1x64xf32>, vector<64x64xf32>, vector<1x64xf32> -> vector<1x64xf32>
    %551 = arith.subf %547, %550 : vector<1x64xf32>
    %552 = vector.extract_strided_slice %524 {offsets = [3, 0], sizes = [1, 64], strides = [1, 1]} : vector<10x64xf32> to vector<1x64xf32>
    %553 = vector.extract_strided_slice %524 {offsets = [8, 0], sizes = [1, 64], strides = [1, 1]} : vector<10x64xf32> to vector<1x64xf32>
    %c3_390 = arith.constant 3 : index
    %c0_391 = arith.constant 0 : index
    %c0_392 = arith.constant 0 : index
    %554 = vector.load %arg27[%c3_390, %c0_391, %c0_392] : memref<5x64x64xf32, #tpu.memory_space<vmem>>, vector<1x64x64xf32>
    %555 = vector.shape_cast %554 : vector<1x64x64xf32> to vector<64x64xf32>
    %cst_393 = arith.constant dense<0.000000e+00> : vector<1x64xf32>
    %556 = tpu.matmul %552, %555, %cst_393 {dimension_numbers = #tpu.dot_dimension_numbers<[1], [0], [0], [1], [0, 0, 1, 1], [], []>} : vector<1x64xf32>, vector<64x64xf32>, vector<1x64xf32> -> vector<1x64xf32>
    %c3_394 = arith.constant 3 : index
    %c0_395 = arith.constant 0 : index
    %c0_396 = arith.constant 0 : index
    %557 = vector.load %arg28[%c3_394, %c0_395, %c0_396] : memref<5x64x64xf32, #tpu.memory_space<vmem>>, vector<1x64x64xf32>
    %558 = vector.shape_cast %557 : vector<1x64x64xf32> to vector<64x64xf32>
    %cst_397 = arith.constant dense<0.000000e+00> : vector<1x64xf32>
    %559 = tpu.matmul %553, %558, %cst_397 {dimension_numbers = #tpu.dot_dimension_numbers<[1], [0], [0], [1], [0, 0, 1, 1], [], []>} : vector<1x64xf32>, vector<64x64xf32>, vector<1x64xf32> -> vector<1x64xf32>
    %560 = arith.subf %556, %559 : vector<1x64xf32>
    %561 = vector.extract_strided_slice %524 {offsets = [4, 0], sizes = [1, 64], strides = [1, 1]} : vector<10x64xf32> to vector<1x64xf32>
    %562 = vector.extract_strided_slice %524 {offsets = [9, 0], sizes = [1, 64], strides = [1, 1]} : vector<10x64xf32> to vector<1x64xf32>
    %c4_398 = arith.constant 4 : index
    %c0_399 = arith.constant 0 : index
    %c0_400 = arith.constant 0 : index
    %563 = vector.load %arg27[%c4_398, %c0_399, %c0_400] : memref<5x64x64xf32, #tpu.memory_space<vmem>>, vector<1x64x64xf32>
    %564 = vector.shape_cast %563 : vector<1x64x64xf32> to vector<64x64xf32>
    %cst_401 = arith.constant dense<0.000000e+00> : vector<1x64xf32>
    %565 = tpu.matmul %561, %564, %cst_401 {dimension_numbers = #tpu.dot_dimension_numbers<[1], [0], [0], [1], [0, 0, 1, 1], [], []>} : vector<1x64xf32>, vector<64x64xf32>, vector<1x64xf32> -> vector<1x64xf32>
    %c4_402 = arith.constant 4 : index
    %c0_403 = arith.constant 0 : index
    %c0_404 = arith.constant 0 : index
    %566 = vector.load %arg28[%c4_402, %c0_403, %c0_404] : memref<5x64x64xf32, #tpu.memory_space<vmem>>, vector<1x64x64xf32>
    %567 = vector.shape_cast %566 : vector<1x64x64xf32> to vector<64x64xf32>
    %cst_405 = arith.constant dense<0.000000e+00> : vector<1x64xf32>
    %568 = tpu.matmul %562, %567, %cst_405 {dimension_numbers = #tpu.dot_dimension_numbers<[1], [0], [0], [1], [0, 0, 1, 1], [], []>} : vector<1x64xf32>, vector<64x64xf32>, vector<1x64xf32> -> vector<1x64xf32>
    %569 = arith.subf %565, %568 : vector<1x64xf32>
    %570 = vector.extract_strided_slice %524 {offsets = [0, 0], sizes = [1, 64], strides = [1, 1]} : vector<10x64xf32> to vector<1x64xf32>
    %571 = vector.extract_strided_slice %524 {offsets = [5, 0], sizes = [1, 64], strides = [1, 1]} : vector<10x64xf32> to vector<1x64xf32>
    %c0_406 = arith.constant 0 : index
    %c0_407 = arith.constant 0 : index
    %c0_408 = arith.constant 0 : index
    %572 = vector.load %arg28[%c0_406, %c0_407, %c0_408] : memref<5x64x64xf32, #tpu.memory_space<vmem>>, vector<1x64x64xf32>
    %573 = vector.shape_cast %572 : vector<1x64x64xf32> to vector<64x64xf32>
    %cst_409 = arith.constant dense<0.000000e+00> : vector<1x64xf32>
    %574 = tpu.matmul %570, %573, %cst_409 {dimension_numbers = #tpu.dot_dimension_numbers<[1], [0], [0], [1], [0, 0, 1, 1], [], []>} : vector<1x64xf32>, vector<64x64xf32>, vector<1x64xf32> -> vector<1x64xf32>
    %c0_410 = arith.constant 0 : index
    %c0_411 = arith.constant 0 : index
    %c0_412 = arith.constant 0 : index
    %575 = vector.load %arg27[%c0_410, %c0_411, %c0_412] : memref<5x64x64xf32, #tpu.memory_space<vmem>>, vector<1x64x64xf32>
    %576 = vector.shape_cast %575 : vector<1x64x64xf32> to vector<64x64xf32>
    %cst_413 = arith.constant dense<0.000000e+00> : vector<1x64xf32>
    %577 = tpu.matmul %571, %576, %cst_413 {dimension_numbers = #tpu.dot_dimension_numbers<[1], [0], [0], [1], [0, 0, 1, 1], [], []>} : vector<1x64xf32>, vector<64x64xf32>, vector<1x64xf32> -> vector<1x64xf32>
    %578 = arith.addf %574, %577 : vector<1x64xf32>
    %579 = vector.extract_strided_slice %524 {offsets = [1, 0], sizes = [1, 64], strides = [1, 1]} : vector<10x64xf32> to vector<1x64xf32>
    %580 = vector.extract_strided_slice %524 {offsets = [6, 0], sizes = [1, 64], strides = [1, 1]} : vector<10x64xf32> to vector<1x64xf32>
    %c1_414 = arith.constant 1 : index
    %c0_415 = arith.constant 0 : index
    %c0_416 = arith.constant 0 : index
    %581 = vector.load %arg28[%c1_414, %c0_415, %c0_416] : memref<5x64x64xf32, #tpu.memory_space<vmem>>, vector<1x64x64xf32>
    %582 = vector.shape_cast %581 : vector<1x64x64xf32> to vector<64x64xf32>
    %cst_417 = arith.constant dense<0.000000e+00> : vector<1x64xf32>
    %583 = tpu.matmul %579, %582, %cst_417 {dimension_numbers = #tpu.dot_dimension_numbers<[1], [0], [0], [1], [0, 0, 1, 1], [], []>} : vector<1x64xf32>, vector<64x64xf32>, vector<1x64xf32> -> vector<1x64xf32>
    %c1_418 = arith.constant 1 : index
    %c0_419 = arith.constant 0 : index
    %c0_420 = arith.constant 0 : index
    %584 = vector.load %arg27[%c1_418, %c0_419, %c0_420] : memref<5x64x64xf32, #tpu.memory_space<vmem>>, vector<1x64x64xf32>
    %585 = vector.shape_cast %584 : vector<1x64x64xf32> to vector<64x64xf32>
    %cst_421 = arith.constant dense<0.000000e+00> : vector<1x64xf32>
    %586 = tpu.matmul %580, %585, %cst_421 {dimension_numbers = #tpu.dot_dimension_numbers<[1], [0], [0], [1], [0, 0, 1, 1], [], []>} : vector<1x64xf32>, vector<64x64xf32>, vector<1x64xf32> -> vector<1x64xf32>
    %587 = arith.addf %583, %586 : vector<1x64xf32>
    %588 = vector.extract_strided_slice %524 {offsets = [2, 0], sizes = [1, 64], strides = [1, 1]} : vector<10x64xf32> to vector<1x64xf32>
    %589 = vector.extract_strided_slice %524 {offsets = [7, 0], sizes = [1, 64], strides = [1, 1]} : vector<10x64xf32> to vector<1x64xf32>
    %c2_422 = arith.constant 2 : index
    %c0_423 = arith.constant 0 : index
    %c0_424 = arith.constant 0 : index
    %590 = vector.load %arg28[%c2_422, %c0_423, %c0_424] : memref<5x64x64xf32, #tpu.memory_space<vmem>>, vector<1x64x64xf32>
    %591 = vector.shape_cast %590 : vector<1x64x64xf32> to vector<64x64xf32>
    %cst_425 = arith.constant dense<0.000000e+00> : vector<1x64xf32>
    %592 = tpu.matmul %588, %591, %cst_425 {dimension_numbers = #tpu.dot_dimension_numbers<[1], [0], [0], [1], [0, 0, 1, 1], [], []>} : vector<1x64xf32>, vector<64x64xf32>, vector<1x64xf32> -> vector<1x64xf32>
    %c2_426 = arith.constant 2 : index
    %c0_427 = arith.constant 0 : index
    %c0_428 = arith.constant 0 : index
    %593 = vector.load %arg27[%c2_426, %c0_427, %c0_428] : memref<5x64x64xf32, #tpu.memory_space<vmem>>, vector<1x64x64xf32>
    %594 = vector.shape_cast %593 : vector<1x64x64xf32> to vector<64x64xf32>
    %cst_429 = arith.constant dense<0.000000e+00> : vector<1x64xf32>
    %595 = tpu.matmul %589, %594, %cst_429 {dimension_numbers = #tpu.dot_dimension_numbers<[1], [0], [0], [1], [0, 0, 1, 1], [], []>} : vector<1x64xf32>, vector<64x64xf32>, vector<1x64xf32> -> vector<1x64xf32>
    %596 = arith.addf %592, %595 : vector<1x64xf32>
    %597 = vector.extract_strided_slice %524 {offsets = [3, 0], sizes = [1, 64], strides = [1, 1]} : vector<10x64xf32> to vector<1x64xf32>
    %598 = vector.extract_strided_slice %524 {offsets = [8, 0], sizes = [1, 64], strides = [1, 1]} : vector<10x64xf32> to vector<1x64xf32>
    %c3_430 = arith.constant 3 : index
    %c0_431 = arith.constant 0 : index
    %c0_432 = arith.constant 0 : index
    %599 = vector.load %arg28[%c3_430, %c0_431, %c0_432] : memref<5x64x64xf32, #tpu.memory_space<vmem>>, vector<1x64x64xf32>
    %600 = vector.shape_cast %599 : vector<1x64x64xf32> to vector<64x64xf32>
    %cst_433 = arith.constant dense<0.000000e+00> : vector<1x64xf32>
    %601 = tpu.matmul %597, %600, %cst_433 {dimension_numbers = #tpu.dot_dimension_numbers<[1], [0], [0], [1], [0, 0, 1, 1], [], []>} : vector<1x64xf32>, vector<64x64xf32>, vector<1x64xf32> -> vector<1x64xf32>
    %c3_434 = arith.constant 3 : index
    %c0_435 = arith.constant 0 : index
    %c0_436 = arith.constant 0 : index
    %602 = vector.load %arg27[%c3_434, %c0_435, %c0_436] : memref<5x64x64xf32, #tpu.memory_space<vmem>>, vector<1x64x64xf32>
    %603 = vector.shape_cast %602 : vector<1x64x64xf32> to vector<64x64xf32>
    %cst_437 = arith.constant dense<0.000000e+00> : vector<1x64xf32>
    %604 = tpu.matmul %598, %603, %cst_437 {dimension_numbers = #tpu.dot_dimension_numbers<[1], [0], [0], [1], [0, 0, 1, 1], [], []>} : vector<1x64xf32>, vector<64x64xf32>, vector<1x64xf32> -> vector<1x64xf32>
    %605 = arith.addf %601, %604 : vector<1x64xf32>
    %606 = vector.extract_strided_slice %524 {offsets = [4, 0], sizes = [1, 64], strides = [1, 1]} : vector<10x64xf32> to vector<1x64xf32>
    %607 = vector.extract_strided_slice %524 {offsets = [9, 0], sizes = [1, 64], strides = [1, 1]} : vector<10x64xf32> to vector<1x64xf32>
    %c4_438 = arith.constant 4 : index
    %c0_439 = arith.constant 0 : index
    %c0_440 = arith.constant 0 : index
    %608 = vector.load %arg28[%c4_438, %c0_439, %c0_440] : memref<5x64x64xf32, #tpu.memory_space<vmem>>, vector<1x64x64xf32>
    %609 = vector.shape_cast %608 : vector<1x64x64xf32> to vector<64x64xf32>
    %cst_441 = arith.constant dense<0.000000e+00> : vector<1x64xf32>
    %610 = tpu.matmul %606, %609, %cst_441 {dimension_numbers = #tpu.dot_dimension_numbers<[1], [0], [0], [1], [0, 0, 1, 1], [], []>} : vector<1x64xf32>, vector<64x64xf32>, vector<1x64xf32> -> vector<1x64xf32>
    %c4_442 = arith.constant 4 : index
    %c0_443 = arith.constant 0 : index
    %c0_444 = arith.constant 0 : index
    %611 = vector.load %arg27[%c4_442, %c0_443, %c0_444] : memref<5x64x64xf32, #tpu.memory_space<vmem>>, vector<1x64x64xf32>
    %612 = vector.shape_cast %611 : vector<1x64x64xf32> to vector<64x64xf32>
    %cst_445 = arith.constant dense<0.000000e+00> : vector<1x64xf32>
    %613 = tpu.matmul %607, %612, %cst_445 {dimension_numbers = #tpu.dot_dimension_numbers<[1], [0], [0], [1], [0, 0, 1, 1], [], []>} : vector<1x64xf32>, vector<64x64xf32>, vector<1x64xf32> -> vector<1x64xf32>
    %614 = arith.addf %610, %613 : vector<1x64xf32>
    %615 = tpu.concatenate %533, %542, %551, %560, %569, %578, %587, %596, %605, %614 in 0 : vector<1x64xf32>, vector<1x64xf32>, vector<1x64xf32>, vector<1x64xf32>, vector<1x64xf32>, vector<1x64xf32>, vector<1x64xf32>, vector<1x64xf32>, vector<1x64xf32>, vector<1x64xf32> -> vector<10x64xf32>
    %c0_446 = arith.constant 0 : index
    %c0_447 = arith.constant 0 : index
    %616 = vector.load %arg25[%c0_446, %c0_447] : memref<10x10xf32, #tpu.memory_space<vmem>>, vector<10x10xf32>
    %cst_448 = arith.constant dense<0.000000e+00> : vector<10x64xf32>
    %617 = tpu.matmul %616, %615, %cst_448 {dimension_numbers = #tpu.dot_dimension_numbers<[1], [0], [0], [1], [0, 0, 1, 1], [], []>} : vector<10x10xf32>, vector<10x64xf32>, vector<10x64xf32> -> vector<10x64xf32>
    %c0_449 = arith.constant 0 : index
    %c0_450 = arith.constant 0 : index
    %618 = vector.load %arg26[%c0_449, %c0_450] : memref<10x10xf32, #tpu.memory_space<vmem>>, vector<10x10xf32>
    %c0_451 = arith.constant 0 : index
    %c0_452 = arith.constant 0 : index
    %619 = vector.load %arg29[%c0_451, %c0_452] : memref<64x64xf32, #tpu.memory_space<vmem>>, vector<64x64xf32>
    %cst_453 = arith.constant dense<0.000000e+00> : vector<10x64xf32>
    %620 = tpu.matmul %522, %619, %cst_453 {dimension_numbers = #tpu.dot_dimension_numbers<[1], [0], [0], [1], [0, 0, 1, 1], [], []>} : vector<10x64xf32>, vector<64x64xf32>, vector<10x64xf32> -> vector<10x64xf32>
    %cst_454 = arith.constant dense<0.000000e+00> : vector<10x64xf32>
    %621 = tpu.matmul %618, %620, %cst_454 {dimension_numbers = #tpu.dot_dimension_numbers<[1], [0], [0], [1], [0, 0, 1, 1], [], []>} : vector<10x10xf32>, vector<10x64xf32>, vector<10x64xf32> -> vector<10x64xf32>
    %622 = arith.addf %617, %621 : vector<10x64xf32>
    %c0_455 = arith.constant 0 : index
    %c0_456 = arith.constant 0 : index
    %623 = vector.load %arg30[%c0_455, %c0_456] : memref<1x64xf32, #tpu.memory_space<vmem>>, vector<1x64xf32>
    %624 = vector.broadcast %623 : vector<1x64xf32> to vector<10x64xf32>
    %625 = arith.addf %622, %624 : vector<10x64xf32>
    %cst_457 = arith.constant 5.000000e-01 : f32
    %626 = vector.broadcast %cst_457 : f32 to vector<10x64xf32>
    %627 = arith.mulf %626, %625 : vector<10x64xf32>
    %cst_458 = arith.constant 0.707106769 : f32
    %628 = vector.broadcast %cst_458 : f32 to vector<10x64xf32>
    %629 = arith.mulf %625, %628 : vector<10x64xf32>
    %cst_459 = arith.constant 0.000000e+00 : f32
    %630 = vector.broadcast %cst_459 : f32 to vector<10x64xf32>
    %631 = arith.cmpf oge, %629, %630 : vector<10x64xf32>
    %cst_460 = arith.constant 1.000000e+00 : f32
    %cst_461 = arith.constant -1.000000e+00 : f32
    %632 = vector.broadcast %cst_460 : f32 to vector<10x64xf32>
    %633 = vector.broadcast %cst_461 : f32 to vector<10x64xf32>
    %634 = arith.select %631, %632, %633 : vector<10x64xi1>, vector<10x64xf32>
    %635 = math.absf %629 : vector<10x64xf32>
    %cst_462 = arith.constant 0.327591091 : f32
    %636 = vector.broadcast %cst_462 : f32 to vector<10x64xf32>
    %637 = arith.mulf %636, %635 : vector<10x64xf32>
    %cst_463 = arith.constant 1.000000e+00 : f32
    %638 = vector.broadcast %cst_463 : f32 to vector<10x64xf32>
    %639 = arith.addf %638, %637 : vector<10x64xf32>
    %cst_464 = arith.constant 1.000000e+00 : f32
    %640 = vector.broadcast %cst_464 : f32 to vector<10x64xf32>
    %641 = arith.divf %640, %639 : vector<10x64xf32>
    %cst_465 = arith.constant 1.06140542 : f32
    %642 = vector.broadcast %cst_465 : f32 to vector<10x64xf32>
    %643 = arith.mulf %642, %641 : vector<10x64xf32>
    %cst_466 = arith.constant -1.45315206 : f32
    %644 = vector.broadcast %cst_466 : f32 to vector<10x64xf32>
    %645 = arith.addf %643, %644 : vector<10x64xf32>
    %646 = arith.mulf %645, %641 : vector<10x64xf32>
    %cst_467 = arith.constant 1.42141378 : f32
    %647 = vector.broadcast %cst_467 : f32 to vector<10x64xf32>
    %648 = arith.addf %646, %647 : vector<10x64xf32>
    %649 = arith.mulf %648, %641 : vector<10x64xf32>
    %cst_468 = arith.constant -0.284496725 : f32
    %650 = vector.broadcast %cst_468 : f32 to vector<10x64xf32>
    %651 = arith.addf %649, %650 : vector<10x64xf32>
    %652 = arith.mulf %651, %641 : vector<10x64xf32>
    %cst_469 = arith.constant 0.254829586 : f32
    %653 = vector.broadcast %cst_469 : f32 to vector<10x64xf32>
    %654 = arith.addf %652, %653 : vector<10x64xf32>
    %655 = arith.mulf %654, %641 : vector<10x64xf32>
    %cst_470 = arith.constant 0.000000e+00 : f32
    %656 = vector.broadcast %cst_470 : f32 to vector<10x64xf32>
    %657 = arith.subf %656, %635 : vector<10x64xf32>
    %658 = arith.mulf %657, %635 : vector<10x64xf32>
    %659 = math.exp %658 : vector<10x64xf32>
    %660 = arith.mulf %655, %659 : vector<10x64xf32>
    %cst_471 = arith.constant 1.000000e+00 : f32
    %661 = vector.broadcast %cst_471 : f32 to vector<10x64xf32>
    %662 = arith.subf %661, %660 : vector<10x64xf32>
    %663 = arith.mulf %634, %662 : vector<10x64xf32>
    %cst_472 = arith.constant 1.000000e+00 : f32
    %664 = vector.broadcast %cst_472 : f32 to vector<10x64xf32>
    %665 = arith.addf %664, %663 : vector<10x64xf32>
    %666 = arith.mulf %627, %665 : vector<10x64xf32>
    %c0_473 = arith.constant 0 : index
    %c0_474 = arith.constant 0 : index
    %667 = vector.load %arg31[%c0_473, %c0_474] : memref<10x10xf32, #tpu.memory_space<vmem>>, vector<10x10xf32>
    %cst_475 = arith.constant dense<0.000000e+00> : vector<10x64xf32>
    %668 = tpu.matmul %667, %666, %cst_475 {dimension_numbers = #tpu.dot_dimension_numbers<[1], [0], [0], [1], [0, 0, 1, 1], [], []>} : vector<10x10xf32>, vector<10x64xf32>, vector<10x64xf32> -> vector<10x64xf32>
    %669 = vector.extract_strided_slice %668 {offsets = [0, 0], sizes = [1, 64], strides = [1, 1]} : vector<10x64xf32> to vector<1x64xf32>
    %670 = vector.extract_strided_slice %668 {offsets = [5, 0], sizes = [1, 64], strides = [1, 1]} : vector<10x64xf32> to vector<1x64xf32>
    %c0_476 = arith.constant 0 : index
    %c0_477 = arith.constant 0 : index
    %c0_478 = arith.constant 0 : index
    %671 = vector.load %arg34[%c0_476, %c0_477, %c0_478] : memref<5x64x32xf32, #tpu.memory_space<vmem>>, vector<1x64x32xf32>
    %672 = vector.shape_cast %671 : vector<1x64x32xf32> to vector<64x32xf32>
    %cst_479 = arith.constant dense<0.000000e+00> : vector<1x32xf32>
    %673 = tpu.matmul %669, %672, %cst_479 {dimension_numbers = #tpu.dot_dimension_numbers<[1], [0], [0], [1], [0, 0, 1, 1], [], []>} : vector<1x64xf32>, vector<64x32xf32>, vector<1x32xf32> -> vector<1x32xf32>
    %c0_480 = arith.constant 0 : index
    %c0_481 = arith.constant 0 : index
    %c0_482 = arith.constant 0 : index
    %674 = vector.load %arg35[%c0_480, %c0_481, %c0_482] : memref<5x64x32xf32, #tpu.memory_space<vmem>>, vector<1x64x32xf32>
    %675 = vector.shape_cast %674 : vector<1x64x32xf32> to vector<64x32xf32>
    %cst_483 = arith.constant dense<0.000000e+00> : vector<1x32xf32>
    %676 = tpu.matmul %670, %675, %cst_483 {dimension_numbers = #tpu.dot_dimension_numbers<[1], [0], [0], [1], [0, 0, 1, 1], [], []>} : vector<1x64xf32>, vector<64x32xf32>, vector<1x32xf32> -> vector<1x32xf32>
    %677 = arith.subf %673, %676 : vector<1x32xf32>
    %678 = vector.extract_strided_slice %668 {offsets = [1, 0], sizes = [1, 64], strides = [1, 1]} : vector<10x64xf32> to vector<1x64xf32>
    %679 = vector.extract_strided_slice %668 {offsets = [6, 0], sizes = [1, 64], strides = [1, 1]} : vector<10x64xf32> to vector<1x64xf32>
    %c1_484 = arith.constant 1 : index
    %c0_485 = arith.constant 0 : index
    %c0_486 = arith.constant 0 : index
    %680 = vector.load %arg34[%c1_484, %c0_485, %c0_486] : memref<5x64x32xf32, #tpu.memory_space<vmem>>, vector<1x64x32xf32>
    %681 = vector.shape_cast %680 : vector<1x64x32xf32> to vector<64x32xf32>
    %cst_487 = arith.constant dense<0.000000e+00> : vector<1x32xf32>
    %682 = tpu.matmul %678, %681, %cst_487 {dimension_numbers = #tpu.dot_dimension_numbers<[1], [0], [0], [1], [0, 0, 1, 1], [], []>} : vector<1x64xf32>, vector<64x32xf32>, vector<1x32xf32> -> vector<1x32xf32>
    %c1_488 = arith.constant 1 : index
    %c0_489 = arith.constant 0 : index
    %c0_490 = arith.constant 0 : index
    %683 = vector.load %arg35[%c1_488, %c0_489, %c0_490] : memref<5x64x32xf32, #tpu.memory_space<vmem>>, vector<1x64x32xf32>
    %684 = vector.shape_cast %683 : vector<1x64x32xf32> to vector<64x32xf32>
    %cst_491 = arith.constant dense<0.000000e+00> : vector<1x32xf32>
    %685 = tpu.matmul %679, %684, %cst_491 {dimension_numbers = #tpu.dot_dimension_numbers<[1], [0], [0], [1], [0, 0, 1, 1], [], []>} : vector<1x64xf32>, vector<64x32xf32>, vector<1x32xf32> -> vector<1x32xf32>
    %686 = arith.subf %682, %685 : vector<1x32xf32>
    %687 = vector.extract_strided_slice %668 {offsets = [2, 0], sizes = [1, 64], strides = [1, 1]} : vector<10x64xf32> to vector<1x64xf32>
    %688 = vector.extract_strided_slice %668 {offsets = [7, 0], sizes = [1, 64], strides = [1, 1]} : vector<10x64xf32> to vector<1x64xf32>
    %c2_492 = arith.constant 2 : index
    %c0_493 = arith.constant 0 : index
    %c0_494 = arith.constant 0 : index
    %689 = vector.load %arg34[%c2_492, %c0_493, %c0_494] : memref<5x64x32xf32, #tpu.memory_space<vmem>>, vector<1x64x32xf32>
    %690 = vector.shape_cast %689 : vector<1x64x32xf32> to vector<64x32xf32>
    %cst_495 = arith.constant dense<0.000000e+00> : vector<1x32xf32>
    %691 = tpu.matmul %687, %690, %cst_495 {dimension_numbers = #tpu.dot_dimension_numbers<[1], [0], [0], [1], [0, 0, 1, 1], [], []>} : vector<1x64xf32>, vector<64x32xf32>, vector<1x32xf32> -> vector<1x32xf32>
    %c2_496 = arith.constant 2 : index
    %c0_497 = arith.constant 0 : index
    %c0_498 = arith.constant 0 : index
    %692 = vector.load %arg35[%c2_496, %c0_497, %c0_498] : memref<5x64x32xf32, #tpu.memory_space<vmem>>, vector<1x64x32xf32>
    %693 = vector.shape_cast %692 : vector<1x64x32xf32> to vector<64x32xf32>
    %cst_499 = arith.constant dense<0.000000e+00> : vector<1x32xf32>
    %694 = tpu.matmul %688, %693, %cst_499 {dimension_numbers = #tpu.dot_dimension_numbers<[1], [0], [0], [1], [0, 0, 1, 1], [], []>} : vector<1x64xf32>, vector<64x32xf32>, vector<1x32xf32> -> vector<1x32xf32>
    %695 = arith.subf %691, %694 : vector<1x32xf32>
    %696 = vector.extract_strided_slice %668 {offsets = [3, 0], sizes = [1, 64], strides = [1, 1]} : vector<10x64xf32> to vector<1x64xf32>
    %697 = vector.extract_strided_slice %668 {offsets = [8, 0], sizes = [1, 64], strides = [1, 1]} : vector<10x64xf32> to vector<1x64xf32>
    %c3_500 = arith.constant 3 : index
    %c0_501 = arith.constant 0 : index
    %c0_502 = arith.constant 0 : index
    %698 = vector.load %arg34[%c3_500, %c0_501, %c0_502] : memref<5x64x32xf32, #tpu.memory_space<vmem>>, vector<1x64x32xf32>
    %699 = vector.shape_cast %698 : vector<1x64x32xf32> to vector<64x32xf32>
    %cst_503 = arith.constant dense<0.000000e+00> : vector<1x32xf32>
    %700 = tpu.matmul %696, %699, %cst_503 {dimension_numbers = #tpu.dot_dimension_numbers<[1], [0], [0], [1], [0, 0, 1, 1], [], []>} : vector<1x64xf32>, vector<64x32xf32>, vector<1x32xf32> -> vector<1x32xf32>
    %c3_504 = arith.constant 3 : index
    %c0_505 = arith.constant 0 : index
    %c0_506 = arith.constant 0 : index
    %701 = vector.load %arg35[%c3_504, %c0_505, %c0_506] : memref<5x64x32xf32, #tpu.memory_space<vmem>>, vector<1x64x32xf32>
    %702 = vector.shape_cast %701 : vector<1x64x32xf32> to vector<64x32xf32>
    %cst_507 = arith.constant dense<0.000000e+00> : vector<1x32xf32>
    %703 = tpu.matmul %697, %702, %cst_507 {dimension_numbers = #tpu.dot_dimension_numbers<[1], [0], [0], [1], [0, 0, 1, 1], [], []>} : vector<1x64xf32>, vector<64x32xf32>, vector<1x32xf32> -> vector<1x32xf32>
    %704 = arith.subf %700, %703 : vector<1x32xf32>
    %705 = vector.extract_strided_slice %668 {offsets = [4, 0], sizes = [1, 64], strides = [1, 1]} : vector<10x64xf32> to vector<1x64xf32>
    %706 = vector.extract_strided_slice %668 {offsets = [9, 0], sizes = [1, 64], strides = [1, 1]} : vector<10x64xf32> to vector<1x64xf32>
    %c4_508 = arith.constant 4 : index
    %c0_509 = arith.constant 0 : index
    %c0_510 = arith.constant 0 : index
    %707 = vector.load %arg34[%c4_508, %c0_509, %c0_510] : memref<5x64x32xf32, #tpu.memory_space<vmem>>, vector<1x64x32xf32>
    %708 = vector.shape_cast %707 : vector<1x64x32xf32> to vector<64x32xf32>
    %cst_511 = arith.constant dense<0.000000e+00> : vector<1x32xf32>
    %709 = tpu.matmul %705, %708, %cst_511 {dimension_numbers = #tpu.dot_dimension_numbers<[1], [0], [0], [1], [0, 0, 1, 1], [], []>} : vector<1x64xf32>, vector<64x32xf32>, vector<1x32xf32> -> vector<1x32xf32>
    %c4_512 = arith.constant 4 : index
    %c0_513 = arith.constant 0 : index
    %c0_514 = arith.constant 0 : index
    %710 = vector.load %arg35[%c4_512, %c0_513, %c0_514] : memref<5x64x32xf32, #tpu.memory_space<vmem>>, vector<1x64x32xf32>
    %711 = vector.shape_cast %710 : vector<1x64x32xf32> to vector<64x32xf32>
    %cst_515 = arith.constant dense<0.000000e+00> : vector<1x32xf32>
    %712 = tpu.matmul %706, %711, %cst_515 {dimension_numbers = #tpu.dot_dimension_numbers<[1], [0], [0], [1], [0, 0, 1, 1], [], []>} : vector<1x64xf32>, vector<64x32xf32>, vector<1x32xf32> -> vector<1x32xf32>
    %713 = arith.subf %709, %712 : vector<1x32xf32>
    %714 = vector.extract_strided_slice %668 {offsets = [0, 0], sizes = [1, 64], strides = [1, 1]} : vector<10x64xf32> to vector<1x64xf32>
    %715 = vector.extract_strided_slice %668 {offsets = [5, 0], sizes = [1, 64], strides = [1, 1]} : vector<10x64xf32> to vector<1x64xf32>
    %c0_516 = arith.constant 0 : index
    %c0_517 = arith.constant 0 : index
    %c0_518 = arith.constant 0 : index
    %716 = vector.load %arg35[%c0_516, %c0_517, %c0_518] : memref<5x64x32xf32, #tpu.memory_space<vmem>>, vector<1x64x32xf32>
    %717 = vector.shape_cast %716 : vector<1x64x32xf32> to vector<64x32xf32>
    %cst_519 = arith.constant dense<0.000000e+00> : vector<1x32xf32>
    %718 = tpu.matmul %714, %717, %cst_519 {dimension_numbers = #tpu.dot_dimension_numbers<[1], [0], [0], [1], [0, 0, 1, 1], [], []>} : vector<1x64xf32>, vector<64x32xf32>, vector<1x32xf32> -> vector<1x32xf32>
    %c0_520 = arith.constant 0 : index
    %c0_521 = arith.constant 0 : index
    %c0_522 = arith.constant 0 : index
    %719 = vector.load %arg34[%c0_520, %c0_521, %c0_522] : memref<5x64x32xf32, #tpu.memory_space<vmem>>, vector<1x64x32xf32>
    %720 = vector.shape_cast %719 : vector<1x64x32xf32> to vector<64x32xf32>
    %cst_523 = arith.constant dense<0.000000e+00> : vector<1x32xf32>
    %721 = tpu.matmul %715, %720, %cst_523 {dimension_numbers = #tpu.dot_dimension_numbers<[1], [0], [0], [1], [0, 0, 1, 1], [], []>} : vector<1x64xf32>, vector<64x32xf32>, vector<1x32xf32> -> vector<1x32xf32>
    %722 = arith.addf %718, %721 : vector<1x32xf32>
    %723 = vector.extract_strided_slice %668 {offsets = [1, 0], sizes = [1, 64], strides = [1, 1]} : vector<10x64xf32> to vector<1x64xf32>
    %724 = vector.extract_strided_slice %668 {offsets = [6, 0], sizes = [1, 64], strides = [1, 1]} : vector<10x64xf32> to vector<1x64xf32>
    %c1_524 = arith.constant 1 : index
    %c0_525 = arith.constant 0 : index
    %c0_526 = arith.constant 0 : index
    %725 = vector.load %arg35[%c1_524, %c0_525, %c0_526] : memref<5x64x32xf32, #tpu.memory_space<vmem>>, vector<1x64x32xf32>
    %726 = vector.shape_cast %725 : vector<1x64x32xf32> to vector<64x32xf32>
    %cst_527 = arith.constant dense<0.000000e+00> : vector<1x32xf32>
    %727 = tpu.matmul %723, %726, %cst_527 {dimension_numbers = #tpu.dot_dimension_numbers<[1], [0], [0], [1], [0, 0, 1, 1], [], []>} : vector<1x64xf32>, vector<64x32xf32>, vector<1x32xf32> -> vector<1x32xf32>
    %c1_528 = arith.constant 1 : index
    %c0_529 = arith.constant 0 : index
    %c0_530 = arith.constant 0 : index
    %728 = vector.load %arg34[%c1_528, %c0_529, %c0_530] : memref<5x64x32xf32, #tpu.memory_space<vmem>>, vector<1x64x32xf32>
    %729 = vector.shape_cast %728 : vector<1x64x32xf32> to vector<64x32xf32>
    %cst_531 = arith.constant dense<0.000000e+00> : vector<1x32xf32>
    %730 = tpu.matmul %724, %729, %cst_531 {dimension_numbers = #tpu.dot_dimension_numbers<[1], [0], [0], [1], [0, 0, 1, 1], [], []>} : vector<1x64xf32>, vector<64x32xf32>, vector<1x32xf32> -> vector<1x32xf32>
    %731 = arith.addf %727, %730 : vector<1x32xf32>
    %732 = vector.extract_strided_slice %668 {offsets = [2, 0], sizes = [1, 64], strides = [1, 1]} : vector<10x64xf32> to vector<1x64xf32>
    %733 = vector.extract_strided_slice %668 {offsets = [7, 0], sizes = [1, 64], strides = [1, 1]} : vector<10x64xf32> to vector<1x64xf32>
    %c2_532 = arith.constant 2 : index
    %c0_533 = arith.constant 0 : index
    %c0_534 = arith.constant 0 : index
    %734 = vector.load %arg35[%c2_532, %c0_533, %c0_534] : memref<5x64x32xf32, #tpu.memory_space<vmem>>, vector<1x64x32xf32>
    %735 = vector.shape_cast %734 : vector<1x64x32xf32> to vector<64x32xf32>
    %cst_535 = arith.constant dense<0.000000e+00> : vector<1x32xf32>
    %736 = tpu.matmul %732, %735, %cst_535 {dimension_numbers = #tpu.dot_dimension_numbers<[1], [0], [0], [1], [0, 0, 1, 1], [], []>} : vector<1x64xf32>, vector<64x32xf32>, vector<1x32xf32> -> vector<1x32xf32>
    %c2_536 = arith.constant 2 : index
    %c0_537 = arith.constant 0 : index
    %c0_538 = arith.constant 0 : index
    %737 = vector.load %arg34[%c2_536, %c0_537, %c0_538] : memref<5x64x32xf32, #tpu.memory_space<vmem>>, vector<1x64x32xf32>
    %738 = vector.shape_cast %737 : vector<1x64x32xf32> to vector<64x32xf32>
    %cst_539 = arith.constant dense<0.000000e+00> : vector<1x32xf32>
    %739 = tpu.matmul %733, %738, %cst_539 {dimension_numbers = #tpu.dot_dimension_numbers<[1], [0], [0], [1], [0, 0, 1, 1], [], []>} : vector<1x64xf32>, vector<64x32xf32>, vector<1x32xf32> -> vector<1x32xf32>
    %740 = arith.addf %736, %739 : vector<1x32xf32>
    %741 = vector.extract_strided_slice %668 {offsets = [3, 0], sizes = [1, 64], strides = [1, 1]} : vector<10x64xf32> to vector<1x64xf32>
    %742 = vector.extract_strided_slice %668 {offsets = [8, 0], sizes = [1, 64], strides = [1, 1]} : vector<10x64xf32> to vector<1x64xf32>
    %c3_540 = arith.constant 3 : index
    %c0_541 = arith.constant 0 : index
    %c0_542 = arith.constant 0 : index
    %743 = vector.load %arg35[%c3_540, %c0_541, %c0_542] : memref<5x64x32xf32, #tpu.memory_space<vmem>>, vector<1x64x32xf32>
    %744 = vector.shape_cast %743 : vector<1x64x32xf32> to vector<64x32xf32>
    %cst_543 = arith.constant dense<0.000000e+00> : vector<1x32xf32>
    %745 = tpu.matmul %741, %744, %cst_543 {dimension_numbers = #tpu.dot_dimension_numbers<[1], [0], [0], [1], [0, 0, 1, 1], [], []>} : vector<1x64xf32>, vector<64x32xf32>, vector<1x32xf32> -> vector<1x32xf32>
    %c3_544 = arith.constant 3 : index
    %c0_545 = arith.constant 0 : index
    %c0_546 = arith.constant 0 : index
    %746 = vector.load %arg34[%c3_544, %c0_545, %c0_546] : memref<5x64x32xf32, #tpu.memory_space<vmem>>, vector<1x64x32xf32>
    %747 = vector.shape_cast %746 : vector<1x64x32xf32> to vector<64x32xf32>
    %cst_547 = arith.constant dense<0.000000e+00> : vector<1x32xf32>
    %748 = tpu.matmul %742, %747, %cst_547 {dimension_numbers = #tpu.dot_dimension_numbers<[1], [0], [0], [1], [0, 0, 1, 1], [], []>} : vector<1x64xf32>, vector<64x32xf32>, vector<1x32xf32> -> vector<1x32xf32>
    %749 = arith.addf %745, %748 : vector<1x32xf32>
    %750 = vector.extract_strided_slice %668 {offsets = [4, 0], sizes = [1, 64], strides = [1, 1]} : vector<10x64xf32> to vector<1x64xf32>
    %751 = vector.extract_strided_slice %668 {offsets = [9, 0], sizes = [1, 64], strides = [1, 1]} : vector<10x64xf32> to vector<1x64xf32>
    %c4_548 = arith.constant 4 : index
    %c0_549 = arith.constant 0 : index
    %c0_550 = arith.constant 0 : index
    %752 = vector.load %arg35[%c4_548, %c0_549, %c0_550] : memref<5x64x32xf32, #tpu.memory_space<vmem>>, vector<1x64x32xf32>
    %753 = vector.shape_cast %752 : vector<1x64x32xf32> to vector<64x32xf32>
    %cst_551 = arith.constant dense<0.000000e+00> : vector<1x32xf32>
    %754 = tpu.matmul %750, %753, %cst_551 {dimension_numbers = #tpu.dot_dimension_numbers<[1], [0], [0], [1], [0, 0, 1, 1], [], []>} : vector<1x64xf32>, vector<64x32xf32>, vector<1x32xf32> -> vector<1x32xf32>
    %c4_552 = arith.constant 4 : index
    %c0_553 = arith.constant 0 : index
    %c0_554 = arith.constant 0 : index
    %755 = vector.load %arg34[%c4_552, %c0_553, %c0_554] : memref<5x64x32xf32, #tpu.memory_space<vmem>>, vector<1x64x32xf32>
    %756 = vector.shape_cast %755 : vector<1x64x32xf32> to vector<64x32xf32>
    %cst_555 = arith.constant dense<0.000000e+00> : vector<1x32xf32>
    %757 = tpu.matmul %751, %756, %cst_555 {dimension_numbers = #tpu.dot_dimension_numbers<[1], [0], [0], [1], [0, 0, 1, 1], [], []>} : vector<1x64xf32>, vector<64x32xf32>, vector<1x32xf32> -> vector<1x32xf32>
    %758 = arith.addf %754, %757 : vector<1x32xf32>
    %759 = tpu.concatenate %677, %686, %695, %704, %713, %722, %731, %740, %749, %758 in 0 : vector<1x32xf32>, vector<1x32xf32>, vector<1x32xf32>, vector<1x32xf32>, vector<1x32xf32>, vector<1x32xf32>, vector<1x32xf32>, vector<1x32xf32>, vector<1x32xf32>, vector<1x32xf32> -> vector<10x32xf32>
    %c0_556 = arith.constant 0 : index
    %c0_557 = arith.constant 0 : index
    %760 = vector.load %arg32[%c0_556, %c0_557] : memref<20x10xf32, #tpu.memory_space<vmem>>, vector<20x10xf32>
    %cst_558 = arith.constant dense<0.000000e+00> : vector<20x32xf32>
    %761 = tpu.matmul %760, %759, %cst_558 {dimension_numbers = #tpu.dot_dimension_numbers<[1], [0], [0], [1], [0, 0, 1, 1], [], []>} : vector<20x10xf32>, vector<10x32xf32>, vector<20x32xf32> -> vector<20x32xf32>
    %c0_559 = arith.constant 0 : index
    %c0_560 = arith.constant 0 : index
    %762 = vector.load %arg33[%c0_559, %c0_560] : memref<20x10xf32, #tpu.memory_space<vmem>>, vector<20x10xf32>
    %c0_561 = arith.constant 0 : index
    %c0_562 = arith.constant 0 : index
    %763 = vector.load %arg36[%c0_561, %c0_562] : memref<64x32xf32, #tpu.memory_space<vmem>>, vector<64x32xf32>
    %cst_563 = arith.constant dense<0.000000e+00> : vector<10x32xf32>
    %764 = tpu.matmul %666, %763, %cst_563 {dimension_numbers = #tpu.dot_dimension_numbers<[1], [0], [0], [1], [0, 0, 1, 1], [], []>} : vector<10x64xf32>, vector<64x32xf32>, vector<10x32xf32> -> vector<10x32xf32>
    %cst_564 = arith.constant dense<0.000000e+00> : vector<20x32xf32>
    %765 = tpu.matmul %762, %764, %cst_564 {dimension_numbers = #tpu.dot_dimension_numbers<[1], [0], [0], [1], [0, 0, 1, 1], [], []>} : vector<20x10xf32>, vector<10x32xf32>, vector<20x32xf32> -> vector<20x32xf32>
    %766 = arith.addf %761, %765 : vector<20x32xf32>
    %c0_565 = arith.constant 0 : index
    %c0_566 = arith.constant 0 : index
    %767 = vector.load %arg37[%c0_565, %c0_566] : memref<1x32xf32, #tpu.memory_space<vmem>>, vector<1x32xf32>
    %768 = vector.broadcast %767 : vector<1x32xf32> to vector<20x32xf32>
    %769 = arith.addf %766, %768 : vector<20x32xf32>
    %cst_567 = arith.constant dense<0.000000e+00> : vector<32xf32>
    %770 = vector.multi_reduction <add>, %769, %cst_567 [0] : vector<20x32xf32> to vector<32xf32>
    %771 = vector.shape_cast %770 : vector<32xf32> to vector<1x32xf32>
    %cst_568 = arith.constant 2.000000e+01 : f32
    %772 = vector.broadcast %cst_568 : f32 to vector<1x32xf32>
    %773 = arith.divf %771, %772 : vector<1x32xf32>
    %774 = vector.broadcast %773 : vector<1x32xf32> to vector<20x32xf32>
    %775 = arith.subf %769, %774 : vector<20x32xf32>
    %776 = arith.mulf %775, %775 : vector<20x32xf32>
    %cst_569 = arith.constant dense<0.000000e+00> : vector<32xf32>
    %777 = vector.multi_reduction <add>, %776, %cst_569 [0] : vector<20x32xf32> to vector<32xf32>
    %778 = vector.shape_cast %777 : vector<32xf32> to vector<1x32xf32>
    %cst_570 = arith.constant 2.000000e+01 : f32
    %779 = vector.broadcast %cst_570 : f32 to vector<1x32xf32>
    %780 = arith.divf %778, %779 : vector<1x32xf32>
    %781 = vector.broadcast %773 : vector<1x32xf32> to vector<20x32xf32>
    %782 = arith.subf %769, %781 : vector<20x32xf32>
    %cst_571 = arith.constant 9.99999974E-6 : f32
    %783 = vector.broadcast %cst_571 : f32 to vector<1x32xf32>
    %784 = arith.addf %780, %783 : vector<1x32xf32>
    %785 = math.rsqrt %784 : vector<1x32xf32>
    %786 = vector.broadcast %785 : vector<1x32xf32> to vector<20x32xf32>
    %787 = arith.mulf %782, %786 : vector<20x32xf32>
    %c0_572 = arith.constant 0 : index
    %c0_573 = arith.constant 0 : index
    %788 = vector.load %arg38[%c0_572, %c0_573] : memref<1x32xf32, #tpu.memory_space<vmem>>, vector<1x32xf32>
    %789 = vector.broadcast %788 : vector<1x32xf32> to vector<20x32xf32>
    %790 = arith.mulf %787, %789 : vector<20x32xf32>
    %c0_574 = arith.constant 0 : index
    %c0_575 = arith.constant 0 : index
    %791 = vector.load %arg39[%c0_574, %c0_575] : memref<1x32xf32, #tpu.memory_space<vmem>>, vector<1x32xf32>
    %792 = vector.broadcast %791 : vector<1x32xf32> to vector<20x32xf32>
    %793 = arith.addf %790, %792 : vector<20x32xf32>
    %cst_576 = arith.constant 5.000000e-01 : f32
    %794 = vector.broadcast %cst_576 : f32 to vector<20x32xf32>
    %795 = arith.mulf %794, %793 : vector<20x32xf32>
    %cst_577 = arith.constant 0.707106769 : f32
    %796 = vector.broadcast %cst_577 : f32 to vector<20x32xf32>
    %797 = arith.mulf %793, %796 : vector<20x32xf32>
    %cst_578 = arith.constant 0.000000e+00 : f32
    %798 = vector.broadcast %cst_578 : f32 to vector<20x32xf32>
    %799 = arith.cmpf oge, %797, %798 : vector<20x32xf32>
    %cst_579 = arith.constant 1.000000e+00 : f32
    %cst_580 = arith.constant -1.000000e+00 : f32
    %800 = vector.broadcast %cst_579 : f32 to vector<20x32xf32>
    %801 = vector.broadcast %cst_580 : f32 to vector<20x32xf32>
    %802 = arith.select %799, %800, %801 : vector<20x32xi1>, vector<20x32xf32>
    %803 = math.absf %797 : vector<20x32xf32>
    %cst_581 = arith.constant 0.327591091 : f32
    %804 = vector.broadcast %cst_581 : f32 to vector<20x32xf32>
    %805 = arith.mulf %804, %803 : vector<20x32xf32>
    %cst_582 = arith.constant 1.000000e+00 : f32
    %806 = vector.broadcast %cst_582 : f32 to vector<20x32xf32>
    %807 = arith.addf %806, %805 : vector<20x32xf32>
    %cst_583 = arith.constant 1.000000e+00 : f32
    %808 = vector.broadcast %cst_583 : f32 to vector<20x32xf32>
    %809 = arith.divf %808, %807 : vector<20x32xf32>
    %cst_584 = arith.constant 1.06140542 : f32
    %810 = vector.broadcast %cst_584 : f32 to vector<20x32xf32>
    %811 = arith.mulf %810, %809 : vector<20x32xf32>
    %cst_585 = arith.constant -1.45315206 : f32
    %812 = vector.broadcast %cst_585 : f32 to vector<20x32xf32>
    %813 = arith.addf %811, %812 : vector<20x32xf32>
    %814 = arith.mulf %813, %809 : vector<20x32xf32>
    %cst_586 = arith.constant 1.42141378 : f32
    %815 = vector.broadcast %cst_586 : f32 to vector<20x32xf32>
    %816 = arith.addf %814, %815 : vector<20x32xf32>
    %817 = arith.mulf %816, %809 : vector<20x32xf32>
    %cst_587 = arith.constant -0.284496725 : f32
    %818 = vector.broadcast %cst_587 : f32 to vector<20x32xf32>
    %819 = arith.addf %817, %818 : vector<20x32xf32>
    %820 = arith.mulf %819, %809 : vector<20x32xf32>
    %cst_588 = arith.constant 0.254829586 : f32
    %821 = vector.broadcast %cst_588 : f32 to vector<20x32xf32>
    %822 = arith.addf %820, %821 : vector<20x32xf32>
    %823 = arith.mulf %822, %809 : vector<20x32xf32>
    %cst_589 = arith.constant 0.000000e+00 : f32
    %824 = vector.broadcast %cst_589 : f32 to vector<20x32xf32>
    %825 = arith.subf %824, %803 : vector<20x32xf32>
    %826 = arith.mulf %825, %803 : vector<20x32xf32>
    %827 = math.exp %826 : vector<20x32xf32>
    %828 = arith.mulf %823, %827 : vector<20x32xf32>
    %cst_590 = arith.constant 1.000000e+00 : f32
    %829 = vector.broadcast %cst_590 : f32 to vector<20x32xf32>
    %830 = arith.subf %829, %828 : vector<20x32xf32>
    %831 = arith.mulf %802, %830 : vector<20x32xf32>
    %cst_591 = arith.constant 1.000000e+00 : f32
    %832 = vector.broadcast %cst_591 : f32 to vector<20x32xf32>
    %833 = arith.addf %832, %831 : vector<20x32xf32>
    %834 = arith.mulf %795, %833 : vector<20x32xf32>
    %835 = tpu.concatenate %834, %354 in 1 : vector<20x32xf32>, vector<20x32xf32> -> vector<20x64xf32>
    %c0_592 = arith.constant 0 : index
    %c0_593 = arith.constant 0 : index
    %836 = vector.load %arg40[%c0_592, %c0_593] : memref<22x20xf32, #tpu.memory_space<vmem>>, vector<22x20xf32>
    %cst_594 = arith.constant dense<0.000000e+00> : vector<22x64xf32>
    %837 = tpu.matmul %836, %835, %cst_594 {dimension_numbers = #tpu.dot_dimension_numbers<[1], [0], [0], [1], [0, 0, 1, 1], [], []>} : vector<22x20xf32>, vector<20x64xf32>, vector<22x64xf32> -> vector<22x64xf32>
    %838 = vector.extract_strided_slice %837 {offsets = [0, 0], sizes = [1, 64], strides = [1, 1]} : vector<22x64xf32> to vector<1x64xf32>
    %839 = vector.extract_strided_slice %837 {offsets = [11, 0], sizes = [1, 64], strides = [1, 1]} : vector<22x64xf32> to vector<1x64xf32>
    %c0_595 = arith.constant 0 : index
    %c0_596 = arith.constant 0 : index
    %c0_597 = arith.constant 0 : index
    %840 = vector.load %arg43[%c0_595, %c0_596, %c0_597] : memref<11x64x16xf32, #tpu.memory_space<vmem>>, vector<1x64x16xf32>
    %841 = vector.shape_cast %840 : vector<1x64x16xf32> to vector<64x16xf32>
    %cst_598 = arith.constant dense<0.000000e+00> : vector<1x16xf32>
    %842 = tpu.matmul %838, %841, %cst_598 {dimension_numbers = #tpu.dot_dimension_numbers<[1], [0], [0], [1], [0, 0, 1, 1], [], []>} : vector<1x64xf32>, vector<64x16xf32>, vector<1x16xf32> -> vector<1x16xf32>
    %c0_599 = arith.constant 0 : index
    %c0_600 = arith.constant 0 : index
    %c0_601 = arith.constant 0 : index
    %843 = vector.load %arg44[%c0_599, %c0_600, %c0_601] : memref<11x64x16xf32, #tpu.memory_space<vmem>>, vector<1x64x16xf32>
    %844 = vector.shape_cast %843 : vector<1x64x16xf32> to vector<64x16xf32>
    %cst_602 = arith.constant dense<0.000000e+00> : vector<1x16xf32>
    %845 = tpu.matmul %839, %844, %cst_602 {dimension_numbers = #tpu.dot_dimension_numbers<[1], [0], [0], [1], [0, 0, 1, 1], [], []>} : vector<1x64xf32>, vector<64x16xf32>, vector<1x16xf32> -> vector<1x16xf32>
    %846 = arith.subf %842, %845 : vector<1x16xf32>
    %847 = vector.extract_strided_slice %837 {offsets = [1, 0], sizes = [1, 64], strides = [1, 1]} : vector<22x64xf32> to vector<1x64xf32>
    %848 = vector.extract_strided_slice %837 {offsets = [12, 0], sizes = [1, 64], strides = [1, 1]} : vector<22x64xf32> to vector<1x64xf32>
    %c1_603 = arith.constant 1 : index
    %c0_604 = arith.constant 0 : index
    %c0_605 = arith.constant 0 : index
    %849 = vector.load %arg43[%c1_603, %c0_604, %c0_605] : memref<11x64x16xf32, #tpu.memory_space<vmem>>, vector<1x64x16xf32>
    %850 = vector.shape_cast %849 : vector<1x64x16xf32> to vector<64x16xf32>
    %cst_606 = arith.constant dense<0.000000e+00> : vector<1x16xf32>
    %851 = tpu.matmul %847, %850, %cst_606 {dimension_numbers = #tpu.dot_dimension_numbers<[1], [0], [0], [1], [0, 0, 1, 1], [], []>} : vector<1x64xf32>, vector<64x16xf32>, vector<1x16xf32> -> vector<1x16xf32>
    %c1_607 = arith.constant 1 : index
    %c0_608 = arith.constant 0 : index
    %c0_609 = arith.constant 0 : index
    %852 = vector.load %arg44[%c1_607, %c0_608, %c0_609] : memref<11x64x16xf32, #tpu.memory_space<vmem>>, vector<1x64x16xf32>
    %853 = vector.shape_cast %852 : vector<1x64x16xf32> to vector<64x16xf32>
    %cst_610 = arith.constant dense<0.000000e+00> : vector<1x16xf32>
    %854 = tpu.matmul %848, %853, %cst_610 {dimension_numbers = #tpu.dot_dimension_numbers<[1], [0], [0], [1], [0, 0, 1, 1], [], []>} : vector<1x64xf32>, vector<64x16xf32>, vector<1x16xf32> -> vector<1x16xf32>
    %855 = arith.subf %851, %854 : vector<1x16xf32>
    %856 = vector.extract_strided_slice %837 {offsets = [2, 0], sizes = [1, 64], strides = [1, 1]} : vector<22x64xf32> to vector<1x64xf32>
    %857 = vector.extract_strided_slice %837 {offsets = [13, 0], sizes = [1, 64], strides = [1, 1]} : vector<22x64xf32> to vector<1x64xf32>
    %c2_611 = arith.constant 2 : index
    %c0_612 = arith.constant 0 : index
    %c0_613 = arith.constant 0 : index
    %858 = vector.load %arg43[%c2_611, %c0_612, %c0_613] : memref<11x64x16xf32, #tpu.memory_space<vmem>>, vector<1x64x16xf32>
    %859 = vector.shape_cast %858 : vector<1x64x16xf32> to vector<64x16xf32>
    %cst_614 = arith.constant dense<0.000000e+00> : vector<1x16xf32>
    %860 = tpu.matmul %856, %859, %cst_614 {dimension_numbers = #tpu.dot_dimension_numbers<[1], [0], [0], [1], [0, 0, 1, 1], [], []>} : vector<1x64xf32>, vector<64x16xf32>, vector<1x16xf32> -> vector<1x16xf32>
    %c2_615 = arith.constant 2 : index
    %c0_616 = arith.constant 0 : index
    %c0_617 = arith.constant 0 : index
    %861 = vector.load %arg44[%c2_615, %c0_616, %c0_617] : memref<11x64x16xf32, #tpu.memory_space<vmem>>, vector<1x64x16xf32>
    %862 = vector.shape_cast %861 : vector<1x64x16xf32> to vector<64x16xf32>
    %cst_618 = arith.constant dense<0.000000e+00> : vector<1x16xf32>
    %863 = tpu.matmul %857, %862, %cst_618 {dimension_numbers = #tpu.dot_dimension_numbers<[1], [0], [0], [1], [0, 0, 1, 1], [], []>} : vector<1x64xf32>, vector<64x16xf32>, vector<1x16xf32> -> vector<1x16xf32>
    %864 = arith.subf %860, %863 : vector<1x16xf32>
    %865 = vector.extract_strided_slice %837 {offsets = [3, 0], sizes = [1, 64], strides = [1, 1]} : vector<22x64xf32> to vector<1x64xf32>
    %866 = vector.extract_strided_slice %837 {offsets = [14, 0], sizes = [1, 64], strides = [1, 1]} : vector<22x64xf32> to vector<1x64xf32>
    %c3_619 = arith.constant 3 : index
    %c0_620 = arith.constant 0 : index
    %c0_621 = arith.constant 0 : index
    %867 = vector.load %arg43[%c3_619, %c0_620, %c0_621] : memref<11x64x16xf32, #tpu.memory_space<vmem>>, vector<1x64x16xf32>
    %868 = vector.shape_cast %867 : vector<1x64x16xf32> to vector<64x16xf32>
    %cst_622 = arith.constant dense<0.000000e+00> : vector<1x16xf32>
    %869 = tpu.matmul %865, %868, %cst_622 {dimension_numbers = #tpu.dot_dimension_numbers<[1], [0], [0], [1], [0, 0, 1, 1], [], []>} : vector<1x64xf32>, vector<64x16xf32>, vector<1x16xf32> -> vector<1x16xf32>
    %c3_623 = arith.constant 3 : index
    %c0_624 = arith.constant 0 : index
    %c0_625 = arith.constant 0 : index
    %870 = vector.load %arg44[%c3_623, %c0_624, %c0_625] : memref<11x64x16xf32, #tpu.memory_space<vmem>>, vector<1x64x16xf32>
    %871 = vector.shape_cast %870 : vector<1x64x16xf32> to vector<64x16xf32>
    %cst_626 = arith.constant dense<0.000000e+00> : vector<1x16xf32>
    %872 = tpu.matmul %866, %871, %cst_626 {dimension_numbers = #tpu.dot_dimension_numbers<[1], [0], [0], [1], [0, 0, 1, 1], [], []>} : vector<1x64xf32>, vector<64x16xf32>, vector<1x16xf32> -> vector<1x16xf32>
    %873 = arith.subf %869, %872 : vector<1x16xf32>
    %874 = vector.extract_strided_slice %837 {offsets = [4, 0], sizes = [1, 64], strides = [1, 1]} : vector<22x64xf32> to vector<1x64xf32>
    %875 = vector.extract_strided_slice %837 {offsets = [15, 0], sizes = [1, 64], strides = [1, 1]} : vector<22x64xf32> to vector<1x64xf32>
    %c4_627 = arith.constant 4 : index
    %c0_628 = arith.constant 0 : index
    %c0_629 = arith.constant 0 : index
    %876 = vector.load %arg43[%c4_627, %c0_628, %c0_629] : memref<11x64x16xf32, #tpu.memory_space<vmem>>, vector<1x64x16xf32>
    %877 = vector.shape_cast %876 : vector<1x64x16xf32> to vector<64x16xf32>
    %cst_630 = arith.constant dense<0.000000e+00> : vector<1x16xf32>
    %878 = tpu.matmul %874, %877, %cst_630 {dimension_numbers = #tpu.dot_dimension_numbers<[1], [0], [0], [1], [0, 0, 1, 1], [], []>} : vector<1x64xf32>, vector<64x16xf32>, vector<1x16xf32> -> vector<1x16xf32>
    %c4_631 = arith.constant 4 : index
    %c0_632 = arith.constant 0 : index
    %c0_633 = arith.constant 0 : index
    %879 = vector.load %arg44[%c4_631, %c0_632, %c0_633] : memref<11x64x16xf32, #tpu.memory_space<vmem>>, vector<1x64x16xf32>
    %880 = vector.shape_cast %879 : vector<1x64x16xf32> to vector<64x16xf32>
    %cst_634 = arith.constant dense<0.000000e+00> : vector<1x16xf32>
    %881 = tpu.matmul %875, %880, %cst_634 {dimension_numbers = #tpu.dot_dimension_numbers<[1], [0], [0], [1], [0, 0, 1, 1], [], []>} : vector<1x64xf32>, vector<64x16xf32>, vector<1x16xf32> -> vector<1x16xf32>
    %882 = arith.subf %878, %881 : vector<1x16xf32>
    %883 = vector.extract_strided_slice %837 {offsets = [5, 0], sizes = [1, 64], strides = [1, 1]} : vector<22x64xf32> to vector<1x64xf32>
    %884 = vector.extract_strided_slice %837 {offsets = [16, 0], sizes = [1, 64], strides = [1, 1]} : vector<22x64xf32> to vector<1x64xf32>
    %c5_635 = arith.constant 5 : index
    %c0_636 = arith.constant 0 : index
    %c0_637 = arith.constant 0 : index
    %885 = vector.load %arg43[%c5_635, %c0_636, %c0_637] : memref<11x64x16xf32, #tpu.memory_space<vmem>>, vector<1x64x16xf32>
    %886 = vector.shape_cast %885 : vector<1x64x16xf32> to vector<64x16xf32>
    %cst_638 = arith.constant dense<0.000000e+00> : vector<1x16xf32>
    %887 = tpu.matmul %883, %886, %cst_638 {dimension_numbers = #tpu.dot_dimension_numbers<[1], [0], [0], [1], [0, 0, 1, 1], [], []>} : vector<1x64xf32>, vector<64x16xf32>, vector<1x16xf32> -> vector<1x16xf32>
    %c5_639 = arith.constant 5 : index
    %c0_640 = arith.constant 0 : index
    %c0_641 = arith.constant 0 : index
    %888 = vector.load %arg44[%c5_639, %c0_640, %c0_641] : memref<11x64x16xf32, #tpu.memory_space<vmem>>, vector<1x64x16xf32>
    %889 = vector.shape_cast %888 : vector<1x64x16xf32> to vector<64x16xf32>
    %cst_642 = arith.constant dense<0.000000e+00> : vector<1x16xf32>
    %890 = tpu.matmul %884, %889, %cst_642 {dimension_numbers = #tpu.dot_dimension_numbers<[1], [0], [0], [1], [0, 0, 1, 1], [], []>} : vector<1x64xf32>, vector<64x16xf32>, vector<1x16xf32> -> vector<1x16xf32>
    %891 = arith.subf %887, %890 : vector<1x16xf32>
    %892 = vector.extract_strided_slice %837 {offsets = [6, 0], sizes = [1, 64], strides = [1, 1]} : vector<22x64xf32> to vector<1x64xf32>
    %893 = vector.extract_strided_slice %837 {offsets = [17, 0], sizes = [1, 64], strides = [1, 1]} : vector<22x64xf32> to vector<1x64xf32>
    %c6_643 = arith.constant 6 : index
    %c0_644 = arith.constant 0 : index
    %c0_645 = arith.constant 0 : index
    %894 = vector.load %arg43[%c6_643, %c0_644, %c0_645] : memref<11x64x16xf32, #tpu.memory_space<vmem>>, vector<1x64x16xf32>
    %895 = vector.shape_cast %894 : vector<1x64x16xf32> to vector<64x16xf32>
    %cst_646 = arith.constant dense<0.000000e+00> : vector<1x16xf32>
    %896 = tpu.matmul %892, %895, %cst_646 {dimension_numbers = #tpu.dot_dimension_numbers<[1], [0], [0], [1], [0, 0, 1, 1], [], []>} : vector<1x64xf32>, vector<64x16xf32>, vector<1x16xf32> -> vector<1x16xf32>
    %c6_647 = arith.constant 6 : index
    %c0_648 = arith.constant 0 : index
    %c0_649 = arith.constant 0 : index
    %897 = vector.load %arg44[%c6_647, %c0_648, %c0_649] : memref<11x64x16xf32, #tpu.memory_space<vmem>>, vector<1x64x16xf32>
    %898 = vector.shape_cast %897 : vector<1x64x16xf32> to vector<64x16xf32>
    %cst_650 = arith.constant dense<0.000000e+00> : vector<1x16xf32>
    %899 = tpu.matmul %893, %898, %cst_650 {dimension_numbers = #tpu.dot_dimension_numbers<[1], [0], [0], [1], [0, 0, 1, 1], [], []>} : vector<1x64xf32>, vector<64x16xf32>, vector<1x16xf32> -> vector<1x16xf32>
    %900 = arith.subf %896, %899 : vector<1x16xf32>
    %901 = vector.extract_strided_slice %837 {offsets = [7, 0], sizes = [1, 64], strides = [1, 1]} : vector<22x64xf32> to vector<1x64xf32>
    %902 = vector.extract_strided_slice %837 {offsets = [18, 0], sizes = [1, 64], strides = [1, 1]} : vector<22x64xf32> to vector<1x64xf32>
    %c7_651 = arith.constant 7 : index
    %c0_652 = arith.constant 0 : index
    %c0_653 = arith.constant 0 : index
    %903 = vector.load %arg43[%c7_651, %c0_652, %c0_653] : memref<11x64x16xf32, #tpu.memory_space<vmem>>, vector<1x64x16xf32>
    %904 = vector.shape_cast %903 : vector<1x64x16xf32> to vector<64x16xf32>
    %cst_654 = arith.constant dense<0.000000e+00> : vector<1x16xf32>
    %905 = tpu.matmul %901, %904, %cst_654 {dimension_numbers = #tpu.dot_dimension_numbers<[1], [0], [0], [1], [0, 0, 1, 1], [], []>} : vector<1x64xf32>, vector<64x16xf32>, vector<1x16xf32> -> vector<1x16xf32>
    %c7_655 = arith.constant 7 : index
    %c0_656 = arith.constant 0 : index
    %c0_657 = arith.constant 0 : index
    %906 = vector.load %arg44[%c7_655, %c0_656, %c0_657] : memref<11x64x16xf32, #tpu.memory_space<vmem>>, vector<1x64x16xf32>
    %907 = vector.shape_cast %906 : vector<1x64x16xf32> to vector<64x16xf32>
    %cst_658 = arith.constant dense<0.000000e+00> : vector<1x16xf32>
    %908 = tpu.matmul %902, %907, %cst_658 {dimension_numbers = #tpu.dot_dimension_numbers<[1], [0], [0], [1], [0, 0, 1, 1], [], []>} : vector<1x64xf32>, vector<64x16xf32>, vector<1x16xf32> -> vector<1x16xf32>
    %909 = arith.subf %905, %908 : vector<1x16xf32>
    %910 = vector.extract_strided_slice %837 {offsets = [8, 0], sizes = [1, 64], strides = [1, 1]} : vector<22x64xf32> to vector<1x64xf32>
    %911 = vector.extract_strided_slice %837 {offsets = [19, 0], sizes = [1, 64], strides = [1, 1]} : vector<22x64xf32> to vector<1x64xf32>
    %c8_659 = arith.constant 8 : index
    %c0_660 = arith.constant 0 : index
    %c0_661 = arith.constant 0 : index
    %912 = vector.load %arg43[%c8_659, %c0_660, %c0_661] : memref<11x64x16xf32, #tpu.memory_space<vmem>>, vector<1x64x16xf32>
    %913 = vector.shape_cast %912 : vector<1x64x16xf32> to vector<64x16xf32>
    %cst_662 = arith.constant dense<0.000000e+00> : vector<1x16xf32>
    %914 = tpu.matmul %910, %913, %cst_662 {dimension_numbers = #tpu.dot_dimension_numbers<[1], [0], [0], [1], [0, 0, 1, 1], [], []>} : vector<1x64xf32>, vector<64x16xf32>, vector<1x16xf32> -> vector<1x16xf32>
    %c8_663 = arith.constant 8 : index
    %c0_664 = arith.constant 0 : index
    %c0_665 = arith.constant 0 : index
    %915 = vector.load %arg44[%c8_663, %c0_664, %c0_665] : memref<11x64x16xf32, #tpu.memory_space<vmem>>, vector<1x64x16xf32>
    %916 = vector.shape_cast %915 : vector<1x64x16xf32> to vector<64x16xf32>
    %cst_666 = arith.constant dense<0.000000e+00> : vector<1x16xf32>
    %917 = tpu.matmul %911, %916, %cst_666 {dimension_numbers = #tpu.dot_dimension_numbers<[1], [0], [0], [1], [0, 0, 1, 1], [], []>} : vector<1x64xf32>, vector<64x16xf32>, vector<1x16xf32> -> vector<1x16xf32>
    %918 = arith.subf %914, %917 : vector<1x16xf32>
    %919 = vector.extract_strided_slice %837 {offsets = [9, 0], sizes = [1, 64], strides = [1, 1]} : vector<22x64xf32> to vector<1x64xf32>
    %920 = vector.extract_strided_slice %837 {offsets = [20, 0], sizes = [1, 64], strides = [1, 1]} : vector<22x64xf32> to vector<1x64xf32>
    %c9_667 = arith.constant 9 : index
    %c0_668 = arith.constant 0 : index
    %c0_669 = arith.constant 0 : index
    %921 = vector.load %arg43[%c9_667, %c0_668, %c0_669] : memref<11x64x16xf32, #tpu.memory_space<vmem>>, vector<1x64x16xf32>
    %922 = vector.shape_cast %921 : vector<1x64x16xf32> to vector<64x16xf32>
    %cst_670 = arith.constant dense<0.000000e+00> : vector<1x16xf32>
    %923 = tpu.matmul %919, %922, %cst_670 {dimension_numbers = #tpu.dot_dimension_numbers<[1], [0], [0], [1], [0, 0, 1, 1], [], []>} : vector<1x64xf32>, vector<64x16xf32>, vector<1x16xf32> -> vector<1x16xf32>
    %c9_671 = arith.constant 9 : index
    %c0_672 = arith.constant 0 : index
    %c0_673 = arith.constant 0 : index
    %924 = vector.load %arg44[%c9_671, %c0_672, %c0_673] : memref<11x64x16xf32, #tpu.memory_space<vmem>>, vector<1x64x16xf32>
    %925 = vector.shape_cast %924 : vector<1x64x16xf32> to vector<64x16xf32>
    %cst_674 = arith.constant dense<0.000000e+00> : vector<1x16xf32>
    %926 = tpu.matmul %920, %925, %cst_674 {dimension_numbers = #tpu.dot_dimension_numbers<[1], [0], [0], [1], [0, 0, 1, 1], [], []>} : vector<1x64xf32>, vector<64x16xf32>, vector<1x16xf32> -> vector<1x16xf32>
    %927 = arith.subf %923, %926 : vector<1x16xf32>
    %928 = vector.extract_strided_slice %837 {offsets = [10, 0], sizes = [1, 64], strides = [1, 1]} : vector<22x64xf32> to vector<1x64xf32>
    %929 = vector.extract_strided_slice %837 {offsets = [21, 0], sizes = [1, 64], strides = [1, 1]} : vector<22x64xf32> to vector<1x64xf32>
    %c10_675 = arith.constant 10 : index
    %c0_676 = arith.constant 0 : index
    %c0_677 = arith.constant 0 : index
    %930 = vector.load %arg43[%c10_675, %c0_676, %c0_677] : memref<11x64x16xf32, #tpu.memory_space<vmem>>, vector<1x64x16xf32>
    %931 = vector.shape_cast %930 : vector<1x64x16xf32> to vector<64x16xf32>
    %cst_678 = arith.constant dense<0.000000e+00> : vector<1x16xf32>
    %932 = tpu.matmul %928, %931, %cst_678 {dimension_numbers = #tpu.dot_dimension_numbers<[1], [0], [0], [1], [0, 0, 1, 1], [], []>} : vector<1x64xf32>, vector<64x16xf32>, vector<1x16xf32> -> vector<1x16xf32>
    %c10_679 = arith.constant 10 : index
    %c0_680 = arith.constant 0 : index
    %c0_681 = arith.constant 0 : index
    %933 = vector.load %arg44[%c10_679, %c0_680, %c0_681] : memref<11x64x16xf32, #tpu.memory_space<vmem>>, vector<1x64x16xf32>
    %934 = vector.shape_cast %933 : vector<1x64x16xf32> to vector<64x16xf32>
    %cst_682 = arith.constant dense<0.000000e+00> : vector<1x16xf32>
    %935 = tpu.matmul %929, %934, %cst_682 {dimension_numbers = #tpu.dot_dimension_numbers<[1], [0], [0], [1], [0, 0, 1, 1], [], []>} : vector<1x64xf32>, vector<64x16xf32>, vector<1x16xf32> -> vector<1x16xf32>
    %936 = arith.subf %932, %935 : vector<1x16xf32>
    %937 = vector.extract_strided_slice %837 {offsets = [0, 0], sizes = [1, 64], strides = [1, 1]} : vector<22x64xf32> to vector<1x64xf32>
    %938 = vector.extract_strided_slice %837 {offsets = [11, 0], sizes = [1, 64], strides = [1, 1]} : vector<22x64xf32> to vector<1x64xf32>
    %c0_683 = arith.constant 0 : index
    %c0_684 = arith.constant 0 : index
    %c0_685 = arith.constant 0 : index
    %939 = vector.load %arg44[%c0_683, %c0_684, %c0_685] : memref<11x64x16xf32, #tpu.memory_space<vmem>>, vector<1x64x16xf32>
    %940 = vector.shape_cast %939 : vector<1x64x16xf32> to vector<64x16xf32>
    %cst_686 = arith.constant dense<0.000000e+00> : vector<1x16xf32>
    %941 = tpu.matmul %937, %940, %cst_686 {dimension_numbers = #tpu.dot_dimension_numbers<[1], [0], [0], [1], [0, 0, 1, 1], [], []>} : vector<1x64xf32>, vector<64x16xf32>, vector<1x16xf32> -> vector<1x16xf32>
    %c0_687 = arith.constant 0 : index
    %c0_688 = arith.constant 0 : index
    %c0_689 = arith.constant 0 : index
    %942 = vector.load %arg43[%c0_687, %c0_688, %c0_689] : memref<11x64x16xf32, #tpu.memory_space<vmem>>, vector<1x64x16xf32>
    %943 = vector.shape_cast %942 : vector<1x64x16xf32> to vector<64x16xf32>
    %cst_690 = arith.constant dense<0.000000e+00> : vector<1x16xf32>
    %944 = tpu.matmul %938, %943, %cst_690 {dimension_numbers = #tpu.dot_dimension_numbers<[1], [0], [0], [1], [0, 0, 1, 1], [], []>} : vector<1x64xf32>, vector<64x16xf32>, vector<1x16xf32> -> vector<1x16xf32>
    %945 = arith.addf %941, %944 : vector<1x16xf32>
    %946 = vector.extract_strided_slice %837 {offsets = [1, 0], sizes = [1, 64], strides = [1, 1]} : vector<22x64xf32> to vector<1x64xf32>
    %947 = vector.extract_strided_slice %837 {offsets = [12, 0], sizes = [1, 64], strides = [1, 1]} : vector<22x64xf32> to vector<1x64xf32>
    %c1_691 = arith.constant 1 : index
    %c0_692 = arith.constant 0 : index
    %c0_693 = arith.constant 0 : index
    %948 = vector.load %arg44[%c1_691, %c0_692, %c0_693] : memref<11x64x16xf32, #tpu.memory_space<vmem>>, vector<1x64x16xf32>
    %949 = vector.shape_cast %948 : vector<1x64x16xf32> to vector<64x16xf32>
    %cst_694 = arith.constant dense<0.000000e+00> : vector<1x16xf32>
    %950 = tpu.matmul %946, %949, %cst_694 {dimension_numbers = #tpu.dot_dimension_numbers<[1], [0], [0], [1], [0, 0, 1, 1], [], []>} : vector<1x64xf32>, vector<64x16xf32>, vector<1x16xf32> -> vector<1x16xf32>
    %c1_695 = arith.constant 1 : index
    %c0_696 = arith.constant 0 : index
    %c0_697 = arith.constant 0 : index
    %951 = vector.load %arg43[%c1_695, %c0_696, %c0_697] : memref<11x64x16xf32, #tpu.memory_space<vmem>>, vector<1x64x16xf32>
    %952 = vector.shape_cast %951 : vector<1x64x16xf32> to vector<64x16xf32>
    %cst_698 = arith.constant dense<0.000000e+00> : vector<1x16xf32>
    %953 = tpu.matmul %947, %952, %cst_698 {dimension_numbers = #tpu.dot_dimension_numbers<[1], [0], [0], [1], [0, 0, 1, 1], [], []>} : vector<1x64xf32>, vector<64x16xf32>, vector<1x16xf32> -> vector<1x16xf32>
    %954 = arith.addf %950, %953 : vector<1x16xf32>
    %955 = vector.extract_strided_slice %837 {offsets = [2, 0], sizes = [1, 64], strides = [1, 1]} : vector<22x64xf32> to vector<1x64xf32>
    %956 = vector.extract_strided_slice %837 {offsets = [13, 0], sizes = [1, 64], strides = [1, 1]} : vector<22x64xf32> to vector<1x64xf32>
    %c2_699 = arith.constant 2 : index
    %c0_700 = arith.constant 0 : index
    %c0_701 = arith.constant 0 : index
    %957 = vector.load %arg44[%c2_699, %c0_700, %c0_701] : memref<11x64x16xf32, #tpu.memory_space<vmem>>, vector<1x64x16xf32>
    %958 = vector.shape_cast %957 : vector<1x64x16xf32> to vector<64x16xf32>
    %cst_702 = arith.constant dense<0.000000e+00> : vector<1x16xf32>
    %959 = tpu.matmul %955, %958, %cst_702 {dimension_numbers = #tpu.dot_dimension_numbers<[1], [0], [0], [1], [0, 0, 1, 1], [], []>} : vector<1x64xf32>, vector<64x16xf32>, vector<1x16xf32> -> vector<1x16xf32>
    %c2_703 = arith.constant 2 : index
    %c0_704 = arith.constant 0 : index
    %c0_705 = arith.constant 0 : index
    %960 = vector.load %arg43[%c2_703, %c0_704, %c0_705] : memref<11x64x16xf32, #tpu.memory_space<vmem>>, vector<1x64x16xf32>
    %961 = vector.shape_cast %960 : vector<1x64x16xf32> to vector<64x16xf32>
    %cst_706 = arith.constant dense<0.000000e+00> : vector<1x16xf32>
    %962 = tpu.matmul %956, %961, %cst_706 {dimension_numbers = #tpu.dot_dimension_numbers<[1], [0], [0], [1], [0, 0, 1, 1], [], []>} : vector<1x64xf32>, vector<64x16xf32>, vector<1x16xf32> -> vector<1x16xf32>
    %963 = arith.addf %959, %962 : vector<1x16xf32>
    %964 = vector.extract_strided_slice %837 {offsets = [3, 0], sizes = [1, 64], strides = [1, 1]} : vector<22x64xf32> to vector<1x64xf32>
    %965 = vector.extract_strided_slice %837 {offsets = [14, 0], sizes = [1, 64], strides = [1, 1]} : vector<22x64xf32> to vector<1x64xf32>
    %c3_707 = arith.constant 3 : index
    %c0_708 = arith.constant 0 : index
    %c0_709 = arith.constant 0 : index
    %966 = vector.load %arg44[%c3_707, %c0_708, %c0_709] : memref<11x64x16xf32, #tpu.memory_space<vmem>>, vector<1x64x16xf32>
    %967 = vector.shape_cast %966 : vector<1x64x16xf32> to vector<64x16xf32>
    %cst_710 = arith.constant dense<0.000000e+00> : vector<1x16xf32>
    %968 = tpu.matmul %964, %967, %cst_710 {dimension_numbers = #tpu.dot_dimension_numbers<[1], [0], [0], [1], [0, 0, 1, 1], [], []>} : vector<1x64xf32>, vector<64x16xf32>, vector<1x16xf32> -> vector<1x16xf32>
    %c3_711 = arith.constant 3 : index
    %c0_712 = arith.constant 0 : index
    %c0_713 = arith.constant 0 : index
    %969 = vector.load %arg43[%c3_711, %c0_712, %c0_713] : memref<11x64x16xf32, #tpu.memory_space<vmem>>, vector<1x64x16xf32>
    %970 = vector.shape_cast %969 : vector<1x64x16xf32> to vector<64x16xf32>
    %cst_714 = arith.constant dense<0.000000e+00> : vector<1x16xf32>
    %971 = tpu.matmul %965, %970, %cst_714 {dimension_numbers = #tpu.dot_dimension_numbers<[1], [0], [0], [1], [0, 0, 1, 1], [], []>} : vector<1x64xf32>, vector<64x16xf32>, vector<1x16xf32> -> vector<1x16xf32>
    %972 = arith.addf %968, %971 : vector<1x16xf32>
    %973 = vector.extract_strided_slice %837 {offsets = [4, 0], sizes = [1, 64], strides = [1, 1]} : vector<22x64xf32> to vector<1x64xf32>
    %974 = vector.extract_strided_slice %837 {offsets = [15, 0], sizes = [1, 64], strides = [1, 1]} : vector<22x64xf32> to vector<1x64xf32>
    %c4_715 = arith.constant 4 : index
    %c0_716 = arith.constant 0 : index
    %c0_717 = arith.constant 0 : index
    %975 = vector.load %arg44[%c4_715, %c0_716, %c0_717] : memref<11x64x16xf32, #tpu.memory_space<vmem>>, vector<1x64x16xf32>
    %976 = vector.shape_cast %975 : vector<1x64x16xf32> to vector<64x16xf32>
    %cst_718 = arith.constant dense<0.000000e+00> : vector<1x16xf32>
    %977 = tpu.matmul %973, %976, %cst_718 {dimension_numbers = #tpu.dot_dimension_numbers<[1], [0], [0], [1], [0, 0, 1, 1], [], []>} : vector<1x64xf32>, vector<64x16xf32>, vector<1x16xf32> -> vector<1x16xf32>
    %c4_719 = arith.constant 4 : index
    %c0_720 = arith.constant 0 : index
    %c0_721 = arith.constant 0 : index
    %978 = vector.load %arg43[%c4_719, %c0_720, %c0_721] : memref<11x64x16xf32, #tpu.memory_space<vmem>>, vector<1x64x16xf32>
    %979 = vector.shape_cast %978 : vector<1x64x16xf32> to vector<64x16xf32>
    %cst_722 = arith.constant dense<0.000000e+00> : vector<1x16xf32>
    %980 = tpu.matmul %974, %979, %cst_722 {dimension_numbers = #tpu.dot_dimension_numbers<[1], [0], [0], [1], [0, 0, 1, 1], [], []>} : vector<1x64xf32>, vector<64x16xf32>, vector<1x16xf32> -> vector<1x16xf32>
    %981 = arith.addf %977, %980 : vector<1x16xf32>
    %982 = vector.extract_strided_slice %837 {offsets = [5, 0], sizes = [1, 64], strides = [1, 1]} : vector<22x64xf32> to vector<1x64xf32>
    %983 = vector.extract_strided_slice %837 {offsets = [16, 0], sizes = [1, 64], strides = [1, 1]} : vector<22x64xf32> to vector<1x64xf32>
    %c5_723 = arith.constant 5 : index
    %c0_724 = arith.constant 0 : index
    %c0_725 = arith.constant 0 : index
    %984 = vector.load %arg44[%c5_723, %c0_724, %c0_725] : memref<11x64x16xf32, #tpu.memory_space<vmem>>, vector<1x64x16xf32>
    %985 = vector.shape_cast %984 : vector<1x64x16xf32> to vector<64x16xf32>
    %cst_726 = arith.constant dense<0.000000e+00> : vector<1x16xf32>
    %986 = tpu.matmul %982, %985, %cst_726 {dimension_numbers = #tpu.dot_dimension_numbers<[1], [0], [0], [1], [0, 0, 1, 1], [], []>} : vector<1x64xf32>, vector<64x16xf32>, vector<1x16xf32> -> vector<1x16xf32>
    %c5_727 = arith.constant 5 : index
    %c0_728 = arith.constant 0 : index
    %c0_729 = arith.constant 0 : index
    %987 = vector.load %arg43[%c5_727, %c0_728, %c0_729] : memref<11x64x16xf32, #tpu.memory_space<vmem>>, vector<1x64x16xf32>
    %988 = vector.shape_cast %987 : vector<1x64x16xf32> to vector<64x16xf32>
    %cst_730 = arith.constant dense<0.000000e+00> : vector<1x16xf32>
    %989 = tpu.matmul %983, %988, %cst_730 {dimension_numbers = #tpu.dot_dimension_numbers<[1], [0], [0], [1], [0, 0, 1, 1], [], []>} : vector<1x64xf32>, vector<64x16xf32>, vector<1x16xf32> -> vector<1x16xf32>
    %990 = arith.addf %986, %989 : vector<1x16xf32>
    %991 = vector.extract_strided_slice %837 {offsets = [6, 0], sizes = [1, 64], strides = [1, 1]} : vector<22x64xf32> to vector<1x64xf32>
    %992 = vector.extract_strided_slice %837 {offsets = [17, 0], sizes = [1, 64], strides = [1, 1]} : vector<22x64xf32> to vector<1x64xf32>
    %c6_731 = arith.constant 6 : index
    %c0_732 = arith.constant 0 : index
    %c0_733 = arith.constant 0 : index
    %993 = vector.load %arg44[%c6_731, %c0_732, %c0_733] : memref<11x64x16xf32, #tpu.memory_space<vmem>>, vector<1x64x16xf32>
    %994 = vector.shape_cast %993 : vector<1x64x16xf32> to vector<64x16xf32>
    %cst_734 = arith.constant dense<0.000000e+00> : vector<1x16xf32>
    %995 = tpu.matmul %991, %994, %cst_734 {dimension_numbers = #tpu.dot_dimension_numbers<[1], [0], [0], [1], [0, 0, 1, 1], [], []>} : vector<1x64xf32>, vector<64x16xf32>, vector<1x16xf32> -> vector<1x16xf32>
    %c6_735 = arith.constant 6 : index
    %c0_736 = arith.constant 0 : index
    %c0_737 = arith.constant 0 : index
    %996 = vector.load %arg43[%c6_735, %c0_736, %c0_737] : memref<11x64x16xf32, #tpu.memory_space<vmem>>, vector<1x64x16xf32>
    %997 = vector.shape_cast %996 : vector<1x64x16xf32> to vector<64x16xf32>
    %cst_738 = arith.constant dense<0.000000e+00> : vector<1x16xf32>
    %998 = tpu.matmul %992, %997, %cst_738 {dimension_numbers = #tpu.dot_dimension_numbers<[1], [0], [0], [1], [0, 0, 1, 1], [], []>} : vector<1x64xf32>, vector<64x16xf32>, vector<1x16xf32> -> vector<1x16xf32>
    %999 = arith.addf %995, %998 : vector<1x16xf32>
    %1000 = vector.extract_strided_slice %837 {offsets = [7, 0], sizes = [1, 64], strides = [1, 1]} : vector<22x64xf32> to vector<1x64xf32>
    %1001 = vector.extract_strided_slice %837 {offsets = [18, 0], sizes = [1, 64], strides = [1, 1]} : vector<22x64xf32> to vector<1x64xf32>
    %c7_739 = arith.constant 7 : index
    %c0_740 = arith.constant 0 : index
    %c0_741 = arith.constant 0 : index
    %1002 = vector.load %arg44[%c7_739, %c0_740, %c0_741] : memref<11x64x16xf32, #tpu.memory_space<vmem>>, vector<1x64x16xf32>
    %1003 = vector.shape_cast %1002 : vector<1x64x16xf32> to vector<64x16xf32>
    %cst_742 = arith.constant dense<0.000000e+00> : vector<1x16xf32>
    %1004 = tpu.matmul %1000, %1003, %cst_742 {dimension_numbers = #tpu.dot_dimension_numbers<[1], [0], [0], [1], [0, 0, 1, 1], [], []>} : vector<1x64xf32>, vector<64x16xf32>, vector<1x16xf32> -> vector<1x16xf32>
    %c7_743 = arith.constant 7 : index
    %c0_744 = arith.constant 0 : index
    %c0_745 = arith.constant 0 : index
    %1005 = vector.load %arg43[%c7_743, %c0_744, %c0_745] : memref<11x64x16xf32, #tpu.memory_space<vmem>>, vector<1x64x16xf32>
    %1006 = vector.shape_cast %1005 : vector<1x64x16xf32> to vector<64x16xf32>
    %cst_746 = arith.constant dense<0.000000e+00> : vector<1x16xf32>
    %1007 = tpu.matmul %1001, %1006, %cst_746 {dimension_numbers = #tpu.dot_dimension_numbers<[1], [0], [0], [1], [0, 0, 1, 1], [], []>} : vector<1x64xf32>, vector<64x16xf32>, vector<1x16xf32> -> vector<1x16xf32>
    %1008 = arith.addf %1004, %1007 : vector<1x16xf32>
    %1009 = vector.extract_strided_slice %837 {offsets = [8, 0], sizes = [1, 64], strides = [1, 1]} : vector<22x64xf32> to vector<1x64xf32>
    %1010 = vector.extract_strided_slice %837 {offsets = [19, 0], sizes = [1, 64], strides = [1, 1]} : vector<22x64xf32> to vector<1x64xf32>
    %c8_747 = arith.constant 8 : index
    %c0_748 = arith.constant 0 : index
    %c0_749 = arith.constant 0 : index
    %1011 = vector.load %arg44[%c8_747, %c0_748, %c0_749] : memref<11x64x16xf32, #tpu.memory_space<vmem>>, vector<1x64x16xf32>
    %1012 = vector.shape_cast %1011 : vector<1x64x16xf32> to vector<64x16xf32>
    %cst_750 = arith.constant dense<0.000000e+00> : vector<1x16xf32>
    %1013 = tpu.matmul %1009, %1012, %cst_750 {dimension_numbers = #tpu.dot_dimension_numbers<[1], [0], [0], [1], [0, 0, 1, 1], [], []>} : vector<1x64xf32>, vector<64x16xf32>, vector<1x16xf32> -> vector<1x16xf32>
    %c8_751 = arith.constant 8 : index
    %c0_752 = arith.constant 0 : index
    %c0_753 = arith.constant 0 : index
    %1014 = vector.load %arg43[%c8_751, %c0_752, %c0_753] : memref<11x64x16xf32, #tpu.memory_space<vmem>>, vector<1x64x16xf32>
    %1015 = vector.shape_cast %1014 : vector<1x64x16xf32> to vector<64x16xf32>
    %cst_754 = arith.constant dense<0.000000e+00> : vector<1x16xf32>
    %1016 = tpu.matmul %1010, %1015, %cst_754 {dimension_numbers = #tpu.dot_dimension_numbers<[1], [0], [0], [1], [0, 0, 1, 1], [], []>} : vector<1x64xf32>, vector<64x16xf32>, vector<1x16xf32> -> vector<1x16xf32>
    %1017 = arith.addf %1013, %1016 : vector<1x16xf32>
    %1018 = vector.extract_strided_slice %837 {offsets = [9, 0], sizes = [1, 64], strides = [1, 1]} : vector<22x64xf32> to vector<1x64xf32>
    %1019 = vector.extract_strided_slice %837 {offsets = [20, 0], sizes = [1, 64], strides = [1, 1]} : vector<22x64xf32> to vector<1x64xf32>
    %c9_755 = arith.constant 9 : index
    %c0_756 = arith.constant 0 : index
    %c0_757 = arith.constant 0 : index
    %1020 = vector.load %arg44[%c9_755, %c0_756, %c0_757] : memref<11x64x16xf32, #tpu.memory_space<vmem>>, vector<1x64x16xf32>
    %1021 = vector.shape_cast %1020 : vector<1x64x16xf32> to vector<64x16xf32>
    %cst_758 = arith.constant dense<0.000000e+00> : vector<1x16xf32>
    %1022 = tpu.matmul %1018, %1021, %cst_758 {dimension_numbers = #tpu.dot_dimension_numbers<[1], [0], [0], [1], [0, 0, 1, 1], [], []>} : vector<1x64xf32>, vector<64x16xf32>, vector<1x16xf32> -> vector<1x16xf32>
    %c9_759 = arith.constant 9 : index
    %c0_760 = arith.constant 0 : index
    %c0_761 = arith.constant 0 : index
    %1023 = vector.load %arg43[%c9_759, %c0_760, %c0_761] : memref<11x64x16xf32, #tpu.memory_space<vmem>>, vector<1x64x16xf32>
    %1024 = vector.shape_cast %1023 : vector<1x64x16xf32> to vector<64x16xf32>
    %cst_762 = arith.constant dense<0.000000e+00> : vector<1x16xf32>
    %1025 = tpu.matmul %1019, %1024, %cst_762 {dimension_numbers = #tpu.dot_dimension_numbers<[1], [0], [0], [1], [0, 0, 1, 1], [], []>} : vector<1x64xf32>, vector<64x16xf32>, vector<1x16xf32> -> vector<1x16xf32>
    %1026 = arith.addf %1022, %1025 : vector<1x16xf32>
    %1027 = vector.extract_strided_slice %837 {offsets = [10, 0], sizes = [1, 64], strides = [1, 1]} : vector<22x64xf32> to vector<1x64xf32>
    %1028 = vector.extract_strided_slice %837 {offsets = [21, 0], sizes = [1, 64], strides = [1, 1]} : vector<22x64xf32> to vector<1x64xf32>
    %c10_763 = arith.constant 10 : index
    %c0_764 = arith.constant 0 : index
    %c0_765 = arith.constant 0 : index
    %1029 = vector.load %arg44[%c10_763, %c0_764, %c0_765] : memref<11x64x16xf32, #tpu.memory_space<vmem>>, vector<1x64x16xf32>
    %1030 = vector.shape_cast %1029 : vector<1x64x16xf32> to vector<64x16xf32>
    %cst_766 = arith.constant dense<0.000000e+00> : vector<1x16xf32>
    %1031 = tpu.matmul %1027, %1030, %cst_766 {dimension_numbers = #tpu.dot_dimension_numbers<[1], [0], [0], [1], [0, 0, 1, 1], [], []>} : vector<1x64xf32>, vector<64x16xf32>, vector<1x16xf32> -> vector<1x16xf32>
    %c10_767 = arith.constant 10 : index
    %c0_768 = arith.constant 0 : index
    %c0_769 = arith.constant 0 : index
    %1032 = vector.load %arg43[%c10_767, %c0_768, %c0_769] : memref<11x64x16xf32, #tpu.memory_space<vmem>>, vector<1x64x16xf32>
    %1033 = vector.shape_cast %1032 : vector<1x64x16xf32> to vector<64x16xf32>
    %cst_770 = arith.constant dense<0.000000e+00> : vector<1x16xf32>
    %1034 = tpu.matmul %1028, %1033, %cst_770 {dimension_numbers = #tpu.dot_dimension_numbers<[1], [0], [0], [1], [0, 0, 1, 1], [], []>} : vector<1x64xf32>, vector<64x16xf32>, vector<1x16xf32> -> vector<1x16xf32>
    %1035 = arith.addf %1031, %1034 : vector<1x16xf32>
    %1036 = tpu.concatenate %846, %855, %864, %873, %882, %891, %900, %909, %918, %927, %936, %945, %954, %963, %972, %981 in 0 : vector<1x16xf32>, vector<1x16xf32>, vector<1x16xf32>, vector<1x16xf32>, vector<1x16xf32>, vector<1x16xf32>, vector<1x16xf32>, vector<1x16xf32>, vector<1x16xf32>, vector<1x16xf32>, vector<1x16xf32>, vector<1x16xf32>, vector<1x16xf32>, vector<1x16xf32>, vector<1x16xf32>, vector<1x16xf32> -> vector<16x16xf32>
    %1037 = tpu.concatenate %990, %999, %1008, %1017, %1026, %1035 in 0 : vector<1x16xf32>, vector<1x16xf32>, vector<1x16xf32>, vector<1x16xf32>, vector<1x16xf32>, vector<1x16xf32> -> vector<6x16xf32>
    %1038 = tpu.concatenate %1036, %1037 in 0 : vector<16x16xf32>, vector<6x16xf32> -> vector<22x16xf32>
    %c0_771 = arith.constant 0 : index
    %c0_772 = arith.constant 0 : index
    %1039 = vector.load %arg41[%c0_771, %c0_772] : memref<40x22xf32, #tpu.memory_space<vmem>>, vector<40x22xf32>
    %cst_773 = arith.constant dense<0.000000e+00> : vector<40x16xf32>
    %1040 = tpu.matmul %1039, %1038, %cst_773 {dimension_numbers = #tpu.dot_dimension_numbers<[1], [0], [0], [1], [0, 0, 1, 1], [], []>} : vector<40x22xf32>, vector<22x16xf32>, vector<40x16xf32> -> vector<40x16xf32>
    %c0_774 = arith.constant 0 : index
    %c0_775 = arith.constant 0 : index
    %1041 = vector.load %arg42[%c0_774, %c0_775] : memref<40x20xf32, #tpu.memory_space<vmem>>, vector<40x20xf32>
    %c0_776 = arith.constant 0 : index
    %c0_777 = arith.constant 0 : index
    %1042 = vector.load %arg45[%c0_776, %c0_777] : memref<64x16xf32, #tpu.memory_space<vmem>>, vector<64x16xf32>
    %cst_778 = arith.constant dense<0.000000e+00> : vector<20x16xf32>
    %1043 = tpu.matmul %835, %1042, %cst_778 {dimension_numbers = #tpu.dot_dimension_numbers<[1], [0], [0], [1], [0, 0, 1, 1], [], []>} : vector<20x64xf32>, vector<64x16xf32>, vector<20x16xf32> -> vector<20x16xf32>
    %cst_779 = arith.constant dense<0.000000e+00> : vector<40x16xf32>
    %1044 = tpu.matmul %1041, %1043, %cst_779 {dimension_numbers = #tpu.dot_dimension_numbers<[1], [0], [0], [1], [0, 0, 1, 1], [], []>} : vector<40x20xf32>, vector<20x16xf32>, vector<40x16xf32> -> vector<40x16xf32>
    %1045 = arith.addf %1040, %1044 : vector<40x16xf32>
    %c0_780 = arith.constant 0 : index
    %c0_781 = arith.constant 0 : index
    %1046 = vector.load %arg46[%c0_780, %c0_781] : memref<1x16xf32, #tpu.memory_space<vmem>>, vector<1x16xf32>
    %1047 = vector.broadcast %1046 : vector<1x16xf32> to vector<40x16xf32>
    %1048 = arith.addf %1045, %1047 : vector<40x16xf32>
    %cst_782 = arith.constant 5.000000e-01 : f32
    %1049 = vector.broadcast %cst_782 : f32 to vector<40x16xf32>
    %1050 = arith.mulf %1049, %1048 : vector<40x16xf32>
    %cst_783 = arith.constant 0.707106769 : f32
    %1051 = vector.broadcast %cst_783 : f32 to vector<40x16xf32>
    %1052 = arith.mulf %1048, %1051 : vector<40x16xf32>
    %cst_784 = arith.constant 0.000000e+00 : f32
    %1053 = vector.broadcast %cst_784 : f32 to vector<40x16xf32>
    %1054 = arith.cmpf oge, %1052, %1053 : vector<40x16xf32>
    %cst_785 = arith.constant 1.000000e+00 : f32
    %cst_786 = arith.constant -1.000000e+00 : f32
    %1055 = vector.broadcast %cst_785 : f32 to vector<40x16xf32>
    %1056 = vector.broadcast %cst_786 : f32 to vector<40x16xf32>
    %1057 = arith.select %1054, %1055, %1056 : vector<40x16xi1>, vector<40x16xf32>
    %1058 = math.absf %1052 : vector<40x16xf32>
    %cst_787 = arith.constant 0.327591091 : f32
    %1059 = vector.broadcast %cst_787 : f32 to vector<40x16xf32>
    %1060 = arith.mulf %1059, %1058 : vector<40x16xf32>
    %cst_788 = arith.constant 1.000000e+00 : f32
    %1061 = vector.broadcast %cst_788 : f32 to vector<40x16xf32>
    %1062 = arith.addf %1061, %1060 : vector<40x16xf32>
    %cst_789 = arith.constant 1.000000e+00 : f32
    %1063 = vector.broadcast %cst_789 : f32 to vector<40x16xf32>
    %1064 = arith.divf %1063, %1062 : vector<40x16xf32>
    %cst_790 = arith.constant 1.06140542 : f32
    %1065 = vector.broadcast %cst_790 : f32 to vector<40x16xf32>
    %1066 = arith.mulf %1065, %1064 : vector<40x16xf32>
    %cst_791 = arith.constant -1.45315206 : f32
    %1067 = vector.broadcast %cst_791 : f32 to vector<40x16xf32>
    %1068 = arith.addf %1066, %1067 : vector<40x16xf32>
    %1069 = arith.mulf %1068, %1064 : vector<40x16xf32>
    %cst_792 = arith.constant 1.42141378 : f32
    %1070 = vector.broadcast %cst_792 : f32 to vector<40x16xf32>
    %1071 = arith.addf %1069, %1070 : vector<40x16xf32>
    %1072 = arith.mulf %1071, %1064 : vector<40x16xf32>
    %cst_793 = arith.constant -0.284496725 : f32
    %1073 = vector.broadcast %cst_793 : f32 to vector<40x16xf32>
    %1074 = arith.addf %1072, %1073 : vector<40x16xf32>
    %1075 = arith.mulf %1074, %1064 : vector<40x16xf32>
    %cst_794 = arith.constant 0.254829586 : f32
    %1076 = vector.broadcast %cst_794 : f32 to vector<40x16xf32>
    %1077 = arith.addf %1075, %1076 : vector<40x16xf32>
    %1078 = arith.mulf %1077, %1064 : vector<40x16xf32>
    %cst_795 = arith.constant 0.000000e+00 : f32
    %1079 = vector.broadcast %cst_795 : f32 to vector<40x16xf32>
    %1080 = arith.subf %1079, %1058 : vector<40x16xf32>
    %1081 = arith.mulf %1080, %1058 : vector<40x16xf32>
    %1082 = math.exp %1081 : vector<40x16xf32>
    %1083 = arith.mulf %1078, %1082 : vector<40x16xf32>
    %cst_796 = arith.constant 1.000000e+00 : f32
    %1084 = vector.broadcast %cst_796 : f32 to vector<40x16xf32>
    %1085 = arith.subf %1084, %1083 : vector<40x16xf32>
    %1086 = arith.mulf %1057, %1085 : vector<40x16xf32>
    %cst_797 = arith.constant 1.000000e+00 : f32
    %1087 = vector.broadcast %cst_797 : f32 to vector<40x16xf32>
    %1088 = arith.addf %1087, %1086 : vector<40x16xf32>
    %1089 = arith.mulf %1050, %1088 : vector<40x16xf32>
    %1090 = vector.extract_strided_slice %1089 {offsets = [0, 0], sizes = [31, 16], strides = [1, 1]} : vector<40x16xf32> to vector<31x16xf32>
    %1091 = tpu.concatenate %1090, %100 in 1 : vector<31x16xf32>, vector<31x16xf32> -> vector<31x32xf32>
    %c0_798 = arith.constant 0 : index
    %c0_799 = arith.constant 0 : index
    %1092 = vector.load %arg47[%c0_798, %c0_799] : memref<32x16xf32, #tpu.memory_space<vmem>>, vector<32x16xf32>
    %cst_800 = arith.constant dense<0.000000e+00> : vector<31x16xf32>
    %1093 = tpu.matmul %1091, %1092, %cst_800 {dimension_numbers = #tpu.dot_dimension_numbers<[1], [0], [0], [1], [0, 0, 1, 1], [], []>} : vector<31x32xf32>, vector<32x16xf32>, vector<31x16xf32> -> vector<31x16xf32>
    %c0_801 = arith.constant 0 : index
    %c0_802 = arith.constant 0 : index
    %1094 = vector.load %arg48[%c0_801, %c0_802] : memref<1x16xf32, #tpu.memory_space<vmem>>, vector<1x16xf32>
    %1095 = vector.broadcast %1094 : vector<1x16xf32> to vector<31x16xf32>
    %1096 = arith.addf %1093, %1095 : vector<31x16xf32>
    %cst_803 = arith.constant 5.000000e-01 : f32
    %1097 = vector.broadcast %cst_803 : f32 to vector<31x16xf32>
    %1098 = arith.mulf %1097, %1096 : vector<31x16xf32>
    %cst_804 = arith.constant 0.707106769 : f32
    %1099 = vector.broadcast %cst_804 : f32 to vector<31x16xf32>
    %1100 = arith.mulf %1096, %1099 : vector<31x16xf32>
    %cst_805 = arith.constant 0.000000e+00 : f32
    %1101 = vector.broadcast %cst_805 : f32 to vector<31x16xf32>
    %1102 = arith.cmpf oge, %1100, %1101 : vector<31x16xf32>
    %cst_806 = arith.constant 1.000000e+00 : f32
    %cst_807 = arith.constant -1.000000e+00 : f32
    %1103 = vector.broadcast %cst_806 : f32 to vector<31x16xf32>
    %1104 = vector.broadcast %cst_807 : f32 to vector<31x16xf32>
    %1105 = arith.select %1102, %1103, %1104 : vector<31x16xi1>, vector<31x16xf32>
    %1106 = math.absf %1100 : vector<31x16xf32>
    %cst_808 = arith.constant 0.327591091 : f32
    %1107 = vector.broadcast %cst_808 : f32 to vector<31x16xf32>
    %1108 = arith.mulf %1107, %1106 : vector<31x16xf32>
    %cst_809 = arith.constant 1.000000e+00 : f32
    %1109 = vector.broadcast %cst_809 : f32 to vector<31x16xf32>
    %1110 = arith.addf %1109, %1108 : vector<31x16xf32>
    %cst_810 = arith.constant 1.000000e+00 : f32
    %1111 = vector.broadcast %cst_810 : f32 to vector<31x16xf32>
    %1112 = arith.divf %1111, %1110 : vector<31x16xf32>
    %cst_811 = arith.constant 1.06140542 : f32
    %1113 = vector.broadcast %cst_811 : f32 to vector<31x16xf32>
    %1114 = arith.mulf %1113, %1112 : vector<31x16xf32>
    %cst_812 = arith.constant -1.45315206 : f32
    %1115 = vector.broadcast %cst_812 : f32 to vector<31x16xf32>
    %1116 = arith.addf %1114, %1115 : vector<31x16xf32>
    %1117 = arith.mulf %1116, %1112 : vector<31x16xf32>
    %cst_813 = arith.constant 1.42141378 : f32
    %1118 = vector.broadcast %cst_813 : f32 to vector<31x16xf32>
    %1119 = arith.addf %1117, %1118 : vector<31x16xf32>
    %1120 = arith.mulf %1119, %1112 : vector<31x16xf32>
    %cst_814 = arith.constant -0.284496725 : f32
    %1121 = vector.broadcast %cst_814 : f32 to vector<31x16xf32>
    %1122 = arith.addf %1120, %1121 : vector<31x16xf32>
    %1123 = arith.mulf %1122, %1112 : vector<31x16xf32>
    %cst_815 = arith.constant 0.254829586 : f32
    %1124 = vector.broadcast %cst_815 : f32 to vector<31x16xf32>
    %1125 = arith.addf %1123, %1124 : vector<31x16xf32>
    %1126 = arith.mulf %1125, %1112 : vector<31x16xf32>
    %cst_816 = arith.constant 0.000000e+00 : f32
    %1127 = vector.broadcast %cst_816 : f32 to vector<31x16xf32>
    %1128 = arith.subf %1127, %1106 : vector<31x16xf32>
    %1129 = arith.mulf %1128, %1106 : vector<31x16xf32>
    %1130 = math.exp %1129 : vector<31x16xf32>
    %1131 = arith.mulf %1126, %1130 : vector<31x16xf32>
    %cst_817 = arith.constant 1.000000e+00 : f32
    %1132 = vector.broadcast %cst_817 : f32 to vector<31x16xf32>
    %1133 = arith.subf %1132, %1131 : vector<31x16xf32>
    %1134 = arith.mulf %1105, %1133 : vector<31x16xf32>
    %cst_818 = arith.constant 1.000000e+00 : f32
    %1135 = vector.broadcast %cst_818 : f32 to vector<31x16xf32>
    %1136 = arith.addf %1135, %1134 : vector<31x16xf32>
    %1137 = arith.mulf %1098, %1136 : vector<31x16xf32>
    %c0_819 = arith.constant 0 : index
    %c0_820 = arith.constant 0 : index
    %1138 = vector.load %arg49[%c0_819, %c0_820] : memref<16x2xf32, #tpu.memory_space<vmem>>, vector<16x2xf32>
    %cst_821 = arith.constant dense<0.000000e+00> : vector<31x2xf32>
    %1139 = tpu.matmul %1137, %1138, %cst_821 {dimension_numbers = #tpu.dot_dimension_numbers<[1], [0], [0], [1], [0, 0, 1, 1], [], []>} : vector<31x16xf32>, vector<16x2xf32>, vector<31x2xf32> -> vector<31x2xf32>
    %c0_822 = arith.constant 0 : index
    %c0_823 = arith.constant 0 : index
    %1140 = vector.load %arg50[%c0_822, %c0_823] : memref<1x2xf32, #tpu.memory_space<vmem>>, vector<1x2xf32>
    %1141 = vector.broadcast %1140 : vector<1x2xf32> to vector<31x2xf32>
    %1142 = arith.addf %1139, %1141 : vector<31x2xf32>
    %c0_824 = arith.constant 0 : index
    %c0_825 = arith.constant 0 : index
    %c0_826 = arith.constant 0 : index
    %1143 = vector.load %arg51[%c0_824, %c0_825, %c0_826] : memref<1x31x2xf32, #tpu.memory_space<vmem>>, vector<1x31x2xf32>
    %1144 = vector.shape_cast %1143 : vector<1x31x2xf32> to vector<31x2xf32>
    %1145 = vector.shape_cast %1142 : vector<31x2xf32> to vector<1x31x2xf32>
    tpu.vector_store %arg51[%c0_824, %c0_825, %c0_826], %1145 {strides = array<i32>} : memref<1x31x2xf32, #tpu.memory_space<vmem>>, vector<1x31x2xf32>,
    return
  }
  func.func @transform_0(%arg0: i32) -> (i32, i32, i32) {
    %c0_i32 = arith.constant 0 : i32
    %c0_i32_0 = arith.constant 0 : i32
    %c0_i32_1 = arith.constant 0 : i32
    return %arg0, %c0_i32, %c0_i32_0 : i32, i32, i32
  }
  func.func @transform_1(%arg0: i32) -> (i32, i32, i32) {
    %c0_i32 = arith.constant 0 : i32
    %c0_i32_0 = arith.constant 0 : i32
    %c0_i32_1 = arith.constant 0 : i32
    return %arg0, %c0_i32, %c0_i32_0 : i32, i32, i32
  }
  func.func @transform_2(%arg0: i32) -> (i32, i32) {
    %c0_i32 = arith.constant 0 : i32
    %c0_i32_0 = arith.constant 0 : i32
    %c0_i32_1 = arith.constant 0 : i32
    return %c0_i32, %c0_i32_0 : i32, i32
  }
  func.func @transform_3(%arg0: i32) -> (i32, i32) {
    %c0_i32 = arith.constant 0 : i32
    %c0_i32_0 = arith.constant 0 : i32
    %c0_i32_1 = arith.constant 0 : i32
    return %c0_i32, %c0_i32_0 : i32, i32
  }
  func.func @transform_4(%arg0: i32) -> (i32, i32) {
    %c0_i32 = arith.constant 0 : i32
    %c0_i32_0 = arith.constant 0 : i32
    %c0_i32_1 = arith.constant 0 : i32
    return %c0_i32, %c0_i32_0 : i32, i32
  }
  func.func @transform_5(%arg0: i32) -> (i32, i32) {
    %c0_i32 = arith.constant 0 : i32
    %c0_i32_0 = arith.constant 0 : i32
    %c0_i32_1 = arith.constant 0 : i32
    return %c0_i32, %c0_i32_0 : i32, i32
  }
  func.func @transform_6(%arg0: i32) -> (i32, i32) {
    %c0_i32 = arith.constant 0 : i32
    %c0_i32_0 = arith.constant 0 : i32
    %c0_i32_1 = arith.constant 0 : i32
    return %c0_i32, %c0_i32_0 : i32, i32
  }
  func.func @transform_7(%arg0: i32) -> (i32, i32) {
    %c0_i32 = arith.constant 0 : i32
    %c0_i32_0 = arith.constant 0 : i32
    %c0_i32_1 = arith.constant 0 : i32
    return %c0_i32, %c0_i32_0 : i32, i32
  }
  func.func @transform_8(%arg0: i32) -> (i32, i32) {
    %c0_i32 = arith.constant 0 : i32
    %c0_i32_0 = arith.constant 0 : i32
    %c0_i32_1 = arith.constant 0 : i32
    return %c0_i32, %c0_i32_0 : i32, i32
  }
  func.func @transform_9(%arg0: i32) -> (i32, i32) {
    %c0_i32 = arith.constant 0 : i32
    %c0_i32_0 = arith.constant 0 : i32
    %c0_i32_1 = arith.constant 0 : i32
    return %c0_i32, %c0_i32_0 : i32, i32
  }
  func.func @transform_10(%arg0: i32) -> (i32, i32, i32) {
    %c0_i32 = arith.constant 0 : i32
    %c0_i32_0 = arith.constant 0 : i32
    %c0_i32_1 = arith.constant 0 : i32
    %c0_i32_2 = arith.constant 0 : i32
    return %c0_i32, %c0_i32_0, %c0_i32_1 : i32, i32, i32
  }
  func.func @transform_11(%arg0: i32) -> (i32, i32, i32) {
    %c0_i32 = arith.constant 0 : i32
    %c0_i32_0 = arith.constant 0 : i32
    %c0_i32_1 = arith.constant 0 : i32
    %c0_i32_2 = arith.constant 0 : i32
    return %c0_i32, %c0_i32_0, %c0_i32_1 : i32, i32, i32
  }
  func.func @transform_12(%arg0: i32) -> (i32, i32) {
    %c0_i32 = arith.constant 0 : i32
    %c0_i32_0 = arith.constant 0 : i32
    %c0_i32_1 = arith.constant 0 : i32
    return %c0_i32, %c0_i32_0 : i32, i32
  }
  func.func @transform_13(%arg0: i32) -> (i32, i32) {
    %c0_i32 = arith.constant 0 : i32
    %c0_i32_0 = arith.constant 0 : i32
    %c0_i32_1 = arith.constant 0 : i32
    return %c0_i32, %c0_i32_0 : i32, i32
  }
  func.func @transform_14(%arg0: i32) -> (i32, i32) {
    %c0_i32 = arith.constant 0 : i32
    %c0_i32_0 = arith.constant 0 : i32
    %c0_i32_1 = arith.constant 0 : i32
    return %c0_i32, %c0_i32_0 : i32, i32
  }
  func.func @transform_15(%arg0: i32) -> (i32, i32) {
    %c0_i32 = arith.constant 0 : i32
    %c0_i32_0 = arith.constant 0 : i32
    %c0_i32_1 = arith.constant 0 : i32
    return %c0_i32, %c0_i32_0 : i32, i32
  }
  func.func @transform_16(%arg0: i32) -> (i32, i32) {
    %c0_i32 = arith.constant 0 : i32
    %c0_i32_0 = arith.constant 0 : i32
    %c0_i32_1 = arith.constant 0 : i32
    return %c0_i32, %c0_i32_0 : i32, i32
  }
  func.func @transform_17(%arg0: i32) -> (i32, i32, i32) {
    %c0_i32 = arith.constant 0 : i32
    %c0_i32_0 = arith.constant 0 : i32
    %c0_i32_1 = arith.constant 0 : i32
    %c0_i32_2 = arith.constant 0 : i32
    return %c0_i32, %c0_i32_0, %c0_i32_1 : i32, i32, i32
  }
  func.func @transform_18(%arg0: i32) -> (i32, i32, i32) {
    %c0_i32 = arith.constant 0 : i32
    %c0_i32_0 = arith.constant 0 : i32
    %c0_i32_1 = arith.constant 0 : i32
    %c0_i32_2 = arith.constant 0 : i32
    return %c0_i32, %c0_i32_0, %c0_i32_1 : i32, i32, i32
  }
  func.func @transform_19(%arg0: i32) -> (i32, i32) {
    %c0_i32 = arith.constant 0 : i32
    %c0_i32_0 = arith.constant 0 : i32
    %c0_i32_1 = arith.constant 0 : i32
    return %c0_i32, %c0_i32_0 : i32, i32
  }
  func.func @transform_20(%arg0: i32) -> (i32, i32) {
    %c0_i32 = arith.constant 0 : i32
    %c0_i32_0 = arith.constant 0 : i32
    %c0_i32_1 = arith.constant 0 : i32
    return %c0_i32, %c0_i32_0 : i32, i32
  }
  func.func @transform_21(%arg0: i32) -> (i32, i32) {
    %c0_i32 = arith.constant 0 : i32
    %c0_i32_0 = arith.constant 0 : i32
    %c0_i32_1 = arith.constant 0 : i32
    return %c0_i32, %c0_i32_0 : i32, i32
  }
  func.func @transform_22(%arg0: i32) -> (i32, i32) {
    %c0_i32 = arith.constant 0 : i32
    %c0_i32_0 = arith.constant 0 : i32
    %c0_i32_1 = arith.constant 0 : i32
    return %c0_i32, %c0_i32_0 : i32, i32
  }
  func.func @transform_23(%arg0: i32) -> (i32, i32) {
    %c0_i32 = arith.constant 0 : i32
    %c0_i32_0 = arith.constant 0 : i32
    %c0_i32_1 = arith.constant 0 : i32
    return %c0_i32, %c0_i32_0 : i32, i32
  }
  func.func @transform_24(%arg0: i32) -> (i32, i32) {
    %c0_i32 = arith.constant 0 : i32
    %c0_i32_0 = arith.constant 0 : i32
    %c0_i32_1 = arith.constant 0 : i32
    return %c0_i32, %c0_i32_0 : i32, i32
  }
  func.func @transform_25(%arg0: i32) -> (i32, i32) {
    %c0_i32 = arith.constant 0 : i32
    %c0_i32_0 = arith.constant 0 : i32
    %c0_i32_1 = arith.constant 0 : i32
    return %c0_i32, %c0_i32_0 : i32, i32
  }
  func.func @transform_26(%arg0: i32) -> (i32, i32, i32) {
    %c0_i32 = arith.constant 0 : i32
    %c0_i32_0 = arith.constant 0 : i32
    %c0_i32_1 = arith.constant 0 : i32
    %c0_i32_2 = arith.constant 0 : i32
    return %c0_i32, %c0_i32_0, %c0_i32_1 : i32, i32, i32
  }
  func.func @transform_27(%arg0: i32) -> (i32, i32, i32) {
    %c0_i32 = arith.constant 0 : i32
    %c0_i32_0 = arith.constant 0 : i32
    %c0_i32_1 = arith.constant 0 : i32
    %c0_i32_2 = arith.constant 0 : i32
    return %c0_i32, %c0_i32_0, %c0_i32_1 : i32, i32, i32
  }
  func.func @transform_28(%arg0: i32) -> (i32, i32) {
    %c0_i32 = arith.constant 0 : i32
    %c0_i32_0 = arith.constant 0 : i32
    %c0_i32_1 = arith.constant 0 : i32
    return %c0_i32, %c0_i32_0 : i32, i32
  }
  func.func @transform_29(%arg0: i32) -> (i32, i32) {
    %c0_i32 = arith.constant 0 : i32
    %c0_i32_0 = arith.constant 0 : i32
    %c0_i32_1 = arith.constant 0 : i32
    return %c0_i32, %c0_i32_0 : i32, i32
  }
  func.func @transform_30(%arg0: i32) -> (i32, i32) {
    %c0_i32 = arith.constant 0 : i32
    %c0_i32_0 = arith.constant 0 : i32
    %c0_i32_1 = arith.constant 0 : i32
    return %c0_i32, %c0_i32_0 : i32, i32
  }
  func.func @transform_31(%arg0: i32) -> (i32, i32) {
    %c0_i32 = arith.constant 0 : i32
    %c0_i32_0 = arith.constant 0 : i32
    %c0_i32_1 = arith.constant 0 : i32
    return %c0_i32, %c0_i32_0 : i32, i32
  }
  func.func @transform_32(%arg0: i32) -> (i32, i32) {
    %c0_i32 = arith.constant 0 : i32
    %c0_i32_0 = arith.constant 0 : i32
    %c0_i32_1 = arith.constant 0 : i32
    return %c0_i32, %c0_i32_0 : i32, i32
  }
  func.func @transform_33(%arg0: i32) -> (i32, i32, i32) {
    %c0_i32 = arith.constant 0 : i32
    %c0_i32_0 = arith.constant 0 : i32
    %c0_i32_1 = arith.constant 0 : i32
    %c0_i32_2 = arith.constant 0 : i32
    return %c0_i32, %c0_i32_0, %c0_i32_1 : i32, i32, i32
  }
  func.func @transform_34(%arg0: i32) -> (i32, i32, i32) {
    %c0_i32 = arith.constant 0 : i32
    %c0_i32_0 = arith.constant 0 : i32
    %c0_i32_1 = arith.constant 0 : i32
    %c0_i32_2 = arith.constant 0 : i32
    return %c0_i32, %c0_i32_0, %c0_i32_1 : i32, i32, i32
  }
  func.func @transform_35(%arg0: i32) -> (i32, i32) {
    %c0_i32 = arith.constant 0 : i32
    %c0_i32_0 = arith.constant 0 : i32
    %c0_i32_1 = arith.constant 0 : i32
    return %c0_i32, %c0_i32_0 : i32, i32
  }
  func.func @transform_36(%arg0: i32) -> (i32, i32) {
    %c0_i32 = arith.constant 0 : i32
    %c0_i32_0 = arith.constant 0 : i32
    %c0_i32_1 = arith.constant 0 : i32
    return %c0_i32, %c0_i32_0 : i32, i32
  }
  func.func @transform_37(%arg0: i32) -> (i32, i32) {
    %c0_i32 = arith.constant 0 : i32
    %c0_i32_0 = arith.constant 0 : i32
    %c0_i32_1 = arith.constant 0 : i32
    return %c0_i32, %c0_i32_0 : i32, i32
  }
  func.func @transform_38(%arg0: i32) -> (i32, i32) {
    %c0_i32 = arith.constant 0 : i32
    %c0_i32_0 = arith.constant 0 : i32
    %c0_i32_1 = arith.constant 0 : i32
    return %c0_i32, %c0_i32_0 : i32, i32
  }
  func.func @transform_39(%arg0: i32) -> (i32, i32) {
    %c0_i32 = arith.constant 0 : i32
    %c0_i32_0 = arith.constant 0 : i32
    %c0_i32_1 = arith.constant 0 : i32
    return %c0_i32, %c0_i32_0 : i32, i32
  }
  func.func @transform_40(%arg0: i32) -> (i32, i32) {
    %c0_i32 = arith.constant 0 : i32
    %c0_i32_0 = arith.constant 0 : i32
    %c0_i32_1 = arith.constant 0 : i32
    return %c0_i32, %c0_i32_0 : i32, i32
  }
  func.func @transform_41(%arg0: i32) -> (i32, i32) {
    %c0_i32 = arith.constant 0 : i32
    %c0_i32_0 = arith.constant 0 : i32
    %c0_i32_1 = arith.constant 0 : i32
    return %c0_i32, %c0_i32_0 : i32, i32
  }
  func.func @transform_42(%arg0: i32) -> (i32, i32, i32) {
    %c0_i32 = arith.constant 0 : i32
    %c0_i32_0 = arith.constant 0 : i32
    %c0_i32_1 = arith.constant 0 : i32
    %c0_i32_2 = arith.constant 0 : i32
    return %c0_i32, %c0_i32_0, %c0_i32_1 : i32, i32, i32
  }
  func.func @transform_43(%arg0: i32) -> (i32, i32, i32) {
    %c0_i32 = arith.constant 0 : i32
    %c0_i32_0 = arith.constant 0 : i32
    %c0_i32_1 = arith.constant 0 : i32
    %c0_i32_2 = arith.constant 0 : i32
    return %c0_i32, %c0_i32_0, %c0_i32_1 : i32, i32, i32
  }
  func.func @transform_44(%arg0: i32) -> (i32, i32) {
    %c0_i32 = arith.constant 0 : i32
    %c0_i32_0 = arith.constant 0 : i32
    %c0_i32_1 = arith.constant 0 : i32
    return %c0_i32, %c0_i32_0 : i32, i32
  }
  func.func @transform_45(%arg0: i32) -> (i32, i32) {
    %c0_i32 = arith.constant 0 : i32
    %c0_i32_0 = arith.constant 0 : i32
    %c0_i32_1 = arith.constant 0 : i32
    return %c0_i32, %c0_i32_0 : i32, i32
  }
  func.func @transform_46(%arg0: i32) -> (i32, i32) {
    %c0_i32 = arith.constant 0 : i32
    %c0_i32_0 = arith.constant 0 : i32
    %c0_i32_1 = arith.constant 0 : i32
    return %c0_i32, %c0_i32_0 : i32, i32
  }
  func.func @transform_47(%arg0: i32) -> (i32, i32) {
    %c0_i32 = arith.constant 0 : i32
    %c0_i32_0 = arith.constant 0 : i32
    %c0_i32_1 = arith.constant 0 : i32
    return %c0_i32, %c0_i32_0 : i32, i32
  }
  func.func @transform_48(%arg0: i32) -> (i32, i32) {
    %c0_i32 = arith.constant 0 : i32
    %c0_i32_0 = arith.constant 0 : i32
    %c0_i32_1 = arith.constant 0 : i32
    return %c0_i32, %c0_i32_0 : i32, i32
  }
  func.func @transform_49(%arg0: i32) -> (i32, i32) {
    %c0_i32 = arith.constant 0 : i32
    %c0_i32_0 = arith.constant 0 : i32
    %c0_i32_1 = arith.constant 0 : i32
    return %c0_i32, %c0_i32_0 : i32, i32
  }
  func.func @transform_50(%arg0: i32) -> (i32, i32, i32) {
    %c0_i32 = arith.constant 0 : i32
    %c0_i32_0 = arith.constant 0 : i32
    %c0_i32_1 = arith.constant 0 : i32
    return %arg0, %c0_i32, %c0_i32_0 : i32, i32, i32
  }
}

</mosaic_0001>

<bundles_post_ra>
// kernel: tpu_custom_call.1
= control target key start
LH: loop header
LB: loop body
LE: loop exit
PB: predicated region body
PF: predicated region fallthrough
CT: control target
= control target key end

     0   :  { %s8659_s6 = smov 1   ;;  %s8660_s10 = smov 2   ;;  %s12242_s0 = inlined_call_operand.smem [shape: u32[51], index: -1, kind: input, shape index: {}] }
   0x1   :  { %s8723_s5 = sld [smem:[%s12242_s0]]   ;;  %s8661_s14 = smov 3  }
   0x2   :  { %s8728_s9 = sld [smem:[%s12242_s0 + %s8659_s6]]   ;;  %s8662_s18 = smov 4  }
   0x3   :  { %s8733_s13 = sld [smem:[%s12242_s0 + %s8660_s10]]   ;;  %s8663_s22 = smov 5  }
   0x4   :  { %s8738_s17 = sld [smem:[%s12242_s0 + %s8661_s14]]   ;;  %s8664_s26 = smov 6  }
   0x5   :  { %s8743_s21 = sld [smem:[%s12242_s0 + %s8662_s18]]   ;;  %s8665_s30 = smov 7  }
   0x6   :  { %s8748_s25 = sld [smem:[%s12242_s0 + %s8663_s22]]   ;;  %s8666_s4 = smov 8  }
   0x7   :  { %12448 = sst [smem:[#allocation2_spill]] %s8723_s5  ;;  %s8667_s10 = smov 9  }
   0x8   :  { %s8753_s29 = sld [smem:[%s12242_s0 + %s8664_s26]]   ;;  %s8668_s15 = smov 10  }
   0x9   :  { %s8758_s3 = sld [smem:[%s12242_s0 + %s8665_s30]]   ;;  %s8669_s20 = smov 11  }
   0xa   :  { %s8763_s8 = sld [smem:[%s12242_s0 + %s8666_s4]]   ;;  %s8670_s26 = smov 12  }
   0xb   :  { %s8768_s14 = sld [smem:[%s12242_s0 + %s8667_s10]]   ;;  %s8671_s1 = smov 13  }
   0xc   :  { %s8773_s19 = sld [smem:[%s12242_s0 + %s8668_s15]]   ;;  %s8672_s7 = smov 14  }
   0xd   :  { %s8778_s24 = sld [smem:[%s12242_s0 + %s8669_s20]]   ;;  %s8673_s15 = smov 15  }
   0xe   :  { %s8783_s30 = sld [smem:[%s12242_s0 + %s8670_s26]]   ;;  %s8674_s22 = smov 16  }
   0xf   :  { %12449 = sst [smem:[#allocation3_spill]] %s8758_s3  ;;  %s8675_s28 = smov 17  }
  0x10   :  { %s8788_s6 = sld [smem:[%s12242_s0 + %s8671_s1]]  }
  0x11   :  { %s8793_s12 = sld [smem:[%s12242_s0 + %s8672_s7]]   ;;  %s8676_s7 = smov 18  }
  0x12   :  { %s8798_s20 = sld [smem:[%s12242_s0 + %s8673_s15]]   ;;  %s8677_s15 = smov 19  }
  0x13   :  { %s8803_s27 = sld [smem:[%s12242_s0 + %s8674_s22]]   ;;  %s8678_s22 = smov 20  }
  0x14   :  { %s8808_s4 = sld [smem:[%s12242_s0 + %s8675_s28]]   ;;  %s8679_s28 = smov 21  }
  0x17   :  { %12450 = sst [smem:[#allocation4_spill]] %s8793_s12 }
  0x18   :  { %12451 = sst [smem:[#allocation5_spill]] %s8798_s20 }
  0x19   :  { %12452 = sst [smem:[#allocation6_spill]] %s8803_s27 }
  0x1a   :  { %12453 = sst [smem:[#allocation7_spill]] %s8808_s4 }
  0x1b   :  { %s8813_s12 = sld [smem:[%s12242_s0 + %s8676_s7]]   ;;  %s8680_s7 = smov 22  }
  0x1c   :  { %s8818_s20 = sld [smem:[%s12242_s0 + %s8677_s15]]   ;;  %s8681_s15 = smov 23  }
  0x1d   :  { %s8823_s27 = sld [smem:[%s12242_s0 + %s8678_s22]]   ;;  %s8682_s22 = smov 24  }
  0x1e   :  { %s8828_s4 = sld [smem:[%s12242_s0 + %s8679_s28]]   ;;  %s8683_s28 = smov 25  }
  0x21   :  { %12454 = sst [smem:[#allocation8_spill]] %s8813_s12 }
  0x22   :  { %12455 = sst [smem:[#allocation9_spill]] %s8818_s20 }
  0x23   :  { %12456 = sst [smem:[#allocation10_spill]] %s8823_s27 }
  0x24   :  { %12457 = sst [smem:[#allocation11_spill]] %s8828_s4 }
  0x25   :  { %s8833_s12 = sld [smem:[%s12242_s0 + %s8680_s7]]   ;;  %s8684_s7 = smov 26  }
  0x26   :  { %s8838_s20 = sld [smem:[%s12242_s0 + %s8681_s15]]   ;;  %s8685_s15 = smov 27  }
  0x27   :  { %s8843_s27 = sld [smem:[%s12242_s0 + %s8682_s22]]   ;;  %s8686_s22 = smov 28  }
  0x28   :  { %s8848_s4 = sld [smem:[%s12242_s0 + %s8683_s28]]   ;;  %s8687_s28 = smov 29  }
  0x2b   :  { %12458 = sst [smem:[#allocation12_spill]] %s8833_s12 }
  0x2c   :  { %12459 = sst [smem:[#allocation13_spill]] %s8838_s20 }
  0x2d   :  { %12460 = sst [smem:[#allocation14_spill]] %s8843_s27 }
  0x2e   :  { %12461 = sst [smem:[#allocation15_spill]] %s8848_s4 }
  0x2f   :  { %s8853_s12 = sld [smem:[%s12242_s0 + %s8684_s7]]   ;;  %s8688_s7 = smov 30  }
  0x30   :  { %s8858_s20 = sld [smem:[%s12242_s0 + %s8685_s15]]   ;;  %s8689_s15 = smov 31  }
  0x31   :  { %s8863_s27 = sld [smem:[%s12242_s0 + %s8686_s22]]   ;;  %s8690_s22 = smov 32  }
  0x32   :  { %s8868_s4 = sld [smem:[%s12242_s0 + %s8687_s28]]   ;;  %s8691_s28 = smov 33  }
  0x35   :  { %12462 = sst [smem:[#allocation16_spill]] %s8853_s12 }
  0x36   :  { %12463 = sst [smem:[#allocation17_spill]] %s8858_s20 }
  0x37   :  { %12464 = sst [smem:[#allocation18_spill]] %s8863_s27 }
  0x38   :  { %12465 = sst [smem:[#allocation19_spill]] %s8868_s4 }
  0x39   :  { %s8873_s12 = sld [smem:[%s12242_s0 + %s8688_s7]]   ;;  %s8692_s7 = smov 34  }
  0x3a   :  { %s8878_s20 = sld [smem:[%s12242_s0 + %s8689_s15]]   ;;  %s8693_s15 = smov 35  }
  0x3b   :  { %s8883_s27 = sld [smem:[%s12242_s0 + %s8690_s22]]   ;;  %s8694_s22 = smov 36  }
  0x3c   :  { %s8888_s4 = sld [smem:[%s12242_s0 + %s8691_s28]]   ;;  %s8695_s28 = smov 37  }
  0x3f   :  { %12466 = sst [smem:[#allocation20_spill]] %s8873_s12 }
  0x40   :  { %12467 = sst [smem:[#allocation21_spill]] %s8878_s20 }
  0x41   :  { %12468 = sst [smem:[#allocation22_spill]] %s8883_s27 }
  0x42   :  { %12469 = sst [smem:[#allocation23_spill]] %s8888_s4 }
  0x43   :  { %s8893_s12 = sld [smem:[%s12242_s0 + %s8692_s7]]   ;;  %s8696_s7 = smov 38  }
  0x44   :  { %s8898_s20 = sld [smem:[%s12242_s0 + %s8693_s15]]   ;;  %s8697_s15 = smov 39  }
  0x45   :  { %s8903_s27 = sld [smem:[%s12242_s0 + %s8694_s22]]   ;;  %s8698_s22 = smov 40  }
  0x46   :  { %s8908_s4 = sld [smem:[%s12242_s0 + %s8695_s28]]   ;;  %s8699_s28 = smov 41  }
  0x49   :  { %12470 = sst [smem:[#allocation24_spill]] %s8893_s12 }
  0x4a   :  { %12471 = sst [smem:[#allocation25_spill]] %s8898_s20 }
  0x4b   :  { %12472 = sst [smem:[#allocation26_spill]] %s8903_s27 }
  0x4c   :  { %12473 = sst [smem:[#allocation27_spill]] %s8908_s4 }
  0x4d   :  { %s8913_s12 = sld [smem:[%s12242_s0 + %s8696_s7]]   ;;  %s8700_s7 = smov 42  }
  0x4e   :  { %s8918_s20 = sld [smem:[%s12242_s0 + %s8697_s15]]   ;;  %s8701_s15 = smov 43  }
  0x4f   :  { %s8923_s27 = sld [smem:[%s12242_s0 + %s8698_s22]]   ;;  %s8702_s22 = smov 44  }
  0x50   :  { %s8928_s4 = sld [smem:[%s12242_s0 + %s8699_s28]]   ;;  %s8703_s28 = smov 45  }
  0x53   :  { %12474 = sst [smem:[#allocation28_spill]] %s8913_s12 }
  0x54   :  { %12475 = sst [smem:[#allocation29_spill]] %s8918_s20 }
  0x55   :  { %12476 = sst [smem:[#allocation30_spill]] %s8923_s27 }
  0x56   :  { %12477 = sst [smem:[#allocation31_spill]] %s8928_s4 }
  0x57   :  { %s8933_s12 = sld [smem:[%s12242_s0 + %s8700_s7]]   ;;  %s8704_s7 = smov 46  }
  0x58   :  { %s8938_s20 = sld [smem:[%s12242_s0 + %s8701_s15]]   ;;  %s8705_s15 = smov 47  }
  0x59   :  { %s8943_s27 = sld [smem:[%s12242_s0 + %s8702_s22]]   ;;  %s8706_s22 = smov 48  }
  0x5a   :  { %s8948_s4 = sld [smem:[%s12242_s0 + %s8703_s28]]   ;;  %s8707_s28 = smov 49  }
  0x5d   :  { %12478 = sst [smem:[#allocation32_spill]] %s8933_s12 }
  0x5e   :  { %12479 = sst [smem:[#allocation33_spill]] %s8938_s20 }
  0x5f   :  { %12480 = sst [smem:[#allocation34_spill]] %s8943_s27 }
  0x60   :  { %12481 = sst [smem:[#allocation35_spill]] %s8948_s4 }
  0x61   :  { %s8953_s12 = sld [smem:[%s12242_s0 + %s8704_s7]]   ;;  %s8708_s7 = smov 50  }
  0x62   :  { %s8958_s20 = sld [smem:[%s12242_s0 + %s8705_s15]]   ;;  %s8975_s15 = smov 0  }
  0x63   :  { %s8963_s27 = sld [smem:[%s12242_s0 + %s8706_s22]]  }
  0x64   :  { %s8968_s4 = sld [smem:[%s12242_s0 + %s8707_s28]]  }
  0x67   :  { %12482 = sst [smem:[#allocation36_spill]] %s8953_s12 }
  0x68   :  { %s8973_s12 = sld [smem:[%s12242_s0 + %s8708_s7]]  }
  0x69 LB: > { %s12483_s3 = sld [smem:[#allocation3_spill]]  ;;  %s7844_s16 = sadd.s32 4294967295, %s8657_s15   ;;  %s8657_s15 = sphi %s8975_s15, %s111_s15  }
  0x6a   : > { %p7848_p0 = scmp.ge.s32.totalorder %s8657_s15, 1  ;;  %p1373_p1 = scmp.lt.s32.totalorder %s8657_s15, 3 }
  0x6c   : > { %p1374_p2 = pnand %p7848_p0, %p1373_p1 }
  0x6e   : > { %1377 = sbr.rel (%p1374_p2) target bundleno = 3839 (0xeff), region = 220 }
  0x73   : > { %s12484_s5 = sld [smem:[#allocation2_spill]]  ;;  %v1521_v0 = vld [vmem:[%s8733_s13 + $0x10] sm:$0xf]  ;;  %vm1563_vm0 = vcmask 1043456   ;;  %v1520_v1 = vld [vmem:[%s8733_s13 + $0x8] sm:$0xff]  ;;  %v1519_v2 = vld [vmem:[%s8733_s13] sm:$0xff] }
  0x74   : > { %7855 = vmatpush.msk.msra.mxu0 %vm1563_vm0, %v1521_v0  ;;  %v8709_v3 = vmov 0   ;;  %p1496_p3 = scmp.lt.s32.totalorder %s7844_s16, 1  ;;  %vm12270_vm1 = vcmask 162816   ;;  %v8525_v12 = vld [vmem:[%s8738_s17] ss:$0 sm:$0xff]  ;;  %s8711_s23 = smov 16  }
  0x75   : > { %8523 = vset.pattern.permute.xlu0 %v8709_v3  ;;  %8524 = vset.pattern.permute.xlu1 %v8709_v3  ;;  %v8526_v15 = vld [vmem:[%s8743_s21] ss:$0 sm:$0xff]  ;;  %s8712_s26 = smov 32   ;;  %s12485_s28 = sld [smem:[#allocation4_spill]] }
  0x76   : > { %1581 = vmatpush.msra.mxu0 %v1520_v1  ;;  %s12868_s16 = smov (!%p1496_p3, %s7844_s16), 1  ;;  %v1764_v31 = vld [vmem:[%s8748_s25] sm:$0xff]  ;;  %s12486_s1 = sld [smem:[#allocation7_spill]] }
  0x77   : > { %s8987_s0 = sshll.u32 %s12868_s16, 5  ;;  %1797 = vmatpush.msra.mxu1 %v1764_v31  ;;  %s12487_s2 = sld [smem:[#allocation8_spill]] }
  0x78   : > { %1582 = vmatpush.msra.mxu0 %v1519_v2  ;;  %s1505_s22 = scalar_lea.vmem %s8728_s9, %s8987_s0  ;;  %s12488_s7 = sld [smem:[#allocation9_spill]] }
  0x79   : > { %s1500_s18 = scalar_lea.vmem %s12484_s5, %s8987_s0  ;;  %v1515_v5 = vld [vmem:[%s1505_s22] sm:$0xff]  ;;  %v1517_v6 = vld [vmem:[%s1505_s22 + $0x10] sm:$0xff]  ;;  %v1516_v8 = vld [vmem:[%s1505_s22 + $0x8] sm:$0xff]  ;;  %s12489_s10 = sld [smem:[#allocation5_spill]] }
  0x7a   : > { %v1511_v4 = vld [vmem:[%s1500_s18] sm:$0xff]  ;;  %1525 = vperm.xlu0 %8523, %v1515_v5   ;;  %1535 = vperm.xlu1 %8524, %v1517_v6   ;;  %v1512_v7 = vld [vmem:[%s1500_s18 + $0x8] sm:$0xff]  ;;  %v1518_v9 = vld [vmem:[%s1505_s22 + $0x18] sm:$0x7f]  ;;  %s12490_s11 = sld [smem:[#allocation6_spill]] }
  0x7b   : > { %7856 = vmatmul.msk.f32.vlgmr.msra.gmra.mxu0 %vm12270_vm1, %v1511_v4  ;;  %v1513_v10 = vld [vmem:[%s1500_s18 + $0x10] sm:$0xff]  ;;  %v1514_v11 = vld [vmem:[%s1500_s18 + $0x18] sm:$0x7f]  ;;  %s12491_s16 = sld [smem:[#allocation10_spill]] }
  0x7c   : > { %s12492_s18 = sld [smem:[#allocation11_spill]] }
  0x7d   : > { %s12493_s22 = sld [smem:[#allocation12_spill]] }
  0x7e   : > { %s12851_s5 = sld [smem:[#allocation36_spill]] }
  0x82   : > { %1530 = vperm.xlu0 %8523, %v1516_v8   ;;  %1540 = vperm.xlu1 %8524, %v1518_v9  }
  0x83   : > { %7857 = vmatmul.msk.f32.gmra.mxu0 %vm12270_vm1, %v1512_v7 }
  0x8b   : > { %7858 = vmatmul.msk.f32.gmra.mxu0 %vm12270_vm1, %v1513_v10 }
  0x93   : > { %7859 = vmatmul.msk.f32.gmra.mxu0 %vm12270_vm1, %v1514_v11 }
  0xec   : > { %v1526_v13 = vpop.permute.xlu0 %1525  ;;  %v1536_v26 = vpop.permute.xlu1 %1535 }
  0xed   : > { %v1546_v14 = vmul.f32 %v8525_v12, %v1526_v13  ;;  %v1548_v29 = vmul.f32 %v8525_v12, %v1536_v26 }
  0xf4   : > { %v1531_v19 = vpop.permute.xlu0 %1530  ;;  %v1541_v40 = vpop.permute.xlu1 %1540 }
  0xf5   : > { %v1547_v21 = vmul.f32 %v8525_v12, %v1531_v19  ;;  %v1549_v43 = vmul.f32 %v8525_v12, %v1541_v40 }
  0xf8   : > { %v1584_v16 = vpop.f32.mrf.mxu0 }
  0xf9   : > { %v1585_v17 = vadd.f32 %v1584_v16, %v1546_v14 }
  0xfb   : > { %v8999_v18 = vadd.f32 %v8526_v15, %v1585_v17 }
  0xfd   : > { %v9002_v20 = vmul.f32 0.70710677, %v8999_v18 }
  0xff   : > { %v1620_v22 = vand.u32 2147483647, %v9002_v20  ;;  %vm1612_vm14 = vcmp.ge.f32.partialorder %v9002_v20, 0.0 }
 0x100   : > { %v1587_v23 = vpop.f32.mrf.mxu0 }
 0x101   : > { %v1624_v24 = vmul.f32 0.3275911, %v1620_v22  ;;  %v1588_v25 = vadd.f32 %v1587_v23, %v1547_v21  ;;  %v1728_v59 = vsub.f32 0.0, %v1620_v22 }
 0x103   : > { %v1628_v27 = vadd.f32 1.0, %v1624_v24  ;;  %v9005_v28 = vadd.f32 %v8526_v15, %v1588_v25  ;;  %v1732_v5 = vmul.f32 %v1728_v59, %v1620_v22 }
 0x105   : > { %8539 = vrcp.f32 %v1628_v27  ;;  %v9008_v30 = vmul.f32 0.70710677, %v9005_v28  ;;  %v1643_v47 = vand.u32 2147483648, %v1628_v27  ;;  %v1641_v50 = vand.u32 2147483647, %v1628_v27 }
 0x106   : > { %vm1637_vm3 = vweird.f32 %v1628_v27  ;;  %v1736_v16 = vmul.f32 1.442695, %v1732_v5 }
 0x107   : > { %v9012_v32 = vand.u32 2147483647, %v9008_v30  ;;  %v1644_v57 = vor.u32 1.1754944e-38, %v1643_v47  ;;  %vm1642_vm5 = vcmp.eq.f32.partialorder %v1641_v50, 8.507059e+37 }
 0x108   : > { %v1590_v33 = vpop.f32.mrf.mxu0 }
 0x109   : > { %v1625_v34 = vmul.f32 0.3275911, %v9012_v32  ;;  %v1591_v35 = vadd.f32 %v1590_v33, %v1548_v29  ;;  %v1729_v13 = vsub.f32 0.0, %v9012_v32 }
 0x10b   : > { %v8540_v36 = vpop.eup %8539  ;;  %v1629_v37 = vadd.f32 1.0, %v1625_v34  ;;  %v9015_v38 = vadd.f32 %v8526_v15, %v1591_v35  ;;  %v1733_v26 = vmul.f32 %v1729_v13, %v9012_v32  ;;  %v1604_v13 = vmul.f32 0.5, %v8999_v18 }
 0x10c   : > { %v1633_v39 = vmul.f32 %v8540_v36, %v1628_v27  ;;  %vm1638_vm2 = vweird.f32 %v8540_v36 }
 0x10d   : > { %8541 = vrcp.f32 %v1629_v37  ;;  %v9018_v41 = vmul.f32 0.70710677, %v9015_v38  ;;  %vm1639_vm4 = vmor %vm1637_vm3, %vm1638_vm2  ;;  %v1658_v0 = vand.u32 2147483648, %v1629_v37  ;;  %v1656_v2 = vand.u32 2147483647, %v1629_v37 }
 0x10e   : > { %v1634_v42 = vsub.f32 1.0, %v1633_v39  ;;  %vm1652_vm7 = vweird.f32 %v1629_v37  ;;  %v1738_v40 = vmul.f32 1.442695, %v1733_v26 }
 0x10f   : > { %v9021_v44 = vand.u32 2147483647, %v9018_v41  ;;  %v1659_v10 = vor.u32 1.1754944e-38, %v1658_v0  ;;  %vm1657_vm9 = vcmp.eq.f32.partialorder %v1656_v2, 8.507059e+37  ;;  %v12273_v0 = vmov -1.0  }
 0x110   : > { %v1593_v45 = vpop.f32.mrf.mxu0  ;;  %v1635_v46 = vmul.f32 %v8540_v36, %v1634_v42 }
 0x111   : > { %v1626_v48 = vmul.f32 0.3275911, %v9021_v44  ;;  %v1594_v49 = vadd.f32 %v1593_v45, %v1549_v43  ;;  %v1730_v42 = vsub.f32 0.0, %v9021_v44 }
 0x112   : > { %v1636_v51 = vadd.f32 %v8540_v36, %v1635_v46 }
 0x113   : > { %v8542_v52 = vpop.eup %8541  ;;  %v1630_v53 = vadd.f32 1.0, %v1626_v48  ;;  %v9024_v54 = vadd.f32 %v8526_v15, %v1594_v49 }
 0x114   : > { %v1648_v55 = vmul.f32 %v8542_v52, %v1629_v37  ;;  %v1640_v56 = vsel %vm1639_vm4, %v8540_v36, %v1636_v51  ;;  %vm1653_vm6 = vweird.f32 %v8542_v52 }
 0x115   : > { %8543 = vrcp.f32 %v1630_v53  ;;  %v9027_v58 = vmul.f32 0.70710677, %v9024_v54  ;;  %v1645_v61 = vsel %vm1642_vm5, %v1644_v57, %v1640_v56  ;;  %vm1654_vm8 = vmor %vm1652_vm7, %vm1653_vm6  ;;  %v1673_v22 = vand.u32 2147483648, %v1630_v53 }
 0x116   : > { %v1649_v60 = vsub.f32 1.0, %v1648_v55  ;;  %v1692_v63 = vmul.f32 1.0614054, %v1645_v61  ;;  %v1671_v25 = vand.u32 2147483647, %v1630_v53  ;;  %vm1667_vm11 = vweird.f32 %v1630_v53 }
 0x117   : > { %v9030_v62 = vand.u32 2147483647, %v9027_v58  ;;  %v1674_v35 = vor.u32 1.1754944e-38, %v1673_v22  ;;  %v1734_v56 = vmul.f32 %v1730_v42, %v9021_v44  ;;  %vm1613_vm5 = vcmp.ge.f32.partialorder %v9008_v30, 0.0 }
 0x118   : > { %v1650_v1 = vmul.f32 %v8542_v52, %v1649_v60  ;;  %v1696_v4 = vadd.f32 -1.4531521, %v1692_v63  ;;  %vm1672_vm13 = vcmp.eq.f32.partialorder %v1671_v25, 8.507059e+37  ;;  %vm1769_vm6 = vcmask 64512  }
 0x119   : > { %v1627_v3 = vmul.f32 0.3275911, %v9030_v62  ;;  %v1731_v44 = vsub.f32 0.0, %v9030_v62  ;;  %vm1614_vm7 = vcmp.ge.f32.partialorder %v9018_v41, 0.0 }
 0x11a   : > { %v1651_v6 = vadd.f32 %v8542_v52, %v1650_v1  ;;  %v1700_v9 = vmul.f32 %v1696_v4, %v1645_v61 }
 0x11b   : > { %v8544_v7 = vpop.eup %8543  ;;  %v9033_v8 = vadd.f32 1.0, %v1627_v3 }
 0x11c   : > { %v1663_v11 = vmul.f32 %v8544_v7, %v1630_v53  ;;  %v1655_v12 = vsel %vm1654_vm8, %v8542_v52, %v1651_v6  ;;  %v1704_v14 = vadd.f32 1.4214138, %v1700_v9  ;;  %vm1668_vm10 = vweird.f32 %v8544_v7 }
 0x11d   : > { %8545 = vrcp.f32 %v9033_v8  ;;  %v1660_v15 = vsel %vm1657_vm9, %v1659_v10, %v1655_v12  ;;  %vm1669_vm12 = vmor %vm1667_vm11, %vm1668_vm10  ;;  %v1686_v49 = vand.u32 2147483647, %v9033_v8  ;;  %v1688_v50 = vand.u32 2147483648, %v9033_v8 }
 0x11e   : > { %v1664_v17 = vsub.f32 1.0, %v1663_v11  ;;  %v1693_v19 = vmul.f32 1.0614054, %v1660_v15  ;;  %v1708_v21 = vmul.f32 %v1704_v14, %v1645_v61  ;;  %8547 = vpow2.f32 %v1736_v16 }
 0x11f   : > { %8549 = vpow2.f32 %v1738_v40  ;;  %vm1682_vm2 = vweird.f32 %v9033_v8  ;;  %v1689_v2 = vor.u32 1.1754944e-38, %v1688_v50  ;;  %vm1687_vm4 = vcmp.eq.f32.partialorder %v1686_v49, 8.507059e+37 }
 0x120   : > { %v1697_v23 = vadd.f32 -1.4531521, %v1693_v19  ;;  %v1665_v24 = vmul.f32 %v8544_v7, %v1664_v17  ;;  %v1712_v27 = vadd.f32 -0.28449672, %v1708_v21  ;;  %v1740_v6 = vmul.f32 1.442695, %v1734_v56 }
 0x121   : > { %v1735_v19 = vmul.f32 %v1731_v44, %v9030_v62  ;;  %v1618_v40 = vsel %vm1614_vm7, 1.0, %v12273_v0  ;;  %vm1615_vm8 = vcmp.ge.f32.partialorder %v9027_v58, 0.0 }
 0x122   : > { %v1701_v29 = vmul.f32 %v1697_v23, %v1660_v15  ;;  %v1666_v31 = vadd.f32 %v8544_v7, %v1665_v24  ;;  %v1716_v34 = vmul.f32 %v1712_v27, %v1645_v61  ;;  %8551 = vpow2.f32 %v1740_v6 }
 0x123   : > { %v8546_v33 = vpop.eup %8545  ;;  %v1742_v30 = vmul.f32 1.442695, %v1735_v19  ;;  %v1605_v27 = vmul.f32 0.5, %v9005_v28  ;;  %v1606_v28 = vmul.f32 0.5, %v9015_v38  ;;  %v1619_v49 = vsel %vm1615_vm8, 1.0, %v12273_v0 }
 0x124   : > { %v1678_v36 = vmul.f32 %v8546_v33, %v9033_v8  ;;  %v1705_v37 = vadd.f32 1.4214138, %v1701_v29  ;;  %v1670_v39 = vsel %vm1669_vm12, %v8544_v7, %v1666_v31  ;;  %v1720_v43 = vadd.f32 0.2548296, %v1716_v34  ;;  %v8548_v51 = vpop.eup %8547  ;;  %v8527_v38 = vld [vmem:[%s8753_s29] ss:$0 sm:$0xff] }
 0x125   : > { %v1675_v45 = vsel %vm1672_vm13, %v1674_v35, %v1670_v39  ;;  %vm1683_vm15 = vweird.f32 %v8546_v33  ;;  %v8550_v12 = vpop.eup %8549  ;;  %8553 = vpow2.f32 %v1742_v30 }
 0x126   : > { %v1679_v32 = vsub.f32 1.0, %v1678_v36  ;;  %v1709_v46 = vmul.f32 %v1705_v37, %v1660_v15  ;;  %v1694_v47 = vmul.f32 1.0614054, %v1675_v45  ;;  %v1724_v48 = vmul.f32 %v1720_v43, %v1645_v61  ;;  %vm1684_vm3 = vmor %vm1682_vm2, %vm1683_vm15 }
 0x127   : > { %v1616_v61 = vsel %vm1612_vm14, 1.0, %v12273_v0 }
 0x128   : > { %v1713_v52 = vadd.f32 -0.28449672, %v1709_v46  ;;  %v1698_v53 = vadd.f32 -1.4531521, %v1694_v47  ;;  %v1680_v55 = vmul.f32 %v8546_v33, %v1679_v32  ;;  %v1744_v57 = vmul.f32 %v8548_v51, %v1724_v48  ;;  %v8552_v34 = vpop.eup %8551 }
 0x129   : > { %v1607_v51 = vmul.f32 0.5, %v9024_v54 }
 0x12a   : > { %v1717_v59 = vmul.f32 %v1713_v52, %v1660_v15  ;;  %v1702_v60 = vmul.f32 %v1698_v53, %v1675_v45  ;;  %v1681_v63 = vadd.f32 %v8546_v33, %v1680_v55  ;;  %v1748_v1 = vsub.f32 1.0, %v1744_v57 }
 0x12b   : > { %v8554_v46 = vpop.eup %8553 }
 0x12c   : > { %v1721_v3 = vadd.f32 0.2548296, %v1717_v59  ;;  %v1706_v4 = vadd.f32 1.4214138, %v1702_v60  ;;  %v1685_v5 = vsel %vm1684_vm3, %v8546_v33, %v1681_v63  ;;  %v1752_v7 = vmul.f32 %v1748_v1, %v1616_v61 }
 0x12d   : > { %v1690_v9 = vsel %vm1687_vm4, %v1689_v2, %v1685_v5 }
 0x12e   : > { %v1725_v10 = vmul.f32 %v1721_v3, %v1660_v15  ;;  %v1710_v11 = vmul.f32 %v1706_v4, %v1675_v45  ;;  %v1695_v8 = vmul.f32 1.0614054, %v1690_v9  ;;  %v1756_v20 = vadd.f32 1.0, %v1752_v7 }
 0x12f   : > { %v1617_v15 = vsel %vm1613_vm5, 1.0, %v12273_v0 }
 0x130   : > { %v1745_v14 = vmul.f32 %v8550_v12, %v1725_v10  ;;  %v1714_v16 = vadd.f32 -0.28449672, %v1710_v11  ;;  %v1699_v17 = vadd.f32 -1.4531521, %v1695_v8  ;;  %v1760_v21 = vmul.f32 %v1756_v20, %v1604_v13 }
 0x132   : > { %v1749_v22 = vsub.f32 1.0, %v1745_v14  ;;  %v1718_v23 = vmul.f32 %v1714_v16, %v1675_v45  ;;  %v1703_v24 = vmul.f32 %v1699_v17, %v1690_v9  ;;  %7860 = vmatmul.msk.f32.vlgmr.msra.gmra.mxu1 %vm1769_vm6, %v1760_v21 }
 0x134   : > { %v1753_v25 = vmul.f32 %v1749_v22, %v1617_v15  ;;  %v1722_v18 = vadd.f32 0.2548296, %v1718_v23  ;;  %v1707_v26 = vadd.f32 1.4214138, %v1703_v24 }
 0x136   : > { %v1757_v29 = vadd.f32 1.0, %v1753_v25  ;;  %v1726_v31 = vmul.f32 %v1722_v18, %v1675_v45  ;;  %v1711_v33 = vmul.f32 %v1707_v26, %v1690_v9 }
 0x138   : > { %v1761_v62 = vmul.f32 %v1757_v29, %v1605_v27  ;;  %v1746_v35 = vmul.f32 %v8552_v34, %v1726_v31  ;;  %v1715_v36 = vadd.f32 -0.28449672, %v1711_v33 }
 0x13a   : > { %v1750_v37 = vsub.f32 1.0, %v1746_v35  ;;  %v1719_v39 = vmul.f32 %v1715_v36, %v1690_v9  ;;  %7861 = vmatmul.msk.f32.gmra.mxu1 %vm1769_vm6, %v1761_v62 }
 0x13c   : > { %v1754_v42 = vmul.f32 %v1750_v37, %v1618_v40  ;;  %v1723_v43 = vadd.f32 0.2548296, %v1719_v39 }
 0x13e   : > { %v1758_v45 = vadd.f32 1.0, %v1754_v42  ;;  %v1727_v32 = vmul.f32 %v1723_v43, %v1690_v9 }
 0x140   : > { %v1762_v41 = vmul.f32 %v1758_v45, %v1606_v28  ;;  %v1747_v47 = vmul.f32 %v8554_v46, %v1727_v32 }
 0x142   : > { %v1751_v48 = vsub.f32 1.0, %v1747_v47  ;;  %7862 = vmatmul.msk.f32.gmra.mxu1 %vm1769_vm6, %v1762_v41 }
 0x144   : > { %v1755_v50 = vmul.f32 %v1751_v48, %v1619_v49 }
 0x146   : > { %v1759_v52 = vadd.f32 1.0, %v1755_v50 }
 0x148   : > { %v1763_v53 = vmul.f32 %v1759_v52, %v1607_v51 }
 0x14a   : > { %7863 = vmatmul.msk.f32.gmra.mxu1 %vm1769_vm6, %v1763_v53 }
 0x1af   : > { %v1799_v55 = vpop.f32.mrf.mxu1 }
 0x1b0   : > { %v9065_v56 = vadd.f32 %v8527_v38, %v1799_v55 }
 0x1b2   : > { %v9068_v58 = vmul.f32 0.70710677, %v9065_v56 }
 0x1b4   : > { %v1827_v57 = vand.u32 2147483647, %v9068_v58  ;;  %vm1819_vm7 = vcmp.ge.f32.partialorder %v9068_v58, 0.0  ;;  %v1811_v58 = vmul.f32 0.5, %v9065_v56 }
 0x1b6   : > { %v1831_v59 = vmul.f32 0.3275911, %v1827_v57  ;;  %v1935_v15 = vsub.f32 0.0, %v1827_v57 }
 0x1b7   : > { %v1802_v60 = vpop.f32.mrf.mxu1 }
 0x1b8   : > { %v1835_v63 = vadd.f32 1.0, %v1831_v59  ;;  %v9071_v61 = vadd.f32 %v8527_v38, %v1802_v60  ;;  %v1939_v62 = vmul.f32 %v1935_v15, %v1827_v57  ;;  %v1823_v15 = vsel %vm1819_vm7, 1.0, %v12273_v0 }
 0x1b9   : > { %vm12322_vm7 = vcmask 1044480  }
 0x1ba   : > { %8555 = vrcp.f32 %v1835_v63  ;;  %v9074_v54 = vmul.f32 0.70710677, %v9071_v61  ;;  %v1850_v8 = vand.u32 2147483648, %v1835_v63  ;;  %v1848_v13 = vand.u32 2147483647, %v1835_v63 }
 0x1bb   : > { %vm1844_vm10 = vweird.f32 %v1835_v63  ;;  %v1943_v45 = vmul.f32 1.442695, %v1939_v62 }
 0x1bc   : > { %v9077_v1 = vand.u32 2147483647, %v9074_v54  ;;  %v1851_v23 = vor.u32 1.1754944e-38, %v1850_v8  ;;  %vm1849_vm12 = vcmp.eq.f32.partialorder %v1848_v13, 8.507059e+37 }
 0x1be   : > { %v1832_v2 = vmul.f32 0.3275911, %v9077_v1 }
 0x1bf   : > { %v1805_v3 = vpop.f32.mrf.mxu1 }
 0x1c0   : > { %v8556_v4 = vpop.eup %8555  ;;  %v1836_v5 = vadd.f32 1.0, %v1832_v2  ;;  %v9080_v6 = vadd.f32 %v8527_v38, %v1805_v3 }
 0x1c1   : > { %v1840_v44 = vmul.f32 %v8556_v4, %v1835_v63  ;;  %vm1845_vm9 = vweird.f32 %v8556_v4 }
 0x1c2   : > { %8557 = vrcp.f32 %v1836_v5  ;;  %v9083_v7 = vmul.f32 0.70710677, %v9080_v6  ;;  %vm1846_vm11 = vmor %vm1844_vm10, %vm1845_vm9  ;;  %v1865_v29 = vand.u32 2147483648, %v1836_v5  ;;  %v1863_v34 = vand.u32 2147483647, %v1836_v5 }
 0x1c3   : > { %v1841_v9 = vsub.f32 1.0, %v1840_v44  ;;  %vm1859_vm14 = vweird.f32 %v1836_v5 }
 0x1c4   : > { %v9086_v10 = vand.u32 2147483647, %v9083_v7  ;;  %v1866_v43 = vor.u32 1.1754944e-38, %v1865_v29  ;;  %vm1864_vm2 = vcmp.eq.f32.partialorder %v1863_v34, 8.507059e+37 }
 0x1c5   : > { %v1842_v11 = vmul.f32 %v8556_v4, %v1841_v9 }
 0x1c6   : > { %v1833_v12 = vmul.f32 0.3275911, %v9086_v10  ;;  %v1937_v9 = vsub.f32 0.0, %v9086_v10 }
 0x1c7   : > { %v1808_v20 = vpop.f32.mrf.mxu1  ;;  %v1843_v14 = vadd.f32 %v8556_v4, %v1842_v11 }
 0x1c8   : > { %v8558_v16 = vpop.eup %8557  ;;  %v1837_v17 = vadd.f32 1.0, %v1833_v12  ;;  %v9089_v19 = vadd.f32 %v8527_v38, %v1808_v20 }
 0x1c9   : > { %v1855_v21 = vmul.f32 %v8558_v16, %v1836_v5  ;;  %v1847_v22 = vsel %vm1846_vm11, %v8556_v4, %v1843_v14  ;;  %vm1860_vm13 = vweird.f32 %v8558_v16 }
 0x1ca   : > { %8559 = vrcp.f32 %v1837_v17  ;;  %v9092_v24 = vmul.f32 0.70710677, %v9089_v19  ;;  %v1852_v18 = vsel %vm1849_vm12, %v1851_v23, %v1847_v22  ;;  %vm1861_vm15 = vmor %vm1859_vm14, %vm1860_vm13  ;;  %v1880_v47 = vand.u32 2147483648, %v1837_v17 }
 0x1cb   : > { %v1856_v25 = vsub.f32 1.0, %v1855_v21  ;;  %v1899_v30 = vmul.f32 1.0614054, %v1852_v18  ;;  %v1878_v50 = vand.u32 2147483647, %v1837_v17  ;;  %vm1874_vm4 = vweird.f32 %v1837_v17 }
 0x1cc   : > { %v9095_v26 = vand.u32 2147483647, %v9092_v24  ;;  %v1881_v57 = vor.u32 1.1754944e-38, %v1880_v47  ;;  %vm1821_vm12 = vcmp.ge.f32.partialorder %v9083_v7, 0.0  ;;  %vm1820_vm13 = vcmp.ge.f32.partialorder %v9074_v54, 0.0 }
 0x1cd   : > { %v1857_v27 = vmul.f32 %v8558_v16, %v1856_v25  ;;  %v1903_v33 = vadd.f32 -1.4531521, %v1899_v30  ;;  %vm1879_vm6 = vcmp.eq.f32.partialorder %v1878_v50, 8.507059e+37  ;;  %v1941_v25 = vmul.f32 %v1937_v9, %v9086_v10 }
 0x1ce   : > { %v1834_v31 = vmul.f32 0.3275911, %v9095_v26  ;;  %v1938_v34 = vsub.f32 0.0, %v9095_v26  ;;  %vm1822_vm14 = vcmp.ge.f32.partialorder %v9092_v24, 0.0  ;;  %v1813_v54 = vmul.f32 0.5, %v9080_v6 }
 0x1cf   : > { %v1858_v35 = vadd.f32 %v8558_v16, %v1857_v27  ;;  %v1907_v39 = vmul.f32 %v1903_v33, %v1852_v18 }
 0x1d0   : > { %v8560_v36 = vpop.eup %8559  ;;  %v1838_v37 = vadd.f32 1.0, %v1834_v31 }
 0x1d1   : > { %v1870_v40 = vmul.f32 %v8560_v36, %v1837_v17  ;;  %v1862_v42 = vsel %vm1861_vm15, %v8558_v16, %v1858_v35  ;;  %v1911_v28 = vadd.f32 1.4214138, %v1907_v39  ;;  %vm1875_vm3 = vweird.f32 %v8560_v36 }
 0x1d2   : > { %8561 = vrcp.f32 %v1838_v37  ;;  %v9098_v46 = vsel %vm1864_vm2, %v1866_v43, %v1862_v42  ;;  %vm1876_vm5 = vmor %vm1874_vm4, %vm1875_vm3  ;;  %v1893_v8 = vand.u32 2147483647, %v1838_v37  ;;  %v1895_v12 = vand.u32 2147483648, %v1838_v37 }
 0x1d3   : > { %v1871_v32 = vsub.f32 1.0, %v1870_v40  ;;  %v1915_v41 = vmul.f32 %v1911_v28, %v1852_v18  ;;  %v1900_v48 = vmul.f32 1.0614054, %v9098_v46  ;;  %8563 = vpow2.f32 %v1943_v45 }
 0x1d4   : > { %v1936_v17 = vsub.f32 0.0, %v9077_v1  ;;  %vm1889_vm9 = vweird.f32 %v1838_v37  ;;  %v1896_v30 = vor.u32 1.1754944e-38, %v1895_v12  ;;  %vm1894_vm11 = vcmp.eq.f32.partialorder %v1893_v8, 8.507059e+37 }
 0x1d5   : > { %v1872_v49 = vmul.f32 %v8560_v36, %v1871_v32  ;;  %v1919_v51 = vadd.f32 -0.28449672, %v1915_v41  ;;  %v1904_v52 = vadd.f32 -1.4531521, %v1900_v48  ;;  %v1947_v39 = vmul.f32 1.442695, %v1941_v25 }
 0x1d6   : > { %v1940_v33 = vmul.f32 %v1936_v17, %v9077_v1  ;;  %v1942_v45 = vmul.f32 %v1938_v34, %v9095_v26  ;;  %v1826_v8 = vsel %vm1822_vm14, 1.0, %v12273_v0  ;;  %vm12272_vm15 = vcmask 1046528   ;;  %v9156_v25 = vld [vmem:[%s8773_s19 + $0x28] sm:$0xff]  ;;  %v9182_v34 = vld [vmem:[%s8778_s24 + $0x20] sm:$0xff] }
 0x1d7   : > { %v1873_v53 = vadd.f32 %v8560_v36, %v1872_v49  ;;  %v1923_v55 = vmul.f32 %v1919_v51, %v1852_v18  ;;  %v1908_v59 = vmul.f32 %v1904_v52, %v9098_v46  ;;  %8565 = vpow2.f32 %v1947_v39  ;;  %v9208_v39 = vld [vmem:[%s8778_s24 + $0x60] sm:$0xff] }
 0x1d8   : > { %v8562_v38 = vpop.eup %8561  ;;  %v1945_v28 = vmul.f32 1.442695, %v1940_v33  ;;  %v1949_v49 = vmul.f32 1.442695, %v1942_v45  ;;  %v1812_v17 = vmul.f32 0.5, %v9071_v61  ;;  %vm1974_vm2 = vcmask 252928  }
 0x1d9   : > { %v1885_v60 = vmul.f32 %v8562_v38, %v1838_v37  ;;  %v1877_v63 = vsel %vm1876_vm5, %v8560_v36, %v1873_v53  ;;  %v1927_v2 = vadd.f32 0.2548296, %v1923_v55  ;;  %v1912_v4 = vadd.f32 1.4214138, %v1908_v59  ;;  %v8564_v13 = vpop.eup %8563  ;;  %v1972_v61 = vld [vmem:[%s12483_s3 + $0x8] sm:$0xff]  ;;  %v9179_v33 = vld [vmem:[%s8778_s24] sm:$0xff] }
 0x1da   : > { %v1882_v3 = vsel %vm1879_vm6, %v1881_v57, %v1877_v63  ;;  %vm1890_vm8 = vweird.f32 %v8562_v38  ;;  %8567 = vpow2.f32 %v1945_v28  ;;  %vm12268_vm3 = vcmask 130048   ;;  %v9224_v28 = vld [vmem:[%s8773_s19 + $0x10] sm:$0xff]  ;;  %v9231_v45 = vld [vmem:[%s8773_s19 + $0x60] sm:$0xff] }
 0x1db   : > { %v1886_v5 = vsub.f32 1.0, %v1885_v60  ;;  %v1901_v44 = vmul.f32 1.0614054, %v1882_v3  ;;  %v1931_v11 = vmul.f32 %v1927_v2, %v1852_v18  ;;  %v1916_v16 = vmul.f32 %v1912_v4, %v9098_v46  ;;  %vm1891_vm10 = vmor %vm1889_vm9, %vm1890_vm8 }
 0x1dc   : > { %8569 = vpow2.f32 %v1949_v49  ;;  %v7874_v49 = vld [vmem:[%s8778_s24 + $0x18] sm:$0xff]  ;;  %vm3078_vm4 = vcmask 1040384   ;;  %vm3080_vm5 = vcmask 1041408   ;;  %vm3082_vm6 = vcmask 1042432  }
 0x1dd   : > { %v1887_v20 = vmul.f32 %v8562_v38, %v1886_v5  ;;  %v1905_v14 = vadd.f32 -1.4531521, %v1901_v44  ;;  %v1951_v21 = vmul.f32 %v8564_v13, %v1931_v11  ;;  %v1920_v31 = vadd.f32 -0.28449672, %v1916_v16  ;;  %v8566_v26 = vpop.eup %8565 }
 0x1de   : > { %v1824_v11 = vsel %vm1820_vm13, 1.0, %v12273_v0  ;;  %v1814_v13 = vmul.f32 0.5, %v9089_v19  ;;  %vm12321_vm8 = vcmask 1045504   ;;  %vm12269_vm9 = vcmask 179200  }
 0x1df   : > { %v1888_v22 = vadd.f32 %v8562_v38, %v1887_v20  ;;  %v1909_v23 = vmul.f32 %v1905_v14, %v1882_v3  ;;  %v1955_v18 = vsub.f32 1.0, %v1951_v21  ;;  %v1924_v43 = vmul.f32 %v1920_v31, %v9098_v46  ;;  %v1971_v21 = vld [vmem:[%s12483_s3] sm:$0xff]  ;;  %v9176_v31 = vld [vmem:[%s8778_s24 + $0x48] sm:$0xff] }
 0x1e0   : > { %v8568_v57 = vpop.eup %8567  ;;  %2272 = vmatpush.msrb.mxu1 %v9176_v31 }
 0x1e1   : > { %v1892_v27 = vsel %vm1891_vm10, %v8562_v38, %v1888_v22  ;;  %v1913_v29 = vadd.f32 1.4214138, %v1909_v23  ;;  %v1959_v62 = vmul.f32 %v1955_v18, %v1823_v15  ;;  %v1928_v48 = vadd.f32 0.2548296, %v1924_v43  ;;  %v1973_v22 = vld [vmem:[%s12483_s3 + $0x10] sm:$0x3f] }
 0x1e2   : > { %v1897_v35 = vsel %vm1894_vm11, %v1896_v30, %v1892_v27  ;;  %v8570_v4 = vpop.eup %8569  ;;  %v9149_v23 = vld [vmem:[%s8773_s19 + $0x8] sm:$0xff]  ;;  %v9153_v15 = vld [vmem:[%s8773_s19] sm:$0xff]  ;;  %s12535_s3 = sld [smem:[#allocation20_spill]] }
 0x1e3   : > { %v1902_v36 = vmul.f32 1.0614054, %v1897_v35  ;;  %v1917_v37 = vmul.f32 %v1913_v29, %v1882_v3  ;;  %v1963_v40 = vadd.f32 1.0, %v1959_v62  ;;  %v1932_v53 = vmul.f32 %v1928_v48, %v9098_v46  ;;  %2034 = vmatpush.msra.mxu3 %v9149_v23  ;;  %v9161_v18 = vld [vmem:[%s8773_s19 + $0x20] sm:$0xff]  ;;  %v9165_v30 = vld [vmem:[%s8778_s24 + $0x8] sm:$0xff] }
 0x1e4   : > { %v1825_v46 = vsel %vm1821_vm12, 1.0, %v12273_v0  ;;  %v9168_v27 = vld [vmem:[%s8778_s24 + $0x28] sm:$0xff]  ;;  %v9187_v62 = vld [vmem:[%s8773_s19 + $0x40] sm:$0xff] }
 0x1e5   : > { %v1906_v10 = vadd.f32 -1.4531521, %v1902_v36  ;;  %v1921_v42 = vadd.f32 -0.28449672, %v1917_v37  ;;  %v9115_v32 = vmul.f32 %v1963_v40, %v1811_v58  ;;  %v1952_v60 = vmul.f32 %v8568_v57, %v1932_v53  ;;  %2035 = vmatpush.msra.mxu3 %v9153_v15  ;;  %v9171_v29 = vld [vmem:[%s8773_s19 + $0x48] sm:$0xff]  ;;  %2166 = vmatpush.msrb.mxu0 %v9168_v27  ;;  %v9197_v36 = vld [vmem:[%s8778_s24 + $0x38] sm:$0xff] }
 0x1e6   : > { %v9201_v37 = vld [vmem:[%s8778_s24 + $0x68] sm:$0xff]  ;;  %v9204_v58 = vld [vmem:[%s8778_s24 + $0x30] sm:$0xff]  ;;  %v9213_v40 = vld [vmem:[%s8773_s19 + $0x18] sm:$0xff] }
 0x1e7   : > { %v1910_v1 = vmul.f32 %v1906_v10, %v1897_v35  ;;  %v1925_v41 = vmul.f32 %v1921_v42, %v1882_v3  ;;  %7449 = vrot.lane.b32.xlu1 %v9115_v32, %s8711_s23  ;;  %v1956_v5 = vsub.f32 1.0, %v1952_v60  ;;  %2060 = vmatpush.msrb.mxu3 %v9165_v30  ;;  %v9221_v43 = vld [vmem:[%s8773_s19 + $0x68] sm:$0xff]  ;;  %v7873_v53 = vld [vmem:[%s8778_s24 + $0x10] sm:$0xff] }
 0x1e8   : > { %2167 = vmatpush.msrb.mxu0 %v9182_v34 }
 0x1e9   : > { %v1914_v47 = vadd.f32 1.4214138, %v1910_v1  ;;  %v1929_v56 = vadd.f32 0.2548296, %v1925_v41  ;;  %v1960_v7 = vmul.f32 %v1956_v5, %v1824_v11  ;;  %2061 = vmatpush.msrb.mxu3 %v9179_v33  ;;  %v9297_v5 = vld [vmem:[%s8773_s19 + $0xa8] sm:$0xff]  ;;  %v9314_v11 = vld [vmem:[%s8773_s19 + $0xa0] sm:$0xff] }
 0x1ea   : > { %2219 = vmatpush.msra.mxu0 %v9197_v36 }
 0x1eb   : > { %v1918_v50 = vmul.f32 %v1914_v47, %v1897_v35  ;;  %v1933_v51 = vmul.f32 %v1929_v56, %v1882_v3  ;;  %v1964_v16 = vadd.f32 1.0, %v1960_v7 }
 0x1ec   : > { %2220 = vmatpush.msra.mxu0 %v9204_v58 }
 0x1ed   : > { %v1922_v52 = vadd.f32 -0.28449672, %v1918_v50  ;;  %v1953_v55 = vmul.f32 %v8566_v26, %v1933_v51  ;;  %v9138_v6 = vmul.f32 %v1964_v16, %v1812_v17  ;;  %v9244_v50 = vld [vmem:[%s8778_s24 + $0x58] sm:$0xff]  ;;  %v9253_v51 = vld [vmem:[%s8773_s19 + $0x88] sm:$0xff]  ;;  %v9266_v26 = vld [vmem:[%s8778_s24 + $0x50] sm:$0xff] }
 0x1ef   : > { %v1926_v38 = vmul.f32 %v1922_v52, %v1897_v35  ;;  %v1957_v2 = vsub.f32 1.0, %v1953_v55  ;;  %v9256_v52 = vld [vmem:[%s8778_s24 + $0x88] sm:$0xff]  ;;  %v9273_v55 = vld [vmem:[%s8778_s24 + $0x80] sm:$0xff] }
 0x1f1   : > { %v1930_v59 = vadd.f32 0.2548296, %v1926_v38  ;;  %v1961_v9 = vmul.f32 %v1957_v2, %v1825_v46  ;;  %v9270_v38 = vld [vmem:[%s8773_s19 + $0x80] sm:$0xff]  ;;  %v9300_v46 = vld [vmem:[%s8778_s24 + $0xa8] sm:$0xff] }
 0x1f3   : > { %v1934_v63 = vmul.f32 %v1930_v59, %v1897_v35  ;;  %v1965_v14 = vadd.f32 1.0, %v1961_v9  ;;  %v9190_v35 = vld [vmem:[%s8778_s24 + $0x40] sm:$0xff]  ;;  %v9310_v9 = vld [vmem:[%s8778_s24 + $0x70] sm:$0xff] }
 0x1f4   : > { %2273 = vmatpush.msrb.mxu1 %v9190_v35 }
 0x1f5   : > { %v1954_v3 = vmul.f32 %v8570_v4, %v1934_v63  ;;  %v9135_v19 = vmul.f32 %v1965_v14, %v1813_v54  ;;  %v7883_v4 = vld [vmem:[%s8773_s19 + $0x38] sm:$0xff]  ;;  %v7894_v14 = vld [vmem:[%s8773_s19 + $0x50] sm:$0xff] }
 0x1f6   : > { %2378 = vmatpush.msra.mxu1 %v9201_v37  ;;  %v9340_v54 = vld [vmem:[%s8778_s24 + $0x90] sm:$0xff] }
 0x1f7   : > { %v1958_v44 = vsub.f32 1.0, %v1954_v3  ;;  %v9288_v3 = vld [vmem:[%s8778_s24 + $0x78] sm:$0xff] }
 0x1f8   : > { %2379 = vmatpush.msra.mxu1 %v9208_v39 }
 0x1f9   : > { %v1962_v12 = vmul.f32 %v1958_v44, %v1826_v8  ;;  %v7882_v44 = vld [vmem:[%s8773_s19 + $0x30] sm:$0xff]  ;;  %v9317_v8 = vld [vmem:[%s8778_s24 + $0xa0] sm:$0xff] }
 0x1fb   : > { %v1966_v20 = vadd.f32 1.0, %v1962_v12 }
 0x1fd   : > { %v9128_v24 = vmul.f32 %v1966_v20, %v1814_v13  ;;  %v7895_v13 = vld [vmem:[%s8773_s19 + $0x58] sm:$0xff] }
 0x1fe   : > { %v9328_v20 = vld [vmem:[%s8778_s24 + $0x98] sm:$0xff] }
 0x1ff   : > { %7864 = vmatpush.msk.msra.mxu2 %vm12272_vm15, %v9128_v24  ;;  %7455 = vrot.lane.b32.xlu1 %v9128_v24, %s8711_s23 }
 0x201   : > { %2001 = vmatpush.msra.mxu2 %v9135_v19 }
 0x203   : > { %2002 = vmatpush.msra.mxu2 %v9138_v6 }
 0x205   : > { %2003 = vmatpush.msra.mxu2 %v9115_v32 }
 0x206   : > { %7865 = vmatmul.msk.f32.vlgmr.msra.gmra.mxu2 %vm1974_vm2, %v1971_v21 }
 0x207   : > { %2140 = vmatpush.msrb.mxu2 %v9156_v25 }
 0x209   : > { %2141 = vmatpush.msrb.mxu2 %v9161_v18 }
 0x20b   : > { %2246 = vmatpush.msra.mxu2 %v9171_v29 }
 0x20d   : > { %2247 = vmatpush.msra.mxu2 %v9187_v62 }
 0x20e   : > { %7866 = vmatmul.msk.f32.gmra.mxu2 %vm1974_vm2, %v1972_v61 }
 0x216   : > { %7867 = vmatmul.msk.f32.gmra.mxu2 %vm1974_vm2, %v1973_v22  ;;  %v7907_v22 = vld [vmem:[%s8773_s19 + $0x78] sm:$0xff] }
 0x289   : > { %v9215_v10 = vpop.f32.mrf.mxu2 }
 0x28a   : > { %7868 = vmatmul.msk.f32.vlgmr.msra.gmra.mxu3 %vm12268_vm3, %v9215_v10  ;;  %v2123_v42 = vrot.slane %v9215_v10, 2  ;;  %v2229_v48 = vrot.slane %v9215_v10, 4  ;;  %v2070_v60 = vrot.slane %v9215_v10, 1  ;;  %v2335_v2 = vrot.slane %v9215_v10, 6 }
 0x28b   : > { %2087 = vmatpush.msra.mxu3 %v9213_v40  ;;  %v2176_v21 = vrot.slane %v9215_v10, 3 }
 0x28c   : > { %7878 = vmatmul.msk.f32.vlgmr.msrb.gmra.mxu2 %vm12268_vm3, %v2123_v42 }
 0x28d   : > { %2352 = vmatpush.msrb.mxu2 %v9221_v43  ;;  %2088 = vmatpush.msra.mxu3 %v9224_v28 }
 0x28f   : > { %2353 = vmatpush.msrb.mxu2 %v9231_v45 }
 0x291   : > { %v9236_v1 = vpop.f32.mrf.mxu2 }
 0x292   : > { %v2043_v41 = vrot.slane %v9236_v1, 3  ;;  %v2149_v47 = vrot.slane %v9236_v1, 5  ;;  %v2255_v56 = vrot.slane %v9236_v1, 7  ;;  %v2202_v57 = vrot.slane %v9236_v1, 6 }
 0x293   : > { %v2096_v12 = vrot.slane %v9236_v1, 4  ;;  %v2546_v61 = vrot.slane %v9236_v1, 2 }
 0x294   : > { %7869 = vmatmul.msk.f32.vlgmr.msrb.gmra.mxu3 %vm12268_vm3, %v2043_v41  ;;  %7881 = vmatmul.msk.f32.vlgmr.msrb.gmra.mxu0 %vm12268_vm3, %v2149_v47 }
 0x295   : > { %7890 = vmatmul.msk.f32.vlgmr.msra.gmra.mxu2 %vm12268_vm3, %v2229_v48  ;;  %7893 = vmatmul.msk.f32.vlgmr.msrb.gmra.mxu1 %vm12268_vm3, %v2255_v56 }
 0x296   : > { %2113 = vmatpush.msrb.mxu3 %v7874_v49  ;;  %2325 = vmatpush.msrb.mxu0 %v9244_v50 }
 0x297   : > { %2457 = vmatpush.msra.mxu2 %v9253_v51  ;;  %2483 = vmatpush.msrb.mxu1 %v9256_v52 }
 0x298   : > { %2114 = vmatpush.msrb.mxu3 %v7873_v53  ;;  %2326 = vmatpush.msrb.mxu0 %v9266_v26 }
 0x299   : > { %v9279_v59 = vpop.f32.mrf.mxu2  ;;  %2458 = vmatpush.msra.mxu2 %v9270_v38  ;;  %2484 = vmatpush.msrb.mxu1 %v9273_v55 }
 0x29a   : > { %v2361_v63 = vrot.slane %v9279_v59, 1  ;;  %v2466_v7 = vrot.slane %v9279_v59, 3  ;;  %v2414_v16 = vrot.slane %v9279_v59, 2  ;;  %v2572_v17 = vrot.slane %v9279_v59, 5 }
 0x29c   : > { %7872 = vmatmul.msk.f32.vlgmr.msra.gmra.mxu3 %vm12268_vm3, %v2070_v60  ;;  %7887 = vmatmul.msk.f32.vlgmr.msra.gmra.mxu0 %vm12268_vm3, %v2202_v57 }
 0x29d   : > { %7902 = vmatmul.msk.f32.vlgmr.msrb.gmra.mxu2 %vm12268_vm3, %v2335_v2  ;;  %7905 = vmatmul.msk.f32.vlgmr.msra.gmra.mxu1 %vm12268_vm3, %v2361_v63 }
 0x29e   : > { %2193 = vmatpush.msra.mxu3 %v7883_v4  ;;  %2431 = vmatpush.msra.mxu0 %v9288_v3 }
 0x29f   : > { %2563 = vmatpush.msrb.mxu2 %v9297_v5  ;;  %2589 = vmatpush.msra.mxu1 %v9300_v46 }
 0x2a0   : > { %2194 = vmatpush.msra.mxu3 %v7882_v44  ;;  %2432 = vmatpush.msra.mxu0 %v9310_v9 }
 0x2a1   : > { %2564 = vmatpush.msrb.mxu2 %v9314_v11  ;;  %2590 = vmatpush.msra.mxu1 %v9317_v8 }
 0x2a4   : > { %7875 = vmatmul.msk.f32.vlgmr.msrb.gmra.mxu3 %vm12268_vm3, %v2096_v12  ;;  %7899 = vmatmul.msk.f32.vlgmr.msrb.gmra.mxu0 %vm12268_vm3, %v9279_v59 }
 0x2a5   : > { %7914 = vmatmul.msk.f32.vlgmr.msra.gmra.mxu2 %vm12268_vm3, %v9236_v1  ;;  %7917 = vmatmul.msk.f32.vlgmr.msrb.gmra.mxu1 %vm12268_vm3, %v2466_v7 }
 0x2a6   : > { %2299 = vmatpush.msrb.mxu3 %v7895_v13  ;;  %2536 = vmatpush.msrb.mxu0 %v9328_v20 }
 0x2a7   : > { %2650 = vmatpush.msra.mxu2 %v9213_v40  ;;  %2670 = vmatpush.msrb.mxu1 %v7874_v49  ;;  %v7906_v40 = vld [vmem:[%s8773_s19 + $0x70] sm:$0xff]  ;;  %v2282_v49 = vrot.slane %v9215_v10, 5 }
 0x2a8   : > { %2300 = vmatpush.msrb.mxu3 %v7894_v14  ;;  %2537 = vmatpush.msrb.mxu0 %v9340_v54 }
 0x2a9   : > { %2651 = vmatpush.msra.mxu2 %v9224_v28  ;;  %2671 = vmatpush.msrb.mxu1 %v7873_v53  ;;  %v2519_v28 = vrot.slane %v9279_v59, 4  ;;  %v7919_v53 = vld [vmem:[%s8773_s19 + $0x98] sm:$0xff] }
 0x2ac   : > { %7884 = vmatmul.msk.f32.vlgmr.msra.gmra.mxu3 %vm12268_vm3, %v2176_v21  ;;  %7911 = vmatmul.msk.f32.vlgmr.msra.gmra.mxu0 %vm12268_vm3, %v2414_v16 }
 0x2ad   : > { %7926 = vmatmul.msk.f32.vlgmr.msrb.gmra.mxu2 %vm12268_vm3, %v2546_v61  ;;  %7929 = vmatmul.msk.f32.vlgmr.msra.gmra.mxu1 %vm12268_vm3, %v2572_v17 }
 0x2ae   : > { %2405 = vmatpush.msra.mxu3 %v7907_v22  ;;  %2630 = vmatpush.msra.mxu0 %v9165_v30  ;;  %v7918_v30 = vld [vmem:[%s8773_s19 + $0x90] sm:$0xff] }
 0x2af   : > { %2730 = vmatpush.msrb.mxu2 %v7883_v4  ;;  %2750 = vmatpush.msra.mxu1 %v9197_v36 }
 0x2b0   : > { %2406 = vmatpush.msra.mxu3 %v7906_v40  ;;  %2631 = vmatpush.msra.mxu0 %v9179_v33  ;;  %v2388_v33 = vrot.slane %v9215_v10, 7 }
 0x2b1   : > { %2731 = vmatpush.msrb.mxu2 %v7882_v44  ;;  %2751 = vmatpush.msra.mxu1 %v9204_v58 }
 0x2b4   : > { %7896 = vmatmul.msk.f32.vlgmr.msrb.gmra.mxu3 %vm12268_vm3, %v2282_v49  ;;  %7923 = vmatmul.msk.f32.vlgmr.msrb.gmra.mxu0 %vm12268_vm3, %v2519_v28 }
 0x2b5   : > { %7932 = vmatmul.msk.f32.vlgmr.msra.gmra.mxu2 %vm12268_vm3, %v2096_v12  ;;  %7933 = vmatmul.msk.f32.vlgmr.msrb.gmra.mxu1 %vm12268_vm3, %v2070_v60 }
 0x2b6   : > { %2510 = vmatpush.msrb.mxu3 %v7919_v53  ;;  %2710 = vmatpush.msrb.mxu0 %v9168_v27  ;;  %v2493_v27 = vrot.slane %v9236_v1, 1 }
 0x2b7   : > { %2810 = vmatpush.msra.mxu2 %v7895_v13  ;;  %2830 = vmatpush.msrb.mxu1 %v9244_v50 }
 0x2b8   : > { %2511 = vmatpush.msrb.mxu3 %v7918_v30  ;;  %2711 = vmatpush.msrb.mxu0 %v9182_v34 }
 0x2b9   : > { %2811 = vmatpush.msra.mxu2 %v7894_v14  ;;  %2831 = vmatpush.msrb.mxu1 %v9266_v26 }
 0x2bc   : > { %7908 = vmatmul.msk.f32.vlgmr.msra.gmra.mxu3 %vm12268_vm3, %v2388_v33  ;;  %7931 = vmatmul.msk.f32.vlgmr.msra.gmra.mxu0 %vm12268_vm3, %v9215_v10 }
 0x2bd   : > { %7936 = vmatmul.msk.f32.vlgmr.msrb.gmra.mxu2 %vm12268_vm3, %v2202_v57  ;;  %7937 = vmatmul.msk.f32.vlgmr.msra.gmra.mxu1 %vm12268_vm3, %v2176_v21 }
 0x2be   : > { %2610 = vmatpush.msra.mxu3 %v9149_v23  ;;  %2790 = vmatpush.msra.mxu0 %v9176_v31  ;;  %v3124_v23 = vld [vmem:[%s8783_s30 + $0x8] sm:$0xff] }
 0x2bf   : > { %2890 = vmatpush.msrb.mxu2 %v7907_v22  ;;  %2910 = vmatpush.msra.mxu1 %v9288_v3 }
 0x2c0   : > { %2611 = vmatpush.msra.mxu3 %v9153_v15  ;;  %2791 = vmatpush.msra.mxu0 %v9190_v35  ;;  %v3123_v15 = vld [vmem:[%s8783_s30] sm:$0xff] }
 0x2c1   : > { %2891 = vmatpush.msrb.mxu2 %v7906_v40  ;;  %2911 = vmatpush.msra.mxu1 %v9310_v9 }
 0x2c4   : > { %7920 = vmatmul.msk.f32.vlgmr.msrb.gmra.mxu3 %vm12268_vm3, %v2493_v27  ;;  %7935 = vmatmul.msk.f32.vlgmr.msrb.gmra.mxu0 %vm12268_vm3, %v2123_v42 }
 0x2c5   : > { %7940 = vmatmul.msk.f32.vlgmr.msra.gmra.mxu2 %vm12268_vm3, %v9279_v59  ;;  %7941 = vmatmul.msk.f32.vlgmr.msrb.gmra.mxu1 %vm12268_vm3, %v2282_v49 }
 0x2c6   : > { %2690 = vmatpush.msrb.mxu3 %v9156_v25  ;;  %2870 = vmatpush.msrb.mxu0 %v9201_v37 }
 0x2c7   : > { %2970 = vmatpush.msra.mxu2 %v7919_v53  ;;  %2990 = vmatpush.msrb.mxu1 %v9328_v20 }
 0x2c8   : > { %2691 = vmatpush.msrb.mxu3 %v9161_v18  ;;  %2871 = vmatpush.msrb.mxu0 %v9208_v39 }
 0x2c9   : > { %2971 = vmatpush.msra.mxu2 %v7918_v30  ;;  %2991 = vmatpush.msrb.mxu1 %v9340_v54 }
 0x2cc   : > { %7930 = vmatmul.msk.f32.vlgmr.msra.gmra.mxu3 %vm12268_vm3, %v2043_v41  ;;  %7939 = vmatmul.msk.f32.vlgmr.msra.gmra.mxu0 %vm12268_vm3, %v2229_v48 }
 0x2cd   : > { %7944 = vmatmul.msk.f32.vlgmr.msrb.gmra.mxu2 %vm12268_vm3, %v2414_v16  ;;  %7945 = vmatmul.msk.f32.vlgmr.msra.gmra.mxu1 %vm12268_vm3, %v2388_v33 }
 0x2ce   : > { %2770 = vmatpush.msra.mxu3 %v9171_v29  ;;  %2950 = vmatpush.msra.mxu0 %v9256_v52 }
 0x2cf   : > { %3150 = vmatpush.msrb.mxu2 %v3124_v23 }
 0x2d0   : > { %2771 = vmatpush.msra.mxu3 %v9187_v62  ;;  %2951 = vmatpush.msra.mxu0 %v9273_v55 }
 0x2d1   : > { %3151 = vmatpush.msrb.mxu2 %v3123_v15 }
 0x2d4   : > { %7934 = vmatmul.msk.f32.vlgmr.msrb.gmra.mxu3 %vm12268_vm3, %v2149_v47  ;;  %7943 = vmatmul.msk.f32.vlgmr.msrb.gmra.mxu0 %vm12268_vm3, %v2335_v2 }
 0x2d5   : > { %7948 = vmatmul.msk.f32.vlgmr.msra.gmra.mxu2 %vm12268_vm3, %v2519_v28  ;;  %7949 = vmatmul.msk.f32.vlgmr.msrb.gmra.mxu1 %vm12268_vm3, %v2493_v27 }
 0x2d6   : > { %2850 = vmatpush.msrb.mxu3 %v9221_v43  ;;  %3030 = vmatpush.msrb.mxu0 %v9300_v46 }
 0x2d8   : > { %2851 = vmatpush.msrb.mxu3 %v9231_v45  ;;  %3031 = vmatpush.msrb.mxu0 %v9317_v8 }
 0x2dc   : > { %7938 = vmatmul.msk.f32.vlgmr.msra.gmra.mxu3 %vm12268_vm3, %v2255_v56  ;;  %7947 = vmatmul.msk.f32.vlgmr.msra.gmra.mxu0 %vm12268_vm3, %v9236_v1 }
 0x2dd   : > { %7952 = vmatmul.msk.f32.vlgmr.msrb.gmra.mxu2 %vm12268_vm3, %v9115_v32  ;;  %2930 = vmatpush.msra.mxu3 %v9253_v51 }
 0x2df   : > { %2931 = vmatpush.msra.mxu3 %v9270_v38 }
 0x2e4   : > { %7942 = vmatmul.msk.f32.vlgmr.msrb.gmra.mxu3 %vm12268_vm3, %v2361_v63  ;;  %7951 = vmatmul.msk.f32.vlgmr.msrb.gmra.mxu0 %vm12268_vm3, %v2546_v61 }
 0x2e5   : > { %7953 = vmatmul.msk.f32.gmra.mxu2 %vm12268_vm3, %v9138_v6  ;;  %3010 = vmatpush.msrb.mxu3 %v9297_v5 }
 0x2e7   : > { %3011 = vmatpush.msrb.mxu3 %v9314_v11 }
 0x2ec   : > { %7946 = vmatmul.msk.f32.vlgmr.msra.gmra.mxu3 %vm12268_vm3, %v2466_v7 }
 0x2ed   : > { %7954 = vmatmul.msk.f32.gmra.mxu2 %vm12268_vm3, %v9135_v19 }
 0x2f4   : > { %7950 = vmatmul.msk.f32.vlgmr.msrb.gmra.mxu3 %vm12268_vm3, %v2572_v17 }
 0x2f5   : > { %7955 = vmatmul.msk.f32.gmra.mxu2 %vm12268_vm3, %v9128_v24 }
 0x30d   : > { %v9465_v32 = vpop.f32.mrf.mxu3 }
 0x30f   : > { %v9467_v25 = vpop.f32.mrf.mxu2 }
 0x311   : > { %v9469_v18 = vpop.f32.mrf.mxu0 }
 0x312   : > { %v9479_v36 = vpop.f32.mrf.mxu1  ;;  %v2172_v22 = vsub.f32 %v9467_v25, %v9469_v18 }
 0x317   : > { %v9471_v29 = vpop.f32.mrf.mxu3 }
 0x318   : > { %v9473_v31 = vpop.f32.mrf.mxu2  ;;  %v2066_v30 = vsub.f32 %v9465_v32, %v9471_v29 }
 0x319   : > { %v9475_v34 = vpop.f32.mrf.mxu0  ;;  %v2278_v33 = vsub.f32 %v9473_v31, %v9479_v36 }
 0x31a   : > { %v9483_v39 = vpop.f32.mrf.mxu1 }
 0x31b   : > { %v3046_v36 = vrot.slane %v2278_v33, 4 }
 0x31f   : > { %v2090_v62 = vpop.f32.mrf.mxu3 }
 0x320   : > { %v9477_v35 = vpop.f32.mrf.mxu2 }
 0x321   : > { %v9481_v37 = vpop.f32.mrf.mxu0 }
 0x322   : > { %v2486_v1 = vpop.f32.mrf.mxu1 }
 0x327   : > { %v2116_v24 = vpop.f32.mrf.mxu3 }
 0x328   : > { %v2460_v58 = vpop.f32.mrf.mxu2  ;;  %v2119_v7 = vsub.f32 %v2090_v62, %v2116_v24 }
 0x329   : > { %v9485_v43 = vpop.f32.mrf.mxu0  ;;  %v2489_v40 = vsub.f32 %v2460_v58, %v2486_v1 }
 0x32a   : > { %v2592_v50 = vpop.f32.mrf.mxu1  ;;  %v3037_v16 = vrot.slane %v2119_v7, 7 }
 0x32c   : > { %v3079_v24 = vsel %vm3078_vm4, %v2066_v30, %v3037_v16  ;;  %v8528_v30 = vld [vmem:[%s8788_s6] ss:$0 sm:$0xff] }
 0x32f   : > { %v2196_v10 = vpop.f32.mrf.mxu3 }
 0x330   : > { %v2566_v42 = vpop.f32.mrf.mxu2  ;;  %v2225_v17 = vsub.f32 %v2196_v10, %v9475_v34  ;;  %v3040_v10 = vrot.slane %v2172_v22, 6  ;;  %v3117_v22 = vld [vmem:[%s8763_s8] sm:$0xff] }
 0x331   : > { %v2539_v47 = vpop.f32.mrf.mxu0  ;;  %v2595_v21 = vsub.f32 %v2566_v42, %v2592_v50 }
 0x332   : > { %v2673_v38 = vpop.f32.mrf.mxu1  ;;  %v3043_v25 = vrot.slane %v2225_v17, 5 }
 0x333   : > { %v3061_v18 = vrot.slane %v2595_v21, 6  ;;  %v3119_v21 = vld [vmem:[%s8763_s8 + $0x10] sm:$0xf] }
 0x337   : > { %v9487_v45 = vpop.f32.mrf.mxu3 }
 0x338   : > { %v2653_v41 = vpop.f32.mrf.mxu2  ;;  %v2331_v42 = vsub.f32 %v9487_v45, %v9481_v37 }
 0x339   : > { %v2633_v51 = vpop.f32.mrf.mxu0  ;;  %v2674_v58 = vadd.f32 %v2673_v38, %v2653_v41 }
 0x33a   : > { %v2753_v60 = vpop.f32.mrf.mxu1 }
 0x33b   : > { %v3067_v38 = vrot.slane %v2674_v58, 4 }
 0x33f   : > { %v9489_v56 = vpop.f32.mrf.mxu3 }
 0x340   : > { %v9491_v48 = vpop.f32.mrf.mxu2 }
 0x341   : > { %v2713_v55 = vpop.f32.mrf.mxu0  ;;  %v2754_v37 = vadd.f32 %v2753_v60, %v9491_v48 }
 0x342   : > { %v2833_v5 = vpop.f32.mrf.mxu1 }
 0x343   : > { %v3073_v7 = vrot.slane %v2754_v37, 2 }
 0x347   : > { %v2513_v52 = vpop.f32.mrf.mxu3 }
 0x348   : > { %v2813_v26 = vpop.f32.mrf.mxu2  ;;  %v2542_v8 = vsub.f32 %v2513_v52, %v2539_v47 }
 0x349   : > { %v2793_v4 = vpop.f32.mrf.mxu0  ;;  %v2834_v15 = vadd.f32 %v2833_v5, %v2813_v26  ;;  %v2437_v5 = vsub.f32 %v9489_v56, %v9485_v43 }
 0x34a   : > { %v2913_v12 = vpop.f32.mrf.mxu1  ;;  %v3058_v14 = vrot.slane %v2542_v8, 7 }
 0x34c   : > { %v3090_v23 = vsel %vm3078_vm4, %v2489_v40, %v3058_v14  ;;  %v3120_v14 = vld [vmem:[%s8768_s14] sm:$0xff]  ;;  %v3118_v40 = vld [vmem:[%s8763_s8 + $0x8] sm:$0xff] }
 0x34d   : > { %v3091_v1 = vsel %vm3080_vm5, %v3090_v23, %v3061_v18 }
 0x34f   : > { %v2613_v57 = vpop.f32.mrf.mxu3 }
 0x350   : > { %v2893_v59 = vpop.f32.mrf.mxu2  ;;  %v2634_v54 = vadd.f32 %v2633_v51, %v2613_v57  ;;  %v3081_v51 = vsel %vm3080_vm5, %v3079_v24, %v3040_v10 }
 0x351   : > { %v2873_v44 = vpop.f32.mrf.mxu0  ;;  %v2914_v27 = vadd.f32 %v2913_v12, %v2893_v59  ;;  %v3083_v41 = vsel %vm3082_vm6, %v3081_v51, %v3043_v25 }
 0x352   : > { %v3064_v34 = vrot.slane %v2634_v54, 5  ;;  %v2993_v32 = vpop.f32.mrf.mxu1  ;;  %v3084_v56 = vsel %vm1563_vm0, %v3083_v41, %v3046_v36 }
 0x353   : > { %v3101_v47 = vrot.slane %v2914_v27, 6 }
 0x354   : > { %v3092_v52 = vsel %vm3082_vm6, %v3091_v1, %v3064_v34 }
 0x355   : > { %v3093_v48 = vsel %vm1563_vm0, %v3092_v52, %v3067_v38 }
 0x357   : > { %v2693_v63 = vpop.f32.mrf.mxu3 }
 0x358   : > { %v2973_v2 = vpop.f32.mrf.mxu2  ;;  %v2714_v62 = vadd.f32 %v2713_v55, %v2693_v63  ;;  %v3049_v63 = vrot.slane %v2331_v42, 3 }
 0x359   : > { %v2953_v20 = vpop.f32.mrf.mxu0  ;;  %v2994_v50 = vadd.f32 %v2993_v32, %v2973_v2 }
 0x35a   : > { %v3070_v26 = vrot.slane %v2714_v62, 3 }
 0x35c   : > { %v3094_v12 = vsel %vm12322_vm7, %v3093_v48, %v3070_v26 }
 0x35d   : > { %v3095_v54 = vsel %vm12321_vm8, %v3094_v12, %v3073_v7 }
 0x35f   : > { %v2773_v3 = vpop.f32.mrf.mxu3 }
 0x360   : > { %v9493_v46 = vpop.f32.mrf.mxu2  ;;  %v2794_v55 = vadd.f32 %v2793_v4, %v2773_v3  ;;  %v2384_v4 = vsub.f32 %v9477_v35, %v9483_v39  ;;  %v3107_v3 = vrot.slane %v2994_v50, 4  ;;  %v3086_v39 = vsel %vm12322_vm7, %v3084_v56, %v3049_v63 }
 0x361   : > { %v3033_v45 = vpop.f32.mrf.mxu0 }
 0x362   : > { %v3076_v60 = vrot.slane %v2794_v55, 1 }
 0x364   : > { %v3096_v16 = vsel %vm12272_vm15, %v3095_v54, %v3076_v60 }
 0x367   : > { %v2853_v9 = vpop.f32.mrf.mxu3 }
 0x368   : > { %v9495_v11 = vpop.f32.mrf.mxu2  ;;  %v2874_v13 = vadd.f32 %v2873_v44, %v2853_v9 }
 0x36a   : > { %v3098_v28 = vrot.slane %v2874_v13, 7  ;;  %v3055_v13 = vrot.slane %v2437_v5, 1 }
 0x36c   : > { %v3112_v29 = vsel %vm3078_vm4, %v2834_v15, %v3098_v28 }
 0x36d   : > { %v3113_v57 = vsel %vm3080_vm5, %v3112_v29, %v3101_v47 }
 0x36f   : > { %v2933_v61 = vpop.f32.mrf.mxu3 }
 0x370   : > { %v2954_v49 = vadd.f32 %v2953_v20, %v2933_v61  ;;  %v3159_v53 = vpop.f32.mrf.mxu2  ;;  %v3052_v20 = vrot.slane %v2384_v4, 2  ;;  %v3122_v61 = vld [vmem:[%s8768_s14 + $0x10] sm:$0xf] }
 0x372   : > { %v3104_v31 = vrot.slane %v2954_v49, 5  ;;  %v3088_v17 = vsel %vm12321_vm8, %v3086_v39, %v3052_v20 }
 0x374   : > { %v3114_v2 = vsel %vm3082_vm6, %v3113_v57, %v3104_v31 }
 0x375   : > { %v3115_v43 = vsel %vm1563_vm0, %v3114_v2, %v3107_v3 }
 0x377   : > { %v3013_v59 = vpop.f32.mrf.mxu3 }
 0x378   : > { %v3034_v44 = vadd.f32 %v3033_v45, %v3013_v59  ;;  %v3162_v9 = vpop.f32.mrf.mxu2 }
 0x379   : > { %7956 = vmatpush.msk.msra.mxu1 %vm12272_vm15, %v3162_v9 }
 0x37a   : > { %v3110_v8 = vrot.slane %v3034_v44, 3 }
 0x37b   : > { %3190 = vmatpush.msra.mxu1 %v3159_v53 }
 0x37c   : > { %v3116_v35 = vsel %vm12322_vm7, %v3115_v43, %v3110_v8 }
 0x37d   : > { %3191 = vmatpush.msra.mxu1 %v9495_v11  ;;  %8456 = vmatpush.msk.msra.mxu3 %vm12321_vm8, %v3116_v35  ;;  %v3089_v11 = vsel %vm12272_vm15, %v3088_v17, %v3055_v13 }
 0x37f   : > { %3192 = vmatpush.msra.mxu1 %v9493_v46  ;;  %8457 = vmatpush.msra.mxu3 %v3096_v16  ;;  %v3121_v46 = vld [vmem:[%s8768_s14 + $0x8] sm:$0xff] }
 0x380   : > { %7957 = vmatmul.msk.f32.vlgmr.msra.gmra.mxu1 %vm1974_vm2, %v3120_v14 }
 0x381   : > { %7960 = vmatpush.msk.msrb.mxu1 %vm12321_vm8, %v3116_v35  ;;  %8458 = vmatpush.msra.mxu3 %v3089_v11 }
 0x382   : > { %7963 = vmatmul.msk.f32.vlgmr.msra.gmra.mxu3 %vm12269_vm9, %v3119_v21 }
 0x383   : > { %3230 = vmatpush.msrb.mxu1 %v3096_v16 }
 0x385   : > { %3231 = vmatpush.msrb.mxu1 %v3089_v11 }
 0x388   : > { %7958 = vmatmul.msk.f32.gmra.mxu1 %vm1974_vm2, %v3121_v46 }
 0x390   : > { %7959 = vmatmul.msk.f32.gmra.mxu1 %vm1974_vm2, %v3122_v61 }
 0x398   : > { %7961 = vmatmul.msk.f32.vlgmr.msrb.gmra.mxu1 %vm12269_vm9, %v3117_v22 }
 0x3a0   : > { %7962 = vmatmul.msk.f32.gmra.mxu1 %vm12269_vm9, %v3118_v40 }
 0x3fd   : > { %v3194_v28 = vpop.f32.mrf.mxu1 }
 0x405   : > { %v3197_v49 = vpop.f32.mrf.mxu1  ;;  %v3239_v53 = vpop.f32.mrf.mxu3 }
 0x40d   : > { %v3200_v33 = vpop.f32.mrf.mxu1 }
 0x40e   : > { %v3240_v27 = vadd.f32 %v3239_v53, %v3200_v33 }
 0x410   : > { %v9548_v23 = vadd.f32 %v8528_v30, %v3240_v27 }
 0x412   : > { %v9551_v15 = vmul.f32 0.70710677, %v9548_v23 }
 0x414   : > { %v3263_v34 = vand.u32 2147483647, %v9551_v15 }
 0x415   : > { %v3233_v62 = vpop.f32.mrf.mxu1 }
 0x416   : > { %v3266_v24 = vmul.f32 0.3275911, %v3263_v34  ;;  %v3234_v25 = vadd.f32 %v3233_v62, %v3194_v28  ;;  %v3344_v44 = vsub.f32 0.0, %v3263_v34 }
 0x418   : > { %v3269_v18 = vadd.f32 1.0, %v3266_v24  ;;  %v9554_v58 = vadd.f32 %v8528_v30, %v3234_v25  ;;  %v3347_v7 = vmul.f32 %v3344_v44, %v3263_v34  ;;  %v3251_v44 = vmul.f32 0.5, %v9548_v23 }
 0x41a   : > { %8571 = vrcp.f32 %v3269_v18  ;;  %v9557_v10 = vmul.f32 0.70710677, %v9554_v58  ;;  %v3311_v55 = vand.u32 2147483648, %v3269_v18  ;;  %v3309_v38 = vand.u32 2147483647, %v3269_v18 }
 0x41b   : > { %vm3305_vm11 = vweird.f32 %v3269_v18  ;;  %v3352_v54 = vmul.f32 1.442695, %v3347_v7 }
 0x41c   : > { %v3261_v42 = vand.u32 2147483647, %v9557_v10  ;;  %v3312_v63 = vor.u32 1.1754944e-38, %v3311_v55  ;;  %vm3310_vm13 = vcmp.eq.f32.partialorder %v3309_v38, 8.507059e+37 }
 0x41d   : > { %v3236_v32 = vpop.f32.mrf.mxu1 }
 0x41e   : > { %v3264_v29 = vmul.f32 0.3275911, %v3261_v42  ;;  %v3237_v31 = vadd.f32 %v3236_v32, %v3197_v49  ;;  %v3342_v16 = vsub.f32 0.0, %v3261_v42 }
 0x420   : > { %v8572_v36 = vpop.eup %8571  ;;  %v3267_v1 = vadd.f32 1.0, %v3264_v29  ;;  %v9560_v47 = vadd.f32 %v8528_v30, %v3237_v31  ;;  %v3345_v53 = vmul.f32 %v3342_v16, %v3261_v42 }
 0x421   : > { %v3301_v50 = vmul.f32 %v8572_v36, %v3269_v18  ;;  %vm3306_vm10 = vweird.f32 %v8572_v36 }
 0x422   : > { %8573 = vrcp.f32 %v3267_v1  ;;  %v9563_v51 = vmul.f32 0.70710677, %v9560_v47  ;;  %vm3307_vm12 = vmor %vm3305_vm11, %vm3306_vm10  ;;  %v3281_v48 = vand.u32 2147483648, %v3267_v1  ;;  %v3279_v12 = vand.u32 2147483647, %v3267_v1 }
 0x423   : > { %v3302_v52 = vsub.f32 1.0, %v3301_v50  ;;  %vm3275_vm2 = vweird.f32 %v3267_v1  ;;  %v3348_v18 = vmul.f32 1.442695, %v3345_v53  ;;  %v9638_v53 = vld [vmem:[%s12486_s1] sm:$0xff] }
 0x424   : > { %v9566_v26 = vand.u32 2147483647, %v9563_v51  ;;  %v3282_v35 = vor.u32 1.1754944e-38, %v3281_v48  ;;  %vm3280_vm11 = vcmp.eq.f32.partialorder %v3279_v12, 8.507059e+37 }
 0x425   : > { %v3303_v41 = vmul.f32 %v8572_v36, %v3302_v52 }
 0x426   : > { %v3265_v37 = vmul.f32 0.3275911, %v9566_v26  ;;  %v3343_v32 = vsub.f32 0.0, %v9566_v26 }
 0x427   : > { %v3304_v45 = vadd.f32 %v8572_v36, %v3303_v41 }
 0x428   : > { %v8574_v57 = vpop.eup %8573  ;;  %v3268_v59 = vadd.f32 1.0, %v3265_v37  ;;  %v3346_v41 = vmul.f32 %v3343_v32, %v9566_v26  ;;  %v9673_v32 = vld [vmem:[%s12487_s2 + $0x58] sm:$0xff] }
 0x429   : > { %v3271_v5 = vmul.f32 %v8574_v57, %v3267_v1  ;;  %v3308_v2 = vsel %vm3307_vm12, %v8572_v36, %v3304_v45  ;;  %vm3276_vm14 = vweird.f32 %v8574_v57 }
 0x42a   : > { %8575 = vrcp.f32 %v3268_v59  ;;  %v3313_v9 = vsel %vm3310_vm13, %v3312_v63, %v3308_v2  ;;  %vm3277_vm10 = vmor %vm3275_vm2, %vm3276_vm14  ;;  %v3294_v61 = vand.u32 2147483647, %v3268_v59  ;;  %v3296_v22 = vand.u32 2147483648, %v3268_v59 }
 0x42b   : > { %v3272_v4 = vsub.f32 1.0, %v3271_v5  ;;  %v3317_v3 = vmul.f32 1.0614054, %v3313_v9  ;;  %8577 = vpow2.f32 %v3352_v54  ;;  %vm3290_vm13 = vweird.f32 %v3268_v59 }
 0x42c   : > { %v3297_v34 = vor.u32 1.1754944e-38, %v3296_v22  ;;  %vm3295_vm2 = vcmp.eq.f32.partialorder %v3294_v61, 8.507059e+37  ;;  %8579 = vpow2.f32 %v3348_v18  ;;  %v3350_v2 = vmul.f32 1.442695, %v3346_v41  ;;  %v9608_v61 = vld [vmem:[%s12487_s2 + $0x18] sm:$0xff]  ;;  %v9670_v18 = vld [vmem:[%s12487_s2 + $0x30] sm:$0xff] }
 0x42d   : > { %v3320_v60 = vadd.f32 -1.4531521, %v3317_v3  ;;  %v3273_v8 = vmul.f32 %v8574_v57, %v3272_v4  ;;  %3450 = vmatpush.msra.mxu1 %v9608_v61  ;;  %v9616_v22 = vld [vmem:[%s12486_s1 + $0x58] sm:$0xff]  ;;  %v9706_v41 = vld [vmem:[%s12486_s1 + $0x68] sm:$0xff] }
 0x42e   : > { %8581 = vpow2.f32 %v3350_v2  ;;  %3536 = vmatpush.msra.mxu2 %v9616_v22 }
 0x42f   : > { %v3323_v43 = vmul.f32 %v3320_v60, %v3313_v9  ;;  %v3274_v56 = vadd.f32 %v8574_v57, %v3273_v8 }
 0x430   : > { %v8576_v13 = vpop.eup %8575 }
 0x431   : > { %v3286_v39 = vmul.f32 %v8576_v13, %v3268_v59  ;;  %v3326_v20 = vadd.f32 1.4214138, %v3323_v43  ;;  %v3278_v14 = vsel %vm3277_vm10, %v8574_v57, %v3274_v56  ;;  %vm3291_vm12 = vweird.f32 %v8576_v13  ;;  %v8578_v50 = vpop.eup %8577 }
 0x432   : > { %v3283_v17 = vsel %vm3280_vm11, %v3282_v35, %v3278_v14  ;;  %vm3292_vm14 = vmor %vm3290_vm13, %vm3291_vm12  ;;  %vm3257_vm10 = vcmp.ge.f32.partialorder %v9551_v15, 0.0  ;;  %v8580_v3 = vpop.eup %8579  ;;  %vm3255_vm11 = vcmp.ge.f32.partialorder %v9557_v10, 0.0  ;;  %v3249_v56 = vmul.f32 0.5, %v9554_v58 }
 0x433   : > { %v3287_v21 = vsub.f32 1.0, %v3286_v39  ;;  %v3329_v11 = vmul.f32 %v3326_v20, %v3313_v9  ;;  %v3315_v46 = vmul.f32 1.0614054, %v3283_v17  ;;  %v3260_v57 = vsel %vm3257_vm10, 1.0, %v12273_v0 }
 0x434   : > { %v3258_v23 = vsel %vm3255_vm11, 1.0, %v12273_v0  ;;  %v8582_v35 = vpop.eup %8581  ;;  %vm3256_vm12 = vcmp.ge.f32.partialorder %v9563_v51, 0.0  ;;  %v3250_v58 = vmul.f32 0.5, %v9560_v47  ;;  %v3369_v51 = vld [vmem:[%s12485_s28] sm:$0xff]  ;;  %v3370_v47 = vld [vmem:[%s12485_s28 + $0x8] sm:$0x3] }
 0x435   : > { %v3332_v40 = vadd.f32 -0.28449672, %v3329_v11  ;;  %v3318_v28 = vadd.f32 -1.4531521, %v3315_v46  ;;  %v3288_v49 = vmul.f32 %v8576_v13, %v3287_v21  ;;  %v3259_v54 = vsel %vm3256_vm12, 1.0, %v12273_v0  ;;  %v9602_v11 = vld [vmem:[%s12486_s1 + $0x18] sm:$0xff] }
 0x436   : > { %v9605_v46 = vld [vmem:[%s12486_s1 + $0x10] sm:$0xff]  ;;  %vm12271_vm13 = vcmask 261120   ;;  %vm4034_vm10 = vcmask 517120  }
 0x437   : > { %v3335_v30 = vmul.f32 %v3332_v40, %v3313_v9  ;;  %v3321_v33 = vmul.f32 %v3318_v28, %v3283_v17  ;;  %v3289_v27 = vadd.f32 %v8576_v13, %v3288_v49  ;;  %v9624_v40 = vld [vmem:[%s12487_s2 + $0x10] sm:$0xff] }
 0x438   : > { %v9627_v28 = vld [vmem:[%s12486_s1 + $0x30] sm:$0xff]  ;;  %3451 = vmatpush.msra.mxu1 %v9624_v40 }
 0x439   : > { %v3338_v62 = vadd.f32 0.2548296, %v3335_v30  ;;  %v3324_v24 = vadd.f32 1.4214138, %v3321_v33  ;;  %v3293_v25 = vsel %vm3292_vm14, %v8576_v13, %v3289_v27  ;;  %v9630_v49 = vld [vmem:[%s12486_s1 + $0x50] sm:$0xff]  ;;  %v9641_v30 = vld [vmem:[%s12487_s2 + $0x8] sm:$0xff] }
 0x43a   : > { %v3298_v29 = vsel %vm3295_vm2, %v3297_v34, %v3293_v25  ;;  %3537 = vmatpush.msra.mxu2 %v9630_v49  ;;  %v9644_v33 = vld [vmem:[%s12486_s1 + $0x28] sm:$0xff]  ;;  %3452 = vmatpush.msra.mxu1 %v9641_v30  ;;  %v9652_v34 = vld [vmem:[%s12487_s2] sm:$0xff]  ;;  %vm3993_vm14 = vcmask 80896   ;;  %vm4032_vm2 = vcmask 523264  }
 0x43b   : > { %v3341_v31 = vmul.f32 %v3338_v62, %v3313_v9  ;;  %v3327_v36 = vmul.f32 %v3324_v24, %v3283_v17  ;;  %v3316_v1 = vmul.f32 1.0614054, %v3298_v29  ;;  %v9649_v27 = vld [vmem:[%s12486_s1 + $0x48] sm:$0xff]  ;;  %v9655_v62 = vld [vmem:[%s12486_s1 + $0x20] sm:$0xff]  ;;  %v9660_v24 = vld [vmem:[%s12487_s2 + $0x38] sm:$0xff] }
 0x43c   : > { %3538 = vmatpush.msra.mxu2 %v9649_v27  ;;  %v9663_v25 = vld [vmem:[%s12486_s1 + $0x40] sm:$0xff]  ;;  %3453 = vmatpush.msra.mxu1 %v9652_v34 }
 0x43d   : > { %v3356_v42 = vmul.f32 %v8578_v50, %v3341_v31  ;;  %v3330_v52 = vadd.f32 -0.28449672, %v3327_v36  ;;  %v3319_v55 = vadd.f32 -1.4531521, %v3316_v1  ;;  %v9681_v31 = vld [vmem:[%s12486_s1 + $0x98] sm:$0xff]  ;;  %v9684_v36 = vld [vmem:[%s12487_s2 + $0x28] sm:$0xff] }
 0x43e   : > { %3539 = vmatpush.msra.mxu2 %v9663_v25  ;;  %3564 = vmatpush.msrb.mxu1 %v9673_v32  ;;  %v9687_v1 = vld [vmem:[%s12487_s2 + $0x50] sm:$0xff] }
 0x43f   : > { %v3359_v38 = vsub.f32 1.0, %v3356_v42  ;;  %v3333_v37 = vmul.f32 %v3330_v52, %v3283_v17  ;;  %v3322_v45 = vmul.f32 %v3319_v55, %v3298_v29  ;;  %v9692_v50 = vld [vmem:[%s12486_s1 + $0x70] sm:$0xff]  ;;  %v9698_v52 = vld [vmem:[%s12487_s2 + $0x20] sm:$0xff]  ;;  %v9703_v55 = vld [vmem:[%s12487_s2 + $0x48] sm:$0xff] }
 0x440   : > { %3650 = vmatpush.msrb.mxu2 %v9681_v31  ;;  %v9695_v42 = vld [vmem:[%s12486_s1 + $0x90] sm:$0xff]  ;;  %3565 = vmatpush.msrb.mxu1 %v9687_v1 }
 0x441   : > { %v3362_v59 = vmul.f32 %v3359_v38, %v3260_v57  ;;  %v3336_v63 = vadd.f32 0.2548296, %v3333_v37  ;;  %v3325_v5 = vadd.f32 1.4214138, %v3322_v45  ;;  %v9709_v38 = vld [vmem:[%s12486_s1 + $0x88] sm:$0xff]  ;;  %v9716_v37 = vld [vmem:[%s12487_s2 + $0x40] sm:$0xff] }
 0x442   : > { %3651 = vmatpush.msrb.mxu2 %v9695_v42  ;;  %3566 = vmatpush.msrb.mxu1 %v9703_v55  ;;  %v9719_v45 = vld [vmem:[%s12486_s1 + $0x60] sm:$0xff] }
 0x443   : > { %v3365_v9 = vadd.f32 1.0, %v3362_v59  ;;  %v3339_v4 = vmul.f32 %v3336_v63, %v3283_v17  ;;  %v3328_v15 = vmul.f32 %v3325_v5, %v3298_v29  ;;  %v9724_v57 = vld [vmem:[%s12486_s1 + $0x80] sm:$0xff]  ;;  %v9730_v59 = vld [vmem:[%s12487_s2 + $0x78] sm:$0xff] }
 0x444   : > { %3652 = vmatpush.msrb.mxu2 %v9709_v38  ;;  %3567 = vmatpush.msrb.mxu1 %v9716_v37 }
 0x445   : > { %v9575_v48 = vmul.f32 %v3365_v9, %v3251_v44  ;;  %v3354_v26 = vmul.f32 %v8580_v3, %v3339_v4  ;;  %v3331_v60 = vadd.f32 -0.28449672, %v3328_v15  ;;  %v9740_v9 = vld [vmem:[%s12487_s2 + $0x70] sm:$0xff]  ;;  %v9744_v4 = vld [vmem:[%s12487_s2 + $0x98] sm:$0xff]  ;;  %v9751_v15 = vld [vmem:[%s12487_s2 + $0x68] sm:$0xff] }
 0x446   : > { %3653 = vmatpush.msrb.mxu2 %v9724_v57  ;;  %v9758_v3 = vld [vmem:[%s12487_s2 + $0x90] sm:$0xff] }
 0x447   : > { %5853 = vrot.lane.b32.xlu2 %v9575_v48, %s8712_s26  ;;  %7964 = vmatpush.msk.msra.mxu0 %vm1563_vm0, %v9575_v48  ;;  %v3357_v8 = vsub.f32 1.0, %v3354_v26  ;;  %v3334_v12 = vmul.f32 %v3331_v60, %v3298_v29  ;;  %v9763_v26 = vld [vmem:[%s12487_s2 + $0x60] sm:$0xff]  ;;  %v9768_v60 = vld [vmem:[%s12487_s2 + $0x88] sm:$0xff] }
 0x449   : > { %v3360_v7 = vmul.f32 %v3357_v8, %v3258_v23  ;;  %v3337_v43 = vadd.f32 0.2548296, %v3334_v12 }
 0x44b   : > { %v3363_v10 = vadd.f32 1.0, %v3360_v7  ;;  %v3340_v13 = vmul.f32 %v3337_v43, %v3298_v29  ;;  %v9676_v29 = vld [vmem:[%s12486_s1 + $0x78] sm:$0xff]  ;;  %v8004_v7 = vld [vmem:[%s12487_s2 + $0x80] sm:$0xff]  ;;  %s12530_s2 = sld [smem:[#allocation19_spill]] }
 0x44d   : > { %v9583_v39 = vmul.f32 %v3363_v10, %v3249_v56  ;;  %v3355_v20 = vmul.f32 %v8582_v35, %v3340_v13  ;;  %v3926_v13 = vld [vmem:[%s12488_s7 + $0x18] sm:$0xff]  ;;  %v3925_v35 = vld [vmem:[%s12488_s7 + $0x10] sm:$0xff] }
 0x44f   : > { %5849 = vrot.lane.b32.xlu0 %v9583_v39, %s8712_s26  ;;  %v3358_v14 = vsub.f32 1.0, %v3355_v20  ;;  %v3924_v20 = vld [vmem:[%s12488_s7 + $0x8] sm:$0xff] }
 0x451   : > { %v3361_v16 = vmul.f32 %v3358_v14, %v3259_v54  ;;  %v3923_v14 = vld [vmem:[%s12488_s7] sm:$0xff] }
 0x453   : > { %v3364_v17 = vadd.f32 1.0, %v3361_v16 }
 0x455   : > { %v9588_v21 = vmul.f32 %v3364_v17, %v3250_v58 }
 0x457   : > { %5851 = vrot.lane.b32.xlu2 %v9588_v21, %s8712_s26  ;;  %3394 = vmatpush.msra.mxu0 %v9588_v21  ;;  %s12495_s26 = sld [smem:[#allocation17_spill]] }
 0x458   : > { %7453 = vrot.lane.b32.xlu0 %v9135_v19, %s8711_s23  ;;  %v9613_v19 = vld [vmem:[%s12486_s1 + $0x38] sm:$0xff] }
 0x459   : > { %3395 = vmatpush.msra.mxu0 %v9583_v39  ;;  %3479 = vmatpush.msrb.mxu3 %v9613_v19 }
 0x45a   : > { %7965 = vmatmul.msk.f32.vlgmr.msra.gmra.mxu0 %vm12270_vm1, %v3369_v51 }
 0x45b   : > { %3423 = vmatpush.msrb.mxu0 %v9602_v11  ;;  %3480 = vmatpush.msrb.mxu3 %v9627_v28 }
 0x45d   : > { %3424 = vmatpush.msrb.mxu0 %v9605_v46  ;;  %3481 = vmatpush.msrb.mxu3 %v9644_v33 }
 0x45f   : > { %7451 = vrot.lane.b32.xlu2 %v9138_v6, %s8711_s23  ;;  %v9619_v6 = vld [vmem:[%s12486_s1 + $0x8] sm:$0xff]  ;;  %3482 = vmatpush.msrb.mxu3 %v9655_v62  ;;  %s12494_s23 = sld [smem:[#allocation16_spill]] }
 0x460   : > { %3425 = vmatpush.msrb.mxu0 %v9619_v6  ;;  %s12529_s1 = sld [smem:[#allocation15_spill]] }
 0x461   : > { %3593 = vmatpush.msra.mxu3 %v9676_v29 }
 0x462   : > { %7966 = vmatmul.msk.f32.gmra.mxu0 %vm12270_vm1, %v3370_v47 }
 0x463   : > { %3426 = vmatpush.msrb.mxu0 %v9638_v53  ;;  %3594 = vmatpush.msra.mxu3 %v9692_v50 }
 0x465   : > { %3507 = vmatpush.msra.mxu0 %v9660_v24  ;;  %3595 = vmatpush.msra.mxu3 %v9706_v41 }
 0x467   : > { %3508 = vmatpush.msra.mxu0 %v9670_v18  ;;  %3596 = vmatpush.msra.mxu3 %v9719_v45 }
 0x469   : > { %3509 = vmatpush.msra.mxu0 %v9684_v36 }
 0x46b   : > { %3510 = vmatpush.msra.mxu0 %v9698_v52 }
 0x4d7   : > { %v9732_v63 = vpop.f32.mrf.mxu0 }
 0x4d8   : > { %7967 = vmatmul.msk.f32.vlgmr.msrb.gmra.mxu0 %vm12271_vm13, %v9732_v63  ;;  %v3435_v5 = vrot.slane %v9732_v63, 5  ;;  %v3464_v2 = vrot.slane %v9732_v63, 1  ;;  %v3521_v44 = vrot.slane %v9732_v63, 2  ;;  %v3492_v8 = vrot.slane %v9732_v63, 6 }
 0x4d9   : > { %3621 = vmatpush.msrb.mxu0 %v9730_v59  ;;  %v3549_v12 = vrot.slane %v9732_v63, 7  ;;  %v3578_v23 = vrot.slane %v9732_v63, 3  ;;  %v3635_v43 = vrot.slane %v9732_v63, 4 }
 0x4da   : > { %7968 = vmatmul.msk.f32.vlgmr.msra.gmra.mxu1 %vm12271_vm13, %v3435_v5  ;;  %7973 = vmatmul.msk.f32.vlgmr.msrb.gmra.mxu3 %vm12271_vm13, %v3464_v2 }
 0x4db   : > { %7983 = vmatmul.msk.f32.vlgmr.msra.gmra.mxu2 %vm12271_vm13, %v3521_v44  ;;  %3622 = vmatpush.msrb.mxu0 %v9740_v9 }
 0x4dc   : > { %3678 = vmatpush.msra.mxu1 %v9744_v4  ;;  %3699 = vmatpush.msrb.mxu3 %v9602_v11 }
 0x4dd   : > { %3739 = vmatpush.msra.mxu2 %v9613_v19  ;;  %3623 = vmatpush.msrb.mxu0 %v9751_v15 }
 0x4de   : > { %3679 = vmatpush.msra.mxu1 %v9758_v3  ;;  %3700 = vmatpush.msrb.mxu3 %v9605_v46 }
 0x4df   : > { %3740 = vmatpush.msra.mxu2 %v9627_v28  ;;  %3624 = vmatpush.msrb.mxu0 %v9763_v26  ;;  %v3400_v56 = vpop.f32.mrf.mxu0 }
 0x4e0   : > { %7978 = vmatmul.msk.f32.vlgmr.msra.gmra.mxu0 %vm12271_vm13, %v3492_v8  ;;  %3680 = vmatpush.msra.mxu1 %v9768_v60  ;;  %v3663_v10 = vrot.slane %v3400_v56, 1 }
 0x4e1   : > { %3701 = vmatpush.msrb.mxu3 %v9619_v6  ;;  %3741 = vmatpush.msra.mxu2 %v9644_v33 }
 0x4e2   : > { %7988 = vmatmul.msk.f32.vlgmr.msrb.gmra.mxu1 %vm12271_vm13, %v3549_v12  ;;  %7993 = vmatmul.msk.f32.vlgmr.msra.gmra.mxu3 %vm12271_vm13, %v3578_v23 }
 0x4e3   : > { %8003 = vmatmul.msk.f32.vlgmr.msrb.gmra.mxu2 %vm12271_vm13, %v3635_v43  ;;  %3681 = vmatpush.msra.mxu1 %v8004_v7 }
 0x4e4   : > { %3702 = vmatpush.msrb.mxu3 %v9638_v53  ;;  %3719 = vmatpush.msra.mxu0 %v9608_v61 }
 0x4e5   : > { %3742 = vmatpush.msra.mxu2 %v9655_v62  ;;  %3759 = vmatpush.msrb.mxu1 %v9660_v24 }
 0x4e6   : > { %3720 = vmatpush.msra.mxu0 %v9624_v40  ;;  %3779 = vmatpush.msra.mxu3 %v9616_v22 }
 0x4e7   : > { %3819 = vmatpush.msrb.mxu2 %v9676_v29  ;;  %3760 = vmatpush.msrb.mxu1 %v9670_v18 }
 0x4e8   : > { %7998 = vmatmul.msk.f32.vlgmr.msrb.gmra.mxu0 %vm12271_vm13, %v3400_v56  ;;  %3780 = vmatpush.msra.mxu3 %v9630_v49 }
 0x4e9   : > { %3721 = vmatpush.msra.mxu0 %v9641_v30  ;;  %3820 = vmatpush.msrb.mxu2 %v9692_v50 }
 0x4ea   : > { %8008 = vmatmul.msk.f32.vlgmr.msra.gmra.mxu1 %vm12271_vm13, %v3663_v10  ;;  %8009 = vmatmul.msk.f32.vlgmr.msrb.gmra.mxu3 %vm12271_vm13, %v3435_v5 }
 0x4eb   : > { %8011 = vmatmul.msk.f32.vlgmr.msra.gmra.mxu2 %vm12271_vm13, %v3492_v8  ;;  %3722 = vmatpush.msra.mxu0 %v9652_v34  ;;  %v3922_v8 = vld [vmem:[%s12490_s11 + $0x8] sm:$0x3] }
 0x4ec   : > { %3761 = vmatpush.msrb.mxu1 %v9684_v36  ;;  %3781 = vmatpush.msra.mxu3 %v9649_v27 }
 0x4ed   : > { %3821 = vmatpush.msrb.mxu2 %v9706_v41  ;;  %3799 = vmatpush.msrb.mxu0 %v9673_v32 }
 0x4ee   : > { %3762 = vmatpush.msrb.mxu1 %v9698_v52  ;;  %3782 = vmatpush.msra.mxu3 %v9663_v25 }
 0x4ef   : > { %3822 = vmatpush.msrb.mxu2 %v9719_v45  ;;  %3800 = vmatpush.msrb.mxu0 %v9687_v1 }
 0x4f0   : > { %8010 = vmatmul.msk.f32.vlgmr.msra.gmra.mxu0 %vm12271_vm13, %v9732_v63  ;;  %3839 = vmatpush.msra.mxu1 %v9730_v59 }
 0x4f1   : > { %3859 = vmatpush.msrb.mxu3 %v9681_v31  ;;  %3947 = vmatpush.msra.mxu2 %v3926_v13 }
 0x4f2   : > { %8012 = vmatmul.msk.f32.vlgmr.msrb.gmra.mxu1 %vm12271_vm13, %v3464_v2  ;;  %8013 = vmatmul.msk.f32.vlgmr.msra.gmra.mxu3 %vm12271_vm13, %v3549_v12 }
 0x4f3   : > { %8015 = vmatmul.msk.f32.vlgmr.msrb.gmra.mxu2 %vm12271_vm13, %v3400_v56  ;;  %3801 = vmatpush.msrb.mxu0 %v9703_v55  ;;  %v8529_v56 = vld [vmem:[%s12491_s16] ss:$0 sm:$0xff]  ;;  %s12496_s16 = sld [smem:[#allocation13_spill]] }
 0x4f4   : > { %3840 = vmatpush.msra.mxu1 %v9740_v9  ;;  %3860 = vmatpush.msrb.mxu3 %v9695_v42  ;;  %v3919_v9 = vld [vmem:[%s12489_s10] sm:$0xff] }
 0x4f5   : > { %3948 = vmatpush.msra.mxu2 %v3925_v35  ;;  %3802 = vmatpush.msrb.mxu0 %v9716_v37 }
 0x4f6   : > { %3841 = vmatpush.msra.mxu1 %v9751_v15  ;;  %3861 = vmatpush.msrb.mxu3 %v9709_v38 }
 0x4f7   : > { %3949 = vmatpush.msra.mxu2 %v3924_v20  ;;  %3879 = vmatpush.msra.mxu0 %v9744_v4 }
 0x4f8   : > { %8014 = vmatmul.msk.f32.vlgmr.msrb.gmra.mxu0 %vm12271_vm13, %v3521_v44  ;;  %3842 = vmatpush.msra.mxu1 %v9763_v26 }
 0x4f9   : > { %3862 = vmatpush.msrb.mxu3 %v9724_v57  ;;  %3950 = vmatpush.msra.mxu2 %v3923_v14 }
 0x4fa   : > { %8016 = vmatmul.msk.f32.vlgmr.msra.gmra.mxu1 %vm12271_vm13, %v3578_v23  ;;  %8017 = vmatmul.msk.f32.vlgmr.msrb.gmra.mxu3 %vm12271_vm13, %v3663_v10 }
 0x4fb   : > { %8019 = vmatmul.msk.f32.vlgmr.msra.gmra.mxu2 %vm12271_vm13, %v9583_v39  ;;  %3880 = vmatpush.msra.mxu0 %v9758_v3  ;;  %v3920_v3 = vld [vmem:[%s12489_s10 + $0x8] sm:$0x3] }
 0x4fd   : > { %3881 = vmatpush.msra.mxu0 %v9768_v60  ;;  %v3921_v60 = vld [vmem:[%s12490_s11] sm:$0xff] }
 0x4ff   : > { %3882 = vmatpush.msra.mxu0 %v8004_v7  ;;  %v8713_v7 = vmov 10.0  }
 0x500   : > { %8018 = vmatmul.msk.f32.vlgmr.msra.gmra.mxu0 %vm12271_vm13, %v3635_v43  ;;  %8583 = vrcp.f32 %v8713_v7 }
 0x503   : > { %8020 = vmatmul.msk.f32.gmra.mxu2 %vm12271_vm13, %v9588_v21 }
 0x506   : > { %v8584_v10 = vpop.eup %8583 }
 0x507   : > { %vm4048_vm11 = vweird.f32 %v8584_v10 }
 0x50b   : > { %8021 = vmatmul.msk.f32.gmra.mxu2 %vm12271_vm13, %v9575_v48 }
 0x555   : > { %v3428_v54 = vpop.f32.mrf.mxu0 }
 0x557   : > { %v3455_v16 = vpop.f32.mrf.mxu1 }
 0x558   : > { %v3458_v33 = vsub.f32 %v3428_v54, %v3455_v16  ;;  %v4044_v54 = vmul.f32 10.0, %v8584_v10 }
 0x55d   : > { %v3484_v58 = vpop.f32.mrf.mxu3  ;;  %v3512_v17 = vpop.f32.mrf.mxu0 }
 0x55e   : > { %v3541_v39 = vpop.f32.mrf.mxu2  ;;  %v3515_v40 = vsub.f32 %v3484_v58, %v3512_v17 }
 0x55f   : > { %v3569_v51 = vpop.f32.mrf.mxu1 }
 0x560   : > { %v3572_v49 = vsub.f32 %v3541_v39, %v3569_v51  ;;  %v3888_v21 = vrot.slane %v3515_v40, 7  ;;  %v4045_v39 = vsub.f32 1.0, %v4044_v54 }
 0x562   : > { %v3891_v34 = vrot.slane %v3572_v49, 6  ;;  %v3911_v24 = vsel %vm3078_vm4, %v3458_v33, %v3888_v21 }
 0x564   : > { %v3912_v32 = vsel %vm3080_vm5, %v3911_v24, %v3891_v34 }
 0x565   : > { %v3598_v47 = vpop.f32.mrf.mxu3  ;;  %v3626_v11 = vpop.f32.mrf.mxu0 }
 0x566   : > { %v3655_v46 = vpop.f32.mrf.mxu2  ;;  %v3629_v53 = vsub.f32 %v3598_v47, %v3626_v11  ;;  %v4046_v11 = vmul.f32 %v8584_v10, %v4045_v39 }
 0x567   : > { %v3683_v61 = vpop.f32.mrf.mxu1 }
 0x568   : > { %v3686_v62 = vsub.f32 %v3655_v46, %v3683_v61  ;;  %v3894_v25 = vrot.slane %v3629_v53, 5 }
 0x56a   : > { %v3897_v29 = vrot.slane %v3686_v62, 4  ;;  %v3913_v36 = vsel %vm3082_vm6, %v3912_v32, %v3894_v25 }
 0x56c   : > { %v3914_v37 = vsel %vm1563_vm0, %v3913_v36, %v3897_v29 }
 0x56d   : > { %v3704_v19 = vpop.f32.mrf.mxu3  ;;  %v3724_v22 = vpop.f32.mrf.mxu0 }
 0x56e   : > { %v3744_v6 = vpop.f32.mrf.mxu2  ;;  %v3725_v18 = vadd.f32 %v3724_v22, %v3704_v19  ;;  %v4047_v19 = vadd.f32 %v8584_v10, %v4046_v11 }
 0x56f   : > { %v3764_v28 = vpop.f32.mrf.mxu1 }
 0x570   : > { %v3765_v31 = vadd.f32 %v3764_v28, %v3744_v6  ;;  %v3900_v1 = vrot.slane %v3725_v18, 3  ;;  %v4049_v40 = vsel %vm4048_vm11, %v8584_v10, %v4047_v19 }
 0x572   : > { %v3903_v45 = vrot.slane %v3765_v31, 2  ;;  %v3915_v5 = vsel %vm12322_vm7, %v3914_v37, %v3900_v1 }
 0x574   : > { %v3916_v44 = vsel %vm12321_vm8, %v3915_v5, %v3903_v45 }
 0x575   : > { %v3784_v30 = vpop.f32.mrf.mxu3  ;;  %v3804_v48 = vpop.f32.mrf.mxu0 }
 0x576   : > { %v3824_v27 = vpop.f32.mrf.mxu2  ;;  %v3805_v50 = vadd.f32 %v3804_v48, %v3784_v30 }
 0x577   : > { %v3844_v42 = vpop.f32.mrf.mxu1 }
 0x578   : > { %v3906_v57 = vrot.slane %v3805_v50, 1  ;;  %v3845_v59 = vadd.f32 %v3844_v42, %v3824_v27 }
 0x57a   : > { %v3917_v4 = vsel %vm12272_vm15, %v3916_v44, %v3906_v57 }
 0x57d   : > { %v3864_v52 = vpop.f32.mrf.mxu3  ;;  %v3884_v55 = vpop.f32.mrf.mxu0 }
 0x57e   : > { %v3885_v41 = vadd.f32 %v3884_v55, %v3864_v52  ;;  %v3952_v38 = vpop.f32.mrf.mxu2 }
 0x580   : > { %v3909_v63 = vrot.slane %v3885_v41, 7 }
 0x582   : > { %v3918_v2 = vsel %vm3078_vm4, %v3845_v59, %v3909_v63  ;;  %v8531_v59 = vld [vmem:[%s12493_s22] ss:$0 sm:$0xff]  ;;  %s12528_s22 = sld [smem:[#allocation14_spill]] }
 0x583   : > { %8025 = vmatpush.msk.msra.mxu3 %vm3080_vm5, %v3918_v2 }
 0x585   : > { %4018 = vmatpush.msra.mxu3 %v3917_v4 }
 0x586   : > { %v3955_v15 = vpop.f32.mrf.mxu2  ;;  %8026 = vmatmul.msk.f32.vlgmr.msra.gmra.mxu3 %vm3993_vm14, %v3919_v9 }
 0x58e   : > { %v3958_v26 = vpop.f32.mrf.mxu2  ;;  %8027 = vmatmul.msk.f32.gmra.mxu3 %vm3993_vm14, %v3920_v3 }
 0x58f   : > { %8022 = vmatpush.msk.msrb.mxu1 %vm1563_vm0, %v3958_v26 }
 0x591   : > { %3984 = vmatpush.msrb.mxu1 %v3955_v15 }
 0x593   : > { %3985 = vmatpush.msrb.mxu1 %v3952_v38  ;;  %v8530_v38 = vld [vmem:[%s12492_s18] ss:$0 sm:$0xff]  ;;  %s12515_s18 = sld [smem:[#allocation18_spill]] }
 0x594   : > { %8023 = vmatmul.msk.f32.vlgmr.msrb.gmra.mxu1 %vm12270_vm1, %v3921_v60 }
 0x59c   : > { %8024 = vmatmul.msk.f32.gmra.mxu1 %vm12270_vm1, %v3922_v8 }
 0x609   : > { %v4020_v12 = vpop.f32.mrf.mxu3 }
 0x611   : > { %v3987_v23 = vpop.f32.mrf.mxu1  ;;  %v4023_v13 = vpop.f32.mrf.mxu3 }
 0x612   : > { %v4021_v43 = vadd.f32 %v4020_v12, %v3987_v23 }
 0x614   : > { %v4030_v20 = vadd.f32 %v8529_v56, %v4021_v43 }
 0x616   : > { %v4033_v58 = vsel %vm4032_vm2, %v4030_v20, 0.0 }
 0x619   : > { %v3990_v35 = vpop.f32.mrf.mxu1 }
 0x61a   : > { %v4024_v14 = vadd.f32 %v4023_v13, %v3990_v35 }
 0x61c   : > { %v4031_v16 = vadd.f32 %v8529_v56, %v4024_v14 }
 0x61e   : > { %v4035_v17 = vsel %vm4034_vm10, %v4031_v16, 0.0 }
 0x61f   : > { %v4036_v51 = vadd.f32 %v4035_v17, %v4033_v58 }
 0x621   : > { %v4037_v47 = vrot.slane %v4036_v51, 4 }
 0x623   : > { %v4038_v46 = vadd.f32 %v4037_v47, %v4036_v51 }
 0x625   : > { %v4039_v61 = vrot.slane %v4038_v46, 2 }
 0x627   : > { %v4040_v22 = vadd.f32 %v4039_v61, %v4038_v46 }
 0x629   : > { %v4041_v6 = vrot.slane %v4040_v22, 1 }
 0x62b   : > { %v4042_v28 = vadd.f32 %v4041_v6, %v4040_v22 }
 0x62d   : > { %v4050_v49 = vmul.f32 %v4049_v40, %v4042_v28 }
 0x62f   : > { %v4051_v21 = vsub.f32 %v4030_v20, %v4050_v49  ;;  %v4052_v53 = vsub.f32 %v4031_v16, %v4050_v49 }
 0x631   : > { %v4053_v30 = vmul.f32 %v4051_v21, %v4051_v21  ;;  %v4054_v48 = vmul.f32 %v4052_v53, %v4052_v53 }
 0x633   : > { %v4055_v33 = vsel %vm4032_vm2, %v4053_v30, 0.0  ;;  %v4056_v27 = vsel %vm4034_vm10, %v4054_v48, 0.0 }
 0x634   : > { %v4057_v34 = vadd.f32 %v4056_v27, %v4055_v33 }
 0x636   : > { %v4058_v62 = vrot.slane %v4057_v34, 4 }
 0x638   : > { %v4059_v24 = vadd.f32 %v4058_v62, %v4057_v34 }
 0x63a   : > { %v4060_v25 = vrot.slane %v4059_v24, 2 }
 0x63c   : > { %v4061_v18 = vadd.f32 %v4060_v25, %v4059_v24  ;;  %v9888_v24 = vld [vmem:[%s12494_s23 + $0x38] sm:$0xff]  ;;  %v9891_v25 = vld [vmem:[%s12494_s23 + $0x30] sm:$0xff] }
 0x63d   : > { %4223 = vmatpush.msra.mxu1 %v9888_v24 }
 0x63e   : > { %v4062_v32 = vrot.slane %v4061_v18, 1 }
 0x63f   : > { %4224 = vmatpush.msra.mxu1 %v9891_v25 }
 0x640   : > { %v4063_v29 = vadd.f32 %v4062_v32, %v4061_v18  ;;  %v9894_v18 = vld [vmem:[%s12495_s26 + $0x38] sm:$0xff] }
 0x641   : > { %4254 = vmatpush.msrb.mxu3 %v9894_v18 }
 0x642   : > { %v4064_v31 = vmul.f32 %v4063_v29, %v4049_v40 }
 0x644   : > { %v4065_v36 = vadd.f32 1e-05, %v4064_v31  ;;  %v9899_v31 = vld [vmem:[%s12495_s26 + $0x78] sm:$0xff] }
 0x645   : > { %4319 = vmatpush.msrb.mxu2 %v9899_v31 }
 0x646   : > { %8585 = vrsqrt.f32 %v4065_v36  ;;  %vm4072_vm10 = vweird.f32 %v4065_v36 }
 0x64c   : > { %v8586_v1 = vpop.eup %8585 }
 0x64d   : > { %v4067_v50 = vmul.f32 %v8586_v1, %v4065_v36  ;;  %vm4073_vm12 = vweird.f32 %v8586_v1 }
 0x64e   : > { %vm4074_vm11 = vmor %vm4072_vm10, %vm4073_vm12 }
 0x64f   : > { %v4068_v42 = vmul.f32 %v8586_v1, %v4067_v50  ;;  %v9906_v50 = vld [vmem:[%s12495_s26 + $0x30] sm:$0xff] }
 0x650   : > { %4255 = vmatpush.msrb.mxu3 %v9906_v50 }
 0x651   : > { %v4069_v52 = vmul.f32 0.5, %v4068_v42  ;;  %v9909_v42 = vld [vmem:[%s12495_s26 + $0x70] sm:$0xff] }
 0x652   : > { %4320 = vmatpush.msrb.mxu2 %v9909_v42 }
 0x653   : > { %v4070_v55 = vsub.f32 1.5, %v4069_v52 }
 0x655   : > { %v4071_v41 = vmul.f32 %v8586_v1, %v4070_v55  ;;  %v9914_v55 = vld [vmem:[%s12495_s26 + $0x28] sm:$0xff] }
 0x656   : > { %4256 = vmatpush.msrb.mxu3 %v9914_v55 }
 0x657   : > { %v4075_v37 = vsel %vm4074_vm11, %v8586_v1, %v4071_v41  ;;  %v9903_v1 = vld [vmem:[%s12494_s23 + $0x28] sm:$0xff] }
 0x658   : > { %v4076_v45 = vmul.f32 %v4075_v37, %v4051_v21  ;;  %v4077_v57 = vmul.f32 %v4075_v37, %v4052_v53  ;;  %v9921_v37 = vld [vmem:[%s12495_s26 + $0x68] sm:$0xff]  ;;  %4225 = vmatpush.msra.mxu1 %v9903_v1 }
 0x659   : > { %4321 = vmatpush.msrb.mxu2 %v9921_v37 }
 0x65a   : > { %v4083_v63 = vmul.f32 %v8530_v38, %v4077_v57  ;;  %v4082_v5 = vmul.f32 %v8530_v38, %v4076_v45  ;;  %v9918_v38 = vld [vmem:[%s12494_s23 + $0x20] sm:$0xff] }
 0x65b   : > { %v9924_v45 = vld [vmem:[%s12495_s26 + $0x20] sm:$0xff]  ;;  %4226 = vmatpush.msra.mxu1 %v9918_v38 }
 0x65c   : > { %v9875_v2 = vadd.f32 %v8531_v59, %v4083_v63  ;;  %v9877_v44 = vadd.f32 %v8531_v59, %v4082_v5  ;;  %v9929_v59 = vld [vmem:[%s12495_s26 + $0x60] sm:$0xff]  ;;  %v9933_v5 = vld [vmem:[%s12494_s23 + $0x18] sm:$0xff]  ;;  %4257 = vmatpush.msrb.mxu3 %v9924_v45 }
 0x65d   : > { %4322 = vmatpush.msrb.mxu2 %v9929_v59  ;;  %4227 = vmatpush.msra.mxu1 %v9933_v5 }
 0x65e   : > { %v9880_v9 = vmul.f32 0.70710677, %v9875_v2  ;;  %v9883_v4 = vmul.f32 0.70710677, %v9877_v44 }
 0x660   : > { %v4099_v15 = vand.u32 2147483647, %v9880_v9  ;;  %v4098_v3 = vand.u32 2147483647, %v9883_v4 }
 0x662   : > { %v4101_v26 = vmul.f32 0.3275911, %v4099_v15  ;;  %v4100_v60 = vmul.f32 0.3275911, %v4098_v3  ;;  %v4153_v47 = vsub.f32 0.0, %v4099_v15  ;;  %v4152_v40 = vsub.f32 0.0, %v4098_v3 }
 0x664   : > { %v4103_v8 = vadd.f32 1.0, %v4101_v26  ;;  %v4102_v12 = vadd.f32 1.0, %v4100_v60  ;;  %v4155_v49 = vmul.f32 %v4153_v47, %v4099_v15  ;;  %v4154_v48 = vmul.f32 %v4152_v40, %v4098_v3  ;;  %v9936_v15 = vld [vmem:[%s12495_s26 + $0x18] sm:$0xff]  ;;  %v10003_v40 = vld [vmem:[%s12495_s26 + $0xb0] sm:$0xff] }
 0x665   : > { %v9941_v26 = vld [vmem:[%s12495_s26 + $0x58] sm:$0xff]  ;;  %4258 = vmatpush.msrb.mxu3 %v9936_v15 }
 0x666   : > { %8587 = vrcp.f32 %v4103_v8  ;;  %v4130_v13 = vand.u32 2147483648, %v4103_v8  ;;  %v4128_v14 = vand.u32 2147483647, %v4103_v8  ;;  %v4115_v54 = vand.u32 2147483648, %v4102_v12  ;;  %4323 = vmatpush.msrb.mxu2 %v9941_v26 }
 0x667   : > { %8589 = vrcp.f32 %v4102_v12  ;;  %v4113_v58 = vand.u32 2147483647, %v4102_v12  ;;  %vm4124_vm11 = vweird.f32 %v4103_v8  ;;  %vm4109_vm9 = vweird.f32 %v4102_v12 }
 0x668   : > { %v4131_v39 = vor.u32 1.1754944e-38, %v4130_v13  ;;  %vm4129_vm1 = vcmp.eq.f32.partialorder %v4128_v14, 8.507059e+37  ;;  %v4116_v46 = vor.u32 1.1754944e-38, %v4115_v54  ;;  %v4158_v27 = vmul.f32 1.442695, %v4155_v49  ;;  %v9960_v13 = vld [vmem:[%s12495_s26 + $0x8] sm:$0xff] }
 0x669   : > { %vm4114_vm15 = vcmp.eq.f32.partialorder %v4113_v58, 8.507059e+37  ;;  %v4156_v29 = vmul.f32 1.442695, %v4154_v48  ;;  %v9966_v14 = vld [vmem:[%s12495_s26 + $0x48] sm:$0xff]  ;;  %v9974_v58 = vld [vmem:[%s12495_s26] sm:$0xff] }
 0x66a   : > { %8591 = vpow2.f32 %v4158_v27  ;;  %v10027_v27 = vld [vmem:[%s12495_s26 + $0xe8] sm:$0xff] }
 0x66b   : > { %8593 = vpow2.f32 %v4156_v29  ;;  %12498 = vst [vmem:[#allocation38_spill] sm:$0xff] %v10027_v27  ;;  %v10043_v29 = vld [vmem:[%s12494_s23 + $0x78] sm:$0xff] }
 0x66c   : > { %v8588_v23 = vpop.eup %8587 }
 0x66d   : > { %v8590_v7 = vpop.eup %8589  ;;  %v4120_v43 = vmul.f32 %v8588_v23, %v4103_v8  ;;  %vm4125_vm12 = vweird.f32 %v8588_v23  ;;  %v9945_v8 = vld [vmem:[%s12494_s23 + $0x10] sm:$0xff] }
 0x66e   : > { %v4105_v56 = vmul.f32 %v8590_v7, %v4102_v12  ;;  %vm4110_vm10 = vweird.f32 %v8590_v7  ;;  %vm4126_vm3 = vmor %vm4124_vm11, %vm4125_vm12  ;;  %v9948_v12 = vld [vmem:[%s12495_s26 + $0x10] sm:$0xff]  ;;  %4228 = vmatpush.msra.mxu1 %v9945_v8 }
 0x66f   : > { %v4121_v10 = vsub.f32 1.0, %v4120_v43  ;;  %vm4111_vm13 = vmor %vm4109_vm9, %vm4110_vm10  ;;  %4259 = vmatpush.msrb.mxu3 %v9948_v12 }
 0x670   : > { %v4106_v35 = vsub.f32 1.0, %v4105_v56  ;;  %v8592_v43 = vpop.eup %8591 }
 0x671   : > { %v4122_v20 = vmul.f32 %v8588_v23, %v4121_v10  ;;  %v9957_v10 = vld [vmem:[%s12494_s23 + $0x8] sm:$0xff]  ;;  %4260 = vmatpush.msrb.mxu3 %v9960_v13 }
 0x672   : > { %v4107_v16 = vmul.f32 %v8590_v7, %v4106_v35  ;;  %v8594_v35 = vpop.eup %8593  ;;  %4229 = vmatpush.msra.mxu1 %v9957_v10 }
 0x673   : > { %v4123_v17 = vadd.f32 %v8588_v23, %v4122_v20  ;;  %4261 = vmatpush.msrb.mxu3 %v9974_v58 }
 0x674   : > { %v4108_v51 = vadd.f32 %v8590_v7, %v4107_v16  ;;  %v9971_v16 = vld [vmem:[%s12494_s23] sm:$0xff] }
 0x675   : > { %v4127_v11 = vsel %vm4126_vm3, %v8588_v23, %v4123_v17  ;;  %v9979_v17 = vld [vmem:[%s12494_s23 + $0xb8] sm:$0xff]  ;;  %4230 = vmatpush.msra.mxu1 %v9971_v16  ;;  %vm12531_vm3 = vcmask 1046528  }
 0x676   : > { %v4132_v61 = vsel %vm4129_vm1, %v4131_v39, %v4127_v11  ;;  %v4112_v19 = vsel %vm4111_vm13, %v8590_v7, %v4108_v51  ;;  %v9953_v7 = vld [vmem:[%s12495_s26 + $0x50] sm:$0xff]  ;;  %vm4095_vm1 = vcmp.ge.f32.partialorder %v9880_v9, 0.0  ;;  %v9982_v39 = vld [vmem:[%s12495_s26 + $0x40] sm:$0xff]  ;;  %v9987_v11 = vld [vmem:[%s12495_s26 + $0xb8] sm:$0xff] }
 0x677   : > { %v4135_v22 = vmul.f32 1.0614054, %v4132_v61  ;;  %v4117_v6 = vsel %vm4114_vm15, %v4116_v46, %v4112_v19  ;;  %vm4094_vm15 = vcmp.ge.f32.partialorder %v9883_v4, 0.0  ;;  %4324 = vmatpush.msrb.mxu2 %v9953_v7  ;;  %v4097_v51 = vsel %vm4095_vm1, 1.0, %v12273_v0  ;;  %v9990_v46 = vld [vmem:[%s12495_s26 + $0xf8] sm:$0xff]  ;;  %4352 = vmatpush.msrb.mxu1 %v9979_v17 }
 0x678   : > { %v4134_v28 = vmul.f32 1.0614054, %v4117_v6  ;;  %v4096_v19 = vsel %vm4094_vm15, 1.0, %v12273_v0  ;;  %v4091_v4 = vmul.f32 0.5, %v9875_v2  ;;  %4384 = vmatpush.msra.mxu3 %v9987_v11  ;;  %v4090_v2 = vmul.f32 0.5, %v9877_v44  ;;  %v10151_v0 = vld [vmem:[%s12495_s26 + $0x80] sm:$0xff] }
 0x679   : > { %v4137_v21 = vadd.f32 -1.4531521, %v4135_v22  ;;  %4325 = vmatpush.msrb.mxu2 %v9966_v14  ;;  %v9998_v22 = vld [vmem:[%s12494_s23 + $0xb0] sm:$0xff] }
 0x67a   : > { %v4136_v53 = vadd.f32 -1.4531521, %v4134_v28  ;;  %v10006_v28 = vld [vmem:[%s12495_s26 + $0xf0] sm:$0xff]  ;;  %4353 = vmatpush.msrb.mxu1 %v9998_v22  ;;  %4385 = vmatpush.msra.mxu3 %v10003_v40 }
 0x67b   : > { %v4139_v30 = vmul.f32 %v4137_v21, %v4132_v61  ;;  %4326 = vmatpush.msrb.mxu2 %v9982_v39  ;;  %v10012_v21 = vld [vmem:[%s12494_s23 + $0xa8] sm:$0xff] }
 0x67c   : > { %v4138_v33 = vmul.f32 %v4136_v53, %v4117_v6  ;;  %4354 = vmatpush.msrb.mxu1 %v10012_v21 }
 0x67d   : > { %v4141_v34 = vadd.f32 1.4214138, %v4139_v30  ;;  %4449 = vmatpush.msra.mxu2 %v9990_v46  ;;  %v10016_v30 = vld [vmem:[%s12495_s26 + $0xa8] sm:$0xff] }
 0x67e   : > { %v4140_v62 = vadd.f32 1.4214138, %v4138_v33  ;;  %v10024_v33 = vld [vmem:[%s12494_s23 + $0xa0] sm:$0xff]  ;;  %4386 = vmatpush.msra.mxu3 %v10016_v30 }
 0x67f   : > { %v4143_v32 = vmul.f32 %v4141_v34, %v4132_v61  ;;  %4450 = vmatpush.msra.mxu2 %v10006_v28  ;;  %v10031_v34 = vld [vmem:[%s12495_s26 + $0xa0] sm:$0xff]  ;;  %4355 = vmatpush.msrb.mxu1 %v10024_v33 }
 0x680   : > { %v4142_v36 = vmul.f32 %v4140_v62, %v4117_v6  ;;  %v4170_v62 = vld [vmem:[%s12496_s16] sm:$0xff]  ;;  %4387 = vmatpush.msra.mxu3 %v10031_v34 }
 0x681   : > { %v4145_v52 = vadd.f32 -0.28449672, %v4143_v32  ;;  %v10040_v32 = vld [vmem:[%s12494_s23 + $0x98] sm:$0xff]  ;;  %4451 = vmatpush.msra.mxu2 %v10027_v27  ;;  %v10214_v27 = vld [vmem:[%s12495_s26 + $0x120] sm:$0xff] }
 0x682   : > { %v4144_v41 = vadd.f32 -0.28449672, %v4142_v36  ;;  %v10048_v36 = vld [vmem:[%s12495_s26 + $0xe0] sm:$0xff]  ;;  %4356 = vmatpush.msrb.mxu1 %v10040_v32 }
 0x683   : > { %v4147_v57 = vmul.f32 %v4145_v52, %v4132_v61  ;;  %12500 = vst [vmem:[#allocation40_spill] sm:$0xff] %v10048_v36  ;;  %v10053_v52 = vld [vmem:[%s12494_s23 + $0x90] sm:$0xff]  ;;  %4452 = vmatpush.msra.mxu2 %v10048_v36 }
 0x684   : > { %v4146_v63 = vmul.f32 %v4144_v41, %v4117_v6  ;;  %v10056_v41 = vld [vmem:[%s12495_s26 + $0x98] sm:$0xff]  ;;  %4357 = vmatpush.msrb.mxu1 %v10053_v52  ;;  %v10173_v36 = vld [vmem:[%s12494_s23 + $0x130] sm:$0xff] }
 0x685   : > { %v4149_v3 = vadd.f32 0.2548296, %v4147_v57  ;;  %v10060_v57 = vld [vmem:[%s12494_s23 + $0x70] sm:$0xff]  ;;  %4388 = vmatpush.msra.mxu3 %v10056_v41 }
 0x686   : > { %v4148_v60 = vadd.f32 0.2548296, %v4146_v63  ;;  %v10064_v63 = vld [vmem:[%s12495_s26 + $0xd8] sm:$0xff] }
 0x687   : > { %v4151_v23 = vmul.f32 %v4149_v3, %v4132_v61  ;;  %12501 = vst [vmem:[#allocation41_spill] sm:$0xff] %v10064_v63  ;;  %v10069_v3 = vld [vmem:[%s12494_s23 + $0x88] sm:$0xff]  ;;  %4453 = vmatpush.msra.mxu2 %v10064_v63 }
 0x688   : > { %v4150_v56 = vmul.f32 %v4148_v60, %v4117_v6  ;;  %v10072_v60 = vld [vmem:[%s12495_s26 + $0x90] sm:$0xff]  ;;  %4358 = vmatpush.msrb.mxu1 %v10069_v3 }
 0x689   : > { %v4161_v20 = vmul.f32 %v8592_v43, %v4151_v23  ;;  %v10075_v23 = vld [vmem:[%s12494_s23 + $0x68] sm:$0xff]  ;;  %v10080_v43 = vld [vmem:[%s12495_s26 + $0xd0] sm:$0xff]  ;;  %4389 = vmatpush.msra.mxu3 %v10072_v60 }
 0x68a   : > { %v4160_v54 = vmul.f32 %v8594_v35, %v4150_v56  ;;  %12502 = vst [vmem:[#allocation42_spill] sm:$0xff] %v10080_v43  ;;  %v10085_v56 = vld [vmem:[%s12494_s23 + $0x60] sm:$0xff]  ;;  %v4171_v35 = vld [vmem:[%s12496_s16 + $0x8] sm:$0x3]  ;;  %4454 = vmatpush.msra.mxu2 %v10080_v43  ;;  %v10163_v43 = vld [vmem:[%s12494_s23 + $0x138] sm:$0xff] }
 0x68b   : > { %v4163_v9 = vsub.f32 1.0, %v4161_v20  ;;  %v10093_v20 = vld [vmem:[%s12494_s23 + $0x58] sm:$0xff] }
 0x68c   : > { %v4162_v47 = vsub.f32 1.0, %v4160_v54  ;;  %v10098_v54 = vld [vmem:[%s12494_s23 + $0x50] sm:$0xff] }
 0x68d   : > { %v4165_v61 = vmul.f32 %v4163_v9, %v4097_v51  ;;  %v10102_v9 = vld [vmem:[%s12494_s23 + $0x48] sm:$0xff]  ;;  %v10106_v51 = vld [vmem:[%s12494_s23 + $0x40] sm:$0xff] }
 0x68e   : > { %v4164_v6 = vmul.f32 %v4162_v47, %v4096_v19  ;;  %v10110_v47 = vld [vmem:[%s12494_s23 + $0xf8] sm:$0xff]  ;;  %v10118_v19 = vld [vmem:[%s12494_s23 + $0xe8] sm:$0xff] }
 0x68f   : > { %v4167_v49 = vadd.f32 1.0, %v4165_v61  ;;  %v10114_v61 = vld [vmem:[%s12494_s23 + $0xf0] sm:$0xff] }
 0x690   : > { %v4166_v53 = vadd.f32 1.0, %v4164_v6  ;;  %v10122_v6 = vld [vmem:[%s12494_s23 + $0xe0] sm:$0xff] }
 0x691   : > { %v10018_v48 = vmul.f32 %v4167_v49, %v4091_v4  ;;  %v10126_v4 = vld [vmem:[%s12494_s23 + $0xd8] sm:$0xff]  ;;  %v10130_v49 = vld [vmem:[%s12494_s23 + $0xd0] sm:$0xff] }
 0x692   : > { %v10035_v44 = vmul.f32 %v4166_v53, %v4090_v2  ;;  %12503 = vst [vmem:[#allocation43_spill] sm:$0xff] %v10126_v4  ;;  %v10135_v53 = vld [vmem:[%s12494_s23 + $0x80] sm:$0xff]  ;;  %v10138_v2 = vld [vmem:[%s12495_s26 + $0x88] sm:$0xff] }
 0x693   : > { %12497 = vst [vmem:[#allocation37_spill] sm:$0xff] %v10018_v48  ;;  %8028 = vmatpush.msk.msrb.mxu0 %vm3080_vm5, %v10018_v48  ;;  %4359 = vmatpush.msrb.mxu1 %v10135_v53  ;;  %v10154_v48 = vld [vmem:[%s12494_s23 + $0xc0] sm:$0xff] }
 0x694   : > { %12499 = vst [vmem:[#allocation39_spill] sm:$0xff] %v10035_v44  ;;  %4390 = vmatpush.msra.mxu3 %v10138_v2 }
 0x695   : > { %4196 = vmatpush.msrb.mxu0 %v10035_v44  ;;  %12504 = vst [vmem:[#allocation44_spill] sm:$0xff] %v10130_v49  ;;  %v10157_v44 = vld [vmem:[%s12495_s26 + $0xc0] sm:$0xff] }
 0x696   : > { %8029 = vmatmul.msk.f32.vlgmr.msrb.gmra.mxu0 %vm3993_vm14, %v4170_v62  ;;  %v10141_v62 = vld [vmem:[%s12494_s23 + $0xc8] sm:$0xff]  ;;  %12507 = vst [vmem:[#allocation47_spill] sm:$0xff] %v10154_v48  ;;  %4391 = vmatpush.msra.mxu3 %v10151_v0 }
 0x697   : > { %4287 = vmatpush.msra.mxu0 %v10043_v29  ;;  %12505 = vst [vmem:[#allocation45_spill] sm:$0xff] %v10141_v62 }
 0x698   : > { %12508 = vst [vmem:[#allocation48_spill] sm:$0xff] %v10157_v44 }
 0x699   : > { %4288 = vmatpush.msra.mxu0 %v10060_v57 }
 0x69b   : > { %4289 = vmatpush.msra.mxu0 %v10075_v23 }
 0x69d   : > { %4290 = vmatpush.msra.mxu0 %v10085_v56 }
 0x69e   : > { %8030 = vmatmul.msk.f32.gmra.mxu0 %vm3993_vm14, %v4171_v35  ;;  %v10146_v35 = vld [vmem:[%s12495_s26 + $0xc8] sm:$0xff] }
 0x69f   : > { %4291 = vmatpush.msra.mxu0 %v10093_v20  ;;  %12506 = vst [vmem:[#allocation46_spill] sm:$0xff] %v10146_v35  ;;  %4455 = vmatpush.msra.mxu2 %v10146_v35 }
 0x6a1   : > { %4292 = vmatpush.msra.mxu0 %v10098_v54  ;;  %4456 = vmatpush.msra.mxu2 %v10157_v44  ;;  %v10177_v44 = vld [vmem:[%s12495_s26 + $0x138] sm:$0xff] }
 0x6a3   : > { %4293 = vmatpush.msra.mxu0 %v10102_v9 }
 0x6a5   : > { %4294 = vmatpush.msra.mxu0 %v10106_v51 }
 0x6a7   : > { %4417 = vmatpush.msrb.mxu0 %v10110_v47 }
 0x6a9   : > { %4418 = vmatpush.msrb.mxu0 %v10114_v61 }
 0x6ab   : > { %4419 = vmatpush.msrb.mxu0 %v10118_v19 }
 0x6ad   : > { %4420 = vmatpush.msrb.mxu0 %v10122_v6 }
 0x6af   : > { %4421 = vmatpush.msrb.mxu0 %v10126_v4  ;;  %v10193_v4 = vld [vmem:[%s12495_s26 + $0x130] sm:$0xff] }
 0x6b1   : > { %4422 = vmatpush.msrb.mxu0 %v10130_v49 }
 0x6b3   : > { %4423 = vmatpush.msrb.mxu0 %v10141_v62 }
 0x6b5   : > { %4424 = vmatpush.msrb.mxu0 %v10154_v48  ;;  %v10186_v48 = vld [vmem:[%s12494_s23 + $0x128] sm:$0xff] }
 0x713   : > { %v10165_v62 = vpop.f32.mrf.mxu0 }
 0x714   : > { %8031 = vmatmul.msk.f32.vlgmr.msra.gmra.mxu1 %vm4032_vm2, %v10165_v62  ;;  %v12286_v35 = vrot.slane %v10165_v62, 5  ;;  %v12287_v63 = vrot.slane %v10165_v62, 1  ;;  %v12288_v49 = vrot.slane %v10165_v62, 6 }
 0x715   : > { %4482 = vmatpush.msra.mxu1 %v10163_v43 }
 0x716   : > { %8032 = vmatmul.msk.f32.vlgmr.msrb.gmra.mxu3 %vm4032_vm2, %v12286_v35  ;;  %8041 = vmatmul.msk.f32.vlgmr.msra.gmra.mxu0 %vm4032_vm2, %v12287_v63  ;;  %v10198_v35 = vld [vmem:[%s12494_s23 + $0x120] sm:$0xff]  ;;  %v10203_v63 = vld [vmem:[%s12495_s26 + $0x128] sm:$0xff] }
 0x717   : > { %8050 = vmatmul.msk.f32.vlgmr.msrb.gmra.mxu2 %vm4032_vm2, %v12288_v49  ;;  %4483 = vmatpush.msra.mxu1 %v10173_v36  ;;  %v10211_v49 = vld [vmem:[%s12494_s23 + $0x118] sm:$0xff] }
 0x718   : > { %4514 = vmatpush.msrb.mxu3 %v10177_v44  ;;  %4535 = vmatpush.msra.mxu0 %v9888_v24  ;;  %v12290_v24 = vrot.slane %v10165_v62, 2 }
 0x719   : > { %4555 = vmatpush.msrb.mxu2 %v9894_v18  ;;  %4484 = vmatpush.msra.mxu1 %v10186_v48  ;;  %v12292_v18 = vrot.slane %v10165_v62, 7 }
 0x71a   : > { %4515 = vmatpush.msrb.mxu3 %v10193_v4  ;;  %4536 = vmatpush.msra.mxu0 %v9891_v25 }
 0x71b   : > { %4556 = vmatpush.msrb.mxu2 %v9906_v50  ;;  %4485 = vmatpush.msra.mxu1 %v10198_v35  ;;  %v10224_v25 = vpop.f32.mrf.mxu0  ;;  %v12291_v50 = vrot.slane %v10165_v62, 3 }
 0x71c   : > { %4516 = vmatpush.msrb.mxu3 %v10203_v63  ;;  %4537 = vmatpush.msra.mxu0 %v9903_v1  ;;  %v10229_v1 = vld [vmem:[%s12494_s23 + $0x110] sm:$0xff] }
 0x71d   : > { %4557 = vmatpush.msrb.mxu2 %v9914_v55  ;;  %8059 = vmatmul.msk.f32.vlgmr.msrb.gmra.mxu1 %vm4032_vm2, %v12290_v24  ;;  %v10234_v55 = vld [vmem:[%s12495_s26 + $0x118] sm:$0xff]  ;;  %v10243_v24 = vld [vmem:[%s12494_s23 + $0x108] sm:$0xff] }
 0x71e   : > { %4486 = vmatpush.msra.mxu1 %v10211_v49  ;;  %4517 = vmatpush.msrb.mxu3 %v10214_v27 }
 0x71f   : > { %4538 = vmatpush.msra.mxu0 %v9918_v38  ;;  %4558 = vmatpush.msrb.mxu2 %v9924_v45  ;;  %v10249_v38 = vld [vmem:[%s12495_s26 + $0x110] sm:$0xff]  ;;  %v10254_v45 = vld [vmem:[%s12494_s23 + $0x100] sm:$0xff] }
 0x720   : > { %8068 = vmatmul.msk.f32.vlgmr.msra.gmra.mxu3 %vm4032_vm2, %v12292_v18  ;;  %8077 = vmatmul.msk.f32.vlgmr.msrb.gmra.mxu0 %vm4032_vm2, %v12291_v50  ;;  %v10259_v50 = vld [vmem:[%s12495_s26 + $0x108] sm:$0xff]  ;;  %v10266_v18 = vld [vmem:[%s12495_s26 + $0x100] sm:$0xff] }
 0x721   : > { %8086 = vmatmul.msk.f32.vlgmr.msra.gmra.mxu2 %vm4032_vm2, %v10224_v25  ;;  %4487 = vmatpush.msra.mxu1 %v10229_v1 }
 0x722   : > { %4518 = vmatpush.msrb.mxu3 %v10234_v55  ;;  %4539 = vmatpush.msra.mxu0 %v9933_v5  ;;  %v4471_v5 = vrot.slane %v10165_v62, 4 }
 0x723   : > { %4559 = vmatpush.msrb.mxu2 %v9936_v15  ;;  %4488 = vmatpush.msra.mxu1 %v10243_v24  ;;  %v4503_v15 = vrot.slane %v10224_v25, 1 }
 0x724   : > { %4519 = vmatpush.msrb.mxu3 %v10249_v38  ;;  %4540 = vmatpush.msra.mxu0 %v9945_v8  ;;  %v12509_v8 = vrot.slane %v10165_v62, 5 }
 0x725   : > { %4560 = vmatpush.msrb.mxu2 %v9948_v12  ;;  %4489 = vmatpush.msra.mxu1 %v10254_v45  ;;  %v12517_v12 = vld [vmem:[#allocation40_spill] sm:$0xff] }
 0x726   : > { %4520 = vmatpush.msrb.mxu3 %v10259_v50  ;;  %4541 = vmatpush.msra.mxu0 %v9957_v10  ;;  %v12519_v10 = vld [vmem:[#allocation41_spill] sm:$0xff] }
 0x727   : > { %4561 = vmatpush.msrb.mxu2 %v9960_v13  ;;  %4575 = vmatpush.msrb.mxu1 %v10043_v29  ;;  %v12520_v13 = vld [vmem:[#allocation45_spill] sm:$0xff] }
 0x728   : > { %8095 = vmatmul.msk.f32.vlgmr.msra.gmra.mxu1 %vm4032_vm2, %v4471_v5  ;;  %4521 = vmatpush.msrb.mxu3 %v10266_v18 }
 0x729   : > { %4542 = vmatpush.msra.mxu0 %v9971_v16  ;;  %4562 = vmatpush.msrb.mxu2 %v9974_v58  ;;  %v12522_v16 = vld [vmem:[#allocation47_spill] sm:$0xff]  ;;  %v4770_v58 = vld [vmem:[%s12515_s18 + $0x38] sm:$0xff] }
 0x72a   : > { %4576 = vmatpush.msrb.mxu1 %v10060_v57  ;;  %4595 = vmatpush.msra.mxu3 %v9899_v31  ;;  %v12510_v31 = vrot.slane %v10165_v62, 6 }
 0x72b   : > { %4615 = vmatpush.msrb.mxu0 %v9979_v17  ;;  %4635 = vmatpush.msra.mxu2 %v9987_v11  ;;  %v12523_v17 = vld [vmem:[#allocation46_spill] sm:$0xff]  ;;  %v4769_v11 = vld [vmem:[%s12515_s18 + $0x30] sm:$0xff] }
 0x72c   : > { %8104 = vmatmul.msk.f32.vlgmr.msrb.gmra.mxu3 %vm4032_vm2, %v4503_v15  ;;  %8105 = vmatmul.msk.f32.vlgmr.msra.gmra.mxu0 %vm4032_vm2, %v12509_v8 }
 0x72d   : > { %8106 = vmatmul.msk.f32.vlgmr.msrb.gmra.mxu2 %vm4032_vm2, %v10165_v62  ;;  %4577 = vmatpush.msrb.mxu1 %v10075_v23 }
 0x72e   : > { %4596 = vmatpush.msra.mxu3 %v9909_v42  ;;  %4616 = vmatpush.msrb.mxu0 %v9998_v22  ;;  %v12511_v42 = vrot.slane %v10165_v62, 1  ;;  %v4768_v22 = vld [vmem:[%s12515_s18 + $0x28] sm:$0xff] }
 0x72f   : > { %4636 = vmatpush.msra.mxu2 %v10003_v40  ;;  %4578 = vmatpush.msrb.mxu1 %v10085_v56  ;;  %v4767_v40 = vld [vmem:[%s12515_s18 + $0x20] sm:$0xff] }
 0x730   : > { %4597 = vmatpush.msra.mxu3 %v9921_v37  ;;  %4617 = vmatpush.msrb.mxu0 %v10012_v21  ;;  %v12512_v37 = vrot.slane %v10165_v62, 7  ;;  %v4765_v21 = vld [vmem:[%s12515_s18 + $0x10] sm:$0xff] }
 0x731   : > { %4637 = vmatpush.msra.mxu2 %v10016_v30  ;;  %4579 = vmatpush.msrb.mxu1 %v10093_v20  ;;  %v4764_v30 = vld [vmem:[%s12515_s18 + $0x8] sm:$0xff] }
 0x732   : > { %4598 = vmatpush.msra.mxu3 %v9929_v59  ;;  %4618 = vmatpush.msrb.mxu0 %v10024_v33  ;;  %v12513_v59 = vrot.slane %v10165_v62, 2  ;;  %v12526_v33 = vld [vmem:[#allocation39_spill] sm:$0xff] }
 0x733   : > { %4638 = vmatpush.msra.mxu2 %v10031_v34  ;;  %4580 = vmatpush.msrb.mxu1 %v10098_v54 }
 0x734   : > { %4599 = vmatpush.msra.mxu3 %v9941_v26  ;;  %4619 = vmatpush.msrb.mxu0 %v10040_v32  ;;  %v12516_v26 = vld [vmem:[#allocation43_spill] sm:$0xff] }
 0x735   : > { %4639 = vmatpush.msra.mxu2 %v10056_v41  ;;  %4581 = vmatpush.msrb.mxu1 %v10102_v9 }
 0x736   : > { %4600 = vmatpush.msra.mxu3 %v9953_v7  ;;  %4620 = vmatpush.msrb.mxu0 %v10053_v52  ;;  %v12518_v7 = vld [vmem:[#allocation44_spill] sm:$0xff] }
 0x737   : > { %4640 = vmatpush.msra.mxu2 %v10072_v60  ;;  %4582 = vmatpush.msrb.mxu1 %v10106_v51 }
 0x738   : > { %4601 = vmatpush.msra.mxu3 %v9966_v14  ;;  %4621 = vmatpush.msrb.mxu0 %v10069_v3  ;;  %v12521_v14 = vld [vmem:[#allocation42_spill] sm:$0xff] }
 0x739   : > { %4641 = vmatpush.msra.mxu2 %v10138_v2  ;;  %8107 = vmatmul.msk.f32.vlgmr.msrb.gmra.mxu1 %vm4032_vm2, %v12510_v31 }
 0x73a   : > { %4655 = vmatpush.msra.mxu1 %v10110_v47  ;;  %4602 = vmatpush.msra.mxu3 %v9982_v39  ;;  %v12524_v39 = vld [vmem:[#allocation48_spill] sm:$0xff] }
 0x73b   : > { %4622 = vmatpush.msrb.mxu0 %v10135_v53  ;;  %4642 = vmatpush.msra.mxu2 %v10151_v0  ;;  %v12514_v0 = vld [vmem:[#allocation38_spill] sm:$0xff] }
 0x73c   : > { %8108 = vmatmul.msk.f32.vlgmr.msra.gmra.mxu3 %vm4032_vm2, %v12511_v42  ;;  %8109 = vmatmul.msk.f32.vlgmr.msrb.gmra.mxu0 %vm4032_vm2, %v12512_v37 }
 0x73d   : > { %8110 = vmatmul.msk.f32.vlgmr.msra.gmra.mxu2 %vm4032_vm2, %v12513_v59  ;;  %4656 = vmatpush.msra.mxu1 %v10114_v61 }
 0x73e   : > { %4675 = vmatpush.msrb.mxu3 %v9990_v46  ;;  %4695 = vmatpush.msra.mxu0 %v10163_v43  ;;  %v12525_v46 = vrot.slane %v10165_v62, 3 }
 0x73f   : > { %4715 = vmatpush.msrb.mxu2 %v10177_v44  ;;  %4657 = vmatpush.msra.mxu1 %v10118_v19 }
 0x740   : > { %4676 = vmatpush.msrb.mxu3 %v10006_v28  ;;  %4696 = vmatpush.msra.mxu0 %v10173_v36  ;;  %v4766_v28 = vld [vmem:[%s12515_s18 + $0x18] sm:$0xff] }
 0x741   : > { %4716 = vmatpush.msrb.mxu2 %v10193_v4  ;;  %4658 = vmatpush.msra.mxu1 %v10122_v6 }
 0x742   : > { %4677 = vmatpush.msrb.mxu3 %v12514_v0  ;;  %4697 = vmatpush.msra.mxu0 %v10186_v48  ;;  %v4763_v48 = vld [vmem:[%s12515_s18] sm:$0xff] }
 0x743   : > { %4717 = vmatpush.msrb.mxu2 %v10203_v63  ;;  %4659 = vmatpush.msra.mxu1 %v12516_v26 }
 0x744   : > { %4678 = vmatpush.msrb.mxu3 %v12517_v12  ;;  %4698 = vmatpush.msra.mxu0 %v10198_v35  ;;  %v4759_v12 = vld [vmem:[%s12528_s22] sm:$0xff] }
 0x745   : > { %4718 = vmatpush.msrb.mxu2 %v10214_v27  ;;  %4660 = vmatpush.msra.mxu1 %v12518_v7  ;;  %v12527_v27 = vld [vmem:[#allocation37_spill] sm:$0xff] }
 0x746   : > { %4679 = vmatpush.msrb.mxu3 %v12519_v10  ;;  %4699 = vmatpush.msra.mxu0 %v10211_v49 }
 0x747   : > { %4719 = vmatpush.msrb.mxu2 %v10234_v55  ;;  %4661 = vmatpush.msra.mxu1 %v12520_v13  ;;  %v4760_v13 = vld [vmem:[%s12528_s22 + $0x8] sm:$0x3] }
 0x748   : > { %4680 = vmatpush.msrb.mxu3 %v12521_v14  ;;  %4700 = vmatpush.msra.mxu0 %v10229_v1 }
 0x749   : > { %4720 = vmatpush.msrb.mxu2 %v10249_v38  ;;  %4662 = vmatpush.msra.mxu1 %v12522_v16  ;;  %v4761_v16 = vld [vmem:[%s12529_s1] sm:$0xff] }
 0x74a   : > { %4681 = vmatpush.msrb.mxu3 %v12523_v17  ;;  %4701 = vmatpush.msra.mxu0 %v10243_v24 }
 0x74b   : > { %4721 = vmatpush.msrb.mxu2 %v10259_v50  ;;  %8111 = vmatmul.msk.f32.vlgmr.msra.gmra.mxu1 %vm4032_vm2, %v10224_v25 }
 0x74c   : > { %4784 = vmatpush.msrb.mxu1 %v4770_v58  ;;  %4682 = vmatpush.msrb.mxu3 %v12524_v39  ;;  %v4762_v58 = vld [vmem:[%s12529_s1 + $0x8] sm:$0x3]  ;;  %v8532_v39 = vld [vmem:[%s12530_s2] ss:$0 sm:$0xff]  ;;  %s12532_s2 = sld [smem:[#allocation23_spill]] }
 0x74d   : > { %4702 = vmatpush.msra.mxu0 %v10254_v45  ;;  %4722 = vmatpush.msrb.mxu2 %v10266_v18  ;;  %s12533_s1 = sld [smem:[#allocation24_spill]] }
 0x74e   : > { %8112 = vmatmul.msk.f32.vlgmr.msrb.gmra.mxu3 %vm4032_vm2, %v12525_v46  ;;  %8113 = vmatmul.msk.f32.vlgmr.msra.gmra.mxu0 %vm4032_vm2, %v4503_v15 }
 0x74f   : > { %8114 = vmatmul.msk.f32.vlgmr.msrb.gmra.mxu2 %vm4032_vm2, %v4471_v5  ;;  %4785 = vmatpush.msrb.mxu1 %v4769_v11 }
 0x751   : > { %4786 = vmatpush.msrb.mxu1 %v4768_v22 }
 0x753   : > { %4787 = vmatpush.msrb.mxu1 %v4767_v40 }
 0x755   : > { %4788 = vmatpush.msrb.mxu1 %v4766_v28 }
 0x757   : > { %4789 = vmatpush.msrb.mxu1 %v4765_v21 }
 0x759   : > { %4790 = vmatpush.msrb.mxu1 %v4764_v30 }
 0x75b   : > { %4791 = vmatpush.msrb.mxu1 %v4763_v48 }
 0x75c   : > { %8115 = vmatmul.msk.f32.vlgmr.msrb.gmra.mxu1 %vm4032_vm2, %v12526_v33 }
 0x764   : > { %8116 = vmatmul.msk.f32.gmra.mxu1 %vm4032_vm2, %v12527_v27 }
 0x791   : > { %v4232_v34 = vpop.f32.mrf.mxu1 }
 0x793   : > { %v4296_v44 = vpop.f32.mrf.mxu0 }
 0x799   : > { %v4263_v32 = vpop.f32.mrf.mxu3 }
 0x79a   : > { %v4328_v29 = vpop.f32.mrf.mxu2  ;;  %v4361_v36 = vpop.f32.mrf.mxu1  ;;  %v4266_v4 = vsub.f32 %v4232_v34, %v4263_v32 }
 0x79b   : > { %v4331_v43 = vsub.f32 %v4296_v44, %v4328_v29 }
 0x79d   : > { %v4426_v52 = vpop.f32.mrf.mxu0  ;;  %v4728_v20 = vrot.slane %v4331_v43, 7 }
 0x79f   : > { %v4751_v49 = vsel %vm3078_vm4, %v4266_v4, %v4728_v20 }
 0x7a3   : > { %v4393_v41 = vpop.f32.mrf.mxu3 }
 0x7a4   : > { %v4458_v57 = vpop.f32.mrf.mxu2  ;;  %v4396_v56 = vsub.f32 %v4361_v36, %v4393_v41 }
 0x7a5   : > { %v4491_v63 = vpop.f32.mrf.mxu1  ;;  %v4461_v54 = vsub.f32 %v4426_v52, %v4458_v57 }
 0x7a6   : > { %v4731_v47 = vrot.slane %v4396_v56, 6 }
 0x7a7   : > { %v4734_v53 = vrot.slane %v4461_v54, 5 }
 0x7a8   : > { %v4752_v62 = vsel %vm3080_vm5, %v4751_v49, %v4731_v47 }
 0x7a9   : > { %v4544_v3 = vpop.f32.mrf.mxu0  ;;  %v4753_v25 = vsel %vm3082_vm6, %v4752_v62, %v4734_v53 }
 0x7af   : > { %v4523_v60 = vpop.f32.mrf.mxu3 }
 0x7b0   : > { %v4564_v23 = vpop.f32.mrf.mxu2  ;;  %v4526_v61 = vsub.f32 %v4491_v63, %v4523_v60 }
 0x7b1   : > { %v4565_v2 = vadd.f32 %v4564_v23, %v4544_v3 }
 0x7b2   : > { %v4737_v35 = vrot.slane %v4526_v61, 4 }
 0x7b3   : > { %v4740_v18 = vrot.slane %v4565_v2, 3 }
 0x7b4   : > { %v4754_v38 = vsel %vm1563_vm0, %v4753_v25, %v4737_v35 }
 0x7b5   : > { %v4755_v59 = vsel %vm12322_vm7, %v4754_v38, %v4740_v18 }
 0x7b6   : > { %v4584_v9 = vpop.f32.mrf.mxu1 }
 0x7b9   : > { %v4624_v51 = vpop.f32.mrf.mxu0 }
 0x7bf   : > { %v4604_v19 = vpop.f32.mrf.mxu3 }
 0x7c0   : > { %v4644_v6 = vpop.f32.mrf.mxu2  ;;  %v4605_v24 = vadd.f32 %v4604_v19, %v4584_v9 }
 0x7c1   : > { %v4645_v50 = vadd.f32 %v4644_v6, %v4624_v51 }
 0x7c2   : > { %v4743_v45 = vrot.slane %v4605_v24, 2 }
 0x7c3   : > { %v4746_v31 = vrot.slane %v4645_v50, 1 }
 0x7c4   : > { %v4756_v0 = vsel %vm12321_vm8, %v4755_v59, %v4743_v45 }
 0x7c5   : > { %v4757_v10 = vsel %vm12531_vm3, %v4756_v0, %v4746_v31  ;;  %v10418_v0 = vld [vmem:[%s12532_s2 + $0x38] sm:$0xff] }
 0x7c8   : > { %v4664_v1 = vpop.f32.mrf.mxu1 }
 0x7cb   : > { %v4704_v55 = vpop.f32.mrf.mxu0 }
 0x7d1   : > { %v4684_v5 = vpop.f32.mrf.mxu3 }
 0x7d2   : > { %v4724_v15 = vpop.f32.mrf.mxu2  ;;  %v4685_v42 = vadd.f32 %v4684_v5, %v4664_v1 }
 0x7d3   : > { %v4725_v8 = vadd.f32 %v4724_v15, %v4704_v55 }
 0x7d5   : > { %v4749_v37 = vrot.slane %v4725_v8, 7 }
 0x7d7   : > { %v4758_v26 = vsel %vm3078_vm4, %v4685_v42, %v4749_v37 }
 0x7d8   : > { %8120 = vmatpush.msk.msrb.mxu0 %vm3080_vm5, %v4758_v26  ;;  %v10421_v26 = vld [vmem:[%s12532_s2 + $0x30] sm:$0xff] }
 0x7d9   : > { %v4793_v7 = vpop.f32.mrf.mxu1 }
 0x7da   : > { %4855 = vmatpush.msrb.mxu0 %v4757_v10 }
 0x7db   : > { %8121 = vmatmul.msk.f32.vlgmr.msrb.gmra.mxu0 %vm3993_vm14, %v4759_v12  ;;  %v10424_v12 = vld [vmem:[%s12533_s1 + $0x38] sm:$0xff] }
 0x7dc   : > { %5033 = vmatpush.msra.mxu0 %v10424_v12 }
 0x7e1   : > { %v4796_v14 = vpop.f32.mrf.mxu1 }
 0x7e2   : > { %8117 = vmatpush.msk.msra.mxu3 %vm3080_vm5, %v4796_v14  ;;  %v10433_v14 = vld [vmem:[%s12532_s2 + $0x28] sm:$0xff] }
 0x7e3   : > { %8122 = vmatmul.msk.f32.gmra.mxu0 %vm3993_vm14, %v4760_v13  ;;  %v10429_v13 = vld [vmem:[%s12533_s1 + $0x78] sm:$0xff] }
 0x7e4   : > { %4823 = vmatpush.msra.mxu3 %v4793_v7  ;;  %5098 = vmatpush.msra.mxu1 %v10429_v13 }
 0x7e5   : > { %8118 = vmatmul.msk.f32.vlgmr.msra.gmra.mxu3 %vm3993_vm14, %v4761_v16  ;;  %v10436_v16 = vld [vmem:[%s12533_s1 + $0x30] sm:$0xff] }
 0x7e6   : > { %5002 = vmatpush.msrb.mxu3 %v10418_v0  ;;  %5034 = vmatpush.msra.mxu0 %v10436_v16 }
 0x7e8   : > { %5003 = vmatpush.msrb.mxu3 %v10421_v26 }
 0x7ea   : > { %5004 = vmatpush.msrb.mxu3 %v10433_v14 }
 0x7ed   : > { %8119 = vmatmul.msk.f32.gmra.mxu3 %vm3993_vm14, %v4762_v58  ;;  %v10439_v58 = vld [vmem:[%s12533_s1 + $0x70] sm:$0xff] }
 0x7ee   : > { %5099 = vmatpush.msra.mxu1 %v10439_v58 }
 0x858   : > { %v4857_v17 = vpop.f32.mrf.mxu0 }
 0x860   : > { %v4860_v28 = vpop.f32.mrf.mxu0 }
 0x868   : > { %v4825_v11 = vpop.f32.mrf.mxu3 }
 0x869   : > { %v4858_v46 = vadd.f32 %v4857_v17, %v4825_v11 }
 0x86b   : > { %v10405_v22 = vadd.f32 %v8532_v39, %v4858_v46  ;;  %v10448_v46 = vld [vmem:[%s12532_s2 + $0x20] sm:$0xff] }
 0x86c   : > { %5005 = vmatpush.msrb.mxu3 %v10448_v46 }
 0x86d   : > { %v10408_v40 = vmul.f32 0.70710677, %v10405_v22 }
 0x86f   : > { %v4877_v21 = vand.u32 2147483647, %v10408_v40 }
 0x870   : > { %v4828_v30 = vpop.f32.mrf.mxu3 }
 0x871   : > { %v4879_v48 = vmul.f32 0.3275911, %v4877_v21  ;;  %v4861_v33 = vadd.f32 %v4860_v28, %v4828_v30  ;;  %v4931_v61 = vsub.f32 0.0, %v4877_v21  ;;  %v10451_v28 = vld [vmem:[%s12533_s1 + $0x68] sm:$0xff] }
 0x872   : > { %5100 = vmatpush.msra.mxu1 %v10451_v28 }
 0x873   : > { %v4881_v27 = vadd.f32 1.0, %v4879_v48  ;;  %v10411_v34 = vadd.f32 %v8532_v39, %v4861_v33  ;;  %v4933_v62 = vmul.f32 %v4931_v61, %v4877_v21  ;;  %v10444_v39 = vld [vmem:[%s12533_s1 + $0x28] sm:$0xff]  ;;  %v10454_v21 = vld [vmem:[%s12533_s1 + $0x20] sm:$0xff]  ;;  %v10510_v61 = vld [vmem:[%s12532_s2 + $0xb8] sm:$0xff] }
 0x874   : > { %5035 = vmatpush.msra.mxu0 %v10444_v39  ;;  %v10459_v33 = vld [vmem:[%s12533_s1 + $0x60] sm:$0xff] }
 0x875   : > { %8595 = vrcp.f32 %v4881_v27  ;;  %v10414_v44 = vmul.f32 0.70710677, %v10411_v34  ;;  %v4894_v63 = vand.u32 2147483648, %v4881_v27  ;;  %v4892_v60 = vand.u32 2147483647, %v4881_v27  ;;  %5101 = vmatpush.msra.mxu1 %v10459_v33 }
 0x876   : > { %vm4888_vm13 = vweird.f32 %v4881_v27  ;;  %v4935_v38 = vmul.f32 1.442695, %v4933_v62  ;;  %5036 = vmatpush.msra.mxu0 %v10454_v21  ;;  %v10531_v62 = vld [vmem:[%s12533_s1 + $0xb0] sm:$0xff] }
 0x877   : > { %v4878_v32 = vand.u32 2147483647, %v10414_v44  ;;  %v4895_v56 = vor.u32 1.1754944e-38, %v4894_v63  ;;  %vm4893_vm10 = vcmp.eq.f32.partialorder %v4892_v60, 8.507059e+37 }
 0x879   : > { %v4880_v29 = vmul.f32 0.3275911, %v4878_v32  ;;  %v4932_v50 = vsub.f32 0.0, %v4878_v32 }
 0x87b   : > { %v8596_v36 = vpop.eup %8595  ;;  %v4882_v52 = vadd.f32 1.0, %v4880_v29  ;;  %v4934_v15 = vmul.f32 %v4932_v50, %v4878_v32  ;;  %v10466_v32 = vld [vmem:[%s12533_s1 + $0x18] sm:$0xff]  ;;  %v10540_v50 = vld [vmem:[%s12532_s2 + $0xa8] sm:$0xff] }
 0x87c   : > { %v4884_v41 = vmul.f32 %v8596_v36, %v4881_v27  ;;  %vm4889_vm9 = vweird.f32 %v8596_v36  ;;  %v10463_v27 = vld [vmem:[%s12532_s2 + $0x18] sm:$0xff]  ;;  %5037 = vmatpush.msra.mxu0 %v10466_v32 }
 0x87d   : > { %8597 = vrcp.f32 %v4882_v52  ;;  %vm4890_vm12 = vmor %vm4888_vm13, %vm4889_vm9  ;;  %v4909_v19 = vand.u32 2147483648, %v4882_v52  ;;  %v4907_v4 = vand.u32 2147483647, %v4882_v52  ;;  %vm4903_vm1 = vweird.f32 %v4882_v52  ;;  %5006 = vmatpush.msrb.mxu3 %v10463_v27 }
 0x87e   : > { %v4885_v57 = vsub.f32 1.0, %v4884_v41  ;;  %8599 = vpow2.f32 %v4935_v38  ;;  %v4937_v59 = vmul.f32 1.442695, %v4934_v15  ;;  %v10478_v41 = vld [vmem:[%s12533_s1 + $0x10] sm:$0xff]  ;;  %vm4873_vm9 = vcmp.ge.f32.partialorder %v10408_v40, 0.0  ;;  %v4949_v15 = vld [vmem:[%s12535_s3] sm:$0xff] }
 0x87f   : > { %v4910_v35 = vor.u32 1.1754944e-38, %v4909_v19  ;;  %vm4908_vm3 = vcmp.eq.f32.partialorder %v4907_v4, 8.507059e+37  ;;  %vm4874_vm13 = vcmp.ge.f32.partialorder %v10414_v44, 0.0  ;;  %5038 = vmatpush.msra.mxu0 %v10478_v41  ;;  %v10513_v19 = vld [vmem:[%s12533_s1 + $0x40] sm:$0xff]  ;;  %v10518_v4 = vld [vmem:[%s12533_s1 + $0xb8] sm:$0xff] }
 0x880   : > { %v4886_v3 = vmul.f32 %v8596_v36, %v4885_v57  ;;  %8601 = vpow2.f32 %v4937_v59  ;;  %v10584_v59 = vld [vmem:[%s12533_s1 + $0x98] sm:$0xff] }
 0x882   : > { %v4887_v23 = vadd.f32 %v8596_v36, %v4886_v3  ;;  %v10484_v3 = vld [vmem:[%s12533_s1 + $0x50] sm:$0xff] }
 0x883   : > { %v8598_v43 = vpop.eup %8597 }
 0x884   : > { %v4899_v20 = vmul.f32 %v8598_v43, %v4882_v52  ;;  %v4891_v54 = vsel %vm4890_vm12, %v8596_v36, %v4887_v23  ;;  %vm4904_vm11 = vweird.f32 %v8598_v43  ;;  %v8600_v11 = vpop.eup %8599  ;;  %v10471_v36 = vld [vmem:[%s12533_s1 + $0x58] sm:$0xff]  ;;  %v10475_v52 = vld [vmem:[%s12532_s2 + $0x10] sm:$0xff]  ;;  %v10488_v23 = vld [vmem:[%s12532_s2 + $0x8] sm:$0xff]  ;;  %vm12569_vm12 = vcmask 1046528  }
 0x885   : > { %v4896_v9 = vsel %vm4893_vm10, %v4895_v56, %v4891_v54  ;;  %vm4905_vm15 = vmor %vm4903_vm1, %vm4904_vm11  ;;  %5102 = vmatpush.msra.mxu1 %v10471_v36  ;;  %5007 = vmatpush.msrb.mxu3 %v10475_v52  ;;  %v10497_v56 = vld [vmem:[%s12533_s1 + $0x48] sm:$0xff]  ;;  %vm12571_vm10 = vcmask 261120   ;;  %vm5666_vm11 = vcmask 257024  }
 0x886   : > { %v4900_v51 = vsub.f32 1.0, %v4899_v20  ;;  %v4913_v47 = vmul.f32 1.0614054, %v4896_v9  ;;  %v8602_v60 = vpop.eup %8601  ;;  %v12534_v20 = vmov -1.0  }
 0x887   : > { %v4875_v54 = vsel %vm4873_vm9, 1.0, %v12534_v20  ;;  %5103 = vmatpush.msra.mxu1 %v10484_v3  ;;  %5008 = vmatpush.msrb.mxu3 %v10488_v23 }
 0x888   : > { %v4901_v6 = vmul.f32 %v8598_v43, %v4900_v51  ;;  %v4915_v49 = vadd.f32 -1.4531521, %v4913_v47  ;;  %v10505_v51 = vld [vmem:[%s12533_s1] sm:$0xff] }
 0x889   : > { %5104 = vmatpush.msra.mxu1 %v10497_v56 }
 0x88a   : > { %v4902_v53 = vadd.f32 %v8598_v43, %v4901_v6  ;;  %v4917_v2 = vmul.f32 %v4915_v49, %v4896_v9  ;;  %v4876_v6 = vsel %vm4874_vm13, 1.0, %v12534_v20  ;;  %v10521_v49 = vld [vmem:[%s12533_s1 + $0xf8] sm:$0xff]  ;;  %v10679_v20 = vld [vmem:[%s12533_s1 + $0x80] sm:$0xff] }
 0x88b   : > { %5105 = vmatpush.msra.mxu1 %v10513_v19 }
 0x88c   : > { %v4906_v24 = vsel %vm4905_vm15, %v8598_v43, %v4902_v53  ;;  %v4919_v25 = vadd.f32 1.4214138, %v4917_v2  ;;  %v10491_v43 = vld [vmem:[%s12533_s1 + $0x8] sm:$0xff]  ;;  %v10526_v2 = vld [vmem:[%s12532_s2 + $0xb0] sm:$0xff]  ;;  %vm12573_vm15 = vmmov %vm12571_vm10 }
 0x88d   : > { %v4911_v18 = vsel %vm4908_vm3, %v4910_v35, %v4906_v24  ;;  %5039 = vmatpush.msra.mxu0 %v10491_v43  ;;  %v10534_v35 = vld [vmem:[%s12533_s1 + $0xf0] sm:$0xff]  ;;  %v4870_v24 = vmul.f32 0.5, %v10411_v34  ;;  %5228 = vmatpush.msrb.mxu1 %v10521_v49  ;;  %v10552_v34 = vld [vmem:[%s12532_s2 + $0xa0] sm:$0xff]  ;;  %vm12574_vm3 = vmmov %vm12571_vm10 }
 0x88e   : > { %v4914_v1 = vmul.f32 1.0614054, %v4911_v18  ;;  %v4921_v55 = vmul.f32 %v4919_v25, %v4896_v9 }
 0x88f   : > { %5040 = vmatpush.msra.mxu0 %v10505_v51  ;;  %5229 = vmatpush.msrb.mxu1 %v10534_v35 }
 0x890   : > { %v4916_v45 = vadd.f32 -1.4531521, %v4914_v1  ;;  %v4923_v5 = vadd.f32 -0.28449672, %v4921_v55  ;;  %v10544_v1 = vld [vmem:[%s12533_s1 + $0xa8] sm:$0xff]  ;;  %v4869_v55 = vmul.f32 0.5, %v10405_v22 }
 0x891   : > { %5163 = vmatpush.msrb.mxu0 %v10518_v4 }
 0x892   : > { %v4918_v8 = vmul.f32 %v4916_v45, %v4911_v18  ;;  %v4925_v31 = vmul.f32 %v4923_v5, %v4896_v9  ;;  %v10555_v45 = vld [vmem:[%s12533_s1 + $0xe8] sm:$0xff]  ;;  %v10559_v5 = vld [vmem:[%s12533_s1 + $0xa0] sm:$0xff] }
 0x893   : > { %5164 = vmatpush.msrb.mxu0 %v10531_v62  ;;  %12537 = vst [vmem:[#allocation43_spill] sm:$0xff] %v10555_v45  ;;  %5230 = vmatpush.msrb.mxu1 %v10555_v45  ;;  %v10742_v45 = vld [vmem:[%s12533_s1 + $0x120] sm:$0xff] }
 0x894   : > { %v4920_v42 = vadd.f32 1.4214138, %v4918_v8  ;;  %v4927_v37 = vadd.f32 0.2548296, %v4925_v31  ;;  %v10568_v8 = vld [vmem:[%s12532_s2 + $0x98] sm:$0xff] }
 0x895   : > { %5165 = vmatpush.msrb.mxu0 %v10544_v1  ;;  %v10571_v31 = vld [vmem:[%s12532_s2 + $0x78] sm:$0xff] }
 0x896   : > { %v4922_v7 = vmul.f32 %v4920_v42, %v4911_v18  ;;  %v4929_v10 = vmul.f32 %v4927_v37, %v4896_v9  ;;  %v10502_v9 = vld [vmem:[%s12532_s2] sm:$0xff]  ;;  %v10581_v37 = vld [vmem:[%s12532_s2 + $0x90] sm:$0xff] }
 0x897   : > { %5009 = vmatpush.msrb.mxu3 %v10502_v9  ;;  %v10576_v42 = vld [vmem:[%s12533_s1 + $0xe0] sm:$0xff]  ;;  %5166 = vmatpush.msrb.mxu0 %v10559_v5 }
 0x898   : > { %v4924_v17 = vadd.f32 -0.28449672, %v4922_v7  ;;  %v4939_v48 = vmul.f32 %v8600_v11, %v4929_v10  ;;  %12539 = vst [vmem:[#allocation44_spill] sm:$0xff] %v10576_v42  ;;  %v10588_v7 = vld [vmem:[%s12532_s2 + $0x70] sm:$0xff]  ;;  %v10592_v10 = vld [vmem:[%s12533_s1 + $0xd8] sm:$0xff]  ;;  %5231 = vmatpush.msrb.mxu1 %v10576_v42 }
 0x899   : > { %5131 = vmatpush.msra.mxu3 %v10510_v61  ;;  %12540 = vst [vmem:[#allocation41_spill] sm:$0xff] %v10592_v10  ;;  %v10600_v11 = vld [vmem:[%s12533_s1 + $0x90] sm:$0xff]  ;;  %5167 = vmatpush.msrb.mxu0 %v10584_v59 }
 0x89a   : > { %v4926_v30 = vmul.f32 %v4924_v17, %v4911_v18  ;;  %v4941_v63 = vsub.f32 1.0, %v4939_v48  ;;  %v10597_v17 = vld [vmem:[%s12532_s2 + $0x88] sm:$0xff]  ;;  %v10608_v48 = vld [vmem:[%s12533_s1 + $0xd0] sm:$0xff]  ;;  %5232 = vmatpush.msrb.mxu1 %v10592_v10 }
 0x89b   : > { %5132 = vmatpush.msra.mxu3 %v10526_v2  ;;  %12541 = vst [vmem:[#allocation45_spill] sm:$0xff] %v10608_v48  ;;  %5168 = vmatpush.msrb.mxu0 %v10600_v11  ;;  %v10701_v42 = vld [vmem:[%s12532_s2 + $0x130] sm:$0xff] }
 0x89c   : > { %v4928_v29 = vadd.f32 0.2548296, %v4926_v30  ;;  %v4943_v44 = vmul.f32 %v4941_v63, %v4875_v54  ;;  %v10603_v30 = vld [vmem:[%s12532_s2 + $0x68] sm:$0xff]  ;;  %5233 = vmatpush.msrb.mxu1 %v10608_v48  ;;  %v10621_v63 = vld [vmem:[%s12532_s2 + $0x58] sm:$0xff]  ;;  %v10634_v54 = vld [vmem:[%s12532_s2 + $0x40] sm:$0xff] }
 0x89d   : > { %5133 = vmatpush.msra.mxu3 %v10540_v50  ;;  %v10691_v48 = vld [vmem:[%s12532_s2 + $0x138] sm:$0xff] }
 0x89e   : > { %v4930_v57 = vmul.f32 %v4928_v29, %v4911_v18  ;;  %v4945_v18 = vadd.f32 1.0, %v4943_v44  ;;  %v10613_v29 = vld [vmem:[%s12532_s2 + $0x60] sm:$0xff]  ;;  %v10642_v44 = vld [vmem:[%s12532_s2 + $0xf0] sm:$0xff] }
 0x89f   : > { %5134 = vmatpush.msra.mxu3 %v10552_v34 }
 0x8a0   : > { %v4940_v40 = vmul.f32 %v8602_v60, %v4930_v57  ;;  %v10563_v22 = vmul.f32 %v4945_v18, %v4869_v55  ;;  %v4950_v57 = vld [vmem:[%s12535_s3 + $0x8] sm:$0x3]  ;;  %v10626_v60 = vld [vmem:[%s12532_s2 + $0x50] sm:$0xff]  ;;  %v10663_v18 = vld [vmem:[%s12532_s2 + $0x80] sm:$0xff]  ;;  %s12570_s3 = sld [smem:[#allocation26_spill]] }
 0x8a1   : > { %5135 = vmatpush.msra.mxu3 %v10568_v8  ;;  %v10666_v55 = vld [vmem:[%s12533_s1 + $0x88] sm:$0xff] }
 0x8a2   : > { %v4942_v47 = vsub.f32 1.0, %v4940_v40  ;;  %12538 = vst [vmem:[#allocation40_spill] sm:$0xff] %v10563_v22  ;;  %v10630_v40 = vld [vmem:[%s12532_s2 + $0x48] sm:$0xff]  ;;  %5169 = vmatpush.msrb.mxu0 %v10666_v55 }
 0x8a3   : > { %5136 = vmatpush.msra.mxu3 %v10581_v37 }
 0x8a4   : > { %v4944_v53 = vmul.f32 %v4942_v47, %v4876_v6  ;;  %v10638_v47 = vld [vmem:[%s12532_s2 + $0xf8] sm:$0xff]  ;;  %v10646_v6 = vld [vmem:[%s12532_s2 + $0xe8] sm:$0xff]  ;;  %5170 = vmatpush.msrb.mxu0 %v10679_v20 }
 0x8a5   : > { %5137 = vmatpush.msra.mxu3 %v10597_v17 }
 0x8a6   : > { %v4946_v25 = vadd.f32 1.0, %v4944_v53  ;;  %v10650_v53 = vld [vmem:[%s12532_s2 + $0xe0] sm:$0xff] }
 0x8a7   : > { %5138 = vmatpush.msra.mxu3 %v10663_v18 }
 0x8a8   : > { %v10547_v38 = vmul.f32 %v4946_v25, %v4870_v24  ;;  %v10654_v24 = vld [vmem:[%s12532_s2 + $0xd8] sm:$0xff]  ;;  %v10658_v25 = vld [vmem:[%s12532_s2 + $0xd0] sm:$0xff] }
 0x8a9   : > { %12542 = vst [vmem:[#allocation42_spill] sm:$0xff] %v10654_v24 }
 0x8aa   : > { %12536 = vst [vmem:[#allocation38_spill] sm:$0xff] %v10547_v38  ;;  %8123 = vmatpush.msk.msra.mxu2 %vm3080_vm5, %v10547_v38  ;;  %v10682_v38 = vld [vmem:[%s12532_s2 + $0xc0] sm:$0xff] }
 0x8ab   : > { %12543 = vst [vmem:[#allocation47_spill] sm:$0xff] %v10658_v25 }
 0x8ac   : > { %4975 = vmatpush.msra.mxu2 %v10563_v22  ;;  %12546 = vst [vmem:[#allocation39_spill] sm:$0xff] %v10682_v38  ;;  %v10685_v22 = vld [vmem:[%s12533_s1 + $0xc0] sm:$0xff] }
 0x8ad   : > { %8124 = vmatmul.msk.f32.vlgmr.msra.gmra.mxu2 %vm3993_vm14, %v4949_v15  ;;  %v10669_v15 = vld [vmem:[%s12532_s2 + $0xc8] sm:$0xff]  ;;  %12547 = vst [vmem:[#allocation37_spill] sm:$0xff] %v10685_v22 }
 0x8ae   : > { %5066 = vmatpush.msrb.mxu2 %v10571_v31  ;;  %12544 = vst [vmem:[#allocation46_spill] sm:$0xff] %v10669_v15 }
 0x8b0   : > { %5067 = vmatpush.msrb.mxu2 %v10588_v7 }
 0x8b2   : > { %5068 = vmatpush.msrb.mxu2 %v10603_v30 }
 0x8b4   : > { %5069 = vmatpush.msrb.mxu2 %v10613_v29 }
 0x8b5   : > { %8125 = vmatmul.msk.f32.gmra.mxu2 %vm3993_vm14, %v4950_v57  ;;  %v10674_v57 = vld [vmem:[%s12533_s1 + $0xc8] sm:$0xff] }
 0x8b6   : > { %5070 = vmatpush.msrb.mxu2 %v10621_v63  ;;  %12545 = vst [vmem:[#allocation48_spill] sm:$0xff] %v10674_v57  ;;  %5234 = vmatpush.msrb.mxu1 %v10674_v57 }
 0x8b8   : > { %5071 = vmatpush.msrb.mxu2 %v10626_v60  ;;  %5235 = vmatpush.msrb.mxu1 %v10685_v22  ;;  %v10705_v22 = vld [vmem:[%s12533_s1 + $0x138] sm:$0xff] }
 0x8ba   : > { %5072 = vmatpush.msrb.mxu2 %v10630_v40 }
 0x8bc   : > { %5073 = vmatpush.msrb.mxu2 %v10634_v54 }
 0x8be   : > { %5196 = vmatpush.msra.mxu2 %v10638_v47 }
 0x8c0   : > { %5197 = vmatpush.msra.mxu2 %v10642_v44 }
 0x8c2   : > { %5198 = vmatpush.msra.mxu2 %v10646_v6 }
 0x8c4   : > { %5199 = vmatpush.msra.mxu2 %v10650_v53 }
 0x8c6   : > { %5200 = vmatpush.msra.mxu2 %v10654_v24  ;;  %v10721_v24 = vld [vmem:[%s12533_s1 + $0x130] sm:$0xff] }
 0x8c8   : > { %5201 = vmatpush.msra.mxu2 %v10658_v25 }
 0x8ca   : > { %5202 = vmatpush.msra.mxu2 %v10669_v15 }
 0x8cc   : > { %5203 = vmatpush.msra.mxu2 %v10682_v38  ;;  %v10714_v38 = vld [vmem:[%s12532_s2 + $0x128] sm:$0xff] }
 0x930   : > { %v10693_v15 = vpop.f32.mrf.mxu2 }
 0x931   : > { %8126 = vmatmul.msk.f32.vlgmr.msrb.gmra.mxu3 %vm4032_vm2, %v10693_v15  ;;  %v12309_v57 = vrot.slane %v10693_v15, 5  ;;  %v12310_v10 = vrot.slane %v10693_v15, 1  ;;  %v12311_v25 = vrot.slane %v10693_v15, 6 }
 0x932   : > { %5261 = vmatpush.msrb.mxu3 %v10691_v48 }
 0x933   : > { %8127 = vmatmul.msk.f32.vlgmr.msra.gmra.mxu0 %vm4032_vm2, %v12309_v57  ;;  %8136 = vmatmul.msk.f32.vlgmr.msrb.gmra.mxu2 %vm4032_vm2, %v12310_v10  ;;  %v10726_v57 = vld [vmem:[%s12532_s2 + $0x120] sm:$0xff]  ;;  %v10731_v10 = vld [vmem:[%s12533_s1 + $0x128] sm:$0xff] }
 0x934   : > { %8145 = vmatmul.msk.f32.vlgmr.msra.gmra.mxu1 %vm4032_vm2, %v12311_v25  ;;  %5262 = vmatpush.msrb.mxu3 %v10701_v42  ;;  %v10739_v25 = vld [vmem:[%s12532_s2 + $0x118] sm:$0xff] }
 0x935   : > { %5293 = vmatpush.msra.mxu0 %v10705_v22  ;;  %5314 = vmatpush.msrb.mxu2 %v10418_v0  ;;  %v12313_v0 = vrot.slane %v10693_v15, 2 }
 0x936   : > { %5334 = vmatpush.msra.mxu1 %v10424_v12  ;;  %5263 = vmatpush.msrb.mxu3 %v10714_v38  ;;  %v12315_v12 = vrot.slane %v10693_v15, 7 }
 0x937   : > { %5294 = vmatpush.msra.mxu0 %v10721_v24  ;;  %5315 = vmatpush.msrb.mxu2 %v10421_v26 }
 0x938   : > { %5335 = vmatpush.msra.mxu1 %v10436_v16  ;;  %5264 = vmatpush.msrb.mxu3 %v10726_v57  ;;  %v10752_v26 = vpop.f32.mrf.mxu2  ;;  %v12314_v16 = vrot.slane %v10693_v15, 3 }
 0x939   : > { %5295 = vmatpush.msra.mxu0 %v10731_v10  ;;  %5316 = vmatpush.msrb.mxu2 %v10433_v14  ;;  %v10757_v14 = vld [vmem:[%s12532_s2 + $0x110] sm:$0xff] }
 0x93a   : > { %5336 = vmatpush.msra.mxu1 %v10444_v39  ;;  %8154 = vmatmul.msk.f32.vlgmr.msra.gmra.mxu3 %vm4032_vm2, %v12313_v0  ;;  %v10762_v39 = vld [vmem:[%s12533_s1 + $0x118] sm:$0xff]  ;;  %v10771_v0 = vld [vmem:[%s12532_s2 + $0x108] sm:$0xff] }
 0x93b   : > { %5265 = vmatpush.msrb.mxu3 %v10739_v25  ;;  %5296 = vmatpush.msra.mxu0 %v10742_v45 }
 0x93c   : > { %5317 = vmatpush.msrb.mxu2 %v10448_v46  ;;  %5337 = vmatpush.msra.mxu1 %v10454_v21  ;;  %v10777_v46 = vld [vmem:[%s12533_s1 + $0x110] sm:$0xff]  ;;  %v10782_v21 = vld [vmem:[%s12532_s2 + $0x100] sm:$0xff]  ;;  %s12568_s2 = sld [smem:[#allocation22_spill]] }
 0x93d   : > { %8163 = vmatmul.msk.f32.vlgmr.msrb.gmra.mxu0 %vm4032_vm2, %v12315_v12  ;;  %8172 = vmatmul.msk.f32.vlgmr.msra.gmra.mxu2 %vm4032_vm2, %v12314_v16  ;;  %v10787_v16 = vld [vmem:[%s12533_s1 + $0x108] sm:$0xff]  ;;  %v10794_v12 = vld [vmem:[%s12533_s1 + $0x100] sm:$0xff]  ;;  %s12554_s1 = sld [smem:[#allocation25_spill]] }
 0x93e   : > { %8181 = vmatmul.msk.f32.vlgmr.msrb.gmra.mxu1 %vm4032_vm2, %v10752_v26  ;;  %5266 = vmatpush.msrb.mxu3 %v10757_v14 }
 0x93f   : > { %5297 = vmatpush.msra.mxu0 %v10762_v39  ;;  %5318 = vmatpush.msrb.mxu2 %v10463_v27  ;;  %v5250_v27 = vrot.slane %v10693_v15, 4 }
 0x940   : > { %5338 = vmatpush.msra.mxu1 %v10466_v32  ;;  %5267 = vmatpush.msrb.mxu3 %v10771_v0  ;;  %v12548_v32 = vrot.slane %v10693_v15, 5 }
 0x941   : > { %5298 = vmatpush.msra.mxu0 %v10777_v46  ;;  %5319 = vmatpush.msrb.mxu2 %v10475_v52  ;;  %v5282_v52 = vrot.slane %v10752_v26, 1 }
 0x942   : > { %5339 = vmatpush.msra.mxu1 %v10478_v41  ;;  %5268 = vmatpush.msrb.mxu3 %v10782_v21  ;;  %v12555_v41 = vld [vmem:[#allocation42_spill] sm:$0xff] }
 0x943   : > { %5299 = vmatpush.msra.mxu0 %v10787_v16  ;;  %5320 = vmatpush.msrb.mxu2 %v10488_v23  ;;  %v12557_v23 = vld [vmem:[#allocation47_spill] sm:$0xff] }
 0x944   : > { %5340 = vmatpush.msra.mxu1 %v10491_v43  ;;  %5354 = vmatpush.msra.mxu3 %v10571_v31  ;;  %v12558_v43 = vld [vmem:[#allocation41_spill] sm:$0xff] }
 0x945   : > { %8190 = vmatmul.msk.f32.vlgmr.msrb.gmra.mxu3 %vm4032_vm2, %v5250_v27  ;;  %5300 = vmatpush.msra.mxu0 %v10794_v12 }
 0x946   : > { %5321 = vmatpush.msrb.mxu2 %v10502_v9  ;;  %5341 = vmatpush.msra.mxu1 %v10505_v51  ;;  %v12561_v9 = vld [vmem:[#allocation39_spill] sm:$0xff]  ;;  %v5551_v51 = vld [vmem:[%s12554_s1 + $0x38] sm:$0xff] }
 0x947   : > { %5355 = vmatpush.msra.mxu3 %v10588_v7  ;;  %5374 = vmatpush.msrb.mxu0 %v10429_v13  ;;  %v12549_v13 = vrot.slane %v10693_v15, 6 }
 0x948   : > { %5394 = vmatpush.msra.mxu2 %v10510_v61  ;;  %5414 = vmatpush.msrb.mxu1 %v10518_v4  ;;  %v12562_v61 = vld [vmem:[#allocation48_spill] sm:$0xff]  ;;  %v5550_v4 = vld [vmem:[%s12554_s1 + $0x30] sm:$0xff] }
 0x949   : > { %8200 = vmatmul.msk.f32.vlgmr.msrb.gmra.mxu2 %vm4032_vm2, %v12548_v32  ;;  %8201 = vmatmul.msk.f32.vlgmr.msra.gmra.mxu1 %vm4032_vm2, %v10693_v15 }
 0x94a   : > { %5356 = vmatpush.msra.mxu3 %v10603_v30  ;;  %5375 = vmatpush.msrb.mxu0 %v10439_v58  ;;  %v12550_v58 = vrot.slane %v10693_v15, 1 }
 0x94b   : > { %5395 = vmatpush.msra.mxu2 %v10526_v2  ;;  %5415 = vmatpush.msrb.mxu1 %v10531_v62  ;;  %v5549_v2 = vld [vmem:[%s12554_s1 + $0x28] sm:$0xff]  ;;  %v5548_v62 = vld [vmem:[%s12554_s1 + $0x20] sm:$0xff] }
 0x94c   : > { %5357 = vmatpush.msra.mxu3 %v10613_v29  ;;  %5376 = vmatpush.msrb.mxu0 %v10451_v28  ;;  %v12551_v28 = vrot.slane %v10693_v15, 7 }
 0x94d   : > { %5396 = vmatpush.msra.mxu2 %v10540_v50  ;;  %5416 = vmatpush.msrb.mxu1 %v10544_v1  ;;  %v5546_v50 = vld [vmem:[%s12554_s1 + $0x10] sm:$0xff]  ;;  %v5545_v1 = vld [vmem:[%s12554_s1 + $0x8] sm:$0xff] }
 0x94e   : > { %8199 = vmatmul.msk.f32.vlgmr.msra.gmra.mxu0 %vm4032_vm2, %v5282_v52  ;;  %5358 = vmatpush.msra.mxu3 %v10621_v63 }
 0x94f   : > { %5377 = vmatpush.msrb.mxu0 %v10459_v33  ;;  %5397 = vmatpush.msra.mxu2 %v10552_v34  ;;  %v12552_v33 = vrot.slane %v10693_v15, 2  ;;  %v12565_v34 = vld [vmem:[#allocation40_spill] sm:$0xff] }
 0x950   : > { %5417 = vmatpush.msrb.mxu1 %v10559_v5  ;;  %5359 = vmatpush.msra.mxu3 %v10626_v60 }
 0x951   : > { %5378 = vmatpush.msrb.mxu0 %v10471_v36  ;;  %5398 = vmatpush.msra.mxu2 %v10568_v8  ;;  %v12553_v36 = vld [vmem:[#allocation43_spill] sm:$0xff] }
 0x952   : > { %5418 = vmatpush.msrb.mxu1 %v10584_v59  ;;  %5360 = vmatpush.msra.mxu3 %v10630_v40 }
 0x953   : > { %5379 = vmatpush.msrb.mxu0 %v10484_v3  ;;  %5399 = vmatpush.msra.mxu2 %v10581_v37  ;;  %v12556_v3 = vld [vmem:[#allocation44_spill] sm:$0xff] }
 0x954   : > { %5419 = vmatpush.msrb.mxu1 %v10600_v11  ;;  %5361 = vmatpush.msra.mxu3 %v10634_v54 }
 0x955   : > { %5380 = vmatpush.msrb.mxu0 %v10497_v56  ;;  %5400 = vmatpush.msra.mxu2 %v10597_v17  ;;  %v12559_v56 = vld [vmem:[#allocation46_spill] sm:$0xff] }
 0x956   : > { %5420 = vmatpush.msrb.mxu1 %v10666_v55  ;;  %8202 = vmatmul.msk.f32.vlgmr.msra.gmra.mxu3 %vm4032_vm2, %v12549_v13 }
 0x957   : > { %5434 = vmatpush.msrb.mxu3 %v10638_v47  ;;  %5381 = vmatpush.msrb.mxu0 %v10513_v19  ;;  %v12563_v19 = vld [vmem:[#allocation37_spill] sm:$0xff] }
 0x958   : > { %5401 = vmatpush.msra.mxu2 %v10663_v18  ;;  %5421 = vmatpush.msrb.mxu1 %v10679_v20  ;;  %v12560_v20 = vld [vmem:[#allocation45_spill] sm:$0xff] }
 0x959   : > { %8203 = vmatmul.msk.f32.vlgmr.msrb.gmra.mxu0 %vm4032_vm2, %v12550_v58  ;;  %8204 = vmatmul.msk.f32.vlgmr.msra.gmra.mxu2 %vm4032_vm2, %v12551_v28 }
 0x95a   : > { %8205 = vmatmul.msk.f32.vlgmr.msrb.gmra.mxu1 %vm4032_vm2, %v12552_v33  ;;  %5435 = vmatpush.msrb.mxu3 %v10642_v44 }
 0x95b   : > { %5454 = vmatpush.msra.mxu0 %v10521_v49  ;;  %5474 = vmatpush.msrb.mxu2 %v10691_v48  ;;  %v12564_v49 = vrot.slane %v10693_v15, 3 }
 0x95c   : > { %5494 = vmatpush.msra.mxu1 %v10705_v22  ;;  %5436 = vmatpush.msrb.mxu3 %v10646_v6 }
 0x95d   : > { %5455 = vmatpush.msra.mxu0 %v10534_v35  ;;  %5475 = vmatpush.msrb.mxu2 %v10701_v42  ;;  %v5547_v35 = vld [vmem:[%s12554_s1 + $0x18] sm:$0xff] }
 0x95e   : > { %5495 = vmatpush.msra.mxu1 %v10721_v24  ;;  %5437 = vmatpush.msrb.mxu3 %v10650_v53 }
 0x95f   : > { %5456 = vmatpush.msra.mxu0 %v12553_v36  ;;  %5476 = vmatpush.msrb.mxu2 %v10714_v38  ;;  %v5544_v38 = vld [vmem:[%s12554_s1] sm:$0xff]  ;;  %s12567_s1 = sld [smem:[#allocation21_spill]] }
 0x960   : > { %5496 = vmatpush.msra.mxu1 %v10731_v10  ;;  %5438 = vmatpush.msrb.mxu3 %v12555_v41 }
 0x961   : > { %5457 = vmatpush.msra.mxu0 %v12556_v3  ;;  %5477 = vmatpush.msrb.mxu2 %v10726_v57 }
 0x962   : > { %5497 = vmatpush.msra.mxu1 %v10742_v45  ;;  %5439 = vmatpush.msrb.mxu3 %v12557_v23  ;;  %v12566_v45 = vld [vmem:[#allocation38_spill] sm:$0xff] }
 0x963   : > { %5458 = vmatpush.msra.mxu0 %v12558_v43  ;;  %5478 = vmatpush.msrb.mxu2 %v10739_v25 }
 0x964   : > { %5498 = vmatpush.msra.mxu1 %v10762_v39  ;;  %5440 = vmatpush.msrb.mxu3 %v12559_v56 }
 0x965   : > { %5459 = vmatpush.msra.mxu0 %v12560_v20  ;;  %5479 = vmatpush.msrb.mxu2 %v10757_v14  ;;  %v5538_v3 = vld [vmem:[%s12567_s1] sm:$0xff]  ;;  %v5539_v56 = vld [vmem:[%s12567_s1 + $0x8] sm:$0xff] }
 0x966   : > { %5499 = vmatpush.msra.mxu1 %v10777_v46  ;;  %5441 = vmatpush.msrb.mxu3 %v12561_v9  ;;  %v5540_v9 = vld [vmem:[%s12567_s1 + $0x10] sm:$0xf]  ;;  %s12576_s1 = sld [smem:[#allocation28_spill]] }
 0x967   : > { %5460 = vmatpush.msra.mxu0 %v12562_v61  ;;  %5480 = vmatpush.msrb.mxu2 %v10771_v0  ;;  %v5542_v61 = vld [vmem:[%s12568_s2 + $0x8] sm:$0xff] }
 0x968   : > { %5500 = vmatpush.msra.mxu1 %v10787_v16  ;;  %8206 = vmatmul.msk.f32.vlgmr.msrb.gmra.mxu3 %vm4032_vm2, %v10752_v26 }
 0x969   : > { %5565 = vmatpush.msra.mxu3 %v5551_v51  ;;  %5461 = vmatpush.msra.mxu0 %v12563_v19  ;;  %v5541_v51 = vld [vmem:[%s12568_s2] sm:$0xff]  ;;  %v5543_v19 = vld [vmem:[%s12568_s2 + $0x10] sm:$0xf]  ;;  %s12581_s2 = sld [smem:[#allocation29_spill]] }
 0x96a   : > { %5481 = vmatpush.msrb.mxu2 %v10782_v21  ;;  %5501 = vmatpush.msra.mxu1 %v10794_v12 }
 0x96b   : > { %8207 = vmatmul.msk.f32.vlgmr.msra.gmra.mxu0 %vm4032_vm2, %v12564_v49  ;;  %8208 = vmatmul.msk.f32.vlgmr.msrb.gmra.mxu2 %vm4032_vm2, %v5282_v52 }
 0x96c   : > { %8209 = vmatmul.msk.f32.vlgmr.msra.gmra.mxu1 %vm4032_vm2, %v5250_v27  ;;  %5566 = vmatpush.msra.mxu3 %v5550_v4 }
 0x96e   : > { %5567 = vmatpush.msra.mxu3 %v5549_v2 }
 0x970   : > { %5568 = vmatpush.msra.mxu3 %v5548_v62 }
 0x972   : > { %5569 = vmatpush.msra.mxu3 %v5547_v35  ;;  %v8714_v35 = vmov 20.0  }
 0x973   : > { %8603 = vrcp.f32 %v8714_v35 }
 0x974   : > { %5570 = vmatpush.msra.mxu3 %v5546_v50 }
 0x976   : > { %5571 = vmatpush.msra.mxu3 %v5545_v1 }
 0x978   : > { %5572 = vmatpush.msra.mxu3 %v5544_v38  ;;  %v8533_v38 = vld [vmem:[%s12570_s3] ss:$0 sm:$0xff]  ;;  %s12575_s3 = sld [smem:[#allocation27_spill]] }
 0x979   : > { %8210 = vmatmul.msk.f32.vlgmr.msra.gmra.mxu3 %vm4032_vm2, %v12565_v34 }
 0x981   : > { %8211 = vmatmul.msk.f32.gmra.mxu3 %vm4032_vm2, %v12566_v45  ;;  %v8604_v45 = vpop.eup %8603 }
 0x982   : > { %vm5680_vm1 = vweird.f32 %v8604_v45 }
 0x9b0   : > { %v5042_v31 = vpop.f32.mrf.mxu0 }
 0x9b1   : > { %v5107_v5 = vpop.f32.mrf.mxu1 }
 0x9b4   : > { %v5011_v22 = vpop.f32.mrf.mxu3 }
 0x9b5   : > { %v5045_v53 = vsub.f32 %v5011_v22, %v5042_v31 }
 0x9b6   : > { %v5075_v8 = vpop.f32.mrf.mxu2 }
 0x9b7   : > { %v5110_v48 = vsub.f32 %v5075_v8, %v5107_v5 }
 0x9b9   : > { %v5507_v63 = vrot.slane %v5110_v48, 7 }
 0x9ba   : > { %v5172_v7 = vpop.f32.mrf.mxu0 }
 0x9bb   : > { %v5237_v42 = vpop.f32.mrf.mxu1  ;;  %v5530_v25 = vsel %vm3078_vm4, %v5045_v53, %v5507_v63 }
 0x9bd   : > { %v5140_v37 = vpop.f32.mrf.mxu3 }
 0x9be   : > { %v5175_v29 = vsub.f32 %v5140_v37, %v5172_v7  ;;  %v5676_v37 = vmul.f32 20.0, %v8604_v45 }
 0x9c0   : > { %v5205_v59 = vpop.f32.mrf.mxu2  ;;  %v5510_v54 = vrot.slane %v5175_v29, 6 }
 0x9c1   : > { %v5240_v60 = vsub.f32 %v5205_v59, %v5237_v42 }
 0x9c2   : > { %v5531_v15 = vsel %vm3080_vm5, %v5530_v25, %v5510_v54 }
 0x9c3   : > { %v5513_v18 = vrot.slane %v5240_v60, 5 }
 0x9c5   : > { %v5532_v26 = vsel %vm3082_vm6, %v5531_v15, %v5513_v18 }
 0x9c6   : > { %v5343_v10 = vpop.f32.mrf.mxu1 }
 0x9c8   : > { %v5270_v17 = vpop.f32.mrf.mxu3 }
 0x9cb   : > { %v5302_v30 = vpop.f32.mrf.mxu0 }
 0x9cc   : > { %v5323_v11 = vpop.f32.mrf.mxu2  ;;  %v5305_v47 = vsub.f32 %v5270_v17, %v5302_v30 }
 0x9cd   : > { %v5344_v55 = vadd.f32 %v5343_v10, %v5323_v11  ;;  %v5677_v11 = vsub.f32 1.0, %v5676_v37 }
 0x9ce   : > { %v5516_v57 = vrot.slane %v5305_v47, 4 }
 0x9cf   : > { %v5519_v12 = vrot.slane %v5344_v55, 3  ;;  %v5678_v29 = vmul.f32 %v8604_v45, %v5677_v11 }
 0x9d0   : > { %v5533_v39 = vsel %vm1563_vm0, %v5532_v26, %v5516_v57 }
 0x9d1   : > { %v5534_v13 = vsel %vm12322_vm7, %v5533_v39, %v5519_v12 }
 0x9d6   : > { %v5383_v24 = vpop.f32.mrf.mxu0 }
 0x9d7   : > { %v5423_v40 = vpop.f32.mrf.mxu1 }
 0x9d9   : > { %v5363_v44 = vpop.f32.mrf.mxu3 }
 0x9da   : > { %v5384_v0 = vadd.f32 %v5383_v24, %v5363_v44 }
 0x9dc   : > { %v5403_v6 = vpop.f32.mrf.mxu2  ;;  %v5522_v46 = vrot.slane %v5384_v0, 2 }
 0x9dd   : > { %v5424_v16 = vadd.f32 %v5423_v40, %v5403_v6  ;;  %v5679_v40 = vadd.f32 %v8604_v45, %v5678_v29 }
 0x9de   : > { %v5535_v36 = vsel %vm12321_vm8, %v5534_v13, %v5522_v46 }
 0x9df   : > { %v5525_v58 = vrot.slane %v5424_v16, 1  ;;  %v5681_v44 = vsel %vm5680_vm1, %v8604_v45, %v5679_v40 }
 0x9e1   : > { %v5536_v23 = vsel %vm12569_vm12, %v5535_v36, %v5525_v58 }
 0x9e8   : > { %v5463_v52 = vpop.f32.mrf.mxu0 }
 0x9e9   : > { %v5503_v14 = vpop.f32.mrf.mxu1 }
 0x9eb   : > { %v5443_v21 = vpop.f32.mrf.mxu3 }
 0x9ec   : > { %v5464_v28 = vadd.f32 %v5463_v52, %v5443_v21 }
 0x9ee   : > { %v5483_v27 = vpop.f32.mrf.mxu2 }
 0x9ef   : > { %v5504_v32 = vadd.f32 %v5503_v14, %v5483_v27 }
 0x9f1   : > { %v5528_v33 = vrot.slane %v5504_v32, 7 }
 0x9f3   : > { %v5537_v41 = vsel %vm3078_vm4, %v5464_v28, %v5528_v33 }
 0x9f4   : > { %8216 = vmatpush.msk.msra.mxu2 %vm3080_vm5, %v5537_v41 }
 0x9f6   : > { %5645 = vmatpush.msra.mxu2 %v5536_v23 }
 0x9f7   : > { %8217 = vmatmul.msk.f32.vlgmr.msra.gmra.mxu2 %vm3993_vm14, %v5538_v3 }
 0x9fc   : > { %v5574_v43 = vpop.f32.mrf.mxu3 }
 0x9ff   : > { %8218 = vmatmul.msk.f32.gmra.mxu2 %vm3993_vm14, %v5539_v56 }
 0xa04   : > { %v5577_v20 = vpop.f32.mrf.mxu3 }
 0xa05   : > { %8212 = vmatpush.msk.msrb.mxu0 %vm3080_vm5, %v5577_v20 }
 0xa07   : > { %5607 = vmatpush.msrb.mxu0 %v5574_v43  ;;  %8219 = vmatmul.msk.f32.gmra.mxu2 %vm3993_vm14, %v5540_v9  ;;  %v8534_v43 = vld [vmem:[%s12575_s3] ss:$0 sm:$0xff]  ;;  %s12578_s3 = sld [smem:[#allocation33_spill]] }
 0xa08   : > { %8213 = vmatmul.msk.f32.vlgmr.msrb.gmra.mxu0 %vm3993_vm14, %v5541_v51 }
 0xa10   : > { %8214 = vmatmul.msk.f32.gmra.mxu0 %vm3993_vm14, %v5542_v61  ;;  %v8535_v61 = vld [vmem:[%s12576_s1] ss:$0 sm:$0xff]  ;;  %s12577_s1 = sld [smem:[#allocation32_spill]] }
 0xa18   : > { %8215 = vmatmul.msk.f32.gmra.mxu0 %vm3993_vm14, %v5543_v19  ;;  %vm12572_vm14 = vmmov %vm12571_vm10 }
 0xa7a   : > { %v5647_v4 = vpop.f32.mrf.mxu2 }
 0xa82   : > { %v5650_v2 = vpop.f32.mrf.mxu2 }
 0xa85   : > { %v5609_v49 = vpop.f32.mrf.mxu0 }
 0xa86   : > { %v5648_v1 = vadd.f32 %v5647_v4, %v5609_v49 }
 0xa88   : > { %v5660_v22 = vadd.f32 %v8533_v38, %v5648_v1 }
 0xa8a   : > { %v5653_v5 = vpop.f32.mrf.mxu2  ;;  %v5663_v59 = vsel %vm12572_vm14, %v5660_v22, 0.0 }
 0xa8d   : > { %v5612_v62 = vpop.f32.mrf.mxu0 }
 0xa8e   : > { %v5651_v50 = vadd.f32 %v5650_v2, %v5612_v62 }
 0xa90   : > { %v5661_v34 = vadd.f32 %v8533_v38, %v5651_v50 }
 0xa92   : > { %v5664_v31 = vsel %vm12571_vm10, %v5661_v34, 0.0 }
 0xa93   : > { %v5665_v10 = vadd.f32 %v5664_v31, %v5663_v59 }
 0xa95   : > { %v5615_v8 = vpop.f32.mrf.mxu0 }
 0xa96   : > { %v5654_v42 = vadd.f32 %v5653_v5, %v5615_v8 }
 0xa98   : > { %v5662_v7 = vadd.f32 %v8533_v38, %v5654_v42 }
 0xa9a   : > { %v5667_v17 = vsel %vm5666_vm11, %v5662_v7, 0.0 }
 0xa9b   : > { %v5668_v30 = vadd.f32 %v5667_v17, %v5665_v10 }
 0xa9d   : > { %v5669_v48 = vrot.slane %v5668_v30, 4 }
 0xa9f   : > { %v5670_v63 = vadd.f32 %v5669_v48, %v5668_v30 }
 0xaa1   : > { %v5671_v60 = vrot.slane %v5670_v63, 2 }
 0xaa3   : > { %v5672_v54 = vadd.f32 %v5671_v60, %v5670_v63 }
 0xaa5   : > { %v5673_v47 = vrot.slane %v5672_v54, 1 }
 0xaa7   : > { %v5674_v6 = vadd.f32 %v5673_v47, %v5672_v54 }
 0xaa9   : > { %v5682_v53 = vmul.f32 %v5681_v44, %v5674_v6 }
 0xaab   : > { %v5683_v24 = vsub.f32 %v5660_v22, %v5682_v53  ;;  %v5684_v25 = vsub.f32 %v5661_v34, %v5682_v53  ;;  %v5685_v18 = vsub.f32 %v5662_v7, %v5682_v53 }
 0xaad   : > { %v5686_v55 = vmul.f32 %v5683_v24, %v5683_v24  ;;  %v5687_v15 = vmul.f32 %v5684_v25, %v5684_v25  ;;  %v5688_v57 = vmul.f32 %v5685_v18, %v5685_v18 }
 0xaaf   : > { %v5689_v0 = vsel %vm12573_vm15, %v5686_v55, 0.0  ;;  %v5690_v26 = vsel %vm12574_vm3, %v5687_v15, 0.0  ;;  %v5692_v16 = vsel %vm5666_vm11, %v5688_v57, 0.0 }
 0xab0   : > { %v5691_v12 = vadd.f32 %v5690_v26, %v5689_v0 }
 0xab2   : > { %v5693_v14 = vadd.f32 %v5692_v16, %v5691_v12 }
 0xab4   : > { %v5694_v39 = vrot.slane %v5693_v14, 4 }
 0xab6   : > { %v5695_v46 = vadd.f32 %v5694_v39, %v5693_v14 }
 0xab8   : > { %v5696_v21 = vrot.slane %v5695_v46, 2 }
 0xaba   : > { %v5697_v27 = vadd.f32 %v5696_v21, %v5695_v46 }
 0xabc   : > { %v5698_v32 = vrot.slane %v5697_v27, 1 }
 0xabe   : > { %v5699_v52 = vadd.f32 %v5698_v32, %v5697_v27 }
 0xac0   : > { %v5700_v13 = vmul.f32 %v5699_v52, %v5681_v44 }
 0xac2   : > { %v5701_v58 = vadd.f32 1e-05, %v5700_v13 }
 0xac4   : > { %8605 = vrsqrt.f32 %v5701_v58  ;;  %vm5708_vm13 = vweird.f32 %v5701_v58 }
 0xaca   : > { %v8606_v28 = vpop.eup %8605 }
 0xacb   : > { %v5703_v33 = vmul.f32 %v8606_v28, %v5701_v58  ;;  %vm5709_vm9 = vweird.f32 %v8606_v28 }
 0xacc   : > { %vm5710_vm12 = vmor %vm5708_vm13, %vm5709_vm9 }
 0xacd   : > { %v5704_v36 = vmul.f32 %v8606_v28, %v5703_v33 }
 0xacf   : > { %v5705_v41 = vmul.f32 0.5, %v5704_v36 }
 0xad1   : > { %v5706_v3 = vsub.f32 1.5, %v5705_v41 }
 0xad3   : > { %v5707_v23 = vmul.f32 %v8606_v28, %v5706_v3 }
 0xad5   : > { %v5711_v56 = vsel %vm5710_vm12, %v8606_v28, %v5707_v23 }
 0xad6   : > { %v5712_v20 = vmul.f32 %v5711_v56, %v5683_v24  ;;  %v5713_v9 = vmul.f32 %v5711_v56, %v5684_v25  ;;  %v5714_v51 = vmul.f32 %v5711_v56, %v5685_v18 }
 0xad8   : > { %v5721_v19 = vmul.f32 %v8534_v43, %v5714_v51  ;;  %v5720_v4 = vmul.f32 %v8534_v43, %v5713_v9  ;;  %v5719_v49 = vmul.f32 %v8534_v43, %v5712_v20 }
 0xada   : > { %v10945_v2 = vadd.f32 %v8535_v61, %v5721_v19  ;;  %v10947_v62 = vadd.f32 %v8535_v61, %v5720_v4  ;;  %v10949_v35 = vadd.f32 %v8535_v61, %v5719_v49 }
 0xadc   : > { %v10952_v50 = vmul.f32 0.70710677, %v10945_v2  ;;  %v10955_v1 = vmul.f32 0.70710677, %v10947_v62  ;;  %v10958_v38 = vmul.f32 0.70710677, %v10949_v35 }
 0xade   : > { %v5743_v34 = vand.u32 2147483647, %v10952_v50  ;;  %v10962_v45 = vand.u32 2147483647, %v10955_v1  ;;  %v10965_v5 = vand.u32 2147483647, %v10958_v38 }
 0xae0   : > { %v5746_v22 = vmul.f32 0.3275911, %v5743_v34  ;;  %v5745_v8 = vmul.f32 0.3275911, %v10962_v45  ;;  %v5744_v31 = vmul.f32 0.3275911, %v10965_v5 }
 0xae1   : > { %v5824_v63 = vsub.f32 0.0, %v5743_v34  ;;  %v5823_v27 = vsub.f32 0.0, %v10962_v45  ;;  %v5822_v33 = vsub.f32 0.0, %v10965_v5 }
 0xae2   : > { %v5749_v42 = vadd.f32 1.0, %v5746_v22  ;;  %v5748_v37 = vadd.f32 1.0, %v5745_v8  ;;  %v5747_v59 = vadd.f32 1.0, %v5744_v31 }
 0xae3   : > { %v5827_v36 = vmul.f32 %v5824_v63, %v5743_v34  ;;  %v5826_v43 = vmul.f32 %v5823_v27, %v10962_v45  ;;  %v5825_v51 = vmul.f32 %v5822_v33, %v10965_v5  ;;  %v11015_v27 = vld [vmem:[%s12578_s3 + $0x30] sm:$0xff]  ;;  %v11027_v33 = vld [vmem:[%s12577_s1 + $0x58] sm:$0xff] }
 0xae4   : > { %8607 = vrcp.f32 %v5749_v42  ;;  %v5791_v29 = vand.u32 2147483648, %v5749_v42  ;;  %v5789_v60 = vand.u32 2147483647, %v5749_v42  ;;  %v5774_v44 = vand.u32 2147483647, %v5748_v37 }
 0xae5   : > { %8609 = vrcp.f32 %v5748_v37  ;;  %v5776_v6 = vand.u32 2147483648, %v5748_v37  ;;  %vm5785_vm11 = vweird.f32 %v5749_v42  ;;  %vm5770_vm1 = vweird.f32 %v5748_v37 }
 0xae6   : > { %8611 = vrcp.f32 %v5747_v59  ;;  %v5792_v18 = vor.u32 1.1754944e-38, %v5791_v29  ;;  %v5761_v55 = vand.u32 2147483648, %v5747_v59  ;;  %v5759_v0 = vand.u32 2147483647, %v5747_v59 }
 0xae7   : > { %vm5790_vm9 = vcmp.eq.f32.partialorder %v5789_v60, 8.507059e+37  ;;  %vm5775_vm12 = vcmp.eq.f32.partialorder %v5774_v44, 8.507059e+37  ;;  %v5777_v12 = vor.u32 1.1754944e-38, %v5776_v6  ;;  %vm5755_vm8 = vweird.f32 %v5747_v59  ;;  %v10981_v44 = vld [vmem:[%s12577_s1 + $0x78] sm:$0xff] }
 0xae8   : > { %v5762_v32 = vor.u32 1.1754944e-38, %v5761_v55  ;;  %v5832_v61 = vmul.f32 1.442695, %v5827_v36  ;;  %v5830_v22 = vmul.f32 1.442695, %v5826_v43  ;;  %5986 = vmatpush.msrb.mxu2 %v10981_v44  ;;  %v10990_v55 = vld [vmem:[%s12577_s1 + $0x28] sm:$0xff] }
 0xae9   : > { %v11031_v36 = vld [vmem:[%s12578_s3 + $0x28] sm:$0xff]  ;;  %v11040_v43 = vld [vmem:[%s12577_s1 + $0x10] sm:$0xff] }
 0xaea   : > { %v8608_v7 = vpop.eup %8607  ;;  %8613 = vpow2.f32 %v5832_v61 }
 0xaeb   : > { %v8610_v10 = vpop.eup %8609  ;;  %v5781_v17 = vmul.f32 %v8608_v7, %v5749_v42  ;;  %vm5786_vm10 = vweird.f32 %v8608_v7  ;;  %8615 = vpow2.f32 %v5830_v22  ;;  %v11066_v22 = vld [vmem:[%s12578_s3 + $0x10] sm:$0xff] }
 0xaec   : > { %v5766_v11 = vmul.f32 %v8610_v10, %v5748_v37  ;;  %v8612_v30 = vpop.eup %8611  ;;  %vm5771_vm14 = vweird.f32 %v8610_v10  ;;  %vm5787_vm15 = vmor %vm5785_vm11, %vm5786_vm10  ;;  %vm5760_vm10 = vcmp.eq.f32.partialorder %v5759_v0, 8.507059e+37  ;;  %v5828_v37 = vmul.f32 1.442695, %v5825_v51  ;;  %v11050_v51 = vld [vmem:[%s12578_s3 + $0x18] sm:$0xff] }
 0xaed   : > { %v5782_v48 = vsub.f32 1.0, %v5781_v17  ;;  %v5751_v54 = vmul.f32 %v8612_v30, %v5747_v59  ;;  %vm5756_vm3 = vweird.f32 %v8612_v30  ;;  %vm5772_vm13 = vmor %vm5770_vm1, %vm5771_vm14  ;;  %v12579_v0 = vmov -1.0  }
 0xaee   : > { %v5767_v40 = vsub.f32 1.0, %v5766_v11  ;;  %vm5757_vm7 = vmor %vm5755_vm8, %vm5756_vm3  ;;  %8617 = vpow2.f32 %v5828_v37  ;;  %vm5736_vm8 = vcmp.ge.f32.partialorder %v10955_v1, 0.0  ;;  %vm5735_vm11 = vcmp.ge.f32.partialorder %v10958_v38, 0.0  ;;  %v11037_v38 = vld [vmem:[%s12578_s3 + $0x20] sm:$0xff] }
 0xaef   : > { %v5783_v47 = vmul.f32 %v8608_v7, %v5782_v48  ;;  %v5752_v24 = vsub.f32 1.0, %v5751_v54  ;;  %v10975_v54 = vld [vmem:[%s12577_s1 + $0x38] sm:$0xff]  ;;  %v5731_v1 = vmul.f32 0.5, %v10945_v2  ;;  %vm12580_vm14 = vcmask 261120   ;;  %v5861_v37 = vld [vmem:[%s12581_s2] sm:$0xff] }
 0xaf0   : > { %v5768_v53 = vmul.f32 %v8610_v10, %v5767_v40  ;;  %v8614_v48 = vpop.eup %8613  ;;  %5921 = vmatpush.msrb.mxu3 %v10975_v54  ;;  %vm12583_vm1 = vmmov %vm12580_vm14  ;;  %vm12587_vm3 = vcmask 162816  }
 0xaf1   : > { %v5784_v25 = vadd.f32 %v8608_v7, %v5783_v47  ;;  %v5753_v57 = vmul.f32 %v8612_v30, %v5752_v24  ;;  %v8616_v60 = vpop.eup %8615  ;;  %v10978_v47 = vld [vmem:[%s12577_s1 + $0x30] sm:$0xff] }
 0xaf2   : > { %v5769_v15 = vadd.f32 %v8610_v10, %v5768_v53  ;;  %v10987_v24 = vld [vmem:[%s12577_s1 + $0x70] sm:$0xff]  ;;  %5922 = vmatpush.msrb.mxu3 %v10978_v47 }
 0xaf3   : > { %v5788_v26 = vsel %vm5787_vm15, %v8608_v7, %v5784_v25  ;;  %v5754_v39 = vadd.f32 %v8612_v30, %v5753_v57  ;;  %v5854_v57 = vpop.permute.xlu2 %5853  ;;  %5987 = vmatpush.msrb.mxu2 %v10987_v24  ;;  %vm12585_vm15 = vmmov %vm12583_vm1 }
 0xaf4   : > { %v5793_v16 = vsel %vm5790_vm9, %v5792_v18, %v5788_v26  ;;  %v5773_v14 = vsel %vm5772_vm13, %v8610_v10, %v5769_v15  ;;  %v8618_v25 = vpop.eup %8617  ;;  %v10993_v15 = vld [vmem:[%s12577_s1 + $0x68] sm:$0xff]  ;;  %5923 = vmatpush.msrb.mxu3 %v10990_v55  ;;  %vm12588_vm9 = vmmov %vm12587_vm3 }
 0xaf5   : > { %v5797_v46 = vmul.f32 1.0614054, %v5793_v16  ;;  %v5778_v21 = vsel %vm5775_vm12, %v5777_v12, %v5773_v14  ;;  %v5758_v13 = vsel %vm5757_vm7, %v8612_v30, %v5754_v39  ;;  %vm5737_vm7 = vcmp.ge.f32.partialorder %v10952_v50, 0.0  ;;  %v11002_v14 = vld [vmem:[%s12578_s3 + $0x38] sm:$0xff]  ;;  %v11008_v50 = vld [vmem:[%s12577_s1 + $0x20] sm:$0xff]  ;;  %5988 = vmatpush.msrb.mxu2 %v10993_v15  ;;  %vm12594_vm13 = vmmov %vm12587_vm3 }
 0xaf6   : > { %v5796_v52 = vmul.f32 1.0614054, %v5778_v21  ;;  %v5763_v28 = vsel %vm5760_vm10, %v5762_v32, %v5758_v13  ;;  %v5740_v26 = vsel %vm5737_vm7, 1.0, %v12579_v0  ;;  %5953 = vmatpush.msra.mxu0 %v11002_v14  ;;  %5924 = vmatpush.msrb.mxu3 %v11008_v50  ;;  %vm12824_vm12 = vcmask 1044480  }
 0xaf7   : > { %v5800_v58 = vadd.f32 -1.4531521, %v5797_v46  ;;  %v5795_v3 = vmul.f32 1.0614054, %v5763_v28  ;;  %v5739_v46 = vsel %vm5736_vm8, 1.0, %v12579_v0  ;;  %vm12840_vm8 = vcmask 1046528  }
 0xaf8   : > { %v5799_v41 = vadd.f32 -1.4531521, %v5796_v52  ;;  %5954 = vmatpush.msra.mxu0 %v11015_v27 }
 0xaf9   : > { %v5803_v23 = vmul.f32 %v5800_v58, %v5793_v16  ;;  %v5798_v20 = vadd.f32 -1.4531521, %v5795_v3  ;;  %v5738_v58 = vsel %vm5735_vm11, 1.0, %v12579_v0  ;;  %v11248_v0 = vld [vmem:[%s12578_s3 + $0x88] sm:$0xff]  ;;  %vm12843_vm11 = vcmask 179200  }
 0xafa   : > { %v5802_v56 = vmul.f32 %v5799_v41, %v5778_v21  ;;  %v5730_v41 = vmul.f32 0.5, %v10947_v62  ;;  %5955 = vmatpush.msra.mxu0 %v11031_v36  ;;  %12602 = vst [vmem:[#allocation52_spill] sm:$0xff] %v11248_v0 }
 0xafb   : > { %v5806_v9 = vadd.f32 1.4214138, %v5803_v23  ;;  %v5801_v4 = vmul.f32 %v5798_v20, %v5763_v28  ;;  %v5729_v20 = vmul.f32 0.5, %v10949_v35  ;;  %v5852_v35 = vpop.permute.xlu2 %5851 }
 0xafc   : > { %v5805_v19 = vadd.f32 1.4214138, %v5802_v56  ;;  %5956 = vmatpush.msra.mxu0 %v11037_v38 }
 0xafd   : > { %v5809_v49 = vmul.f32 %v5806_v9, %v5793_v16  ;;  %v5804_v31 = vadd.f32 1.4214138, %v5801_v4  ;;  %v11047_v9 = vld [vmem:[%s12577_s1 + $0x50] sm:$0xff] }
 0xafe   : > { %v5808_v8 = vmul.f32 %v5805_v19, %v5778_v21  ;;  %v11056_v19 = vld [vmem:[%s12577_s1 + $0x8] sm:$0xff]  ;;  %5957 = vmatpush.msra.mxu0 %v11050_v51 }
 0xaff   : > { %v5812_v42 = vadd.f32 -0.28449672, %v5809_v49  ;;  %v5807_v59 = vmul.f32 %v5804_v31, %v5763_v28  ;;  %v11063_v49 = vld [vmem:[%s12577_s1 + $0x48] sm:$0xff]  ;;  %v11073_v31 = vld [vmem:[%s12577_s1] sm:$0xff] }
 0xb00   : > { %v5811_v34 = vadd.f32 -0.28449672, %v5808_v8  ;;  %5958 = vmatpush.msra.mxu0 %v11066_v22 }
 0xb01   : > { %v5815_v7 = vmul.f32 %v5812_v42, %v5793_v16  ;;  %v5810_v10 = vadd.f32 -0.28449672, %v5807_v59  ;;  %v5850_v42 = vpop.permute.xlu0 %5849 }
 0xb02   : > { %v5814_v45 = vmul.f32 %v5811_v34, %v5778_v21  ;;  %v11080_v34 = vld [vmem:[%s12577_s1 + $0xb8] sm:$0xff] }
 0xb03   : > { %v5818_v5 = vadd.f32 0.2548296, %v5815_v7  ;;  %v5813_v11 = vmul.f32 %v5810_v10, %v5763_v28  ;;  %v11086_v7 = vld [vmem:[%s12578_s3 + $0x78] sm:$0xff]  ;;  %v11096_v10 = vld [vmem:[%s12577_s1 + $0xb0] sm:$0xff] }
 0xb04   : > { %v5817_v17 = vadd.f32 0.2548296, %v5814_v45  ;;  %v11090_v45 = vld [vmem:[%s12577_s1 + $0x40] sm:$0xff] }
 0xb05   : > { %v5821_v30 = vmul.f32 %v5818_v5, %v5793_v16  ;;  %v5816_v63 = vadd.f32 0.2548296, %v5813_v11  ;;  %v11099_v5 = vld [vmem:[%s12577_s1 + $0xf8] sm:$0xff]  ;;  %v11107_v11 = vld [vmem:[%s12578_s3 + $0x8] sm:$0xff] }
 0xb06   : > { %v5820_v29 = vmul.f32 %v5817_v17, %v5778_v21  ;;  %v11011_v21 = vld [vmem:[%s12577_s1 + $0x60] sm:$0xff]  ;;  %v11103_v17 = vld [vmem:[%s12578_s3 + $0x70] sm:$0xff]  ;;  %5959 = vmatpush.msra.mxu0 %v11107_v11 }
 0xb07   : > { %v5836_v40 = vmul.f32 %v8614_v48, %v5821_v30  ;;  %v5819_v53 = vmul.f32 %v5816_v63, %v5763_v28  ;;  %v11024_v28 = vld [vmem:[%s12577_s1 + $0x18] sm:$0xff]  ;;  %5989 = vmatpush.msrb.mxu2 %v11011_v21  ;;  %v11112_v30 = vld [vmem:[%s12577_s1 + $0xa8] sm:$0xff]  ;;  %v11115_v48 = vld [vmem:[%s12577_s1 + $0xf0] sm:$0xff] }
 0xb08   : > { %v5835_v6 = vmul.f32 %v8616_v60, %v5820_v29  ;;  %5925 = vmatpush.msrb.mxu3 %v11024_v28  ;;  %v11118_v29 = vld [vmem:[%s12578_s3 + $0x68] sm:$0xff]  ;;  %v11123_v63 = vld [vmem:[%s12578_s3] sm:$0xff] }
 0xb09   : > { %v5839_v18 = vsub.f32 1.0, %v5836_v40  ;;  %v5834_v16 = vmul.f32 %v8618_v25, %v5819_v53  ;;  %5990 = vmatpush.msrb.mxu2 %v11027_v33  ;;  %v11127_v60 = vld [vmem:[%s12577_s1 + $0xa0] sm:$0xff]  ;;  %v11130_v40 = vld [vmem:[%s12577_s1 + $0xe8] sm:$0xff]  ;;  %v11139_v53 = vld [vmem:[%s12578_s3 + $0xb8] sm:$0xff]  ;;  %5960 = vmatpush.msra.mxu0 %v11123_v63 }
 0xb0a   : > { %v5838_v12 = vsub.f32 1.0, %v5835_v6  ;;  %5926 = vmatpush.msrb.mxu3 %v11040_v43  ;;  %v11134_v6 = vld [vmem:[%s12578_s3 + $0x60] sm:$0xff]  ;;  %v5862_v25 = vld [vmem:[%s12581_s2 + $0x8] sm:$0xff] }
 0xb0b   : > { %v5842_v39 = vmul.f32 %v5839_v18, %v5740_v26  ;;  %v5837_v52 = vsub.f32 1.0, %v5834_v16  ;;  %5991 = vmatpush.msrb.mxu2 %v11047_v9  ;;  %v11144_v18 = vld [vmem:[%s12577_s1 + $0x98] sm:$0xff]  ;;  %v11153_v26 = vld [vmem:[%s12577_s1 + $0xe0] sm:$0xff]  ;;  %6083 = vmatpush.msrb.mxu0 %v11139_v53  ;;  %v11161_v16 = vld [vmem:[%s12578_s3 + $0xb0] sm:$0xff] }
 0xb0c   : > { %v5841_v32 = vmul.f32 %v5838_v12, %v5739_v46  ;;  %5927 = vmatpush.msrb.mxu3 %v11056_v19  ;;  %v11157_v12 = vld [vmem:[%s12577_s1 + $0x90] sm:$0xff]  ;;  %v11169_v46 = vld [vmem:[%s12577_s1 + $0xd8] sm:$0xff] }
 0xb0d   : > { %v5845_v13 = vadd.f32 1.0, %v5842_v39  ;;  %v5840_v2 = vmul.f32 %v5837_v52, %v5738_v58  ;;  %5992 = vmatpush.msrb.mxu2 %v11063_v49  ;;  %v11165_v39 = vld [vmem:[%s12578_s3 + $0x50] sm:$0xff]  ;;  %12589 = vst [vmem:[#allocation47_spill] sm:$0xff] %v11169_v46  ;;  %v11177_v52 = vld [vmem:[%s12578_s3 + $0x48] sm:$0xff]  ;;  %6084 = vmatpush.msrb.mxu0 %v11161_v16 }
 0xb0e   : > { %v5844_v3 = vadd.f32 1.0, %v5841_v32  ;;  %5928 = vmatpush.msrb.mxu3 %v11073_v31  ;;  %v11174_v32 = vld [vmem:[%s12577_s1 + $0x88] sm:$0xff]  ;;  %12590 = vst [vmem:[#allocation41_spill] sm:$0xff] %v11177_v52  ;;  %v5863_v58 = vld [vmem:[%s12581_s2 + $0x10] sm:$0x3f]  ;;  %s12841_s2 = sld [smem:[#allocation31_spill]] }
 0xb0f   : > { %v5848_v23 = vmul.f32 %v5845_v13, %v5731_v1  ;;  %v5843_v62 = vadd.f32 1.0, %v5840_v2  ;;  %5993 = vmatpush.msrb.mxu2 %v11090_v45  ;;  %v11182_v1 = vld [vmem:[%s12577_s1 + $0xd0] sm:$0xff]  ;;  %v11187_v13 = vld [vmem:[%s12578_s3 + $0x40] sm:$0xff] }
 0xb10   : > { %v5847_v56 = vmul.f32 %v5844_v3, %v5730_v41  ;;  %6051 = vmatpush.msra.mxu3 %v11080_v34  ;;  %12591 = vst [vmem:[#allocation46_spill] sm:$0xff] %v11182_v1  ;;  %v11194_v41 = vld [vmem:[%s12578_s3 + $0xf8] sm:$0xff]  ;;  %v11199_v3 = vld [vmem:[%s12578_s3 + $0xf0] sm:$0xff]  ;;  %v11204_v2 = vld [vmem:[%s12577_s1 + $0x80] sm:$0xff] }
 0xb11   : > { %v11053_v61 = vsel %vm12580_vm14, %v5848_v23, %v5854_v57  ;;  %v5846_v4 = vmul.f32 %v5843_v62, %v5729_v20  ;;  %6116 = vmatpush.msra.mxu2 %v11099_v5  ;;  %v11148_v57 = vld [vmem:[%s12578_s3 + $0x58] sm:$0xff]  ;;  %12592 = vst [vmem:[#allocation45_spill] sm:$0xff] %v11187_v13  ;;  %v11207_v23 = vld [vmem:[%s12578_s3 + $0xa8] sm:$0xff]  ;;  %v11220_v62 = vld [vmem:[%s12578_s3 + $0xa0] sm:$0xff] }
 0xb12   : > { %12582 = vst [vmem:[#allocation43_spill] sm:$0xff] %v11053_v61  ;;  %8220 = vmatpush.msk.msrb.mxu1 %vm1563_vm0, %v11053_v61  ;;  %v11069_v8 = vsel %vm12583_vm1, %v5847_v56, %v5852_v35  ;;  %6052 = vmatpush.msra.mxu3 %v11096_v10  ;;  %v11210_v56 = vld [vmem:[%s12577_s1 + $0xc8] sm:$0xff]  ;;  %v11223_v35 = vld [vmem:[%s12577_s1 + $0xc0] sm:$0xff]  ;;  %vm12844_vm14 = vmmov %vm12843_vm11 }
 0xb13   : > { %12584 = vst [vmem:[#allocation42_spill] sm:$0xff] %v11069_v8  ;;  %v11083_v59 = vsel %vm12585_vm15, %v5846_v4, %v5850_v42  ;;  %6117 = vmatpush.msra.mxu2 %v11115_v48  ;;  %6085 = vmatpush.msrb.mxu0 %v11207_v23  ;;  %v11215_v20 = vld [vmem:[%s12578_s3 + $0xe8] sm:$0xff]  ;;  %v11226_v4 = vld [vmem:[%s12578_s3 + $0xe0] sm:$0xff]  ;;  %v11232_v42 = vld [vmem:[%s12578_s3 + $0x98] sm:$0xff] }
 0xb14   : > { %5890 = vmatpush.msrb.mxu1 %v11069_v8  ;;  %12586 = vst [vmem:[#allocation44_spill] sm:$0xff] %v11083_v59  ;;  %6053 = vmatpush.msra.mxu3 %v11112_v30  ;;  %v11251_v61 = vld [vmem:[%s12578_s3 + $0xc8] sm:$0xff]  ;;  %v11256_v8 = vld [vmem:[%s12578_s3 + $0x80] sm:$0xff]  ;;  %vm12845_vm1 = vmmov %vm12843_vm11 }
 0xb15   : > { %6118 = vmatpush.msra.mxu2 %v11130_v40  ;;  %12593 = vst [vmem:[#allocation39_spill] sm:$0xff] %v11194_v41  ;;  %6086 = vmatpush.msrb.mxu0 %v11220_v62  ;;  %vm12847_vm15 = vmmov %vm12587_vm3 }
 0xb16   : > { %5891 = vmatpush.msrb.mxu1 %v11083_v59  ;;  %6054 = vmatpush.msra.mxu3 %v11127_v60  ;;  %12595 = vst [vmem:[#allocation48_spill] sm:$0xff] %v11199_v3  ;;  %v11259_v59 = vld [vmem:[%s12578_s3 + $0xc0] sm:$0xff] }
 0xb17   : > { %8221 = vmatmul.msk.f32.vlgmr.msrb.gmra.mxu1 %vm12587_vm3, %v5861_v37  ;;  %6119 = vmatpush.msra.mxu2 %v11153_v26  ;;  %12596 = vst [vmem:[#allocation37_spill] sm:$0xff] %v11210_v56  ;;  %v11235_v37 = vld [vmem:[%s12578_s3 + $0xd8] sm:$0xff]  ;;  %vm12848_vm3 = vmmov %vm12845_vm1 }
 0xb18   : > { %6018 = vmatpush.msra.mxu1 %v11086_v7  ;;  %6055 = vmatpush.msra.mxu3 %v11144_v18  ;;  %12597 = vst [vmem:[#allocation40_spill] sm:$0xff] %v11215_v20 }
 0xb19   : > { %6120 = vmatpush.msra.mxu2 %v11169_v46  ;;  %12598 = vst [vmem:[#allocation38_spill] sm:$0xff] %v11223_v35  ;;  %6087 = vmatpush.msrb.mxu0 %v11232_v42  ;;  %v11323_v46 = vld [vmem:[%s12577_s1 + $0x158] sm:$0xff] }
 0xb1a   : > { %6019 = vmatpush.msra.mxu1 %v11103_v17  ;;  %6056 = vmatpush.msra.mxu3 %v11157_v12  ;;  %12599 = vst [vmem:[#allocation49_spill] sm:$0xff] %v11226_v4 }
 0xb1b   : > { %6121 = vmatpush.msra.mxu2 %v11182_v1  ;;  %12600 = vst [vmem:[#allocation50_spill] sm:$0xff] %v11235_v37  ;;  %v11302_v1 = vld [vmem:[%s12577_s1 + $0x160] sm:$0xff] }
 0xb1c   : > { %6020 = vmatpush.msra.mxu1 %v11118_v29  ;;  %6057 = vmatpush.msra.mxu3 %v11174_v32  ;;  %12603 = vst [vmem:[#allocation53_spill] sm:$0xff] %v11251_v61 }
 0xb1d   : > { %6122 = vmatpush.msra.mxu2 %v11210_v56  ;;  %12604 = vst [vmem:[#allocation54_spill] sm:$0xff] %v11256_v8  ;;  %v11293_v56 = vld [vmem:[%s12577_s1 + $0x168] sm:$0xff] }
 0xb1e   : > { %6021 = vmatpush.msra.mxu1 %v11134_v6  ;;  %6058 = vmatpush.msra.mxu3 %v11204_v2  ;;  %12605 = vst [vmem:[#allocation55_spill] sm:$0xff] %v11259_v59 }
 0xb1f   : > { %8222 = vmatmul.msk.f32.gmra.mxu1 %vm12588_vm9, %v5862_v25  ;;  %6123 = vmatpush.msra.mxu2 %v11223_v35  ;;  %v11240_v25 = vld [vmem:[%s12578_s3 + $0x90] sm:$0xff]  ;;  %12610 = vst [vmem:[#allocation60_spill] sm:$0xff] %v11293_v56 }
 0xb20   : > { %6022 = vmatpush.msra.mxu1 %v11148_v57  ;;  %6088 = vmatpush.msrb.mxu0 %v11240_v25  ;;  %v11285_v35 = vld [vmem:[%s12577_s1 + $0x170] sm:$0xff]  ;;  %12612 = vst [vmem:[#allocation62_spill] sm:$0xff] %v11302_v1 }
 0xb21   : > { %12608 = vst [vmem:[#allocation58_spill] sm:$0xff] %v11285_v35 }
 0xb22   : > { %6023 = vmatpush.msra.mxu1 %v11165_v39  ;;  %6089 = vmatpush.msrb.mxu0 %v11248_v0  ;;  %12615 = vst [vmem:[#allocation65_spill] sm:$0xff] %v11323_v46  ;;  %v11353_v0 = vld [vmem:[%s12577_s1 + $0x100] sm:$0xff] }
 0xb23   : > { %12621 = vst [vmem:[#allocation71_spill] sm:$0xff] %v11353_v0 }
 0xb24   : > { %6024 = vmatpush.msra.mxu1 %v11177_v52  ;;  %6090 = vmatpush.msrb.mxu0 %v11256_v8  ;;  %v11527_v52 = vld [vmem:[%s12578_s3 + $0x1a0] sm:$0xff] }
 0xb25   : > { %12662 = vst [vmem:[#allocation108_spill] sm:$0xff] %v11527_v52 }
 0xb26   : > { %6025 = vmatpush.msra.mxu1 %v11187_v13  ;;  %v11314_v13 = vld [vmem:[%s12577_s1 + $0x110] sm:$0xff] }
 0xb27   : > { %8223 = vmatmul.msk.f32.gmra.mxu1 %vm12594_vm13, %v5863_v58  ;;  %v11243_v58 = vld [vmem:[%s12578_s3 + $0xd0] sm:$0xff]  ;;  %12613 = vst [vmem:[#allocation63_spill] sm:$0xff] %v11314_v13  ;;  %vm12849_vm13 = vmmov %vm12588_vm9 }
 0xb28   : > { %6148 = vmatpush.msrb.mxu1 %v11194_v41  ;;  %12601 = vst [vmem:[#allocation51_spill] sm:$0xff] %v11243_v58  ;;  %v11299_v41 = vld [vmem:[%s12577_s1 + $0x118] sm:$0xff] }
 0xb29   : > { %12611 = vst [vmem:[#allocation61_spill] sm:$0xff] %v11299_v41 }
 0xb2a   : > { %6149 = vmatpush.msrb.mxu1 %v11199_v3  ;;  %v11290_v3 = vld [vmem:[%s12577_s1 + $0x120] sm:$0xff] }
 0xb2b   : > { %12609 = vst [vmem:[#allocation59_spill] sm:$0xff] %v11290_v3 }
 0xb2c   : > { %6150 = vmatpush.msrb.mxu1 %v11215_v20  ;;  %v11275_v20 = vld [vmem:[%s12577_s1 + $0x178] sm:$0xff] }
 0xb2d   : > { %12606 = vst [vmem:[#allocation56_spill] sm:$0xff] %v11275_v20 }
 0xb2e   : > { %6151 = vmatpush.msrb.mxu1 %v11226_v4  ;;  %v11272_v4 = vld [vmem:[%s12577_s1 + $0x130] sm:$0xff] }
 0xb30   : > { %6152 = vmatpush.msrb.mxu1 %v11235_v37 }
 0xb32   : > { %6153 = vmatpush.msrb.mxu1 %v11243_v58  ;;  %v11264_v58 = vld [vmem:[%s12577_s1 + $0x138] sm:$0xff] }
 0xb34   : > { %6154 = vmatpush.msrb.mxu1 %v11251_v61 }
 0xb36   : > { %6155 = vmatpush.msrb.mxu1 %v11259_v59  ;;  %v11282_v59 = vld [vmem:[%s12577_s1 + $0x128] sm:$0xff] }
 0xb37   : > { %12607 = vst [vmem:[#allocation57_spill] sm:$0xff] %v11282_v59 }
 0xb94   : > { %v11266_v37 = vpop.f32.mrf.mxu1 }
 0xb95   : > { %8224 = vmatmul.msk.f32.vlgmr.msrb.gmra.mxu3 %vm4032_vm2, %v11266_v37  ;;  %v12337_v61 = vrot.slane %v11266_v37, 1 }
 0xb96   : > { %6181 = vmatpush.msrb.mxu3 %v11264_v58 }
 0xb97   : > { %8234 = vmatmul.msk.f32.vlgmr.msrb.gmra.mxu2 %vm4032_vm2, %v12337_v61  ;;  %v12347_v61 = vrot.slane %v11266_v37, 2 }
 0xb98   : > { %6182 = vmatpush.msrb.mxu3 %v11272_v4  ;;  %6246 = vmatpush.msrb.mxu2 %v11275_v20 }
 0xb9a   : > { %6183 = vmatpush.msrb.mxu3 %v11282_v59  ;;  %6247 = vmatpush.msrb.mxu2 %v11285_v35  ;;  %v11602_v59 = vld [vmem:[%s12578_s3 + $0x180] sm:$0xff] }
 0xb9b   : > { %12678 = vst [vmem:[#allocation124_spill] sm:$0xff] %v11602_v59 }
 0xb9c   : > { %6184 = vmatpush.msrb.mxu3 %v11290_v3  ;;  %6248 = vmatpush.msrb.mxu2 %v11293_v56  ;;  %v11306_v20 = vpop.f32.mrf.mxu1  ;;  %v12353_v56 = vrot.slane %v11266_v37, 3  ;;  %v11320_v3 = vld [vmem:[%s12578_s3 + $0x138] sm:$0xff] }
 0xb9d   : > { %8252 = vmatmul.msk.f32.vlgmr.msra.gmra.mxu3 %vm4032_vm2, %v12347_v61  ;;  %v12350_v35 = vrot.slane %v11306_v20, 3  ;;  %v12351_v8 = vrot.slane %v11306_v20, 4  ;;  %12614 = vst [vmem:[#allocation64_spill] sm:$0xff] %v11320_v3  ;;  %v11332_v61 = vld [vmem:[%s12578_s3 + $0x178] sm:$0xff] }
 0xb9e   : > { %6185 = vmatpush.msrb.mxu3 %v11299_v41  ;;  %6249 = vmatpush.msrb.mxu2 %v11302_v1  ;;  %12616 = vst [vmem:[#allocation66_spill] sm:$0xff] %v11332_v61  ;;  %v11335_v1 = vld [vmem:[%s12577_s1 + $0x108] sm:$0xff]  ;;  %v11342_v41 = vld [vmem:[%s12578_s3 + $0x130] sm:$0xff] }
 0xb9f   : > { %8225 = vmatmul.msk.f32.vlgmr.msra.gmra.mxu0 %vm4032_vm2, %v12350_v35  ;;  %8243 = vmatmul.msk.f32.vlgmr.msra.gmra.mxu1 %vm4032_vm2, %v12351_v8  ;;  %12617 = vst [vmem:[#allocation67_spill] sm:$0xff] %v11335_v1  ;;  %v11345_v35 = vld [vmem:[%s12577_s1 + $0x150] sm:$0xff] }
 0xba0   : > { %8270 = vmatmul.msk.f32.vlgmr.msra.gmra.mxu2 %vm4032_vm2, %v12353_v56  ;;  %6186 = vmatpush.msrb.mxu3 %v11314_v13  ;;  %12618 = vst [vmem:[#allocation68_spill] sm:$0xff] %v11342_v41  ;;  %v11350_v8 = vld [vmem:[%s12578_s3 + $0x170] sm:$0xff]  ;;  %v11358_v56 = vld [vmem:[%s12578_s3 + $0x128] sm:$0xff] }
 0xba1   : > { %12619 = vst [vmem:[#allocation69_spill] sm:$0xff] %v11345_v35  ;;  %6213 = vmatpush.msra.mxu0 %v11320_v3  ;;  %6250 = vmatpush.msrb.mxu2 %v11323_v46  ;;  %v11361_v13 = vld [vmem:[%s12577_s1 + $0x148] sm:$0xff]  ;;  %v11369_v3 = vld [vmem:[%s12577_s1 + $0x1b8] sm:$0xff] }
 0xba2   : > { %12620 = vst [vmem:[#allocation70_spill] sm:$0xff] %v11350_v8  ;;  %6278 = vmatpush.msra.mxu1 %v11332_v61  ;;  %6187 = vmatpush.msrb.mxu3 %v11335_v1  ;;  %v11366_v46 = vld [vmem:[%s12578_s3 + $0x168] sm:$0xff]  ;;  %v11374_v61 = vld [vmem:[%s12578_s3 + $0x120] sm:$0xff]  ;;  %v12372_v1 = vrot.slane %v11266_v37, 5 }
 0xba3   : > { %12622 = vst [vmem:[#allocation72_spill] sm:$0xff] %v11358_v56  ;;  %6214 = vmatpush.msra.mxu0 %v11342_v41  ;;  %6251 = vmatpush.msrb.mxu2 %v11345_v35  ;;  %v11380_v41 = vld [vmem:[%s12577_s1 + $0x140] sm:$0xff] }
 0xba4   : > { %12623 = vst [vmem:[#allocation73_spill] sm:$0xff] %v11361_v13  ;;  %6279 = vmatpush.msra.mxu1 %v11350_v8  ;;  %6188 = vmatpush.msrb.mxu3 %v11353_v0  ;;  %v11383_v35 = vld [vmem:[%s12578_s3 + $0x160] sm:$0xff]  ;;  %v11388_v8 = vld [vmem:[%s12577_s1 + $0x1b0] sm:$0xff]  ;;  %v11391_v0 = vld [vmem:[%s12577_s1 + $0x1f8] sm:$0xff] }
 0xba5   : > { %12624 = vst [vmem:[#allocation74_spill] sm:$0xff] %v11366_v46  ;;  %6215 = vmatpush.msra.mxu0 %v11358_v56  ;;  %6252 = vmatpush.msrb.mxu2 %v11361_v13  ;;  %v12631_v56 = vrot.slane %v11266_v37, 4  ;;  %v11408_v13 = vld [vmem:[%s12578_s3 + $0x158] sm:$0xff] }
 0xba6   : > { %12625 = vst [vmem:[#allocation75_spill] sm:$0xff] %v11369_v3  ;;  %6280 = vmatpush.msra.mxu1 %v11366_v46  ;;  %6311 = vmatpush.msra.mxu3 %v11369_v3  ;;  %v11402_v46 = vld [vmem:[%s12578_s3 + $0x118] sm:$0xff]  ;;  %v12635_v3 = vrot.slane %v11306_v20, 5 }
 0xba7   : > { %12626 = vst [vmem:[#allocation76_spill] sm:$0xff] %v11374_v61  ;;  %8288 = vmatmul.msk.f32.vlgmr.msrb.gmra.mxu3 %vm4032_vm2, %v12631_v56  ;;  %6216 = vmatpush.msra.mxu0 %v11374_v61  ;;  %v11411_v56 = vld [vmem:[%s12577_s1 + $0x1a8] sm:$0xff] }
 0xba8   : > { %12627 = vst [vmem:[#allocation77_spill] sm:$0xff] %v11380_v41  ;;  %6253 = vmatpush.msrb.mxu2 %v11380_v41  ;;  %6281 = vmatpush.msra.mxu1 %v11383_v35  ;;  %v11420_v41 = vld [vmem:[%s12577_s1 + $0x1f0] sm:$0xff]  ;;  %v11441_v61 = vld [vmem:[%s12578_s3 + $0x108] sm:$0xff] }
 0xba9   : > { %12628 = vst [vmem:[#allocation78_spill] sm:$0xff] %v11383_v35  ;;  %6312 = vmatpush.msra.mxu3 %v11388_v8  ;;  %8261 = vmatmul.msk.f32.vlgmr.msrb.gmra.mxu0 %vm4032_vm2, %v12635_v3  ;;  %v12636_v35 = vrot.slane %v11306_v20, 6  ;;  %v11433_v3 = vld [vmem:[%s12577_s1 + $0x1a0] sm:$0xff] }
 0xbaa   : > { %12629 = vst [vmem:[#allocation79_spill] sm:$0xff] %v11388_v8  ;;  %6376 = vmatpush.msra.mxu2 %v11391_v0  ;;  %6217 = vmatpush.msra.mxu0 %v11402_v46  ;;  %v11430_v8 = vld [vmem:[%s12578_s3 + $0x150] sm:$0xff] }
 0xbab   : > { %12630 = vst [vmem:[#allocation80_spill] sm:$0xff] %v11391_v0  ;;  %8279 = vmatmul.msk.f32.vlgmr.msrb.gmra.mxu1 %vm4032_vm2, %v12636_v35  ;;  %v11423_v0 = vld [vmem:[%s12578_s3 + $0x110] sm:$0xff]  ;;  %8306 = vmatmul.msk.f32.vlgmr.msrb.gmra.mxu2 %vm4032_vm2, %v12372_v1  ;;  %v11438_v35 = vld [vmem:[%s12577_s1 + $0x1e8] sm:$0xff] }
 0xbac   : > { %12632 = vst [vmem:[#allocation81_spill] sm:$0xff] %v11402_v46  ;;  %6282 = vmatpush.msra.mxu1 %v11408_v13  ;;  %6313 = vmatpush.msra.mxu3 %v11411_v56  ;;  %v11446_v1 = vld [vmem:[%s12578_s3 + $0x148] sm:$0xff]  ;;  %v11449_v46 = vld [vmem:[%s12577_s1 + $0x198] sm:$0xff] }
 0xbad   : > { %12633 = vst [vmem:[#allocation82_spill] sm:$0xff] %v11408_v13  ;;  %6377 = vmatpush.msra.mxu2 %v11420_v41  ;;  %6218 = vmatpush.msra.mxu0 %v11423_v0  ;;  %v11454_v13 = vld [vmem:[%s12577_s1 + $0x1e0] sm:$0xff] }
 0xbae   : > { %12634 = vst [vmem:[#allocation83_spill] sm:$0xff] %v11411_v56  ;;  %6283 = vmatpush.msra.mxu1 %v11430_v8  ;;  %6314 = vmatpush.msra.mxu3 %v11433_v3  ;;  %v11457_v56 = vld [vmem:[%s12578_s3 + $0x100] sm:$0xff] }
 0xbaf   : > { %12637 = vst [vmem:[#allocation84_spill] sm:$0xff] %v11420_v41  ;;  %6378 = vmatpush.msra.mxu2 %v11438_v35  ;;  %6219 = vmatpush.msra.mxu0 %v11441_v61  ;;  %v11462_v41 = vld [vmem:[%s12578_s3 + $0x140] sm:$0xff] }
 0xbb0   : > { %12638 = vst [vmem:[#allocation85_spill] sm:$0xff] %v11423_v0  ;;  %v11465_v0 = vld [vmem:[%s12577_s1 + $0x190] sm:$0xff]  ;;  %6284 = vmatpush.msra.mxu1 %v11446_v1  ;;  %6315 = vmatpush.msra.mxu3 %v11449_v46 }
 0xbb1   : > { %12639 = vst [vmem:[#allocation86_spill] sm:$0xff] %v11430_v8  ;;  %v11470_v8 = vld [vmem:[%s12578_s3 + $0x1b8] sm:$0xff]  ;;  %6379 = vmatpush.msra.mxu2 %v11454_v13  ;;  %6220 = vmatpush.msra.mxu0 %v11457_v56 }
 0xbb2   : > { %12640 = vst [vmem:[#allocation87_spill] sm:$0xff] %v11433_v3  ;;  %v11473_v3 = vld [vmem:[%s12577_s1 + $0x1d8] sm:$0xff]  ;;  %6285 = vmatpush.msra.mxu1 %v11462_v41  ;;  %6316 = vmatpush.msra.mxu3 %v11465_v0 }
 0xbb3   : > { %12641 = vst [vmem:[#allocation88_spill] sm:$0xff] %v11438_v35  ;;  %6343 = vmatpush.msrb.mxu0 %v11470_v8  ;;  %6380 = vmatpush.msra.mxu2 %v11473_v3  ;;  %v11491_v35 = vld [vmem:[%s12578_s3 + $0x1b0] sm:$0xff] }
 0xbb4   : > { %12642 = vst [vmem:[#allocation89_spill] sm:$0xff] %v11441_v61  ;;  %v11479_v61 = vld [vmem:[%s12578_s3 + $0x1f8] sm:$0xff] }
 0xbb5   : > { %12643 = vst [vmem:[#allocation90_spill] sm:$0xff] %v11446_v1  ;;  %v11482_v1 = vpop.f32.mrf.mxu1  ;;  %6408 = vmatpush.msrb.mxu1 %v11479_v61  ;;  %6344 = vmatpush.msrb.mxu0 %v11491_v35 }
 0xbb6   : > { %12644 = vst [vmem:[#allocation91_spill] sm:$0xff] %v11449_v46  ;;  %v11486_v46 = vld [vmem:[%s12577_s1 + $0x188] sm:$0xff]  ;;  %8315 = vmatmul.msk.f32.vlgmr.msra.gmra.mxu1 %vm4032_vm2, %v11482_v1 }
 0xbb7   : > { %12645 = vst [vmem:[#allocation92_spill] sm:$0xff] %v11454_v13  ;;  %v11494_v13 = vld [vmem:[%s12577_s1 + $0x1d0] sm:$0xff]  ;;  %6317 = vmatpush.msra.mxu3 %v11486_v46 }
 0xbb8   : > { %12646 = vst [vmem:[#allocation93_spill] sm:$0xff] %v11457_v56  ;;  %v11504_v56 = vld [vmem:[%s12577_s1 + $0x180] sm:$0xff]  ;;  %6381 = vmatpush.msra.mxu2 %v11494_v13 }
 0xbb9   : > { %12647 = vst [vmem:[#allocation94_spill] sm:$0xff] %v11462_v41  ;;  %v12655_v41 = vrot.slane %v11306_v20, 7  ;;  %6318 = vmatpush.msra.mxu3 %v11504_v56 }
 0xbba   : > { %12648 = vst [vmem:[#allocation95_spill] sm:$0xff] %v11465_v0  ;;  %v11501_v0 = vld [vmem:[%s12578_s3 + $0x1f0] sm:$0xff] }
 0xbbb   : > { %12649 = vst [vmem:[#allocation96_spill] sm:$0xff] %v11470_v8  ;;  %8297 = vmatmul.msk.f32.vlgmr.msra.gmra.mxu0 %vm4032_vm2, %v12655_v41  ;;  %v11513_v8 = vld [vmem:[%s12577_s1 + $0x1c8] sm:$0xff]  ;;  %6409 = vmatpush.msrb.mxu1 %v11501_v0 }
 0xbbc   : > { %12650 = vst [vmem:[#allocation97_spill] sm:$0xff] %v11473_v3  ;;  %v11510_v3 = vld [vmem:[%s12578_s3 + $0x1a8] sm:$0xff]  ;;  %6382 = vmatpush.msra.mxu2 %v11513_v8 }
 0xbbd   : > { %12651 = vst [vmem:[#allocation98_spill] sm:$0xff] %v11479_v61  ;;  %v11518_v41 = vld [vmem:[%s12578_s3 + $0x1e8] sm:$0xff]  ;;  %v12399_v61 = vrot.slane %v11266_v37, 6  ;;  %6345 = vmatpush.msrb.mxu0 %v11510_v3 }
 0xbbe   : > { %12652 = vst [vmem:[#allocation99_spill] sm:$0xff] %v11486_v46  ;;  %v11524_v46 = vld [vmem:[%s12577_s1 + $0x238] sm:$0xff]  ;;  %6410 = vmatpush.msrb.mxu1 %v11518_v41 }
 0xbbf   : > { %12653 = vst [vmem:[#allocation100_spill] sm:$0xff] %v11491_v35  ;;  %v11535_v35 = vld [vmem:[%s12578_s3 + $0x1e0] sm:$0xff]  ;;  %8324 = vmatmul.msk.f32.vlgmr.msra.gmra.mxu3 %vm4032_vm2, %v12399_v61  ;;  %6346 = vmatpush.msrb.mxu0 %v11527_v52  ;;  %v11556_v61 = vld [vmem:[%s12578_s3 + $0x1d8] sm:$0xff]  ;;  %v11569_v52 = vld [vmem:[%s12578_s3 + $0x190] sm:$0xff] }
 0xbc0   : > { %12654 = vst [vmem:[#allocation101_spill] sm:$0xff] %v11494_v13  ;;  %v11532_v13 = vld [vmem:[%s12577_s1 + $0x1c0] sm:$0xff]  ;;  %6440 = vmatpush.msrb.mxu3 %v11524_v46  ;;  %6411 = vmatpush.msrb.mxu1 %v11535_v35 }
 0xbc1   : > { %12656 = vst [vmem:[#allocation102_spill] sm:$0xff] %v11501_v0  ;;  %v11542_v0 = vld [vmem:[%s12577_s1 + $0x230] sm:$0xff]  ;;  %6383 = vmatpush.msra.mxu2 %v11532_v13 }
 0xbc2   : > { %12657 = vst [vmem:[#allocation103_spill] sm:$0xff] %v11504_v56  ;;  %v11548_v56 = vld [vmem:[%s12577_s1 + $0x278] sm:$0xff]  ;;  %6441 = vmatpush.msrb.mxu3 %v11542_v0  ;;  %6412 = vmatpush.msrb.mxu1 %v11556_v61 }
 0xbc3   : > { %12658 = vst [vmem:[#allocation104_spill] sm:$0xff] %v11510_v3  ;;  %v11551_v3 = vld [vmem:[%s12578_s3 + $0x198] sm:$0xff]  ;;  %6505 = vmatpush.msrb.mxu2 %v11548_v56 }
 0xbc4   : > { %12659 = vst [vmem:[#allocation105_spill] sm:$0xff] %v11513_v8  ;;  %v12405_v8 = vrot.slane %v11266_v37, 7  ;;  %6347 = vmatpush.msrb.mxu0 %v11551_v3 }
 0xbc5   : > { %12660 = vst [vmem:[#allocation106_spill] sm:$0xff] %v11518_v41  ;;  %v11559_v41 = vld [vmem:[%s12577_s1 + $0x228] sm:$0xff] }
 0xbc6   : > { %12661 = vst [vmem:[#allocation107_spill] sm:$0xff] %v11524_v46  ;;  %8342 = vmatmul.msk.f32.vlgmr.msra.gmra.mxu2 %vm4032_vm2, %v12405_v8  ;;  %v11566_v46 = vld [vmem:[%s12577_s1 + $0x270] sm:$0xff]  ;;  %6442 = vmatpush.msrb.mxu3 %v11559_v41  ;;  %v11582_v8 = vld [vmem:[%s12577_s1 + $0x268] sm:$0xff] }
 0xbc7   : > { %12663 = vst [vmem:[#allocation109_spill] sm:$0xff] %v11532_v13  ;;  %v11577_v13 = vld [vmem:[%s12577_s1 + $0x220] sm:$0xff]  ;;  %6506 = vmatpush.msrb.mxu2 %v11566_v46  ;;  %6348 = vmatpush.msrb.mxu0 %v11569_v52 }
 0xbc8   : > { %12664 = vst [vmem:[#allocation110_spill] sm:$0xff] %v11535_v35  ;;  %v11574_v35 = vld [vmem:[%s12578_s3 + $0x1d0] sm:$0xff]  ;;  %6443 = vmatpush.msrb.mxu3 %v11577_v13 }
 0xbc9   : > { %12665 = vst [vmem:[#allocation111_spill] sm:$0xff] %v11542_v0  ;;  %v11585_v0 = vld [vmem:[%s12578_s3 + $0x188] sm:$0xff]  ;;  %6413 = vmatpush.msrb.mxu1 %v11574_v35  ;;  %6507 = vmatpush.msrb.mxu2 %v11582_v8 }
 0xbca   : > { %12666 = vst [vmem:[#allocation112_spill] sm:$0xff] %v11548_v56  ;;  %v11590_v56 = vld [vmem:[%s12578_s3 + $0x1c8] sm:$0xff]  ;;  %6349 = vmatpush.msrb.mxu0 %v11585_v0 }
 0xbcb   : > { %12667 = vst [vmem:[#allocation113_spill] sm:$0xff] %v11551_v3  ;;  %v11593_v3 = vld [vmem:[%s12577_s1 + $0x218] sm:$0xff]  ;;  %6414 = vmatpush.msrb.mxu1 %v11590_v56 }
 0xbcc   : > { %12668 = vst [vmem:[#allocation114_spill] sm:$0xff] %v11556_v61  ;;  %6444 = vmatpush.msrb.mxu3 %v11593_v3  ;;  %v11613_v61 = vld [vmem:[%s12577_s1 + $0x210] sm:$0xff]  ;;  %6350 = vmatpush.msrb.mxu0 %v11602_v59 }
 0xbcd   : > { %12669 = vst [vmem:[#allocation115_spill] sm:$0xff] %v11559_v41  ;;  %v11599_v41 = vld [vmem:[%s12577_s1 + $0x260] sm:$0xff]  ;;  %v11638_v59 = vld [vmem:[%s12578_s3 + $0x230] sm:$0xff] }
 0xbce   : > { %12670 = vst [vmem:[#allocation116_spill] sm:$0xff] %v11566_v46  ;;  %6508 = vmatpush.msrb.mxu2 %v11599_v41  ;;  %v11618_v46 = vld [vmem:[%s12578_s3 + $0x238] sm:$0xff]  ;;  %6445 = vmatpush.msrb.mxu3 %v11613_v61 }
 0xbcf   : > { %12671 = vst [vmem:[#allocation117_spill] sm:$0xff] %v11569_v52  ;;  %v11608_v52 = vld [vmem:[%s12578_s3 + $0x1c0] sm:$0xff]  ;;  %6472 = vmatpush.msra.mxu0 %v11618_v46 }
 0xbd0   : > { %12672 = vst [vmem:[#allocation118_spill] sm:$0xff] %v11574_v35  ;;  %v11621_v35 = vld [vmem:[%s12577_s1 + $0x258] sm:$0xff]  ;;  %6415 = vmatpush.msrb.mxu1 %v11608_v52 }
 0xbd1   : > { %12673 = vst [vmem:[#allocation119_spill] sm:$0xff] %v11577_v13  ;;  %6509 = vmatpush.msrb.mxu2 %v11621_v35  ;;  %v11649_v13 = vld [vmem:[%s12577_s1 + $0x200] sm:$0xff]  ;;  %6473 = vmatpush.msra.mxu0 %v11638_v59 }
 0xbd2   : > { %12674 = vst [vmem:[#allocation120_spill] sm:$0xff] %v11582_v8  ;;  %v11628_v8 = vld [vmem:[%s12578_s3 + $0x278] sm:$0xff] }
 0xbd3   : > { %12675 = vst [vmem:[#allocation121_spill] sm:$0xff] %v11590_v56  ;;  %v12682_v56 = vrot.slane %v11482_v1, 1  ;;  %6537 = vmatpush.msra.mxu1 %v11628_v8 }
 0xbd4   : > { %12676 = vst [vmem:[#allocation122_spill] sm:$0xff] %v11593_v3  ;;  %v11631_v3 = vld [vmem:[%s12577_s1 + $0x208] sm:$0xff] }
 0xbd5   : > { %12677 = vst [vmem:[#allocation123_spill] sm:$0xff] %v11599_v41  ;;  %8333 = vmatmul.msk.f32.vlgmr.msrb.gmra.mxu0 %vm4032_vm2, %v12682_v56  ;;  %v12685_v41 = vrot.slane %v11482_v1, 2  ;;  %v11646_v56 = vld [vmem:[%s12578_s3 + $0x270] sm:$0xff]  ;;  %6446 = vmatpush.msrb.mxu3 %v11631_v3 }
 0xbd6   : > { %12679 = vst [vmem:[#allocation125_spill] sm:$0xff] %v11608_v52  ;;  %v11641_v52 = vld [vmem:[%s12577_s1 + $0x250] sm:$0xff]  ;;  %6538 = vmatpush.msra.mxu1 %v11646_v56 }
 0xbd7   : > { %12680 = vst [vmem:[#allocation126_spill] sm:$0xff] %v11613_v61  ;;  %8351 = vmatmul.msk.f32.vlgmr.msrb.gmra.mxu1 %vm4032_vm2, %v12685_v41  ;;  %v11654_v41 = vld [vmem:[%s12578_s3 + $0x228] sm:$0xff]  ;;  %6510 = vmatpush.msrb.mxu2 %v11641_v52 }
 0xbd8   : > { %12681 = vst [vmem:[#allocation127_spill] sm:$0xff] %v11621_v35  ;;  %v11657_v61 = vld [vmem:[%s12577_s1 + $0x248] sm:$0xff]  ;;  %6447 = vmatpush.msrb.mxu3 %v11649_v13  ;;  %6474 = vmatpush.msra.mxu0 %v11654_v41 }
 0xbd9   : > { %12683 = vst [vmem:[#allocation128_spill] sm:$0xff] %v11628_v8  ;;  %v11662_v35 = vld [vmem:[%s12578_s3 + $0x268] sm:$0xff]  ;;  %v11667_v8 = vld [vmem:[%s12577_s1 + $0x2b8] sm:$0xff]  ;;  %6511 = vmatpush.msrb.mxu2 %v11657_v61  ;;  %8360 = vmatmul.msk.f32.vlgmr.msrb.gmra.mxu3 %vm4032_vm2, %v11306_v20 }
 0xbda   : > { %12684 = vst [vmem:[#allocation129_spill] sm:$0xff] %v11631_v3  ;;  %v11670_v3 = vld [vmem:[%s12578_s3 + $0x220] sm:$0xff]  ;;  %6539 = vmatpush.msra.mxu1 %v11662_v35  ;;  %6570 = vmatpush.msra.mxu3 %v11667_v8 }
 0xbdb   : > { %12686 = vst [vmem:[#allocation130_spill] sm:$0xff] %v11638_v59  ;;  %v11675_v59 = vld [vmem:[%s12577_s1 + $0x240] sm:$0xff]  ;;  %6475 = vmatpush.msra.mxu0 %v11670_v3 }
 0xbdc   : > { %12687 = vst [vmem:[#allocation131_spill] sm:$0xff] %v11641_v52  ;;  %v11678_v52 = vld [vmem:[%s12578_s3 + $0x260] sm:$0xff]  ;;  %6512 = vmatpush.msrb.mxu2 %v11675_v59 }
 0xbdd   : > { %12688 = vst [vmem:[#allocation132_spill] sm:$0xff] %v11646_v56  ;;  %v11684_v56 = vld [vmem:[%s12577_s1 + $0x2b0] sm:$0xff]  ;;  %6540 = vmatpush.msra.mxu1 %v11678_v52 }
 0xbde   : > { %12689 = vst [vmem:[#allocation133_spill] sm:$0xff] %v11649_v13  ;;  %v11690_v13 = vld [vmem:[%s12578_s3 + $0x218] sm:$0xff]  ;;  %6571 = vmatpush.msra.mxu3 %v11684_v56  ;;  %6623 = vmatpush.msra.mxu2 %v10975_v54  ;;  %v11723_v54 = vld [vmem:[%s12578_s3 + $0x248] sm:$0xff] }
 0xbdf   : > { %12690 = vst [vmem:[#allocation134_spill] sm:$0xff] %v11654_v41  ;;  %v11698_v41 = vld [vmem:[%s12577_s1 + $0x2a8] sm:$0xff]  ;;  %6476 = vmatpush.msra.mxu0 %v11690_v13 }
 0xbe0   : > { %12691 = vst [vmem:[#allocation135_spill] sm:$0xff] %v11657_v61  ;;  %v12436_v61 = vrot.slane %v11306_v20, 1  ;;  %6572 = vmatpush.msra.mxu3 %v11698_v41  ;;  %6624 = vmatpush.msra.mxu2 %v10978_v47  ;;  %v11738_v47 = vld [vmem:[%s12578_s3 + $0x240] sm:$0xff] }
 0xbe1   : > { %12692 = vst [vmem:[#allocation136_spill] sm:$0xff] %v11662_v35  ;;  %v11695_v35 = vld [vmem:[%s12578_s3 + $0x258] sm:$0xff] }
 0xbe2   : > { %12693 = vst [vmem:[#allocation137_spill] sm:$0xff] %v11667_v8  ;;  %8378 = vmatmul.msk.f32.vlgmr.msrb.gmra.mxu2 %vm4032_vm2, %v12436_v61  ;;  %v11705_v8 = vld [vmem:[%s12578_s3 + $0x210] sm:$0xff]  ;;  %6541 = vmatpush.msra.mxu1 %v11695_v35  ;;  %v11718_v61 = vld [vmem:[%s12578_s3 + $0x208] sm:$0xff] }
 0xbe3   : > { %12694 = vst [vmem:[#allocation138_spill] sm:$0xff] %v11675_v59  ;;  %v11710_v59 = vld [vmem:[%s12578_s3 + $0x250] sm:$0xff]  ;;  %6477 = vmatpush.msra.mxu0 %v11705_v8  ;;  %6625 = vmatpush.msra.mxu2 %v10990_v55  ;;  %v12703_v55 = vrot.slane %v11482_v1, 3 }
 0xbe4   : > { %12695 = vst [vmem:[#allocation139_spill] sm:$0xff] %v11678_v52  ;;  %v11713_v52 = vld [vmem:[%s12577_s1 + $0x2a0] sm:$0xff]  ;;  %6542 = vmatpush.msra.mxu1 %v11710_v59 }
 0xbe5   : > { %12696 = vst [vmem:[#allocation140_spill] sm:$0xff] %v11684_v56  ;;  %v11726_v56 = vld [vmem:[%s12577_s1 + $0x298] sm:$0xff]  ;;  %6573 = vmatpush.msra.mxu3 %v11713_v52  ;;  %6478 = vmatpush.msra.mxu0 %v11718_v61 }
 0xbe6   : > { %12697 = vst [vmem:[#allocation141_spill] sm:$0xff] %v11690_v13  ;;  %6543 = vmatpush.msra.mxu1 %v11723_v54  ;;  %v11743_v13 = vld [vmem:[%s12577_s1 + $0x290] sm:$0xff]  ;;  %6626 = vmatpush.msra.mxu2 %v11008_v50 }
 0xbe7   : > { %12698 = vst [vmem:[#allocation142_spill] sm:$0xff] %v11695_v35  ;;  %v11732_v35 = vld [vmem:[%s12578_s3 + $0x200] sm:$0xff]  ;;  %6574 = vmatpush.msra.mxu3 %v11726_v56  ;;  %v11762_v50 = vld [vmem:[%s12578_s3 + $0x2b0] sm:$0xff] }
 0xbe8   : > { %12699 = vst [vmem:[#allocation143_spill] sm:$0xff] %v11698_v41  ;;  %6479 = vmatpush.msra.mxu0 %v11732_v35  ;;  %6544 = vmatpush.msra.mxu1 %v11738_v47  ;;  %v11755_v41 = vld [vmem:[%s12577_s1 + $0x288] sm:$0xff] }
 0xbe9   : > { %12700 = vst [vmem:[#allocation144_spill] sm:$0xff] %v11710_v59  ;;  %v11748_v59 = vld [vmem:[%s12578_s3 + $0x2b8] sm:$0xff]  ;;  %8369 = vmatmul.msk.f32.vlgmr.msra.gmra.mxu0 %vm4032_vm2, %v12703_v55  ;;  %6575 = vmatpush.msra.mxu3 %v11743_v13  ;;  %v11772_v55 = vld [vmem:[%s12578_s3 + $0x2a8] sm:$0xff] }
 0xbea   : > { %12701 = vst [vmem:[#allocation145_spill] sm:$0xff] %v11723_v54  ;;  %v12704_v54 = vrot.slane %v11482_v1, 4  ;;  %6602 = vmatpush.msrb.mxu0 %v11748_v59  ;;  %6627 = vmatpush.msra.mxu2 %v11024_v28  ;;  %v6559_v28 = vrot.slane %v11306_v20, 2 }
 0xbeb   : > { %12702 = vst [vmem:[#allocation146_spill] sm:$0xff] %v11738_v47  ;;  %v11767_v47 = vld [vmem:[%s12577_s1 + $0x280] sm:$0xff]  ;;  %6643 = vmatpush.msrb.mxu1 %v11002_v14  ;;  %6576 = vmatpush.msra.mxu3 %v11755_v41  ;;  %v11791_v14 = vld [vmem:[%s12578_s3 + $0x298] sm:$0xff]  ;;  %s12817_s1 = sld [smem:[#allocation34_spill]] }
 0xbec   : > { %8387 = vmatmul.msk.f32.vlgmr.msra.gmra.mxu1 %vm4032_vm2, %v12704_v54  ;;  %6603 = vmatpush.msrb.mxu0 %v11762_v50  ;;  %v11780_v54 = vld [vmem:[%s12578_s3 + $0x2a0] sm:$0xff] }
 0xbed   : > { %6628 = vmatpush.msra.mxu2 %v11040_v43  ;;  %6644 = vmatpush.msrb.mxu1 %v11015_v27  ;;  %v12705_v27 = vrot.slane %v11306_v20, 3  ;;  %v12709_v43 = vld [vmem:[#allocation41_spill] sm:$0xff] }
 0xbee   : > { %6577 = vmatpush.msra.mxu3 %v11767_v47  ;;  %6604 = vmatpush.msrb.mxu0 %v11772_v55 }
 0xbef   : > { %6629 = vmatpush.msra.mxu2 %v11056_v19  ;;  %6645 = vmatpush.msrb.mxu1 %v11031_v36  ;;  %v11800_v36 = vld [vmem:[%s12578_s3 + $0x290] sm:$0xff] }
 0xbf0   : > { %8396 = vmatmul.msk.f32.vlgmr.msra.gmra.mxu3 %vm4032_vm2, %v6559_v28  ;;  %6605 = vmatpush.msrb.mxu0 %v11780_v54  ;;  %v12712_v19 = vld [vmem:[#allocation59_spill] sm:$0xff] }
 0xbf1   : > { %6663 = vmatpush.msrb.mxu3 %v10981_v44  ;;  %6630 = vmatpush.msra.mxu2 %v11073_v31  ;;  %v11807_v44 = vld [vmem:[%s12578_s3 + $0x288] sm:$0xff]  ;;  %v12715_v31 = vrot.slane %v11266_v37, 1 }
 0xbf2   : > { %6646 = vmatpush.msrb.mxu1 %v11037_v38  ;;  %8406 = vmatmul.msk.f32.vlgmr.msra.gmra.mxu2 %vm4032_vm2, %v12705_v27  ;;  %v6591_v38 = vrot.slane %v11482_v1, 5  ;;  %v12745_v27 = vld [vmem:[#allocation53_spill] sm:$0xff] }
 0xbf3   : > { %6664 = vmatpush.msrb.mxu3 %v10987_v24  ;;  %6703 = vmatpush.msrb.mxu2 %v11080_v34  ;;  %v11814_v24 = vld [vmem:[%s12578_s3 + $0x280] sm:$0xff]  ;;  %v12716_v34 = vrot.slane %v11266_v37, 2  ;;  %s12846_s3 = sld [smem:[#allocation35_spill]] }
 0xbf4   : > { %6606 = vmatpush.msrb.mxu0 %v11791_v14  ;;  %6647 = vmatpush.msrb.mxu1 %v11050_v51  ;;  %v12711_v51 = vld [vmem:[#allocation47_spill] sm:$0xff] }
 0xbf5   : > { %6665 = vmatpush.msrb.mxu3 %v10993_v15  ;;  %6704 = vmatpush.msrb.mxu2 %v11096_v10  ;;  %v12706_v15 = vrot.slane %v11306_v20, 4  ;;  %v12719_v10 = vld [vmem:[#allocation61_spill] sm:$0xff] }
 0xbf6   : > { %6607 = vmatpush.msrb.mxu0 %v11800_v36  ;;  %6648 = vmatpush.msrb.mxu1 %v11066_v22  ;;  %v12714_v22 = vld [vmem:[#allocation54_spill] sm:$0xff] }
 0xbf7   : > { %6666 = vmatpush.msrb.mxu3 %v11011_v21  ;;  %6705 = vmatpush.msrb.mxu2 %v11112_v30  ;;  %v12707_v21 = vrot.slane %v11306_v20, 5  ;;  %v12723_v30 = vld [vmem:[#allocation63_spill] sm:$0xff] }
 0xbf8   : > { %6608 = vmatpush.msrb.mxu0 %v11807_v44  ;;  %6649 = vmatpush.msrb.mxu1 %v11107_v11  ;;  %v12722_v11 = vld [vmem:[#allocation48_spill] sm:$0xff] }
 0xbf9   : > { %6667 = vmatpush.msrb.mxu3 %v11027_v33  ;;  %6706 = vmatpush.msrb.mxu2 %v11127_v60  ;;  %v12708_v33 = vld [vmem:[#allocation57_spill] sm:$0xff]  ;;  %v12727_v60 = vld [vmem:[#allocation67_spill] sm:$0xff] }
 0xbfa   : > { %6609 = vmatpush.msrb.mxu0 %v11814_v24  ;;  %6650 = vmatpush.msrb.mxu1 %v11123_v63  ;;  %v12726_v63 = vld [vmem:[#allocation40_spill] sm:$0xff] }
 0xbfb   : > { %8405 = vmatmul.msk.f32.vlgmr.msrb.gmra.mxu0 %vm4032_vm2, %v6591_v38  ;;  %8407 = vmatmul.msk.f32.vlgmr.msrb.gmra.mxu1 %vm4032_vm2, %v11266_v37 }
 0xbfc   : > { %6668 = vmatpush.msrb.mxu3 %v11047_v9  ;;  %6683 = vmatpush.msra.mxu0 %v11086_v7  ;;  %v12710_v9 = vld [vmem:[#allocation52_spill] sm:$0xff]  ;;  %v12717_v7 = vld [vmem:[#allocation46_spill] sm:$0xff] }
 0xbfd   : > { %6707 = vmatpush.msrb.mxu2 %v11144_v18  ;;  %6723 = vmatpush.msra.mxu1 %v11139_v53  ;;  %v12730_v53 = vld [vmem:[#allocation56_spill] sm:$0xff]  ;;  %v12731_v18 = vld [vmem:[#allocation49_spill] sm:$0xff] }
 0xbfe   : > { %6669 = vmatpush.msrb.mxu3 %v11063_v49  ;;  %6684 = vmatpush.msra.mxu0 %v11103_v17  ;;  %v12713_v49 = vld [vmem:[#allocation45_spill] sm:$0xff] }
 0xbff   : > { %6708 = vmatpush.msrb.mxu2 %v11157_v12  ;;  %6724 = vmatpush.msra.mxu1 %v11161_v16  ;;  %v12721_v17 = vld [vmem:[#allocation37_spill] sm:$0xff]  ;;  %v12734_v12 = vrot.slane %v11306_v20, 7  ;;  %v12735_v16 = vld [vmem:[#allocation58_spill] sm:$0xff] }
 0xc00   : > { %6670 = vmatpush.msrb.mxu3 %v11090_v45  ;;  %6685 = vmatpush.msra.mxu0 %v11118_v29  ;;  %v12718_v45 = vld [vmem:[#allocation39_spill] sm:$0xff]  ;;  %v12725_v29 = vld [vmem:[#allocation38_spill] sm:$0xff] }
 0xc01   : > { %6709 = vmatpush.msrb.mxu2 %v11174_v32  ;;  %6725 = vmatpush.msra.mxu1 %v11207_v23  ;;  %v12737_v32 = vld [vmem:[#allocation50_spill] sm:$0xff]  ;;  %v12739_v23 = vld [vmem:[#allocation60_spill] sm:$0xff] }
 0xc02   : > { %8408 = vmatmul.msk.f32.vlgmr.msrb.gmra.mxu3 %vm4032_vm2, %v12706_v15  ;;  %6686 = vmatpush.msra.mxu0 %v11134_v6  ;;  %v12729_v6 = vrot.slane %v11306_v20, 6  ;;  %v12746_v15 = vld [vmem:[#allocation89_spill] sm:$0xff] }
 0xc03   : > { %6743 = vmatpush.msra.mxu3 %v11099_v5  ;;  %6710 = vmatpush.msrb.mxu2 %v11204_v2  ;;  %v12720_v5 = vld [vmem:[#allocation64_spill] sm:$0xff]  ;;  %v12738_v2 = vld [vmem:[#allocation81_spill] sm:$0xff] }
 0xc04   : > { %6726 = vmatpush.msra.mxu1 %v11220_v62  ;;  %8410 = vmatmul.msk.f32.vlgmr.msrb.gmra.mxu2 %vm4032_vm2, %v12707_v21  ;;  %v12740_v62 = vld [vmem:[#allocation79_spill] sm:$0xff]  ;;  %v12747_v21 = vld [vmem:[#allocation65_spill] sm:$0xff] }
 0xc05   : > { %6744 = vmatpush.msra.mxu3 %v11115_v48  ;;  %6783 = vmatpush.msra.mxu2 %v11264_v58  ;;  %v12724_v48 = vld [vmem:[#allocation68_spill] sm:$0xff]  ;;  %v12744_v58 = vld [vmem:[#allocation83_spill] sm:$0xff] }
 0xc06   : > { %6687 = vmatpush.msra.mxu0 %v11148_v57  ;;  %6727 = vmatpush.msra.mxu1 %v11232_v42  ;;  %v12732_v57 = vld [vmem:[#allocation71_spill] sm:$0xff]  ;;  %v12742_v42 = vld [vmem:[#allocation85_spill] sm:$0xff] }
 0xc07   : > { %6745 = vmatpush.msra.mxu3 %v11130_v40  ;;  %6784 = vmatpush.msra.mxu2 %v11272_v4  ;;  %v12728_v40 = vld [vmem:[#allocation72_spill] sm:$0xff]  ;;  %v12741_v4 = vld [vmem:[#allocation51_spill] sm:$0xff] }
 0xc08   : > { %6688 = vmatpush.msra.mxu0 %v11165_v39  ;;  %6728 = vmatpush.msra.mxu1 %v11240_v25  ;;  %v12736_v39 = vld [vmem:[#allocation75_spill] sm:$0xff]  ;;  %v12743_v25 = vld [vmem:[#allocation62_spill] sm:$0xff] }
 0xc09   : > { %6746 = vmatpush.msra.mxu3 %v11153_v26  ;;  %6785 = vmatpush.msra.mxu2 %v12708_v33  ;;  %v12733_v26 = vld [vmem:[#allocation76_spill] sm:$0xff]  ;;  %v12748_v33 = vld [vmem:[#allocation87_spill] sm:$0xff] }
 0xc0a   : > { %6689 = vmatpush.msra.mxu0 %v12709_v43  ;;  %6729 = vmatpush.msra.mxu1 %v12710_v9  ;;  %v12749_v43 = vld [vmem:[#allocation55_spill] sm:$0xff]  ;;  %v12750_v9 = vld [vmem:[#allocation93_spill] sm:$0xff] }
 0xc0b   : > { %6747 = vmatpush.msra.mxu3 %v12711_v51  ;;  %6786 = vmatpush.msra.mxu2 %v12712_v19  ;;  %v12751_v51 = vrot.slane %v11266_v37, 3  ;;  %v12752_v19 = vrot.slane %v11266_v37, 4 }
 0xc0c   : > { %6690 = vmatpush.msra.mxu0 %v12713_v49  ;;  %6730 = vmatpush.msra.mxu1 %v12714_v22  ;;  %v12753_v49 = vld [vmem:[#allocation69_spill] sm:$0xff]  ;;  %v12754_v22 = vld [vmem:[#allocation66_spill] sm:$0xff] }
 0xc0d   : > { %8409 = vmatmul.msk.f32.vlgmr.msra.gmra.mxu0 %vm4032_vm2, %v12715_v31  ;;  %8411 = vmatmul.msk.f32.vlgmr.msra.gmra.mxu1 %vm4032_vm2, %v12716_v34  ;;  %v12755_v31 = vld [vmem:[#allocation91_spill] sm:$0xff]  ;;  %v12756_v34 = vld [vmem:[#allocation96_spill] sm:$0xff] }
 0xc0e   : > { %6748 = vmatpush.msra.mxu3 %v12717_v7  ;;  %6763 = vmatpush.msrb.mxu0 %v12718_v45  ;;  %v12757_v7 = vld [vmem:[#allocation73_spill] sm:$0xff]  ;;  %v12758_v45 = vld [vmem:[#allocation70_spill] sm:$0xff] }
 0xc0f   : > { %6787 = vmatpush.msra.mxu2 %v12719_v10  ;;  %6803 = vmatpush.msrb.mxu1 %v12720_v5  ;;  %v12759_v10 = vld [vmem:[#allocation95_spill] sm:$0xff]  ;;  %v12760_v5 = vld [vmem:[#allocation100_spill] sm:$0xff] }
 0xc10   : > { %6749 = vmatpush.msra.mxu3 %v12721_v17  ;;  %6764 = vmatpush.msrb.mxu0 %v12722_v11  ;;  %v12761_v17 = vld [vmem:[#allocation77_spill] sm:$0xff]  ;;  %v12762_v11 = vld [vmem:[#allocation74_spill] sm:$0xff] }
 0xc11   : > { %6788 = vmatpush.msra.mxu2 %v12723_v30  ;;  %6804 = vmatpush.msrb.mxu1 %v12724_v48  ;;  %v12763_v30 = vld [vmem:[#allocation99_spill] sm:$0xff]  ;;  %v12764_v48 = vld [vmem:[#allocation104_spill] sm:$0xff] }
 0xc12   : > { %6750 = vmatpush.msra.mxu3 %v12725_v29  ;;  %6765 = vmatpush.msrb.mxu0 %v12726_v63  ;;  %v12765_v29 = vld [vmem:[#allocation80_spill] sm:$0xff]  ;;  %v12766_v63 = vld [vmem:[#allocation78_spill] sm:$0xff] }
 0xc13   : > { %6789 = vmatpush.msra.mxu2 %v12727_v60  ;;  %6805 = vmatpush.msrb.mxu1 %v12728_v40  ;;  %v12767_v60 = vld [vmem:[#allocation103_spill] sm:$0xff]  ;;  %v12768_v40 = vld [vmem:[#allocation108_spill] sm:$0xff] }
 0xc14   : > { %8412 = vmatmul.msk.f32.vlgmr.msra.gmra.mxu3 %vm4032_vm2, %v12729_v6  ;;  %6766 = vmatpush.msrb.mxu0 %v12731_v18  ;;  %v12769_v6 = vrot.slane %v11482_v1, 1  ;;  %v12771_v18 = vld [vmem:[#allocation107_spill] sm:$0xff] }
 0xc15   : > { %6823 = vmatpush.msrb.mxu3 %v12730_v53  ;;  %6790 = vmatpush.msra.mxu2 %v12732_v57  ;;  %v12770_v53 = vld [vmem:[#allocation84_spill] sm:$0xff]  ;;  %v12772_v57 = vld [vmem:[#allocation82_spill] sm:$0xff] }
 0xc16   : > { %6806 = vmatpush.msrb.mxu1 %v12733_v26  ;;  %8414 = vmatmul.msk.f32.vlgmr.msra.gmra.mxu2 %vm4032_vm2, %v12734_v12  ;;  %v12773_v26 = vld [vmem:[#allocation113_spill] sm:$0xff]  ;;  %v12774_v12 = vld [vmem:[#allocation88_spill] sm:$0xff] }
 0xc17   : > { %6824 = vmatpush.msrb.mxu3 %v12735_v16  ;;  %6863 = vmatpush.msrb.mxu2 %v12736_v39  ;;  %v12775_v16 = vld [vmem:[#allocation111_spill] sm:$0xff]  ;;  %v12776_v39 = vld [vmem:[#allocation86_spill] sm:$0xff] }
 0xc18   : > { %6767 = vmatpush.msrb.mxu0 %v12737_v32  ;;  %6807 = vmatpush.msrb.mxu1 %v12738_v2  ;;  %v12777_v32 = vld [vmem:[#allocation117_spill] sm:$0xff]  ;;  %v12778_v2 = vld [vmem:[#allocation92_spill] sm:$0xff] }
 0xc19   : > { %6825 = vmatpush.msrb.mxu3 %v12739_v23  ;;  %6864 = vmatpush.msrb.mxu2 %v12740_v62  ;;  %v12779_v23 = vld [vmem:[#allocation115_spill] sm:$0xff]  ;;  %v12780_v62 = vld [vmem:[#allocation90_spill] sm:$0xff] }
 0xc1a   : > { %6768 = vmatpush.msrb.mxu0 %v12741_v4  ;;  %6808 = vmatpush.msrb.mxu1 %v12742_v42  ;;  %v5930_v4 = vpop.f32.mrf.mxu3  ;;  %v5995_v42 = vpop.f32.mrf.mxu2 }
 0xc1b   : > { %6826 = vmatpush.msrb.mxu3 %v12743_v25  ;;  %6865 = vmatpush.msrb.mxu2 %v12744_v58  ;;  %v12781_v25 = vld [vmem:[#allocation97_spill] sm:$0xff] }
 0xc1c   : > { %6769 = vmatpush.msrb.mxu0 %v12745_v27  ;;  %6809 = vmatpush.msrb.mxu1 %v12746_v15  ;;  %v5962_v58 = vpop.f32.mrf.mxu0  ;;  %v6027_v27 = vpop.f32.mrf.mxu1  ;;  %v12782_v15 = vld [vmem:[#allocation119_spill] sm:$0xff] }
 0xc1d   : > { %6827 = vmatpush.msrb.mxu3 %v12747_v21  ;;  %6866 = vmatpush.msrb.mxu2 %v12748_v33  ;;  %v12783_v21 = vld [vmem:[#allocation94_spill] sm:$0xff]  ;;  %v5965_v33 = vsub.f32 %v5930_v4, %v5962_v58  ;;  %v12808_v4 = vld [vmem:[#allocation140_spill] sm:$0xff] }
 0xc1e   : > { %6770 = vmatpush.msrb.mxu0 %v12749_v43  ;;  %6810 = vmatpush.msrb.mxu1 %v12750_v9  ;;  %v6030_v43 = vsub.f32 %v5995_v42, %v6027_v27  ;;  %v12784_v9 = vld [vmem:[#allocation124_spill] sm:$0xff]  ;;  %v12809_v42 = vld [vmem:[#allocation118_spill] sm:$0xff]  ;;  %v12811_v27 = vld [vmem:[#allocation143_spill] sm:$0xff] }
 0xc1f   : > { %8413 = vmatmul.msk.f32.vlgmr.msrb.gmra.mxu0 %vm4032_vm2, %v12751_v51  ;;  %8415 = vmatmul.msk.f32.vlgmr.msrb.gmra.mxu1 %vm4032_vm2, %v12752_v19  ;;  %v12785_v51 = vrot.slane %v11266_v37, 5  ;;  %v12786_v19 = vrot.slane %v11266_v37, 6 }
 0xc20   : > { %6828 = vmatpush.msrb.mxu3 %v12753_v49  ;;  %6843 = vmatpush.msra.mxu0 %v12754_v22  ;;  %v7056_v49 = vrot.slane %v6030_v43, 7  ;;  %v12788_v22 = vld [vmem:[#allocation98_spill] sm:$0xff]  ;;  %v12814_v43 = vld [vmem:[#allocation125_spill] sm:$0xff] }
 0xc21   : > { %6867 = vmatpush.msrb.mxu2 %v12755_v31  ;;  %6883 = vmatpush.msra.mxu1 %v12756_v34  ;;  %v12789_v31 = vld [vmem:[#allocation122_spill] sm:$0xff]  ;;  %v12790_v34 = vld [vmem:[#allocation105_spill] sm:$0xff] }
 0xc22   : > { %6829 = vmatpush.msrb.mxu3 %v12757_v7  ;;  %6844 = vmatpush.msra.mxu0 %v12758_v45  ;;  %v7097_v7 = vsel %vm3078_vm4, %v5965_v33, %v7056_v49  ;;  %v12791_v45 = vld [vmem:[#allocation102_spill] sm:$0xff]  ;;  %v12813_v33 = vld [vmem:[#allocation127_spill] sm:$0xff] }
 0xc23   : > { %6868 = vmatpush.msrb.mxu2 %v12759_v10  ;;  %6884 = vmatpush.msra.mxu1 %v12760_v5  ;;  %v12792_v10 = vld [vmem:[#allocation126_spill] sm:$0xff] }
 0xc24   : > { %6830 = vmatpush.msrb.mxu3 %v12761_v17  ;;  %6845 = vmatpush.msra.mxu0 %v12762_v11  ;;  %v12793_v5 = vld [vmem:[#allocation130_spill] sm:$0xff]  ;;  %v12794_v17 = vld [vmem:[#allocation109_spill] sm:$0xff] }
 0xc25   : > { %6869 = vmatpush.msrb.mxu2 %v12763_v30  ;;  %6885 = vmatpush.msra.mxu1 %v12764_v48  ;;  %v12795_v11 = vld [vmem:[#allocation106_spill] sm:$0xff]  ;;  %v12796_v30 = vld [vmem:[#allocation129_spill] sm:$0xff] }
 0xc26   : > { %8416 = vmatmul.msk.f32.vlgmr.msrb.gmra.mxu3 %vm4032_vm2, %v11482_v1  ;;  %6846 = vmatpush.msra.mxu0 %v12766_v63  ;;  %v12797_v48 = vld [vmem:[#allocation134_spill] sm:$0xff] }
 0xc27   : > { %6903 = vmatpush.msra.mxu3 %v12765_v29  ;;  %6870 = vmatpush.msrb.mxu2 %v12767_v60  ;;  %v12799_v29 = vld [vmem:[#allocation112_spill] sm:$0xff]  ;;  %v12800_v63 = vld [vmem:[#allocation110_spill] sm:$0xff]  ;;  %v6060_v60 = vpop.f32.mrf.mxu3 }
 0xc28   : > { %6886 = vmatpush.msra.mxu1 %v12768_v40  ;;  %8418 = vmatmul.msk.f32.vlgmr.msrb.gmra.mxu2 %vm4032_vm2, %v12769_v6  ;;  %v6125_v40 = vpop.f32.mrf.mxu2  ;;  %v12801_v6 = vld [vmem:[#allocation133_spill] sm:$0xff] }
 0xc29   : > { %6904 = vmatpush.msra.mxu3 %v12770_v53  ;;  %6943 = vmatpush.msra.mxu2 %v12771_v18  ;;  %v6092_v53 = vpop.f32.mrf.mxu0  ;;  %v6157_v18 = vpop.f32.mrf.mxu1 }
 0xc2a   : > { %6847 = vmatpush.msra.mxu0 %v12772_v57  ;;  %6887 = vmatpush.msra.mxu1 %v12773_v26  ;;  %v12802_v57 = vrot.slane %v11482_v1, 3  ;;  %v12803_v26 = vld [vmem:[#allocation116_spill] sm:$0xff] }
 0xc2b   : > { %6905 = vmatpush.msra.mxu3 %v12774_v12  ;;  %6944 = vmatpush.msra.mxu2 %v12775_v16  ;;  %v6095_v12 = vsub.f32 %v6060_v60, %v6092_v53  ;;  %v6160_v16 = vsub.f32 %v6125_v40, %v6157_v18 }
 0xc2c   : > { %6848 = vmatpush.msra.mxu0 %v12776_v39  ;;  %6888 = vmatpush.msra.mxu1 %v12777_v32  ;;  %v12804_v39 = vld [vmem:[#allocation137_spill] sm:$0xff]  ;;  %v12805_v32 = vld [vmem:[#allocation114_spill] sm:$0xff] }
 0xc2d   : > { %6906 = vmatpush.msra.mxu3 %v12778_v2  ;;  %6945 = vmatpush.msra.mxu2 %v12779_v23  ;;  %v12806_v2 = vld [vmem:[#allocation141_spill] sm:$0xff]  ;;  %v12807_v23 = vld [vmem:[#allocation120_spill] sm:$0xff] }
 0xc2e   : > { %6849 = vmatpush.msra.mxu0 %v12780_v62  ;;  %6889 = vmatpush.msra.mxu1 %v11585_v0  ;;  %v12787_v0 = vld [vmem:[#allocation101_spill] sm:$0xff]  ;;  %v7059_v62 = vrot.slane %v6095_v12, 6 }
 0xc2f   : > { %6907 = vmatpush.msra.mxu3 %v12781_v25  ;;  %6946 = vmatpush.msra.mxu2 %v12782_v15  ;;  %v12810_v25 = vld [vmem:[#allocation123_spill] sm:$0xff]  ;;  %v12812_v15 = vld [vmem:[#allocation121_spill] sm:$0xff] }
 0xc30   : > { %6850 = vmatpush.msra.mxu0 %v12783_v21  ;;  %6890 = vmatpush.msra.mxu1 %v12784_v9  ;;  %v7098_v58 = vsel %vm3080_vm5, %v7097_v7, %v7059_v62  ;;  %v12816_v9 = vld [vmem:[#allocation131_spill] sm:$0xff] }
 0xc31   : > { %8417 = vmatmul.msk.f32.vlgmr.msra.gmra.mxu0 %vm4032_vm2, %v12785_v51  ;;  %8419 = vmatmul.msk.f32.vlgmr.msra.gmra.mxu1 %vm4032_vm2, %v12786_v19  ;;  %v6190_v51 = vpop.f32.mrf.mxu3  ;;  %v12818_v19 = vld [vmem:[#allocation128_spill] sm:$0xff] }
 0xc32   : > { %6908 = vmatpush.msra.mxu3 %v12787_v0  ;;  %6923 = vmatpush.msrb.mxu0 %v12788_v22  ;;  %v12820_v22 = vld [vmem:[#allocation132_spill] sm:$0xff] }
 0xc33   : > { %6947 = vmatpush.msra.mxu2 %v12789_v31  ;;  %6963 = vmatpush.msrb.mxu1 %v11618_v46  ;;  %v12798_v46 = vrot.slane %v11482_v1, 2  ;;  %v6287_v49 = vpop.f32.mrf.mxu1 }
 0xc34   : > { %6909 = vmatpush.msra.mxu3 %v12790_v34  ;;  %6924 = vmatpush.msrb.mxu0 %v12791_v45  ;;  %v12821_v34 = vld [vmem:[#allocation138_spill] sm:$0xff]  ;;  %v12822_v45 = vld [vmem:[#allocation136_spill] sm:$0xff] }
 0xc35   : > { %6948 = vmatpush.msra.mxu2 %v12792_v10  ;;  %6964 = vmatpush.msrb.mxu1 %v12793_v5  ;;  %v12823_v10 = vrot.slane %v11482_v1, 4  ;;  %v12825_v5 = vld [vmem:[#allocation139_spill] sm:$0xff] }
 0xc36   : > { %6910 = vmatpush.msra.mxu3 %v12794_v17  ;;  %6925 = vmatpush.msrb.mxu0 %v12795_v11  ;;  %v7145_v17 = vld [vmem:[%s12817_s1 + $0x20] sm:$0xff]  ;;  %v12827_v11 = vld [vmem:[#allocation144_spill] sm:$0xff]  ;;  %v7143_v1 = vld [vmem:[%s12817_s1 + $0x10] sm:$0xff] }
 0xc37   : > { %6949 = vmatpush.msra.mxu2 %v12796_v30  ;;  %6965 = vmatpush.msrb.mxu1 %v12797_v48  ;;  %v7141_v30 = vld [vmem:[%s12817_s1] sm:$0xff]  ;;  %v12832_v48 = vld [vmem:[#allocation42_spill] sm:$0xff] }
 0xc38   : > { %8420 = vmatmul.msk.f32.vlgmr.msra.gmra.mxu3 %vm4032_vm2, %v12798_v46  ;;  %6926 = vmatpush.msrb.mxu0 %v12800_v63 }
 0xc39   : > { %6983 = vmatpush.msrb.mxu3 %v12799_v29  ;;  %6950 = vmatpush.msra.mxu2 %v12801_v6 }
 0xc3a   : > { %6966 = vmatpush.msrb.mxu1 %v11670_v3  ;;  %8422 = vmatmul.msk.f32.vlgmr.msra.gmra.mxu2 %vm4032_vm2, %v12802_v57  ;;  %v7062_v3 = vrot.slane %v6160_v16, 5 }
 0xc3b   : > { %6984 = vmatpush.msrb.mxu3 %v12803_v26  ;;  %7023 = vmatpush.msrb.mxu2 %v12804_v39 }
 0xc3c   : > { %6927 = vmatpush.msrb.mxu0 %v12805_v32  ;;  %6967 = vmatpush.msrb.mxu1 %v12806_v2  ;;  %v7099_v21 = vsel %vm3082_vm6, %v7098_v58, %v7062_v3 }
 0xc3d   : > { %6985 = vmatpush.msrb.mxu3 %v12807_v23  ;;  %7024 = vmatpush.msrb.mxu2 %v12808_v4 }
 0xc3e   : > { %6928 = vmatpush.msrb.mxu0 %v12809_v42  ;;  %6968 = vmatpush.msrb.mxu1 %v11705_v8  ;;  %v12815_v8 = vrot.slane %v11266_v37, 7  ;;  %v12819_v37 = vld [vmem:[#allocation135_spill] sm:$0xff] }
 0xc3f   : > { %6986 = vmatpush.msrb.mxu3 %v12810_v25  ;;  %7025 = vmatpush.msrb.mxu2 %v12811_v27 }
 0xc40   : > { %6929 = vmatpush.msrb.mxu0 %v12812_v15  ;;  %6969 = vmatpush.msrb.mxu1 %v11718_v61  ;;  %v6222_v61 = vpop.f32.mrf.mxu0 }
 0xc41   : > { %6987 = vmatpush.msrb.mxu3 %v12813_v33  ;;  %7026 = vmatpush.msrb.mxu2 %v11713_v52  ;;  %v6255_v52 = vpop.f32.mrf.mxu2  ;;  %v6225_v0 = vsub.f32 %v6190_v51, %v6222_v61 }
 0xc42   : > { %6930 = vmatpush.msrb.mxu0 %v12814_v43  ;;  %6970 = vmatpush.msrb.mxu1 %v11732_v35  ;;  %v6290_v35 = vsub.f32 %v6255_v52, %v6287_v49  ;;  %v6320_v29 = vpop.f32.mrf.mxu3 }
 0xc43   : > { %8421 = vmatmul.msk.f32.vlgmr.msrb.gmra.mxu0 %vm4032_vm2, %v12815_v8  ;;  %8423 = vmatmul.msk.f32.vlgmr.msrb.gmra.mxu1 %vm4032_vm2, %v11306_v20  ;;  %v7065_v31 = vrot.slane %v6225_v0, 4 }
 0xc44   : > { %6988 = vmatpush.msrb.mxu3 %v12816_v9  ;;  %7003 = vmatpush.msra.mxu0 %v12818_v19  ;;  %v7068_v7 = vrot.slane %v6290_v35, 3 }
 0xc45   : > { %7027 = vmatpush.msrb.mxu2 %v11726_v56  ;;  %7043 = vmatpush.msra.mxu1 %v11748_v59  ;;  %v7148_v56 = vld [vmem:[%s12817_s1 + $0x38] sm:$0xff]  ;;  %v7100_v59 = vsel %vm1563_vm0, %v7099_v21, %v7065_v31 }
 0xc46   : > { %6989 = vmatpush.msrb.mxu3 %v12819_v37  ;;  %7004 = vmatpush.msra.mxu0 %v12820_v22 }
 0xc47   : > { %7028 = vmatpush.msrb.mxu2 %v11743_v13  ;;  %7044 = vmatpush.msra.mxu1 %v11762_v50  ;;  %v7147_v13 = vld [vmem:[%s12817_s1 + $0x30] sm:$0xff]  ;;  %v12025_v50 = vsel %vm12824_vm12, %v7100_v59, %v7068_v7 }
 0xc48   : > { %6990 = vmatpush.msrb.mxu3 %v12821_v34  ;;  %7005 = vmatpush.msra.mxu0 %v12822_v45 }
 0xc49   : > { %7029 = vmatpush.msrb.mxu2 %v11755_v41  ;;  %7045 = vmatpush.msra.mxu1 %v11772_v55  ;;  %v7146_v41 = vld [vmem:[%s12817_s1 + $0x28] sm:$0xff] }
 0xc4a   : > { %8424 = vmatmul.msk.f32.vlgmr.msrb.gmra.mxu3 %vm4032_vm2, %v12823_v10  ;;  %7006 = vmatpush.msra.mxu0 %v12825_v5  ;;  %v12826_v55 = vld [vmem:[#allocation142_spill] sm:$0xff] }
 0xc4b   : > { %7165 = vmatpush.msra.mxu3 %v7148_v56  ;;  %7030 = vmatpush.msrb.mxu2 %v11767_v47  ;;  %v7144_v47 = vld [vmem:[%s12817_s1 + $0x18] sm:$0xff] }
 0xc4c   : > { %7046 = vmatpush.msra.mxu1 %v11780_v54  ;;  %8426 = vmatmul.msk.f32.vlgmr.msrb.gmra.mxu2 %vm4032_vm2, %v6591_v38  ;;  %v12828_v54 = vld [vmem:[#allocation145_spill] sm:$0xff]  ;;  %v12829_v38 = vld [vmem:[#allocation146_spill] sm:$0xff] }
 0xc4d   : > { %7166 = vmatpush.msra.mxu3 %v7147_v13  ;;  %7007 = vmatpush.msra.mxu0 %v12826_v55 }
 0xc4e   : > { %7047 = vmatpush.msra.mxu1 %v11791_v14  ;;  %v12830_v14 = vrot.slane %v11306_v20, 1  ;;  %v12061_v20 = vpop.f32.mrf.mxu2 }
 0xc4f   : > { %7167 = vmatpush.msra.mxu3 %v7146_v41  ;;  %7008 = vmatpush.msra.mxu0 %v12827_v11 }
 0xc50   : > { %7048 = vmatpush.msra.mxu1 %v11800_v36  ;;  %v7142_v36 = vld [vmem:[%s12817_s1 + $0x8] sm:$0xff]  ;;  %s12834_s1 = sld [smem:[#allocation30_spill]] }
 0xc51   : > { %7168 = vmatpush.msra.mxu3 %v7145_v17  ;;  %7009 = vmatpush.msra.mxu0 %v12828_v54 }
 0xc52   : > { %7049 = vmatpush.msra.mxu1 %v11807_v44  ;;  %v12831_v44 = vld [vmem:[#allocation44_spill] sm:$0xff]  ;;  %v12059_v46 = vpop.f32.mrf.mxu0 }
 0xc53   : > { %7169 = vmatpush.msra.mxu3 %v7144_v47  ;;  %7010 = vmatpush.msra.mxu0 %v12829_v38  ;;  %v6355_v13 = vsub.f32 %v6320_v29, %v12059_v46 }
 0xc54   : > { %7050 = vmatpush.msra.mxu1 %v11814_v24  ;;  %8425 = vmatmul.msk.f32.vlgmr.msra.gmra.mxu0 %vm4032_vm2, %v12830_v14  ;;  %v12833_v24 = vld [vmem:[#allocation43_spill] sm:$0xff] }
 0xc55   : > { %8427 = vmatmul.msk.f32.vlgmr.msra.gmra.mxu1 %vm4032_vm2, %v6559_v28  ;;  %7170 = vmatpush.msra.mxu3 %v7143_v1  ;;  %v12063_v28 = vpop.f32.mrf.mxu1  ;;  %v7071_v46 = vrot.slane %v6355_v13, 2 }
 0xc57   : > { %7171 = vmatpush.msra.mxu3 %v7142_v36 }
 0xc59   : > { %7172 = vmatpush.msra.mxu3 %v7141_v30 }
 0xc5a   : > { %8428 = vmatmul.msk.f32.vlgmr.msra.gmra.mxu3 %vm4032_vm2, %v12831_v44 }
 0xc5c   : > { %v6449_v60 = vpop.f32.mrf.mxu3 }
 0xc62   : > { %8429 = vmatmul.msk.f32.gmra.mxu3 %vm4032_vm2, %v12832_v48 }
 0xc65   : > { %v6514_v40 = vpop.f32.mrf.mxu2 }
 0xc66   : > { %v6481_v63 = vpop.f32.mrf.mxu0 }
 0xc67   : > { %v6484_v0 = vsub.f32 %v6449_v60, %v6481_v63 }
 0xc69   : > { %v6546_v6 = vpop.f32.mrf.mxu1 }
 0xc6a   : > { %8430 = vmatmul.msk.f32.gmra.mxu3 %vm4032_vm2, %v12833_v24  ;;  %v6549_v27 = vsub.f32 %v6514_v40, %v6546_v6  ;;  %v6420_v24 = vsub.f32 %v12061_v20, %v12063_v28  ;;  %vm12835_vm2 = vmmov %vm12824_vm12 }
 0xc6b   : > { %vm12850_vm12 = vmmov %vm12588_vm9 }
 0xc6c   : > { %v7077_v33 = vrot.slane %v6549_v27, 7  ;;  %v8536_v27 = vld [vmem:[%s12846_s3] ss:$0 sm:$0xff]  ;;  %s1510_s3 = scalar_lea.vmem %s8973_s12, %s8987_s0 }
 0xc6e   : > { %v7104_v37 = vsel %vm3078_vm4, %v6484_v0, %v7077_v33 }
 0xc73   : > { %v6579_v18 = vpop.f32.mrf.mxu3 }
 0xc75   : > { %v6632_v57 = vpop.f32.mrf.mxu2 }
 0xc78   : > { %v6611_v53 = vpop.f32.mrf.mxu0  ;;  %v6652_v26 = vpop.f32.mrf.mxu1 }
 0xc79   : > { %v6614_v15 = vsub.f32 %v6579_v18, %v6611_v53  ;;  %v6653_v43 = vadd.f32 %v6652_v26, %v6632_v57  ;;  %v7074_v57 = vrot.slane %v6420_v24, 1 }
 0xc7b   : > { %v7080_v51 = vrot.slane %v6614_v15, 6  ;;  %v7083_v35 = vrot.slane %v6653_v43, 5 }
 0xc7d   : > { %v7105_v31 = vsel %vm3080_vm5, %v7104_v37, %v7080_v51 }
 0xc7e   : > { %v7106_v5 = vsel %vm3082_vm6, %v7105_v31, %v7083_v35 }
 0xc85   : > { %v6672_v16 = vpop.f32.mrf.mxu3 }
 0xc87   : > { %v6712_v39 = vpop.f32.mrf.mxu2 }
 0xc8a   : > { %v6692_v12 = vpop.f32.mrf.mxu0  ;;  %v6732_v32 = vpop.f32.mrf.mxu1 }
 0xc8b   : > { %v6693_v61 = vadd.f32 %v6692_v12, %v6672_v16  ;;  %v6733_v22 = vadd.f32 %v6732_v32, %v6712_v39  ;;  %v7131_v12 = vld [vmem:[%s12834_s1] sm:$0xff]  ;;  %v7132_v32 = vld [vmem:[%s12834_s1 + $0x8] sm:$0xff] }
 0xc8d   : > { %v7086_v34 = vrot.slane %v6693_v61, 4  ;;  %v7089_v41 = vrot.slane %v6733_v22, 3 }
 0xc8f   : > { %v7107_v11 = vsel %vm1563_vm0, %v7106_v5, %v7086_v34  ;;  %v7468_v5 = vld [vmem:[%s12851_s5 + $0x18] sm:$0xff] }
 0xc90   : > { %v7108_v60 = vsel %vm12835_vm2, %v7107_v11, %v7089_v41  ;;  %7497 = vmatpush.msrb.mxu1 %v7468_v5 }
 0xc97   : > { %v6752_v23 = vpop.f32.mrf.mxu3 }
 0xc99   : > { %v6792_v62 = vpop.f32.mrf.mxu2 }
 0xc9c   : > { %v6772_v2 = vpop.f32.mrf.mxu0  ;;  %v6812_v3 = vpop.f32.mrf.mxu1 }
 0xc9d   : > { %v6773_v45 = vadd.f32 %v6772_v2, %v6752_v23  ;;  %v6813_v47 = vadd.f32 %v6812_v3, %v6792_v62  ;;  %v7136_v62 = vld [vmem:[%s12841_s2] sm:$0xff]  ;;  %v7134_v3 = vld [vmem:[%s12834_s1 + $0x18] sm:$0xff] }
 0xc9f   : > { %v7092_v36 = vrot.slane %v6773_v45, 2  ;;  %v7095_v40 = vrot.slane %v6813_v47, 1 }
 0xca9   : > { %v6832_v42 = vpop.f32.mrf.mxu3 }
 0xcab   : > { %v6872_v25 = vpop.f32.mrf.mxu2 }
 0xcae   : > { %v6852_v4 = vpop.f32.mrf.mxu0  ;;  %v6892_v58 = vpop.f32.mrf.mxu1 }
 0xcaf   : > { %v6893_v19 = vadd.f32 %v6892_v58, %v6872_v25  ;;  %v6853_v10 = vadd.f32 %v6852_v4, %v6832_v42  ;;  %v7137_v4 = vld [vmem:[%s12841_s2 + $0x8] sm:$0xff]  ;;  %v7138_v42 = vld [vmem:[%s12841_s2 + $0x10] sm:$0xff]  ;;  %v7139_v25 = vld [vmem:[%s12841_s2 + $0x18] sm:$0xff] }
 0xcb1   : > { %v7112_v56 = vrot.slane %v6893_v19, 7 }
 0xcb3   : > { %v7126_v54 = vsel %vm3078_vm4, %v6853_v10, %v7112_v56  ;;  %vm12836_vm4 = vcmask 1045504  }
 0xcb4   : > { %v7109_v18 = vsel %vm12836_vm4, %v7108_v60, %v7092_v36  ;;  %vm12838_vm10 = vmmov %vm12836_vm4  ;;  %v7465_v60 = vld [vmem:[%s12851_s5] sm:$0xff] }
 0xcb5   : > { %vm12839_vm7 = vmmov %vm12836_vm4  ;;  %v7110_v28 = vsel %vm12840_vm8, %v7109_v18, %v7095_v40 }
 0xcb6   : > { %v7102_v20 = vsel %vm12839_vm7, %v12025_v50, %v7071_v46  ;;  %v7133_v50 = vld [vmem:[%s12834_s1 + $0x10] sm:$0xff] }
 0xcbb   : > { %v6912_v8 = vpop.f32.mrf.mxu3 }
 0xcbd   : > { %v6952_v9 = vpop.f32.mrf.mxu2 }
 0xcc0   : > { %v6932_v21 = vpop.f32.mrf.mxu0  ;;  %v6972_v52 = vpop.f32.mrf.mxu1 }
 0xcc1   : > { %v6933_v49 = vadd.f32 %v6932_v21, %v6912_v8  ;;  %v6973_v7 = vadd.f32 %v6972_v52, %v6952_v9 }
 0xcc3   : > { %v7115_v59 = vrot.slane %v6933_v49, 6  ;;  %v7118_v1 = vrot.slane %v6973_v7, 5 }
 0xcc5   : > { %v7127_v30 = vsel %vm3080_vm5, %v7126_v54, %v7115_v59  ;;  %vm12837_vm5 = vmmov %vm12835_vm2 }
 0xcc6   : > { %v7128_v6 = vsel %vm3082_vm6, %v7127_v30, %v7118_v1  ;;  %vm12842_vm6 = vmmov %vm12840_vm8  ;;  %v7467_v1 = vld [vmem:[%s12851_s5 + $0x10] sm:$0xff]  ;;  %v7466_v30 = vld [vmem:[%s12851_s5 + $0x8] sm:$0xff] }
 0xcc7   : > { %v7103_v16 = vsel %vm12842_vm6, %v7102_v20, %v7074_v57  ;;  %7498 = vmatpush.msrb.mxu1 %v7467_v1 }
 0xcc9   : > { %7499 = vmatpush.msrb.mxu1 %v7466_v30 }
 0xccb   : > { %7500 = vmatpush.msrb.mxu1 %v7465_v60 }
 0xccd   : > { %v6992_v55 = vpop.f32.mrf.mxu3 }
 0xccf   : > { %v7032_v17 = vpop.f32.mrf.mxu2 }
 0xcd1   : > { %v7012_v38 = vpop.f32.mrf.mxu0 }
 0xcd2   : > { %v7052_v14 = vpop.f32.mrf.mxu1  ;;  %v7013_v44 = vadd.f32 %v7012_v38, %v6992_v55 }
 0xcd3   : > { %v7053_v48 = vadd.f32 %v7052_v14, %v7032_v17 }
 0xcd4   : > { %v7121_v29 = vrot.slane %v7013_v44, 4 }
 0xcd5   : > { %v7124_v63 = vrot.slane %v7053_v48, 3 }
 0xcd6   : > { %v7129_v53 = vsel %vm1563_vm0, %v7128_v6, %v7121_v29 }
 0xcd7   : > { %v7130_v26 = vsel %vm12837_vm5, %v7129_v53, %v7124_v63 }
 0xcd8   : > { %8437 = vmatpush.msk.msra.mxu2 %vm12838_vm10, %v7130_v26 }
 0xcda   : > { %7264 = vmatpush.msra.mxu2 %v7110_v28 }
 0xcdc   : > { %7265 = vmatpush.msra.mxu2 %v7103_v16 }
 0xcdd   : > { %v7174_v39 = vpop.f32.mrf.mxu3  ;;  %8438 = vmatmul.msk.f32.vlgmr.msra.gmra.mxu2 %vm12843_vm11, %v7131_v12 }
 0xce5   : > { %v7177_v2 = vpop.f32.mrf.mxu3  ;;  %8439 = vmatmul.msk.f32.gmra.mxu2 %vm12844_vm14, %v7132_v32 }
 0xced   : > { %v7180_v23 = vpop.f32.mrf.mxu3  ;;  %8440 = vmatmul.msk.f32.gmra.mxu2 %vm12845_vm1, %v7133_v50 }
 0xcee   : > { %8431 = vmatpush.msk.msrb.mxu0 %vm1563_vm0, %v7180_v23 }
 0xcf0   : > { %7215 = vmatpush.msrb.mxu0 %v7177_v2 }
 0xcf2   : > { %7216 = vmatpush.msrb.mxu0 %v7174_v39 }
 0xcf3   : > { %8432 = vmatmul.msk.f32.vlgmr.msrb.gmra.mxu0 %vm12847_vm15, %v7136_v62 }
 0xcf5   : > { %8441 = vmatmul.msk.f32.gmra.mxu2 %vm12848_vm3, %v7134_v3 }
 0xcfb   : > { %8433 = vmatmul.msk.f32.gmra.mxu0 %vm12588_vm9, %v7137_v4 }
 0xd03   : > { %8434 = vmatmul.msk.f32.gmra.mxu0 %vm12849_vm13, %v7138_v42 }
 0xd0b   : > { %8435 = vmatmul.msk.f32.gmra.mxu0 %vm12850_vm12, %v7139_v25 }
 0xd60   : > { %v7267_v58 = vpop.f32.mrf.mxu2 }
 0xd68   : > { %v7270_v43 = vpop.f32.mrf.mxu2 }
 0xd70   : > { %v7218_v15 = vpop.f32.mrf.mxu0  ;;  %v7273_v49 = vpop.f32.mrf.mxu2 }
 0xd71   : > { %v7268_v21 = vadd.f32 %v7267_v58, %v7218_v15 }
 0xd73   : > { %v12102_v33 = vadd.f32 %v8536_v27, %v7268_v21 }
 0xd75   : > { %v12105_v8 = vmul.f32 0.70710677, %v12102_v33 }
 0xd77   : > { %v7305_v9 = vand.u32 2147483647, %v12105_v8  ;;  %vm7297_vm3 = vcmp.ge.f32.partialorder %v12105_v8, 0.0 }
 0xd78   : > { %v7221_v51 = vpop.f32.mrf.mxu0  ;;  %v7276_v17 = vpop.f32.mrf.mxu2 }
 0xd79   : > { %v7309_v61 = vmul.f32 0.3275911, %v7305_v9  ;;  %v7271_v19 = vadd.f32 %v7270_v43, %v7221_v51  ;;  %v7413_v29 = vsub.f32 0.0, %v7305_v9 }
 0xd7b   : > { %v7313_v52 = vadd.f32 1.0, %v7309_v61  ;;  %v12108_v0 = vadd.f32 %v8536_v27, %v7271_v19  ;;  %v7417_v20 = vmul.f32 %v7413_v29, %v7305_v9 }
 0xd7d   : > { %8619 = vrcp.f32 %v7313_v52  ;;  %v12111_v37 = vmul.f32 0.70710677, %v12108_v0  ;;  %v7328_v41 = vand.u32 2147483648, %v7313_v52  ;;  %v7326_v47 = vand.u32 2147483647, %v7313_v52 }
 0xd7e   : > { %vm7322_vm2 = vweird.f32 %v7313_v52  ;;  %v7421_v25 = vmul.f32 1.442695, %v7417_v20 }
 0xd7f   : > { %v12114_v35 = vand.u32 2147483647, %v12111_v37  ;;  %v7329_v44 = vor.u32 1.1754944e-38, %v7328_v41  ;;  %vm7327_vm5 = vcmp.eq.f32.partialorder %v7326_v47, 8.507059e+37 }
 0xd80   : > { %v7224_v22 = vpop.f32.mrf.mxu0 }
 0xd81   : > { %v7274_v31 = vadd.f32 %v7273_v49, %v7224_v22  ;;  %v7310_v34 = vmul.f32 0.3275911, %v12114_v35  ;;  %v7414_v23 = vsub.f32 0.0, %v12114_v35 }
 0xd83   : > { %v8620_v56 = vpop.eup %8619  ;;  %v12117_v7 = vadd.f32 %v8536_v27, %v7274_v31  ;;  %v7314_v59 = vadd.f32 1.0, %v7310_v34  ;;  %v7418_v51 = vmul.f32 %v7414_v23, %v12114_v35 }
 0xd84   : > { %v7318_v45 = vmul.f32 %v8620_v56, %v7313_v52  ;;  %vm7323_vm0 = vweird.f32 %v8620_v56 }
 0xd85   : > { %v12120_v10 = vmul.f32 0.70710677, %v12117_v7  ;;  %8621 = vrcp.f32 %v7314_v59  ;;  %vm7324_vm4 = vmor %vm7322_vm2, %vm7323_vm0  ;;  %v7343_v28 = vand.u32 2147483648, %v7314_v59  ;;  %v7341_v16 = vand.u32 2147483647, %v7314_v59 }
 0xd86   : > { %v7319_v13 = vsub.f32 1.0, %v7318_v45  ;;  %vm7337_vm7 = vweird.f32 %v7314_v59  ;;  %vm7298_vm2 = vcmp.ge.f32.partialorder %v12111_v37, 0.0  ;;  %v7290_v37 = vmul.f32 0.5, %v12108_v0 }
 0xd87   : > { %v12124_v55 = vand.u32 2147483647, %v12120_v10  ;;  %v7344_v4 = vor.u32 1.1754944e-38, %v7343_v28  ;;  %vm7342_vm6 = vcmp.eq.f32.partialorder %v7341_v16, 8.507059e+37  ;;  %v7291_v0 = vmul.f32 0.5, %v12117_v7 }
 0xd88   : > { %v7320_v11 = vmul.f32 %v8620_v56, %v7319_v13  ;;  %v7227_v54 = vpop.f32.mrf.mxu0  ;;  %v7423_v13 = vmul.f32 1.442695, %v7418_v51 }
 0xd89   : > { %v7311_v38 = vmul.f32 0.3275911, %v12124_v55  ;;  %v7277_v36 = vadd.f32 %v7276_v17, %v7227_v54 }
 0xd8a   : > { %v7321_v14 = vadd.f32 %v8620_v56, %v7320_v11  ;;  %v7415_v11 = vsub.f32 0.0, %v12124_v55 }
 0xd8b   : > { %v7315_v48 = vadd.f32 1.0, %v7311_v38  ;;  %v8622_v24 = vpop.eup %8621  ;;  %v12129_v63 = vadd.f32 %v8536_v27, %v7277_v36 }
 0xd8c   : > { %v7325_v46 = vsel %vm7324_vm4, %v8620_v56, %v7321_v14  ;;  %v7333_v6 = vmul.f32 %v8622_v24, %v7314_v59  ;;  %vm7338_vm10 = vweird.f32 %v8622_v24  ;;  %vm12853_vm4 = vcmask 130048  }
 0xd8d   : > { %v7330_v40 = vsel %vm7327_vm5, %v7329_v44, %v7325_v46  ;;  %8623 = vrcp.f32 %v7315_v48  ;;  %v12133_v57 = vmul.f32 0.70710677, %v12129_v63  ;;  %vm7339_vm8 = vmor %vm7337_vm7, %vm7338_vm10  ;;  %v7358_v61 = vand.u32 2147483648, %v7315_v48 }
 0xd8e   : > { %v7377_v53 = vmul.f32 1.0614054, %v7330_v40  ;;  %v7334_v18 = vsub.f32 1.0, %v7333_v6  ;;  %v7356_v49 = vand.u32 2147483647, %v7315_v48  ;;  %vm7352_vm14 = vweird.f32 %v7315_v48  ;;  %vm12855_vm7 = vmmov %vm12853_vm4 }
 0xd8f   : > { %v12136_v39 = vand.u32 2147483647, %v12133_v57  ;;  %v7359_v45 = vor.u32 1.1754944e-38, %v7358_v61  ;;  %vm12854_vm5 = vcmask 261120   ;;  %vm7299_vm10 = vcmp.ge.f32.partialorder %v12120_v10, 0.0 }
 0xd90   : > { %v7381_v26 = vadd.f32 -1.4531521, %v7377_v53  ;;  %v7335_v12 = vmul.f32 %v8622_v24, %v7334_v18  ;;  %vm7357_vm15 = vcmp.eq.f32.partialorder %v7356_v49, 8.507059e+37  ;;  %v7292_v7 = vmul.f32 0.5, %v12129_v63 }
 0xd91   : > { %v7312_v62 = vmul.f32 0.3275911, %v12136_v39 }
 0xd92   : > { %v7385_v32 = vmul.f32 %v7381_v26, %v7330_v40  ;;  %v7336_v50 = vadd.f32 %v8622_v24, %v7335_v12  ;;  %v7289_v12 = vmul.f32 0.5, %v12102_v33 }
 0xd93   : > { %v8624_v2 = vpop.eup %8623  ;;  %v7316_v27 = vadd.f32 1.0, %v7312_v62 }
 0xd94   : > { %v7389_v3 = vadd.f32 1.4214138, %v7385_v32  ;;  %v7348_v42 = vmul.f32 %v8624_v2, %v7315_v48  ;;  %v7340_v58 = vsel %vm7339_vm8, %v8622_v24, %v7336_v50  ;;  %vm7353_vm11 = vweird.f32 %v8624_v2  ;;  %vm12856_vm8 = vmmov %vm12854_vm5 }
 0xd95   : > { %v7345_v21 = vsel %vm7342_vm6, %v7344_v4, %v7340_v58  ;;  %8625 = vrcp.f32 %v7316_v27  ;;  %vm7354_vm1 = vmor %vm7352_vm14, %vm7353_vm11  ;;  %v7419_v24 = vmul.f32 %v7415_v11, %v12124_v55  ;;  %v7371_v46 = vand.u32 2147483647, %v7316_v27 }
 0xd96   : > { %v7393_v15 = vmul.f32 %v7389_v3, %v7330_v40  ;;  %v7349_v43 = vsub.f32 1.0, %v7348_v42  ;;  %v7378_v9 = vmul.f32 1.0614054, %v7345_v21  ;;  %8627 = vpow2.f32 %v7421_v25  ;;  %vm12857_vm11 = vmmov %vm12853_vm4 }
 0xd97   : > { %8629 = vpow2.f32 %v7423_v13  ;;  %v7373_v29 = vand.u32 2147483648, %v7316_v27  ;;  %vm7367_vm13 = vweird.f32 %v7316_v27  ;;  %v7425_v32 = vmul.f32 1.442695, %v7419_v24  ;;  %vm12858_vm14 = vmmov %vm12854_vm5 }
 0xd98   : > { %v7397_v19 = vadd.f32 -0.28449672, %v7393_v15  ;;  %v7350_v52 = vmul.f32 %v8624_v2, %v7349_v43  ;;  %v7382_v22 = vadd.f32 -1.4531521, %v7378_v9  ;;  %vm7372_vm0 = vcmp.eq.f32.partialorder %v7371_v46, 8.507059e+37  ;;  %v7450_v43 = vpop.permute.xlu1 %7449 }
 0xd99   : > { %v7416_v42 = vsub.f32 0.0, %v12136_v39  ;;  %8631 = vpow2.f32 %v7425_v32  ;;  %vm7300_vm6 = vcmp.ge.f32.partialorder %v12133_v57, 0.0 }
 0xd9a   : > { %v7401_v31 = vmul.f32 %v7397_v19, %v7330_v40  ;;  %v7351_v34 = vadd.f32 %v8624_v2, %v7350_v52  ;;  %v7386_v56 = vmul.f32 %v7382_v22, %v7345_v21 }
 0xd9b   : > { %v8626_v41 = vpop.eup %8625  ;;  %v7420_v19 = vmul.f32 %v7416_v42, %v12136_v39  ;;  %v7452_v39 = vpop.permute.xlu2 %7451 }
 0xd9c   : > { %v7405_v59 = vadd.f32 0.2548296, %v7401_v31  ;;  %v7355_v5 = vsel %vm7354_vm1, %v8624_v2, %v7351_v34  ;;  %v7390_v35 = vadd.f32 1.4214138, %v7386_v56  ;;  %v7363_v1 = vmul.f32 %v8626_v41, %v7316_v27  ;;  %v8628_v38 = vpop.eup %8627  ;;  %vm12859_vm1 = vmmov %vm12853_vm4 }
 0xd9d   : > { %v7360_v17 = vsel %vm7357_vm15, %v7359_v45, %v7355_v5  ;;  %vm7368_vm9 = vweird.f32 %v8626_v41  ;;  %v7374_v2 = vor.u32 1.1754944e-38, %v7373_v29  ;;  %v8630_v55 = vpop.eup %8629  ;;  %vm12860_vm15 = vmmov %vm12854_vm5 }
 0xd9e   : > { %v7409_v47 = vmul.f32 %v7405_v59, %v7330_v40  ;;  %v7379_v54 = vmul.f32 1.0614054, %v7360_v17  ;;  %v7394_v14 = vmul.f32 %v7390_v35, %v7345_v21  ;;  %v7364_v44 = vsub.f32 1.0, %v7363_v1  ;;  %vm7369_vm12 = vmor %vm7367_vm13, %vm7368_vm9 }
 0xd9f   : > { %v12852_v40 = vmov -1.0   ;;  %v8632_v56 = vpop.eup %8631  ;;  %v7427_v59 = vmul.f32 1.442695, %v7420_v19 }
 0xda0   : > { %v7429_v36 = vmul.f32 %v8628_v38, %v7409_v47  ;;  %v7383_v30 = vadd.f32 -1.4531521, %v7379_v54  ;;  %v7398_v48 = vadd.f32 -0.28449672, %v7394_v14  ;;  %v7365_v53 = vmul.f32 %v8626_v41, %v7364_v44  ;;  %v7454_v44 = vpop.permute.xlu0 %7453 }
 0xda1   : > { %v7301_v18 = vsel %vm7297_vm3, 1.0, %v12852_v40  ;;  %v7303_v47 = vsel %vm7299_vm10, 1.0, %v12852_v40  ;;  %8633 = vpow2.f32 %v7427_v59  ;;  %v7304_v29 = vsel %vm7300_vm6, 1.0, %v12852_v40 }
 0xda2   : > { %v7433_v60 = vsub.f32 1.0, %v7429_v36  ;;  %v7387_v6 = vmul.f32 %v7383_v30, %v7360_v17  ;;  %v7402_v26 = vmul.f32 %v7398_v48, %v7345_v21  ;;  %v7366_v8 = vadd.f32 %v8626_v41, %v7365_v53 }
 0xda4   : > { %v7437_v20 = vmul.f32 %v7433_v60, %v7301_v18  ;;  %v7391_v28 = vadd.f32 1.4214138, %v7387_v6  ;;  %v7406_v16 = vadd.f32 0.2548296, %v7402_v26  ;;  %v7370_v62 = vsel %vm7369_vm12, %v8626_v41, %v7366_v8  ;;  %v7456_v18 = vpop.permute.xlu1 %7455 }
 0xda5   : > { %v7375_v4 = vsel %vm7372_vm0, %v7374_v2, %v7370_v62 }
 0xda6   : > { %v7441_v50 = vadd.f32 1.0, %v7437_v20  ;;  %v7395_v23 = vmul.f32 %v7391_v28, %v7360_v17  ;;  %v7410_v3 = vmul.f32 %v7406_v16, %v7345_v21  ;;  %v7380_v15 = vmul.f32 1.0614054, %v7375_v4  ;;  %v8537_v20 = vld [vmem:[%s8958_s20] ss:$0 sm:$0xff] }
 0xda7   : > { %v7302_v21 = vsel %vm7298_vm2, 1.0, %v12852_v40  ;;  %v8634_v30 = vpop.eup %8633 }
 0xda8   : > { %v7445_v25 = vmul.f32 %v7441_v50, %v7289_v12  ;;  %v7399_v58 = vadd.f32 -0.28449672, %v7395_v23  ;;  %v7430_v33 = vmul.f32 %v8630_v55, %v7410_v3  ;;  %v7384_v9 = vadd.f32 -1.4531521, %v7380_v15 }
 0xdaa   : > { %v7403_v27 = vmul.f32 %v7399_v58, %v7360_v17  ;;  %v7461_v51 = vsel %vm12853_vm4, %v7445_v25, %v7450_v43  ;;  %v7434_v61 = vsub.f32 1.0, %v7430_v33  ;;  %v7388_v49 = vmul.f32 %v7384_v9, %v7375_v4 }
 0xdab   : > { %8443 = vmatmul.msk.f32.vlgmr.msrb.gmra.mxu1 %vm12854_vm5, %v7461_v51 }
 0xdac   : > { %v7407_v52 = vadd.f32 0.2548296, %v7403_v27  ;;  %v7438_v22 = vmul.f32 %v7434_v61, %v7302_v21  ;;  %v7392_v34 = vadd.f32 1.4214138, %v7388_v49  ;;  %v7675_v21 = vld [vmem:[%s8963_s27 + $0x8] sm:$0xff] }
 0xdad   : > { %7706 = vmatpush.msrb.mxu3 %v7675_v21 }
 0xdae   : > { %v7411_v31 = vmul.f32 %v7407_v52, %v7360_v17  ;;  %v7442_v45 = vadd.f32 1.0, %v7438_v22  ;;  %v7396_v5 = vmul.f32 %v7392_v34, %v7375_v4 }
 0xdb0   : > { %v7431_v13 = vmul.f32 %v8632_v56, %v7411_v31  ;;  %v7446_v41 = vmul.f32 %v7442_v45, %v7290_v37  ;;  %v7400_v11 = vadd.f32 -0.28449672, %v7396_v5  ;;  %v7674_v45 = vld [vmem:[%s8963_s27] sm:$0xff] }
 0xdb1   : > { %7707 = vmatpush.msrb.mxu3 %v7674_v45 }
 0xdb2   : > { %v7435_v35 = vsub.f32 1.0, %v7431_v13  ;;  %v7462_v54 = vsel %vm12855_vm7, %v7446_v41, %v7452_v39  ;;  %v7404_v1 = vmul.f32 %v7400_v11, %v7375_v4 }
 0xdb3   : > { %8444 = vmatmul.msk.f32.gmra.mxu1 %vm12856_vm8, %v7462_v54 }
 0xdb4   : > { %v7439_v17 = vmul.f32 %v7435_v35, %v7303_v47  ;;  %v7408_v14 = vadd.f32 0.2548296, %v7404_v1 }
 0xdb6   : > { %v7443_v38 = vadd.f32 1.0, %v7439_v17  ;;  %v7412_v36 = vmul.f32 %v7408_v14, %v7375_v4 }
 0xdb8   : > { %v7447_v10 = vmul.f32 %v7443_v38, %v7291_v0  ;;  %v7432_v48 = vmul.f32 %v8634_v30, %v7412_v36 }
 0xdba   : > { %v7463_v24 = vsel %vm12857_vm11, %v7447_v10, %v7454_v44  ;;  %v7436_v46 = vsub.f32 1.0, %v7432_v48 }
 0xdbb   : > { %8445 = vmatmul.msk.f32.gmra.mxu1 %vm12858_vm14, %v7463_v24 }
 0xdbc   : > { %v7440_v60 = vmul.f32 %v7436_v46, %v7304_v29 }
 0xdbe   : > { %v7444_v6 = vadd.f32 1.0, %v7440_v60 }
 0xdc0   : > { %v7448_v53 = vmul.f32 %v7444_v6, %v7292_v7 }
 0xdc2   : > { %v7464_v26 = vsel %vm12859_vm1, %v7448_v53, %v7456_v18 }
 0xdc3   : > { %8446 = vmatmul.msk.f32.gmra.mxu1 %vm12860_vm15, %v7464_v26 }
 0xe28   : > { %v7502_v57 = vpop.f32.mrf.mxu1 }
 0xe29   : > { %v12166_v28 = vadd.f32 %v8537_v20, %v7502_v57 }
 0xe2b   : > { %v12169_v8 = vmul.f32 0.70710677, %v12166_v28 }
 0xe2d   : > { %v7530_v12 = vand.u32 2147483647, %v12169_v8  ;;  %vm7522_vm8 = vcmp.ge.f32.partialorder %v12169_v8, 0.0  ;;  %v7514_v8 = vmul.f32 0.5, %v12166_v28 }
 0xe2f   : > { %v7534_v16 = vmul.f32 0.3275911, %v7530_v12  ;;  %v7638_v22 = vsub.f32 0.0, %v7530_v12 }
 0xe30   : > { %v7505_v2 = vpop.f32.mrf.mxu1 }
 0xe31   : > { %v7538_v32 = vadd.f32 1.0, %v7534_v16  ;;  %v12172_v63 = vadd.f32 %v8537_v20, %v7505_v2  ;;  %v7642_v39 = vmul.f32 %v7638_v22, %v7530_v12 }
 0xe33   : > { %8635 = vrcp.f32 %v7538_v32  ;;  %v12175_v55 = vmul.f32 0.70710677, %v12172_v63  ;;  %v7553_v15 = vand.u32 2147483648, %v7538_v32  ;;  %v7551_v27 = vand.u32 2147483647, %v7538_v32 }
 0xe34   : > { %vm7547_vm9 = vweird.f32 %v7538_v32  ;;  %v7646_v14 = vmul.f32 1.442695, %v7642_v39 }
 0xe35   : > { %v12178_v50 = vand.u32 2147483647, %v12175_v55  ;;  %v7554_v61 = vor.u32 1.1754944e-38, %v7553_v15  ;;  %vm7552_vm12 = vcmp.eq.f32.partialorder %v7551_v27, 8.507059e+37 }
 0xe37   : > { %v7535_v23 = vmul.f32 0.3275911, %v12178_v50  ;;  %v7639_v44 = vsub.f32 0.0, %v12178_v50 }
 0xe38   : > { %v7508_v3 = vpop.f32.mrf.mxu1 }
 0xe39   : > { %v8636_v62 = vpop.eup %8635  ;;  %v7539_v42 = vadd.f32 1.0, %v7535_v23  ;;  %v12181_v25 = vadd.f32 %v8537_v20, %v7508_v3  ;;  %v7643_v26 = vmul.f32 %v7639_v44, %v12178_v50 }
 0xe3a   : > { %v7543_v4 = vmul.f32 %v8636_v62, %v7538_v32  ;;  %vm7548_vm3 = vweird.f32 %v8636_v62 }
 0xe3b   : > { %8637 = vrcp.f32 %v7539_v42  ;;  %v12184_v43 = vmul.f32 0.70710677, %v12181_v25  ;;  %vm7549_vm13 = vmor %vm7547_vm9, %vm7548_vm3  ;;  %v7568_v35 = vand.u32 2147483648, %v7539_v42  ;;  %v7566_v47 = vand.u32 2147483647, %v7539_v42 }
 0xe3c   : > { %v7544_v58 = vsub.f32 1.0, %v7543_v4  ;;  %vm7562_vm2 = vweird.f32 %v7539_v42  ;;  %vm12861_vm3 = vcmask 179200   ;;  %vm12862_vm9 = vcmask 162816  }
 0xe3d   : > { %v12187_v9 = vand.u32 2147483647, %v12184_v43  ;;  %v7569_v10 = vor.u32 1.1754944e-38, %v7568_v35  ;;  %vm7567_vm5 = vcmp.eq.f32.partialorder %v7566_v47, 8.507059e+37 }
 0xe3e   : > { %v7545_v33 = vmul.f32 %v8636_v62, %v7544_v58  ;;  %v7648_v58 = vmul.f32 1.442695, %v7643_v26 }
 0xe3f   : > { %v7536_v19 = vmul.f32 0.3275911, %v12187_v9 }
 0xe40   : > { %v7546_v51 = vadd.f32 %v8636_v62, %v7545_v33  ;;  %v7511_v31 = vpop.f32.mrf.mxu1 }
 0xe41   : > { %v8638_v52 = vpop.eup %8637  ;;  %v7540_v37 = vadd.f32 1.0, %v7536_v19  ;;  %v12192_v13 = vadd.f32 %v8537_v20, %v7511_v31 }
 0xe42   : > { %v7550_v49 = vsel %vm7549_vm13, %v8636_v62, %v7546_v51  ;;  %v7558_v56 = vmul.f32 %v8638_v52, %v7539_v42  ;;  %vm7563_vm0 = vweird.f32 %v8638_v52  ;;  %v7640_v51 = vsub.f32 0.0, %v12187_v9 }
 0xe43   : > { %v7555_v34 = vsel %vm7552_vm12, %v7554_v61, %v7550_v49  ;;  %8639 = vrcp.f32 %v7540_v37  ;;  %v12195_v54 = vmul.f32 0.70710677, %v12192_v13  ;;  %vm7564_vm4 = vmor %vm7562_vm2, %vm7563_vm0  ;;  %v7583_v20 = vand.u32 2147483648, %v7540_v37 }
 0xe44   : > { %v7602_v59 = vmul.f32 1.0614054, %v7555_v34  ;;  %v7559_v5 = vsub.f32 1.0, %v7558_v56  ;;  %8641 = vpow2.f32 %v7646_v14  ;;  %v7581_v16 = vand.u32 2147483647, %v7540_v37 }
 0xe45   : > { %v12198_v0 = vand.u32 2147483647, %v12195_v54  ;;  %vm7577_vm7 = vweird.f32 %v7540_v37  ;;  %v7584_v3 = vor.u32 1.1754944e-38, %v7583_v20  ;;  %vm7523_vm12 = vcmp.ge.f32.partialorder %v12175_v55, 0.0 }
 0xe46   : > { %v7606_v41 = vadd.f32 -1.4531521, %v7602_v59  ;;  %v7560_v11 = vmul.f32 %v8638_v52, %v7559_v5  ;;  %vm7582_vm11 = vcmp.eq.f32.partialorder %v7581_v16, 8.507059e+37  ;;  %vm12863_vm0 = vcmask 130048  }
 0xe47   : > { %v7537_v48 = vmul.f32 0.3275911, %v12198_v0  ;;  %v7515_v55 = vmul.f32 0.5, %v12172_v63  ;;  %vm7524_vm2 = vcmp.ge.f32.partialorder %v12184_v43, 0.0  ;;  %v7516_v63 = vmul.f32 0.5, %v12181_v25 }
 0xe48   : > { %v7610_v17 = vmul.f32 %v7606_v41, %v7555_v34  ;;  %v7561_v1 = vadd.f32 %v8638_v52, %v7560_v11 }
 0xe49   : > { %v8640_v36 = vpop.eup %8639  ;;  %v12202_v7 = vadd.f32 1.0, %v7537_v48 }
 0xe4a   : > { %v7614_v38 = vadd.f32 1.4214138, %v7610_v17  ;;  %v7565_v30 = vsel %vm7564_vm4, %v8638_v52, %v7561_v1  ;;  %v7573_v29 = vmul.f32 %v8640_v36, %v7540_v37  ;;  %vm7578_vm10 = vweird.f32 %v8640_v36  ;;  %v8642_v4 = vpop.eup %8641  ;;  %v7135_v1 = vld [vmem:[%s12834_s1 + $0x20] sm:$0xff]  ;;  %vm12864_vm4 = vmmov %vm12863_vm0 }
 0xe4b   : > { %v7570_v46 = vsel %vm7567_vm5, %v7569_v10, %v7565_v30  ;;  %8643 = vrcp.f32 %v12202_v7  ;;  %vm7579_vm6 = vmor %vm7577_vm7, %vm7578_vm10  ;;  %v7526_v52 = vsel %vm7522_vm8, 1.0, %v12852_v40  ;;  %v7644_v37 = vmul.f32 %v7640_v51, %v12187_v9  ;;  %8442 = vmatmul.msk.f32.gmra.mxu2 %vm12861_vm3, %v7135_v1 }
 0xe4c   : > { %v7618_v24 = vmul.f32 %v7614_v38, %v7555_v34  ;;  %v7603_v60 = vmul.f32 1.0614054, %v7570_v46  ;;  %v7574_v53 = vsub.f32 1.0, %v7573_v29  ;;  %8645 = vpow2.f32 %v7648_v58  ;;  %v7140_v38 = vld [vmem:[%s12841_s2 + $0x20] sm:$0xff]  ;;  %vm12865_vm10 = vmmov %vm12863_vm0 }
 0xe4d   : > { %v7596_v45 = vand.u32 2147483647, %v12202_v7  ;;  %v7598_v59 = vand.u32 2147483648, %v12202_v7  ;;  %vm7592_vm1 = vweird.f32 %v12202_v7  ;;  %v7650_v9 = vmul.f32 1.442695, %v7644_v37  ;;  %8436 = vmatmul.msk.f32.gmra.mxu0 %vm12862_vm9, %v7140_v38  ;;  %vm12866_vm7 = vmmov %vm12863_vm0 }
 0xe4e   : > { %v7622_v6 = vadd.f32 -0.28449672, %v7618_v24  ;;  %v7607_v18 = vadd.f32 -1.4531521, %v7603_v60  ;;  %v7575_v12 = vmul.f32 %v8640_v36, %v7574_v53  ;;  %v7641_v29 = vsub.f32 0.0, %v12198_v0 }
 0xe4f   : > { %v7599_v10 = vor.u32 1.1754944e-38, %v7598_v59  ;;  %vm7597_vm13 = vcmp.eq.f32.partialorder %v7596_v45, 8.507059e+37  ;;  %8647 = vpow2.f32 %v7650_v9  ;;  %vm7525_vm5 = vcmp.ge.f32.partialorder %v12195_v54, 0.0  ;;  %v8538_v37 = vld [vmem:[%s8968_s4] ss:$0 sm:$0xff] }
 0xe50   : > { %v7626_v57 = vmul.f32 %v7622_v6, %v7555_v34  ;;  %v7611_v32 = vmul.f32 %v7607_v18, %v7570_v46  ;;  %v7576_v23 = vadd.f32 %v8640_v36, %v7575_v12  ;;  %v7527_v6 = vsel %vm7523_vm12, 1.0, %v12852_v40 }
 0xe51   : > { %v8644_v15 = vpop.eup %8643  ;;  %v7645_v20 = vmul.f32 %v7641_v29, %v12198_v0  ;;  %v7528_v0 = vsel %vm7524_vm2, 1.0, %v12852_v40  ;;  %vm7721_vm8 = vcmask 15360  }
 0xe52   : > { %v7630_v2 = vadd.f32 0.2548296, %v7626_v57  ;;  %v7615_v62 = vadd.f32 1.4214138, %v7611_v32  ;;  %v7580_v50 = vsel %vm7579_vm6, %v8640_v36, %v7576_v23  ;;  %v7588_v21 = vmul.f32 %v8644_v15, %v12202_v7  ;;  %v8646_v36 = vpop.eup %8645 }
 0xe53   : > { %v7585_v27 = vsel %vm7582_vm11, %v7584_v3, %v7580_v50  ;;  %vm7593_vm14 = vweird.f32 %v8644_v15  ;;  %v7652_v3 = vmul.f32 1.442695, %v7645_v20  ;;  %vm7725_vm6 = vcmask 14336  }
 0xe54   : > { %v7634_v42 = vmul.f32 %v7630_v2, %v7555_v34  ;;  %v7619_v33 = vmul.f32 %v7615_v62, %v7570_v46  ;;  %v7604_v19 = vmul.f32 1.0614054, %v7585_v27  ;;  %v7589_v34 = vsub.f32 1.0, %v7588_v21  ;;  %vm7594_vm15 = vmor %vm7592_vm1, %vm7593_vm14 }
 0xe55   : > { %v8648_v23 = vpop.eup %8647  ;;  %8649 = vpow2.f32 %v7652_v3 }
 0xe56   : > { %v7654_v61 = vmul.f32 %v8642_v4, %v7634_v42  ;;  %v7623_v49 = vadd.f32 -0.28449672, %v7619_v33  ;;  %v7608_v31 = vadd.f32 -1.4531521, %v7604_v19  ;;  %v7590_v39 = vmul.f32 %v8644_v15, %v7589_v34 }
 0xe58   : > { %v7658_v22 = vsub.f32 1.0, %v7654_v61  ;;  %v7627_v56 = vmul.f32 %v7623_v49, %v7570_v46  ;;  %v7612_v41 = vmul.f32 %v7608_v31, %v7585_v27  ;;  %v7591_v17 = vadd.f32 %v8644_v15, %v7590_v39 }
 0xe59   : > { %v7529_v49 = vsel %vm7525_vm5, 1.0, %v12852_v40  ;;  %v7517_v31 = vmul.f32 0.5, %v12192_v13 }
 0xe5a   : > { %v7662_v5 = vmul.f32 %v7658_v22, %v7526_v52  ;;  %v7631_v35 = vadd.f32 0.2548296, %v7627_v56  ;;  %v7616_v47 = vadd.f32 1.4214138, %v7612_v41  ;;  %v7595_v28 = vsel %vm7594_vm15, %v8644_v15, %v7591_v17 }
 0xe5b   : > { %v7600_v24 = vsel %vm7597_vm13, %v7599_v10, %v7595_v28  ;;  %v8650_v19 = vpop.eup %8649 }
 0xe5c   : > { %v7666_v11 = vadd.f32 1.0, %v7662_v5  ;;  %v7635_v14 = vmul.f32 %v7631_v35, %v7570_v46  ;;  %v7620_v44 = vmul.f32 %v7616_v47, %v7585_v27  ;;  %v7605_v46 = vmul.f32 1.0614054, %v7600_v24 }
 0xe5e   : > { %v7670_v30 = vmul.f32 %v7666_v11, %v7514_v8  ;;  %v7655_v48 = vmul.f32 %v8646_v36, %v7635_v14  ;;  %v7624_v60 = vadd.f32 -0.28449672, %v7620_v44  ;;  %v7609_v18 = vadd.f32 -1.4531521, %v7605_v46 }
 0xe60   : > { %8447 = vmatmul.msk.f32.vlgmr.msrb.gmra.mxu3 %vm12863_vm0, %v7670_v30  ;;  %v7659_v7 = vsub.f32 1.0, %v7655_v48  ;;  %v7628_v53 = vmul.f32 %v7624_v60, %v7585_v27  ;;  %v7613_v12 = vmul.f32 %v7609_v18, %v7600_v24 }
 0xe62   : > { %v7663_v26 = vmul.f32 %v7659_v7, %v7527_v6  ;;  %v7632_v57 = vadd.f32 0.2548296, %v7628_v53  ;;  %v7617_v2 = vadd.f32 1.4214138, %v7613_v12 }
 0xe64   : > { %v7667_v16 = vadd.f32 1.0, %v7663_v26  ;;  %v7636_v32 = vmul.f32 %v7632_v57, %v7585_v27  ;;  %v7621_v42 = vmul.f32 %v7617_v2, %v7600_v24 }
 0xe66   : > { %v7671_v62 = vmul.f32 %v7667_v16, %v7515_v55  ;;  %v7656_v4 = vmul.f32 %v8648_v23, %v7636_v32  ;;  %v7625_v50 = vadd.f32 -0.28449672, %v7621_v42 }
 0xe68   : > { %8448 = vmatmul.msk.f32.gmra.mxu3 %vm12864_vm4, %v7671_v62  ;;  %v7660_v58 = vsub.f32 1.0, %v7656_v4  ;;  %v7629_v33 = vmul.f32 %v7625_v50, %v7600_v24 }
 0xe6a   : > { %v7664_v15 = vmul.f32 %v7660_v58, %v7528_v0  ;;  %v7633_v51 = vadd.f32 0.2548296, %v7629_v33 }
 0xe6c   : > { %v7668_v27 = vadd.f32 1.0, %v7664_v15  ;;  %v7637_v43 = vmul.f32 %v7633_v51, %v7600_v24 }
 0xe6e   : > { %v7672_v61 = vmul.f32 %v7668_v27, %v7516_v63  ;;  %v7657_v21 = vmul.f32 %v8650_v19, %v7637_v43 }
 0xe70   : > { %8449 = vmatmul.msk.f32.gmra.mxu3 %vm12865_vm10, %v7672_v61  ;;  %v7661_v52 = vsub.f32 1.0, %v7657_v21 }
 0xe72   : > { %v7665_v22 = vmul.f32 %v7661_v52, %v7529_v49 }
 0xe74   : > { %v7669_v25 = vadd.f32 1.0, %v7665_v22 }
 0xe76   : > { %v7673_v34 = vmul.f32 %v7669_v25, %v7517_v31 }
 0xe78   : > { %8450 = vmatmul.msk.f32.gmra.mxu3 %vm12866_vm7, %v7673_v34 }
 0xeca   : > { %v7230_v56 = vpop.f32.mrf.mxu0 }
 0xece   : > { %v7279_v45 = vpop.f32.mrf.mxu2 }
 0xee3   : > { %v7709_v59 = vpop.f32.mrf.mxu3 }
 0xee4   : > { %v7710_v54 = vadd.f32 %v8538_v37, %v7709_v59 }
 0xee6   : > { %7722 = vst.msk [vmem:[%s1510_s3] sm:$0xff] %vm7721_vm8, %v7710_v54 }
 0xeeb   : > { %v7712_v5 = vpop.f32.mrf.mxu3 }
 0xeec   : > { %v7713_v41 = vadd.f32 %v8538_v37, %v7712_v5 }
 0xeee   : > { %7723 = vst.msk [vmem:[%s1510_s3 + $0x8] sm:$0xff] %vm7721_vm8, %v7713_v41 }
 0xef3   : > { %v7715_v39 = vpop.f32.mrf.mxu3 }
 0xef4   : > { %v7716_v40 = vadd.f32 %v8538_v37, %v7715_v39 }
 0xef6   : > { %7724 = vst.msk [vmem:[%s1510_s3 + $0x10] sm:$0xff] %vm7721_vm8, %v7716_v40 }
 0xefb   : > { %v7718_v8 = vpop.f32.mrf.mxu3 }
 0xefc   : > { %v7719_v13 = vadd.f32 %v8538_v37, %v7718_v8 }
 0xefe   : > { %7726 = vst.msk [vmem:[%s1510_s3 + $0x18] sm:$0x7f] %vm7725_vm6, %v7719_v13 }
 0xeff PF: > { %s111_s15 = sadd.s32 1, %s8657_s15  }
 0xf00   : > { %p108_p4 = scmp.ge.s32.totalorder %s111_s15, 4  }
 0xf02   :  { %110 = sbr.rel (!%p108_p4) target bundleno = 105 (0x69), region = 367 }

</bundles_post_ra>
